<compile_context>
chip_gen: v7x
topology: tpu7x:2x2x1
jax: 0.10.0
libtpu: 0.0.40
codegen_flags: <defaults>
</compile_context>

<pallas_src>
import functools

import jax
import jax.numpy as jnp
import numpy as np
from jax import lax
from jax.experimental import pallas as pl
from jax.experimental.pallas import tpu as pltpu


# TODO(synk): the PyTorch module reads IdentityLUT{dim}.txt from disk; here the
# identity LUT is synthesized analytically (k/(dim-1), j/(dim-1), i/(dim-1)),
# which is what that file contains for the standard identity LUT.
def make_identity_lut(dim: int) -> jnp.ndarray:
    """Host-side identity LUT (used only by the pure-JAX reference)."""
    grid = jnp.arange(dim, dtype=jnp.float32) * jnp.float32(1.0 / (dim - 1))
    r = jnp.broadcast_to(grid[None, None, :], (dim, dim, dim))
    g = jnp.broadcast_to(grid[None, :, None], (dim, dim, dim))
    b = jnp.broadcast_to(grid[:, None, None], (dim, dim, dim))
    return jnp.stack([r, g, b], axis=0)  # (3, dim, dim, dim)


def _make_tv3d_kernel(dim: int, tv_type: str):
    C = dim * dim                    # columns per channel: col = g*dim + r
    n_edge = dim * dim * (dim - 1)   # diffs per channel per direction
    n_full = dim * dim * dim
    inv_dim = 1.0 / dim
    scale = 1.0 / (dim - 1)

    def kernel(margin_ref, lut_ref, out_ref):
        m = margin_ref[0]            # runtime monotonicity margin (SMEM scalar)

        # ---- 1-D index helpers: (1,C) per-column and (dim,1) per-row vectors ----
        # floor((col+0.5)/dim) avoids vector int div/mod; exact for dim <= ~128.
        col_f = lax.broadcasted_iota(jnp.int32, (1, C), 1).astype(jnp.float32)
        g_f = jnp.floor((col_f + 0.5) * inv_dim)      # column's g index
        r_f = col_f - g_f * dim                       # column's r index
        mask_r = (r_f < (dim - 1.5))[:, :C - 1]       # (1, C-1): col's r != dim-1
        b_f = lax.broadcasted_iota(jnp.int32, (dim, 1), 0).astype(jnp.float32)

        # ---- finite differences per channel (leading-axis indexing is free) ----
        def dif_r(c):                                  # (dim, C-1); valid where mask_r
            xc = lut_ref[c]
            return xc[:, :C - 1] - xc[:, 1:]

        def dif_g(c):                                  # (dim, C-dim); always valid
            xc = lut_ref[c]
            return xc[:, :C - dim] - xc[:, dim:]

        def dif_b(c):                                  # (dim-1, C); always valid
            xc = lut_ref[c]
            return xc[:dim - 1, :] - xc[1:, :]

        def sq(v):
            return v * v

        # ---- total variation (channel squares summed elementwise, then 1 reduce
        #      per direction; mask applied once on the channel-summed slab) ----
        if tv_type == 'original':
            s_r = jnp.sum(jnp.where(mask_r,
                                    sq(dif_r(0)) + sq(dif_r(1)) + sq(dif_r(2)), 0.0))
            s_g = jnp.sum(sq(dif_g(0)) + sq(dif_g(1)) + sq(dif_g(2)))
            s_b = jnp.sum(sq(dif_b(0)) + sq(dif_b(1)) + sq(dif_b(2)))
            tv = (s_r + s_g + s_b) * (1.0 / (3 * n_edge))
        else:
            # torch: mean(dif_r[1:]**2) + mean(dif_g[[0,2]]**2) + mean(dif_b[:2]**2)
            s_r = jnp.sum(jnp.where(mask_r, sq(dif_r(1)) + sq(dif_r(2)), 0.0))
            s_g = jnp.sum(sq(dif_g(0)) + sq(dif_g(2)))
            s_b = jnp.sum(sq(dif_b(0)) + sq(dif_b(1)))
            tv = (s_r + s_g + s_b) * (1.0 / (2 * n_edge))

        # ---- monotonicity: relu(dif + margin) on the matching channel ----
        mn_r = jnp.sum(jnp.where(mask_r, jnp.maximum(dif_r(0) + m, 0.0), 0.0))
        mn_g = jnp.sum(jnp.maximum(dif_g(1) + m, 0.0))
        mn_b = jnp.sum(jnp.maximum(dif_b(2) + m, 0.0))
        mn = (mn_r + mn_g + mn_b) * (1.0 / n_edge)

        # ---- identity regularizer (identity LUT synthesized from 1-D vectors,
        #      three channels fused into a single cross-lane reduce) ----
        d0 = lut_ref[0] - r_f * scale        # (dim,C) - (1,C) broadcast
        d1 = lut_ref[1] - g_f * scale        # (dim,C) - (1,C)
        d2 = lut_ref[2] - b_f * scale        # (dim,C) - (dim,1)
        idn = jnp.sum(d0 * d0 + d1 * d1 + d2 * d2) * (1.0 / n_full)

        out_ref[0] = tv
        out_ref[1] = mn
        out_ref[2] = idn

    return kernel


@functools.lru_cache(maxsize=None)
def _build_tv3d_call(dim: int, tv_type: str):
    kernel = _make_tv3d_kernel(dim, tv_type)
    return pl.pallas_call(
        kernel,
        out_shape=jax.ShapeDtypeStruct((3,), jnp.float32),
        in_specs=[
            pl.BlockSpec(memory_space=pltpu.MemorySpace.SMEM),   # mn_margin (1,)
            pl.BlockSpec(memory_space=pltpu.MemorySpace.VMEM),   # LUT (3, dim, dim*dim)
        ],
        out_specs=pl.BlockSpec(memory_space=pltpu.MemorySpace.SMEM),
    )


def tv_3d(lut: jnp.ndarray, mn_margin: float = 0.0, tv_type: str = 'original'):
    """Pallas implementation of TV_3D.forward(LUT) -> (tv, mn, identity).

    `lut` is the learnable (3, dim, dim, dim) LUT tensor (LUT.LUT in PyTorch).
    `mn_margin` is a runtime scalar (no recompile when it changes); `tv_type`
    selects the static branch ('original' or anything else).
    """
    assert lut.ndim == 4 and lut.shape[0] == 3
    dim = lut.shape[-1]
    assert lut.shape == (3, dim, dim, dim)
    assert 2 <= dim <= 128, "float-floor index recovery is only exact for moderate dim"
    if lut.dtype != jnp.float32:
        lut = lut.astype(jnp.float32)

    # Channel-leading, lane-dense layout: (3, dim, dim*dim); row=b, col=g*dim+r.
    lut3d = lut.reshape(3, dim, dim * dim)
    margin = jnp.asarray([mn_margin], dtype=jnp.float32)

    out = _build_tv3d_call(dim, tv_type)(margin, lut3d)
    return out[0], out[1], out[2]


def tv_3d_ref(lut, iden, mn_margin=0.0, tv_type='original'):
    """Pure-JAX reference (mirrors the PyTorch forward) for verification."""
    dif_r = lut[:, :, :, :-1] - lut[:, :, :, 1:]
    dif_g = lut[:, :, :-1, :] - lut[:, :, 1:, :]
    dif_b = lut[:, :-1, :, :] - lut[:, 1:, :, :]
    if tv_type == 'original':
        tv = jnp.mean(dif_r ** 2) + jnp.mean(dif_g ** 2) + jnp.mean(dif_b ** 2)
    else:
        tv = (jnp.mean(dif_r[1:] ** 2)
              + jnp.mean(dif_g[jnp.array([0, 2])] ** 2)
              + jnp.mean(dif_b[:2] ** 2))
    relu = lambda v: jnp.maximum(v, 0.0)
    mn = (jnp.mean(relu(dif_r[0] + mn_margin))
          + jnp.mean(relu(dif_g[1] + mn_margin))
          + jnp.mean(relu(dif_b[2] + mn_margin)))
    dr = iden[0] - lut[0]
    dg = iden[1] - lut[1]
    db = iden[2] - lut[2]
    identity = jnp.mean(dr ** 2) + jnp.mean(dg ** 2) + jnp.mean(db ** 2)
    return tv, mn, identity


if __name__ == "__main__":
    dim = 33  # matches TV_3D(dim=33) default
    key = jax.random.PRNGKey(0)

    identity = make_identity_lut(dim)
    noise = 0.05 * jax.random.normal(key, (3, dim, dim, dim), dtype=jnp.float32)
    lut = identity + noise  # stands in for LUT.LUT (learnable (3,dim,dim,dim) tensor)

    # Both tv_type branches; two margins on the same branch exercise the
    # runtime-scalar margin (no retrace/recompile between them).
    for tv_type, margin in (('original', 0.0), ('original', 0.02), ('other', 0.01)):
        tv, mn, idn = tv_3d(lut, mn_margin=margin, tv_type=tv_type)
        jax.block_until_ready((tv, mn, idn))
        tv_r, mn_r, idn_r = tv_3d_ref(lut, identity, margin, tv_type)
        np.testing.assert_allclose(np.asarray(tv), np.asarray(tv_r), rtol=1e-5, atol=1e-6)
        np.testing.assert_allclose(np.asarray(mn), np.asarray(mn_r), rtol=1e-5, atol=1e-6)
        np.testing.assert_allclose(np.asarray(idn), np.asarray(idn_r), rtol=1e-5, atol=1e-6)

    print("KERNEL_OK")
</pallas_src>

<mosaic_0001>
module attributes {stable_mosaic.version = 11 : i64} {
  func.func @kernel(%arg0: memref<1xf32, #tpu.memory_space<smem>>, %arg1: memref<3x33x1089xf32, #tpu.memory_space<vmem>>, %arg2: memref<3xf32, #tpu.memory_space<smem>>) attributes {dimension_semantics = [], scalar_prefetch = 0 : i64, scratch_operands = 0 : i64, tpu.core_type = #tpu.core_type<tc>} {
    %c0 = arith.constant 0 : index
    %0 = memref.load %arg0[%c0] : memref<1xf32, #tpu.memory_space<smem>>
    %1 = tpu.iota {dimensions = array<i32: 1>} : vector<1x1089xi32>
    %2 = arith.sitofp %1 : vector<1x1089xi32> to vector<1x1089xf32>
    %cst = arith.constant 5.000000e-01 : f32
    %3 = vector.broadcast %cst : f32 to vector<1x1089xf32>
    %4 = arith.addf %2, %3 : vector<1x1089xf32>
    %cst_0 = arith.constant 0.0303030312 : f32
    %5 = vector.broadcast %cst_0 : f32 to vector<1x1089xf32>
    %6 = arith.mulf %4, %5 : vector<1x1089xf32>
    %7 = math.floor %6 : vector<1x1089xf32>
    %cst_1 = arith.constant 3.300000e+01 : f32
    %8 = vector.broadcast %cst_1 : f32 to vector<1x1089xf32>
    %9 = arith.mulf %7, %8 : vector<1x1089xf32>
    %10 = arith.subf %2, %9 : vector<1x1089xf32>
    %cst_2 = arith.constant 3.150000e+01 : f32
    %11 = vector.broadcast %cst_2 : f32 to vector<1x1089xf32>
    %12 = arith.cmpf olt, %10, %11 : vector<1x1089xf32>
    %13 = vector.extract_strided_slice %12 {offsets = [0, 0], sizes = [1, 1088], strides = [1, 1]} : vector<1x1089xi1> to vector<1x1088xi1>
    %14 = tpu.iota {dimensions = array<i32: 0>} : vector<33x1xi32>
    %15 = arith.sitofp %14 : vector<33x1xi32> to vector<33x1xf32>
    %c0_3 = arith.constant 0 : index
    %c0_4 = arith.constant 0 : index
    %c0_5 = arith.constant 0 : index
    %16 = vector.load %arg1[%c0_3, %c0_4, %c0_5] : memref<3x33x1089xf32, #tpu.memory_space<vmem>>, vector<1x33x1089xf32>
    %17 = vector.shape_cast %16 : vector<1x33x1089xf32> to vector<33x1089xf32>
    %18 = vector.extract_strided_slice %17 {offsets = [0, 0], sizes = [33, 1088], strides = [1, 1]} : vector<33x1089xf32> to vector<33x1088xf32>
    %19 = vector.extract_strided_slice %17 {offsets = [0, 1], sizes = [33, 1088], strides = [1, 1]} : vector<33x1089xf32> to vector<33x1088xf32>
    %20 = arith.subf %18, %19 : vector<33x1088xf32>
    %21 = arith.mulf %20, %20 : vector<33x1088xf32>
    %c1 = arith.constant 1 : index
    %c0_6 = arith.constant 0 : index
    %c0_7 = arith.constant 0 : index
    %22 = vector.load %arg1[%c1, %c0_6, %c0_7] : memref<3x33x1089xf32, #tpu.memory_space<vmem>>, vector<1x33x1089xf32>
    %23 = vector.shape_cast %22 : vector<1x33x1089xf32> to vector<33x1089xf32>
    %24 = vector.extract_strided_slice %23 {offsets = [0, 0], sizes = [33, 1088], strides = [1, 1]} : vector<33x1089xf32> to vector<33x1088xf32>
    %25 = vector.extract_strided_slice %23 {offsets = [0, 1], sizes = [33, 1088], strides = [1, 1]} : vector<33x1089xf32> to vector<33x1088xf32>
    %26 = arith.subf %24, %25 : vector<33x1088xf32>
    %27 = arith.mulf %26, %26 : vector<33x1088xf32>
    %28 = arith.addf %21, %27 : vector<33x1088xf32>
    %c2 = arith.constant 2 : index
    %c0_8 = arith.constant 0 : index
    %c0_9 = arith.constant 0 : index
    %29 = vector.load %arg1[%c2, %c0_8, %c0_9] : memref<3x33x1089xf32, #tpu.memory_space<vmem>>, vector<1x33x1089xf32>
    %30 = vector.shape_cast %29 : vector<1x33x1089xf32> to vector<33x1089xf32>
    %31 = vector.extract_strided_slice %30 {offsets = [0, 0], sizes = [33, 1088], strides = [1, 1]} : vector<33x1089xf32> to vector<33x1088xf32>
    %32 = vector.extract_strided_slice %30 {offsets = [0, 1], sizes = [33, 1088], strides = [1, 1]} : vector<33x1089xf32> to vector<33x1088xf32>
    %33 = arith.subf %31, %32 : vector<33x1088xf32>
    %34 = arith.mulf %33, %33 : vector<33x1088xf32>
    %35 = arith.addf %28, %34 : vector<33x1088xf32>
    %cst_10 = arith.constant 0.000000e+00 : f32
    %36 = vector.shape_cast %13 : vector<1x1088xi1> to vector<1x1088xi1>
    %37 = vector.broadcast %36 : vector<1x1088xi1> to vector<33x1088xi1>
    %38 = vector.broadcast %cst_10 : f32 to vector<33x1088xf32>
    %39 = arith.select %37, %35, %38 : vector<33x1088xi1>, vector<33x1088xf32>
    %40 = vector.shape_cast %39 : vector<33x1088xf32> to vector<1x33x1088xf32>
    %cst_11 = arith.constant dense<0.000000e+00> : vector<1xf32>
    %41 = vector.multi_reduction <add>, %40, %cst_11 [1, 2] : vector<1x33x1088xf32> to vector<1xf32>
    %42 = vector.shape_cast %41 : vector<1xf32> to vector<1x1x1xf32>
    %43 = vector.extract %42[0, 0, 0] : f32 from vector<1x1x1xf32>
    %c0_12 = arith.constant 0 : index
    %c0_13 = arith.constant 0 : index
    %c0_14 = arith.constant 0 : index
    %44 = vector.load %arg1[%c0_12, %c0_13, %c0_14] : memref<3x33x1089xf32, #tpu.memory_space<vmem>>, vector<1x33x1089xf32>
    %45 = vector.shape_cast %44 : vector<1x33x1089xf32> to vector<33x1089xf32>
    %46 = vector.extract_strided_slice %45 {offsets = [0, 0], sizes = [33, 1056], strides = [1, 1]} : vector<33x1089xf32> to vector<33x1056xf32>
    %47 = vector.extract_strided_slice %45 {offsets = [0, 33], sizes = [33, 1056], strides = [1, 1]} : vector<33x1089xf32> to vector<33x1056xf32>
    %48 = arith.subf %46, %47 : vector<33x1056xf32>
    %49 = arith.mulf %48, %48 : vector<33x1056xf32>
    %c1_15 = arith.constant 1 : index
    %c0_16 = arith.constant 0 : index
    %c0_17 = arith.constant 0 : index
    %50 = vector.load %arg1[%c1_15, %c0_16, %c0_17] : memref<3x33x1089xf32, #tpu.memory_space<vmem>>, vector<1x33x1089xf32>
    %51 = vector.shape_cast %50 : vector<1x33x1089xf32> to vector<33x1089xf32>
    %52 = vector.extract_strided_slice %51 {offsets = [0, 0], sizes = [33, 1056], strides = [1, 1]} : vector<33x1089xf32> to vector<33x1056xf32>
    %53 = vector.extract_strided_slice %51 {offsets = [0, 33], sizes = [33, 1056], strides = [1, 1]} : vector<33x1089xf32> to vector<33x1056xf32>
    %54 = arith.subf %52, %53 : vector<33x1056xf32>
    %55 = arith.mulf %54, %54 : vector<33x1056xf32>
    %56 = arith.addf %49, %55 : vector<33x1056xf32>
    %c2_18 = arith.constant 2 : index
    %c0_19 = arith.constant 0 : index
    %c0_20 = arith.constant 0 : index
    %57 = vector.load %arg1[%c2_18, %c0_19, %c0_20] : memref<3x33x1089xf32, #tpu.memory_space<vmem>>, vector<1x33x1089xf32>
    %58 = vector.shape_cast %57 : vector<1x33x1089xf32> to vector<33x1089xf32>
    %59 = vector.extract_strided_slice %58 {offsets = [0, 0], sizes = [33, 1056], strides = [1, 1]} : vector<33x1089xf32> to vector<33x1056xf32>
    %60 = vector.extract_strided_slice %58 {offsets = [0, 33], sizes = [33, 1056], strides = [1, 1]} : vector<33x1089xf32> to vector<33x1056xf32>
    %61 = arith.subf %59, %60 : vector<33x1056xf32>
    %62 = arith.mulf %61, %61 : vector<33x1056xf32>
    %63 = arith.addf %56, %62 : vector<33x1056xf32>
    %64 = vector.shape_cast %63 : vector<33x1056xf32> to vector<1x33x1056xf32>
    %cst_21 = arith.constant dense<0.000000e+00> : vector<1xf32>
    %65 = vector.multi_reduction <add>, %64, %cst_21 [1, 2] : vector<1x33x1056xf32> to vector<1xf32>
    %66 = vector.shape_cast %65 : vector<1xf32> to vector<1x1x1xf32>
    %67 = vector.extract %66[0, 0, 0] : f32 from vector<1x1x1xf32>
    %c0_22 = arith.constant 0 : index
    %c0_23 = arith.constant 0 : index
    %c0_24 = arith.constant 0 : index
    %68 = vector.load %arg1[%c0_22, %c0_23, %c0_24] : memref<3x33x1089xf32, #tpu.memory_space<vmem>>, vector<1x33x1089xf32>
    %69 = vector.shape_cast %68 : vector<1x33x1089xf32> to vector<33x1089xf32>
    %70 = vector.extract_strided_slice %69 {offsets = [0, 0], sizes = [32, 1089], strides = [1, 1]} : vector<33x1089xf32> to vector<32x1089xf32>
    %71 = vector.extract_strided_slice %69 {offsets = [1, 0], sizes = [32, 1089], strides = [1, 1]} : vector<33x1089xf32> to vector<32x1089xf32>
    %72 = arith.subf %70, %71 : vector<32x1089xf32>
    %73 = arith.mulf %72, %72 : vector<32x1089xf32>
    %c1_25 = arith.constant 1 : index
    %c0_26 = arith.constant 0 : index
    %c0_27 = arith.constant 0 : index
    %74 = vector.load %arg1[%c1_25, %c0_26, %c0_27] : memref<3x33x1089xf32, #tpu.memory_space<vmem>>, vector<1x33x1089xf32>
    %75 = vector.shape_cast %74 : vector<1x33x1089xf32> to vector<33x1089xf32>
    %76 = vector.extract_strided_slice %75 {offsets = [0, 0], sizes = [32, 1089], strides = [1, 1]} : vector<33x1089xf32> to vector<32x1089xf32>
    %77 = vector.extract_strided_slice %75 {offsets = [1, 0], sizes = [32, 1089], strides = [1, 1]} : vector<33x1089xf32> to vector<32x1089xf32>
    %78 = arith.subf %76, %77 : vector<32x1089xf32>
    %79 = arith.mulf %78, %78 : vector<32x1089xf32>
    %80 = arith.addf %73, %79 : vector<32x1089xf32>
    %c2_28 = arith.constant 2 : index
    %c0_29 = arith.constant 0 : index
    %c0_30 = arith.constant 0 : index
    %81 = vector.load %arg1[%c2_28, %c0_29, %c0_30] : memref<3x33x1089xf32, #tpu.memory_space<vmem>>, vector<1x33x1089xf32>
    %82 = vector.shape_cast %81 : vector<1x33x1089xf32> to vector<33x1089xf32>
    %83 = vector.extract_strided_slice %82 {offsets = [0, 0], sizes = [32, 1089], strides = [1, 1]} : vector<33x1089xf32> to vector<32x1089xf32>
    %84 = vector.extract_strided_slice %82 {offsets = [1, 0], sizes = [32, 1089], strides = [1, 1]} : vector<33x1089xf32> to vector<32x1089xf32>
    %85 = arith.subf %83, %84 : vector<32x1089xf32>
    %86 = arith.mulf %85, %85 : vector<32x1089xf32>
    %87 = arith.addf %80, %86 : vector<32x1089xf32>
    %88 = vector.shape_cast %87 : vector<32x1089xf32> to vector<1x32x1089xf32>
    %cst_31 = arith.constant dense<0.000000e+00> : vector<1xf32>
    %89 = vector.multi_reduction <add>, %88, %cst_31 [1, 2] : vector<1x32x1089xf32> to vector<1xf32>
    %90 = vector.shape_cast %89 : vector<1xf32> to vector<1x1x1xf32>
    %91 = vector.extract %90[0, 0, 0] : f32 from vector<1x1x1xf32>
    %92 = arith.addf %43, %67 : f32
    %93 = arith.addf %92, %91 : f32
    %cst_32 = arith.constant 9.565350e-06 : f32
    %94 = arith.mulf %93, %cst_32 : f32
    %c0_33 = arith.constant 0 : index
    %c0_34 = arith.constant 0 : index
    %c0_35 = arith.constant 0 : index
    %95 = vector.load %arg1[%c0_33, %c0_34, %c0_35] : memref<3x33x1089xf32, #tpu.memory_space<vmem>>, vector<1x33x1089xf32>
    %96 = vector.shape_cast %95 : vector<1x33x1089xf32> to vector<33x1089xf32>
    %97 = vector.extract_strided_slice %96 {offsets = [0, 0], sizes = [33, 1088], strides = [1, 1]} : vector<33x1089xf32> to vector<33x1088xf32>
    %98 = vector.extract_strided_slice %96 {offsets = [0, 1], sizes = [33, 1088], strides = [1, 1]} : vector<33x1089xf32> to vector<33x1088xf32>
    %99 = arith.subf %97, %98 : vector<33x1088xf32>
    %100 = vector.broadcast %0 : f32 to vector<33x1088xf32>
    %101 = arith.addf %99, %100 : vector<33x1088xf32>
    %cst_36 = arith.constant 0.000000e+00 : f32
    %102 = vector.broadcast %cst_36 : f32 to vector<33x1088xf32>
    %103 = arith.maximumf %101, %102 : vector<33x1088xf32>
    %cst_37 = arith.constant 0.000000e+00 : f32
    %104 = vector.shape_cast %13 : vector<1x1088xi1> to vector<1x1088xi1>
    %105 = vector.broadcast %104 : vector<1x1088xi1> to vector<33x1088xi1>
    %106 = vector.broadcast %cst_37 : f32 to vector<33x1088xf32>
    %107 = arith.select %105, %103, %106 : vector<33x1088xi1>, vector<33x1088xf32>
    %108 = vector.shape_cast %107 : vector<33x1088xf32> to vector<1x33x1088xf32>
    %cst_38 = arith.constant dense<0.000000e+00> : vector<1xf32>
    %109 = vector.multi_reduction <add>, %108, %cst_38 [1, 2] : vector<1x33x1088xf32> to vector<1xf32>
    %110 = vector.shape_cast %109 : vector<1xf32> to vector<1x1x1xf32>
    %111 = vector.extract %110[0, 0, 0] : f32 from vector<1x1x1xf32>
    %c1_39 = arith.constant 1 : index
    %c0_40 = arith.constant 0 : index
    %c0_41 = arith.constant 0 : index
    %112 = vector.load %arg1[%c1_39, %c0_40, %c0_41] : memref<3x33x1089xf32, #tpu.memory_space<vmem>>, vector<1x33x1089xf32>
    %113 = vector.shape_cast %112 : vector<1x33x1089xf32> to vector<33x1089xf32>
    %114 = vector.extract_strided_slice %113 {offsets = [0, 0], sizes = [33, 1056], strides = [1, 1]} : vector<33x1089xf32> to vector<33x1056xf32>
    %115 = vector.extract_strided_slice %113 {offsets = [0, 33], sizes = [33, 1056], strides = [1, 1]} : vector<33x1089xf32> to vector<33x1056xf32>
    %116 = arith.subf %114, %115 : vector<33x1056xf32>
    %117 = vector.broadcast %0 : f32 to vector<33x1056xf32>
    %118 = arith.addf %116, %117 : vector<33x1056xf32>
    %cst_42 = arith.constant 0.000000e+00 : f32
    %119 = vector.broadcast %cst_42 : f32 to vector<33x1056xf32>
    %120 = arith.maximumf %118, %119 : vector<33x1056xf32>
    %121 = vector.shape_cast %120 : vector<33x1056xf32> to vector<1x33x1056xf32>
    %cst_43 = arith.constant dense<0.000000e+00> : vector<1xf32>
    %122 = vector.multi_reduction <add>, %121, %cst_43 [1, 2] : vector<1x33x1056xf32> to vector<1xf32>
    %123 = vector.shape_cast %122 : vector<1xf32> to vector<1x1x1xf32>
    %124 = vector.extract %123[0, 0, 0] : f32 from vector<1x1x1xf32>
    %c2_44 = arith.constant 2 : index
    %c0_45 = arith.constant 0 : index
    %c0_46 = arith.constant 0 : index
    %125 = vector.load %arg1[%c2_44, %c0_45, %c0_46] : memref<3x33x1089xf32, #tpu.memory_space<vmem>>, vector<1x33x1089xf32>
    %126 = vector.shape_cast %125 : vector<1x33x1089xf32> to vector<33x1089xf32>
    %127 = vector.extract_strided_slice %126 {offsets = [0, 0], sizes = [32, 1089], strides = [1, 1]} : vector<33x1089xf32> to vector<32x1089xf32>
    %128 = vector.extract_strided_slice %126 {offsets = [1, 0], sizes = [32, 1089], strides = [1, 1]} : vector<33x1089xf32> to vector<32x1089xf32>
    %129 = arith.subf %127, %128 : vector<32x1089xf32>
    %130 = vector.broadcast %0 : f32 to vector<32x1089xf32>
    %131 = arith.addf %129, %130 : vector<32x1089xf32>
    %cst_47 = arith.constant 0.000000e+00 : f32
    %132 = vector.broadcast %cst_47 : f32 to vector<32x1089xf32>
    %133 = arith.maximumf %131, %132 : vector<32x1089xf32>
    %134 = vector.shape_cast %133 : vector<32x1089xf32> to vector<1x32x1089xf32>
    %cst_48 = arith.constant dense<0.000000e+00> : vector<1xf32>
    %135 = vector.multi_reduction <add>, %134, %cst_48 [1, 2] : vector<1x32x1089xf32> to vector<1xf32>
    %136 = vector.shape_cast %135 : vector<1xf32> to vector<1x1x1xf32>
    %137 = vector.extract %136[0, 0, 0] : f32 from vector<1x1x1xf32>
    %138 = arith.addf %111, %124 : f32
    %139 = arith.addf %138, %137 : f32
    %cst_49 = arith.constant 2.86960512E-5 : f32
    %140 = arith.mulf %139, %cst_49 : f32
    %c0_50 = arith.constant 0 : index
    %c0_51 = arith.constant 0 : index
    %c0_52 = arith.constant 0 : index
    %141 = vector.load %arg1[%c0_50, %c0_51, %c0_52] : memref<3x33x1089xf32, #tpu.memory_space<vmem>>, vector<1x33x1089xf32>
    %142 = vector.shape_cast %141 : vector<1x33x1089xf32> to vector<33x1089xf32>
    %cst_53 = arith.constant 3.125000e-02 : f32
    %143 = vector.broadcast %cst_53 : f32 to vector<1x1089xf32>
    %144 = arith.mulf %10, %143 : vector<1x1089xf32>
    %145 = vector.broadcast %144 : vector<1x1089xf32> to vector<33x1089xf32>
    %146 = arith.subf %142, %145 : vector<33x1089xf32>
    %c1_54 = arith.constant 1 : index
    %c0_55 = arith.constant 0 : index
    %c0_56 = arith.constant 0 : index
    %147 = vector.load %arg1[%c1_54, %c0_55, %c0_56] : memref<3x33x1089xf32, #tpu.memory_space<vmem>>, vector<1x33x1089xf32>
    %148 = vector.shape_cast %147 : vector<1x33x1089xf32> to vector<33x1089xf32>
    %cst_57 = arith.constant 3.125000e-02 : f32
    %149 = vector.broadcast %cst_57 : f32 to vector<1x1089xf32>
    %150 = arith.mulf %7, %149 : vector<1x1089xf32>
    %151 = vector.broadcast %150 : vector<1x1089xf32> to vector<33x1089xf32>
    %152 = arith.subf %148, %151 : vector<33x1089xf32>
    %c2_58 = arith.constant 2 : index
    %c0_59 = arith.constant 0 : index
    %c0_60 = arith.constant 0 : index
    %153 = vector.load %arg1[%c2_58, %c0_59, %c0_60] : memref<3x33x1089xf32, #tpu.memory_space<vmem>>, vector<1x33x1089xf32>
    %154 = vector.shape_cast %153 : vector<1x33x1089xf32> to vector<33x1089xf32>
    %cst_61 = arith.constant 3.125000e-02 : f32
    %155 = vector.broadcast %cst_61 : f32 to vector<33x1xf32>
    %156 = arith.mulf %15, %155 : vector<33x1xf32>
    %157 = vector.broadcast %156 : vector<33x1xf32> to vector<33x1089xf32>
    %158 = arith.subf %154, %157 : vector<33x1089xf32>
    %159 = arith.mulf %146, %146 : vector<33x1089xf32>
    %160 = arith.mulf %152, %152 : vector<33x1089xf32>
    %161 = arith.addf %159, %160 : vector<33x1089xf32>
    %162 = arith.mulf %158, %158 : vector<33x1089xf32>
    %163 = arith.addf %161, %162 : vector<33x1089xf32>
    %164 = vector.shape_cast %163 : vector<33x1089xf32> to vector<1x33x1089xf32>
    %cst_62 = arith.constant dense<0.000000e+00> : vector<1xf32>
    %165 = vector.multi_reduction <add>, %164, %cst_62 [1, 2] : vector<1x33x1089xf32> to vector<1xf32>
    %166 = vector.shape_cast %165 : vector<1xf32> to vector<1x1x1xf32>
    %167 = vector.extract %166[0, 0, 0] : f32 from vector<1x1x1xf32>
    %cst_63 = arith.constant 2.78264743E-5 : f32
    %168 = arith.mulf %167, %cst_63 : f32
    %c0_64 = arith.constant 0 : index
    %169 = memref.load %arg2[%c0_64] : memref<3xf32, #tpu.memory_space<smem>>
    memref.store %94, %arg2[%c0_64] : memref<3xf32, #tpu.memory_space<smem>>
    %c1_65 = arith.constant 1 : index
    %170 = memref.load %arg2[%c1_65] : memref<3xf32, #tpu.memory_space<smem>>
    memref.store %140, %arg2[%c1_65] : memref<3xf32, #tpu.memory_space<smem>>
    %c2_66 = arith.constant 2 : index
    %171 = memref.load %arg2[%c2_66] : memref<3xf32, #tpu.memory_space<smem>>
    memref.store %168, %arg2[%c2_66] : memref<3xf32, #tpu.memory_space<smem>>
    return
  }
}

</mosaic_0001>

<bundles_post_ra>
// kernel: tpu_custom_call.1
= control target key start
LH: loop header
LB: loop body
LE: loop exit
PB: predicated region body
PF: predicated region fallthrough
CT: control target
= control target key end

     0   :  { %8 = vsyncpa [#allocation4], 0  ;;  %s9216_s0 = inlined_call_operand.<no memory space> [shape: f32[1], index: 0, kind: input, shape index: {}]   ;;  %s9217_s1 = inlined_call_operand.hbm [shape: f32[3,33,1089], index: 1, kind: input, shape index: {}]   ;;  %s9218_s2 = inlined_call_operand.hbm [shape: f32[3], index: 2, kind: output, shape index: {}]  }
   0x1   :  { %9 = vsyncpa [#allocation5], 0  ;;  %s4440_s9 = smov [#allocation3]   ;;  %s4404_s13 = scalar_lea.hbm %s9217_s1, 17280 }
   0x2   :  { %s17_s10 = sshll.u32 %s4440_s9, 4  ;;  %p4405_p0 = scmp.ne.s32.totalorder %s9217_s1, %s4404_s13  ;;  %s18_s10 = int_to_ptr.vmem [resolvable:$true] %s17_s10 }
   0x3   :  { %p4408_p1 = scmp.lt.u32.totalorder %s4404_s13, %s9217_s1 }
   0x5   :  { %p4410_p2 = pnand %p4408_p1, %p4405_p0 }
   0x7   :  { %4413 = shalt.err (!%p4410_p2)
}
   0x8   :  { %s4414_s18 = scalar_lea.vmem %s18_s10, 17280  ;;  %p4419_p4 = scmp.lt.s32.totalorder %s18_s10, %s18_s10 }
   0x9   :  { %p4415_p3 = scmp.ne.s32.totalorder %s18_s10, %s4414_s18  ;;  %p4420_p5 = scmp.lt.s32.totalorder %s4414_s18, %s4414_s18 }
   0xb   :  { %p4421_p6 = por %p4420_p5, %p4419_p4 }
   0xd   :  { %p4422_p7 = pnand %p4421_p6, %p4415_p3 }
   0xf   :  { %4425 = shalt.err (!%p4422_p7)
}
  0x10   :  { %s4441_s19 = smov 1152   ;;  %s4442_s20 = smov 72  }
  0x11   :  { %23 = dma.hbm_to_vmem [thread:$0]  %s9217_s1, 17280, %s18_s10, [#allocation4], %s4441_s19, %s4441_s19, %s4442_s20  }
  0x12   :  { %4436 = dma.done.wait [#allocation4], 17280  }
  0x13   :  { %4437 = vsyncadd [#allocation4], 4294950016  ;;  %v4473_v0 = vld [vmem:[#allocation3 + $0x10] sm:$0xff]  ;;  %v4475_v1 = vld [vmem:[#allocation3] sm:$0xff]  ;;  %s4443_s23 = smov 127   ;;  %v9219_v46 = vlaneseq  ;;  %vm292_vm0 = vcmask 1039360  }
  0x14   :  { %206 = vrot.lane.b32.xlu1 %v4473_v0, %s4443_s23  ;;  %202 = vrot.lane.b32.xlu0 %v4475_v1, %s4443_s23  ;;  %v4481_v2 = vld [vmem:[#allocation3 + $0x18] sm:$0xff]  ;;  %v4483_v3 = vld [vmem:[#allocation3 + $0x8] sm:$0xff]  ;;  %v4491_v5 = vld [vmem:[#allocation3 + $0x20] sm:$0xff]  ;;  %vm1340_vm10 = vcmask 523264   ;;  %vm1373_vm11 = vcmask 1040384   ;;  %vm2356_vm12 = vcmask 1046528  }
  0x15   :  { %v4489_v4 = vld [vmem:[#allocation3 + $0x28] sm:$0xff]  ;;  %v4497_v6 = vld [vmem:[#allocation3 + $0x38] sm:$0xff]  ;;  %v4499_v7 = vld [vmem:[#allocation3 + $0x30] sm:$0xff]  ;;  %v4643_v49 = vand.u32 127, %v9219_v46  ;;  %vm1390_vm13 = vcmask 516096   ;;  %vm3003_vm14 = vcmask 531456  }
  0x16   :  { %v4505_v8 = vld [vmem:[#allocation3 + $0x48] sm:$0xff]  ;;  %v4507_v9 = vld [vmem:[#allocation3 + $0x40] sm:$0xff]  ;;  %v4513_v10 = vld [vmem:[#allocation3 + $0x58] sm:$0xff]  ;;  %vm1492_vm15 = vcmask 777216   ;;  %s4426_s13 = scalar_lea.hbm %s9218_s2, 16 }
  0x17   :  { %v4515_v11 = vld [vmem:[#allocation3 + $0x50] sm:$0xff]  ;;  %v4521_v12 = vld [vmem:[#allocation3 + $0x68] sm:$0xff]  ;;  %v4523_v13 = vld [vmem:[#allocation3 + $0x60] sm:$0xff]  ;;  %v4648_v52 = vadd.s32 128, %v4643_v49  ;;  %v4651_v53 = vadd.s32 256, %v4643_v49  ;;  %v4656_v54 = vadd.s32 384, %v4643_v49  ;;  %v9220_v58 = vcvt.s32.f32 %v4643_v49  ;;  %p4427_p8 = scmp.ne.s32.totalorder %s9218_s2, %s4426_s13  ;;  %p4430_p9 = scmp.lt.u32.totalorder %s4426_s13, %s9218_s2 }
  0x18   :  { %208 = vrot.lane.b32.xlu1 %v4481_v2, %s4443_s23  ;;  %204 = vrot.lane.b32.xlu0 %v4483_v3, %s4443_s23  ;;  %v4529_v14 = vld [vmem:[#allocation3 + $0x78] sm:$0xff]  ;;  %v4531_v15 = vld [vmem:[#allocation3 + $0x70] sm:$0xff]  ;;  %v4537_v16 = vld [vmem:[#allocation3 + $0x88] sm:$0xff]  ;;  %v4659_v55 = vadd.s32 640, %v4643_v49  ;;  %v4663_v59 = vadd.s32 512, %v4643_v49  ;;  %v4666_v60 = vadd.s32 896, %v4643_v49 }
  0x19   :  { %v4539_v17 = vld [vmem:[#allocation3 + $0x80] sm:$0xff]  ;;  %v4545_v18 = vld [vmem:[#allocation3 + $0x98] sm:$0xff]  ;;  %v4547_v19 = vld [vmem:[#allocation3 + $0x90] sm:$0xff]  ;;  %v9222_v61 = vcvt.s32.f32 %v4648_v52  ;;  %v9221_v62 = vcvt.s32.f32 %v4651_v53  ;;  %v9223_v63 = vcvt.s32.f32 %v4656_v54  ;;  %p4432_p10 = pnand %p4430_p9, %p4427_p8 }
  0x1a   :  { %v4553_v20 = vld [vmem:[#allocation3 + $0xa8] sm:$0xff]  ;;  %v4555_v21 = vld [vmem:[#allocation3 + $0xa0] sm:$0xff]  ;;  %v4561_v22 = vld [vmem:[#allocation3 + $0xb8] sm:$0xff] }
  0x1b   :  { %v4563_v23 = vld [vmem:[#allocation3 + $0xb0] sm:$0xff]  ;;  %v4569_v24 = vld [vmem:[#allocation3 + $0xc8] sm:$0xff]  ;;  %v4571_v25 = vld [vmem:[#allocation3 + $0xc0] sm:$0xff] }
  0x1c   :  { %212 = vrot.lane.b32.xlu1 %v4489_v4, %s4443_s23  ;;  %210 = vrot.lane.b32.xlu0 %v4491_v5, %s4443_s23  ;;  %v4577_v26 = vld [vmem:[#allocation3 + $0xd8] sm:$0xff]  ;;  %v4579_v27 = vld [vmem:[#allocation3 + $0xd0] sm:$0xff]  ;;  %v4585_v28 = vld [vmem:[#allocation3 + $0xe8] sm:$0xff] }
  0x1d   :  { %9557 = vst [vmem:[#allocation9_spill] sm:$0xff] %v4585_v28  ;;  %v4587_v29 = vld [vmem:[#allocation3 + $0xe0] sm:$0xff]  ;;  %v4593_v30 = vld [vmem:[#allocation3 + $0xf8] sm:$0xff]  ;;  %v4595_v31 = vld [vmem:[#allocation3 + $0xf0] sm:$0xff] }
  0x1e   :  { %9558 = vst [vmem:[#allocation10_spill] sm:$0xff] %v4593_v30  ;;  %9559 = vst [vmem:[#allocation11_spill] sm:$0xff] %v4595_v31  ;;  %v4601_v32 = vld [vmem:[#allocation3 + $0x108] sm:$0xff]  ;;  %v4603_v33 = vld [vmem:[#allocation3 + $0x100] sm:$0xff] }
  0x1f   :  { %9560 = vst [vmem:[#allocation12_spill] sm:$0xff] %v4601_v32  ;;  %9561 = vst [vmem:[#allocation13_spill] sm:$0xff] %v4603_v33  ;;  %v4609_v34 = vld [vmem:[#allocation3 + $0x118] sm:$0xff]  ;;  %v4611_v35 = vld [vmem:[#allocation3 + $0x110] sm:$0xff] }
  0x20   :  { %216 = vrot.lane.b32.xlu1 %v4497_v6, %s4443_s23  ;;  %214 = vrot.lane.b32.xlu0 %v4499_v7, %s4443_s23  ;;  %9562 = vst [vmem:[#allocation14_spill] sm:$0xff] %v4609_v34  ;;  %9563 = vst [vmem:[#allocation15_spill] sm:$0xff] %v4611_v35  ;;  %v4617_v36 = vld [vmem:[#allocation3 + $0x128] sm:$0x1]  ;;  %v4619_v37 = vld [vmem:[#allocation3 + $0x120] sm:$0x1] }
  0x21   :  { %9564 = vst [vmem:[#allocation16_spill] sm:$0xff] %v4617_v36  ;;  %9565 = vst [vmem:[#allocation17_spill] sm:$0xff] %v4619_v37  ;;  %v4625_v38 = vld [vmem:[#allocation3 + $0x138] sm:$0x1]  ;;  %v4627_v39 = vld [vmem:[#allocation3 + $0x130] sm:$0x1] }
  0x22   :  { %9566 = vst [vmem:[#allocation18_spill] sm:$0xff] %v4625_v38  ;;  %9567 = vst [vmem:[#allocation19_spill] sm:$0xff] %v4627_v39  ;;  %v153_v40 = vld [vmem:[#allocation3 + $0x148] sm:$0x1]  ;;  %v4633_v41 = vld [vmem:[#allocation3 + $0x140] sm:$0x1] }
  0x23   :  { %9568 = vst [vmem:[#allocation20_spill] sm:$0xff] %v4633_v41  ;;  %v155_v42 = vld [vmem:[#allocation3 + $0x158] sm:$0x1]  ;;  %v154_v43 = vld [vmem:[#allocation3 + $0x150] sm:$0x1]  ;;  %v469_v44 = vld [vmem:[#allocation3 + $0x168] sm:$0xff] }
  0x24   :  { %220 = vrot.lane.b32.xlu1 %v4505_v8, %s4443_s23  ;;  %218 = vrot.lane.b32.xlu0 %v4507_v9, %s4443_s23  ;;  %v156_v45 = vld [vmem:[#allocation3 + $0x160] sm:$0x1]  ;;  %v471_v47 = vld [vmem:[#allocation3 + $0x178] sm:$0xff]  ;;  %v470_v48 = vld [vmem:[#allocation3 + $0x170] sm:$0xff] }
  0x25   :  { %v473_v50 = vld [vmem:[#allocation3 + $0x188] sm:$0xff]  ;;  %v472_v51 = vld [vmem:[#allocation3 + $0x180] sm:$0xff]  ;;  %v475_v56 = vld [vmem:[#allocation3 + $0x198] sm:$0xff] }
  0x26   :  { %v474_v57 = vld [vmem:[#allocation3 + $0x190] sm:$0xff]  ;;  %v479_v46 = vld [vmem:[#allocation3 + $0x1b8] sm:$0xff] }
  0x28   :  { %224 = vrot.lane.b32.xlu1 %v4513_v10, %s4443_s23  ;;  %222 = vrot.lane.b32.xlu0 %v4515_v11, %s4443_s23 }
  0x2c   :  { %228 = vrot.lane.b32.xlu1 %v4521_v12, %s4443_s23  ;;  %226 = vrot.lane.b32.xlu0 %v4523_v13, %s4443_s23 }
  0x30   :  { %232 = vrot.lane.b32.xlu1 %v4529_v14, %s4443_s23  ;;  %230 = vrot.lane.b32.xlu0 %v4531_v15, %s4443_s23 }
  0x34   :  { %236 = vrot.lane.b32.xlu1 %v4537_v16, %s4443_s23  ;;  %234 = vrot.lane.b32.xlu0 %v4539_v17, %s4443_s23 }
  0x38   :  { %240 = vrot.lane.b32.xlu1 %v4545_v18, %s4443_s23  ;;  %238 = vrot.lane.b32.xlu0 %v4547_v19, %s4443_s23 }
  0x3c   :  { %244 = vrot.lane.b32.xlu1 %v4553_v20, %s4443_s23  ;;  %242 = vrot.lane.b32.xlu0 %v4555_v21, %s4443_s23 }
  0x40   :  { %248 = vrot.lane.b32.xlu1 %v4561_v22, %s4443_s23  ;;  %246 = vrot.lane.b32.xlu0 %v4563_v23, %s4443_s23 }
  0x44   :  { %252 = vrot.lane.b32.xlu1 %v4569_v24, %s4443_s23  ;;  %250 = vrot.lane.b32.xlu0 %v4571_v25, %s4443_s23 }
  0x48   :  { %256 = vrot.lane.b32.xlu1 %v4577_v26, %s4443_s23  ;;  %254 = vrot.lane.b32.xlu0 %v4579_v27, %s4443_s23 }
  0x4c   :  { %260 = vrot.lane.b32.xlu1 %v4585_v28, %s4443_s23  ;;  %258 = vrot.lane.b32.xlu0 %v4587_v29, %s4443_s23 }
  0x50   :  { %264 = vrot.lane.b32.xlu1 %v4593_v30, %s4443_s23  ;;  %262 = vrot.lane.b32.xlu0 %v4595_v31, %s4443_s23  ;;  %v9590_v30 = vcvt.s32.f32 %v4648_v52 }
  0x54   :  { %268 = vrot.lane.b32.xlu1 %v4601_v32, %s4443_s23  ;;  %266 = vrot.lane.b32.xlu0 %v4603_v33, %s4443_s23 }
  0x58   :  { %272 = vrot.lane.b32.xlu1 %v4609_v34, %s4443_s23  ;;  %270 = vrot.lane.b32.xlu0 %v4611_v35, %s4443_s23 }
  0x5c   :  { %276 = vrot.lane.b32.xlu1 %v4617_v36, %s4443_s23  ;;  %274 = vrot.lane.b32.xlu0 %v4619_v37, %s4443_s23 }
  0x60   :  { %280 = vrot.lane.b32.xlu1 %v4625_v38, %s4443_s23  ;;  %278 = vrot.lane.b32.xlu0 %v4627_v39, %s4443_s23  ;;  %v481_v38 = vld [vmem:[#allocation3 + $0x1c8] sm:$0xff]  ;;  %v480_v39 = vld [vmem:[#allocation3 + $0x1c0] sm:$0xff] }
  0x64   :  { %284 = vrot.lane.b32.xlu1 %v153_v40, %s4443_s23  ;;  %282 = vrot.lane.b32.xlu0 %v4633_v41, %s4443_s23  ;;  %v9225_v40 = vcvt.s32.f32 %v4659_v55 }
  0x68   :  { %288 = vrot.lane.b32.xlu1 %v155_v42, %s4443_s23  ;;  %286 = vrot.lane.b32.xlu0 %v154_v43, %s4443_s23  ;;  %v477_v42 = vld [vmem:[#allocation3 + $0x1a8] sm:$0xff]  ;;  %v476_v43 = vld [vmem:[#allocation3 + $0x1a0] sm:$0xff] }
  0x6c   :  { %559 = vrot.lane.b32.xlu1 %v469_v44, %s4443_s23  ;;  %290 = vrot.lane.b32.xlu0 %v156_v45, %s4443_s23  ;;  %v47_v44 = vadd.f32 0.5, %v9220_v58  ;;  %v9226_v45 = vcvt.s32.f32 %v4663_v59  ;;  %v478_v58 = vld [vmem:[#allocation3 + $0x1b0] sm:$0xff] }
  0x70   :  { %563 = vrot.lane.b32.xlu1 %v471_v47, %s4443_s23  ;;  %561 = vrot.lane.b32.xlu0 %v470_v48, %s4443_s23  ;;  %v48_v48 = vadd.f32 0.5, %v9222_v61  ;;  %v4691_v47 = vmul.f32 0.030303031, %v47_v44 }
  0x72   :  { %9569 = vst [vmem:[#allocation21_spill] sm:$0xff] %v4691_v47  ;;  %v9577_v37 = vfloor.f32 %v4691_v47 }
  0x74   :  { %567 = vrot.lane.b32.xlu1 %v473_v50, %s4443_s23  ;;  %565 = vrot.lane.b32.xlu0 %v472_v51, %s4443_s23  ;;  %v49_v50 = vadd.f32 0.5, %v9221_v62  ;;  %v50_v51 = vadd.f32 0.5, %v9223_v63  ;;  %v51_v62 = vadd.f32 0.5, %v9226_v45  ;;  %v4700_v63 = vmul.f32 0.030303031, %v48_v48 }
  0x76   :  { %9571 = vst [vmem:[#allocation22_spill] sm:$0xff] %v4700_v63  ;;  %v4702_v41 = vmul.f32 0.030303031, %v49_v50  ;;  %v4712_v36 = vmul.f32 0.030303031, %v51_v62  ;;  %v74_v50 = vmul.f32 33.0, %v9577_v37 }
  0x78   :  { %571 = vrot.lane.b32.xlu1 %v475_v56, %s4443_s23  ;;  %569 = vrot.lane.b32.xlu0 %v474_v57, %s4443_s23  ;;  %v52_v56 = vadd.f32 0.5, %v9225_v40  ;;  %v4689_v57 = vadd.s32 768, %v4643_v49  ;;  %9572 = vst [vmem:[#allocation23_spill] sm:$0xff] %v4702_v41  ;;  %v4706_v40 = vmul.f32 0.030303031, %v50_v51  ;;  %9575 = vst [vmem:[#allocation26_spill] sm:$0xff] %v4712_v36  ;;  %v9579_v51 = vfloor.f32 %v4700_v63 }
  0x79   :  { %v9580_v34 = vfloor.f32 %v4702_v41  ;;  %v485_v63 = vld [vmem:[#allocation3 + $0x1e8] sm:$0xff] }
  0x7a   :  { %9573 = vst [vmem:[#allocation24_spill] sm:$0xff] %v4706_v40  ;;  %v4708_v44 = vmul.f32 0.030303031, %v52_v56  ;;  %v9234_v45 = vcvt.s32.f32 %v4689_v57  ;;  %v75_v56 = vmul.f32 33.0, %v9579_v51  ;;  %v9581_v37 = vfloor.f32 %v4706_v40 }
  0x7b   :  { %v4746_v51 = vstv %s9216_s0  ;;  %s4444_s0 = smov 95  }
  0x7c   :  { %575 = vrot.lane.b32.xlu1 %v477_v42, %s4443_s23  ;;  %573 = vrot.lane.b32.xlu0 %v476_v43, %s4443_s23  ;;  %v9570_v42 = vcvt.s32.f32 %v4666_v60  ;;  %v4698_v43 = vadd.s32 1024, %v4643_v49  ;;  %9574 = vst [vmem:[#allocation25_spill] sm:$0xff] %v4708_v44  ;;  %v53_v62 = vadd.f32 0.5, %v9234_v45  ;;  %v76_v45 = vmul.f32 33.0, %v9580_v34  ;;  %9584 = vst [vmem:[#allocation29_spill] sm:$0xff] %v4746_v51  ;;  %v484_v34 = vld [vmem:[#allocation3 + $0x1e0] sm:$0xff] }
  0x7d   :  { %v4760_v31 = vsub.f32 %v9590_v30, %v75_v56  ;;  %v9592_v30 = vcvt.s32.f32 %v4651_v53  ;;  %v486_v56 = vld [vmem:[#allocation3 + $0x1f0] sm:$0xff]  ;;  %v9600_v53 = vcvt.s32.f32 %v4666_v60 }
  0x7e   :  { %v54_v61 = vadd.f32 0.5, %v9570_v42  ;;  %v483_v42 = vld [vmem:[#allocation3 + $0x1d8] sm:$0xff] }
  0x7f   :  { %9591 = vst [vmem:[#allocation32_spill] sm:$0xff] %v4760_v31  ;;  %v4778_v52 = vsub.f32 %v9592_v30, %v76_v45  ;;  %vm93_vm2 = vcmp.lt.f32.partialorder %v4760_v31, 31.5 }
  0x80   :  { %579 = vrot.lane.b32.xlu1 %v479_v46, %s4443_s23  ;;  %577 = vrot.lane.b32.xlu0 %v478_v58, %s4443_s23  ;;  %v4714_v48 = vmul.f32 0.030303031, %v54_v61  ;;  %v482_v61 = vld [vmem:[#allocation3 + $0x1d0] sm:$0xff]  ;;  %v77_v46 = vmul.f32 33.0, %v9581_v37  ;;  %v9582_v58 = vfloor.f32 %v4708_v44 }
  0x81   :  { %9593 = vst [vmem:[#allocation33_spill] sm:$0xff] %v4778_v52  ;;  %vm94_vm3 = vcmp.lt.f32.partialorder %v4778_v52, 31.5 }
  0x82   :  { %9576 = vst [vmem:[#allocation27_spill] sm:$0xff] %v4714_v48  ;;  %v79_v47 = vmul.f32 33.0, %v9582_v58  ;;  %v9588_v37 = vfloor.f32 %v4714_v48 }
  0x84   :  { %583 = vrot.lane.b32.xlu1 %v481_v38, %s4443_s23  ;;  %581 = vrot.lane.b32.xlu0 %v480_v39, %s4443_s23  ;;  %v9578_v38 = vcvt.s32.f32 %v4698_v43  ;;  %v81_v44 = vmul.f32 33.0, %v9588_v37 }
  0x86   :  { %v55_v35 = vadd.f32 0.5, %v9578_v38  ;;  %v207_v39 = vpop.permute.xlu1 %206  ;;  %v203_v32 = vpop.permute.xlu0 %202  ;;  %v4741_v38 = vmul.f32 0.030303031, %v53_v62  ;;  %v4795_v45 = vsub.f32 %v9600_v53, %v81_v44 }
  0x88   :  { %587 = vrot.lane.b32.xlu1 %v483_v42, %s4443_s23  ;;  %585 = vrot.lane.b32.xlu0 %v482_v61, %s4443_s23  ;;  %9583 = vst [vmem:[#allocation28_spill] sm:$0xff] %v4741_v38  ;;  %v9585_v42 = vcvt.s32.f32 %v4643_v49  ;;  %v9587_v61 = vfloor.f32 %v4712_v36  ;;  %v4756_v58 = vmul.f32 0.030303031, %v55_v35  ;;  %9601 = vst [vmem:[#allocation37_spill] sm:$0xff] %v4795_v45  ;;  %vm99_vm8 = vcmp.lt.f32.partialorder %v4795_v45, 31.5 }
  0x8a   :  { %v4750_v41 = vsub.f32 %v9585_v42, %v74_v50  ;;  %v78_v40 = vmul.f32 33.0, %v9587_v61  ;;  %9589 = vst [vmem:[#allocation31_spill] sm:$0xff] %v4756_v58  ;;  %v209_v62 = vpop.permute.xlu1 %208  ;;  %v205_v33 = vpop.permute.xlu0 %204 }
  0x8b   :  { %v295_v28 = vsel %vm292_vm0, %v207_v39, %v209_v62  ;;  %v293_v49 = vsel %vm292_vm0, %v203_v32, %v205_v33  ;;  %v294_v50 = vsel %vm292_vm0, %v205_v33, %v207_v39  ;;  %v9594_v32 = vcvt.s32.f32 %v4656_v54 }
  0x8c   :  { %9586 = vst [vmem:[#allocation30_spill] sm:$0xff] %v4750_v41  ;;  %v4766_v42 = vsub.f32 %v4473_v0, %v295_v28  ;;  %v4769_v61 = vsub.f32 %v4475_v1, %v293_v49  ;;  %v4772_v35 = vsub.f32 %v4483_v3, %v294_v50  ;;  %591 = vrot.lane.b32.xlu1 %v485_v63, %s4443_s23  ;;  %v9596_v0 = vcvt.s32.f32 %v4659_v55  ;;  %v487_v3 = vld [vmem:[#allocation3 + $0x1f8] sm:$0xff] }
  0x8d   :  { %589 = vrot.lane.b32.xlu0 %v484_v34, %s4443_s23  ;;  %v4782_v33 = vsub.f32 %v9594_v32, %v77_v46  ;;  %v9245_v1 = vfloor.f32 %v4741_v38  ;;  %v9598_v63 = vcvt.s32.f32 %v4663_v59  ;;  %v9244_v54 = vfloor.f32 %v4756_v58  ;;  %v489_v32 = vld [vmem:[#allocation3 + $0x208] sm:$0xff] }
  0x8e   :  { %v4786_v28 = vsub.f32 %v9596_v0, %v79_v47  ;;  %v3051_v46 = vadd.f32 %v4746_v51, %v4766_v42  ;;  %v213_v55 = vpop.permute.xlu1 %212  ;;  %v211_v47 = vpop.permute.xlu0 %210  ;;  %v3049_v34 = vadd.f32 %v4746_v51, %v4769_v61  ;;  %v3050_v37 = vadd.f32 %v4746_v51, %v4772_v35  ;;  %v488_v0 = vld [vmem:[#allocation3 + $0x200] sm:$0xff] }
  0x8f   :  { %9595 = vst [vmem:[#allocation34_spill] sm:$0xff] %v4782_v33  ;;  %v4791_v39 = vsub.f32 %v9598_v63, %v78_v40  ;;  %v296_v59 = vsel %vm292_vm0, %v209_v62, %v211_v47  ;;  %v297_v40 = vsel %vm292_vm0, %v211_v47, %v213_v55  ;;  %vm92_vm1 = vcmp.lt.f32.partialorder %v4750_v41, 31.5 }
  0x90   :  { %9597 = vst [vmem:[#allocation35_spill] sm:$0xff] %v4786_v28  ;;  %v4809_v60 = vsub.f32 %v4481_v2, %v296_v59  ;;  %v4812_v44 = vsub.f32 %v4491_v5, %v297_v40  ;;  %595 = vrot.lane.b32.xlu1 %v487_v3, %s4443_s23  ;;  %v80_v49 = vmul.f32 33.0, %v9245_v1  ;;  %v3096_v62 = vmax.f32 %v3051_v46, 0.0 }
  0x91   :  { %9599 = vst [vmem:[#allocation36_spill] sm:$0xff] %v4791_v39  ;;  %593 = vrot.lane.b32.xlu0 %v486_v56, %s4443_s23  ;;  %v3094_v50 = vmax.f32 %v3049_v34, 0.0  ;;  %v3095_v30 = vmax.f32 %v3050_v37, 0.0  ;;  %v82_v63 = vmul.f32 33.0, %v9244_v54  ;;  %vm95_vm4 = vcmp.lt.f32.partialorder %v4782_v33, 31.5 }
  0x92   :  { %v3052_v2 = vadd.f32 %v4746_v51, %v4809_v60  ;;  %v217_v5 = vpop.permute.xlu1 %216  ;;  %v215_v3 = vpop.permute.xlu0 %214  ;;  %v3053_v46 = vadd.f32 %v4746_v51, %v4812_v44  ;;  %vm96_vm5 = vcmp.lt.f32.partialorder %v4791_v39, 31.5  ;;  %vm97_vm6 = vcmp.lt.f32.partialorder %v4786_v28, 31.5 }
  0x93   :  { %v3139_v56 = vsel %vm92_vm1, %v3094_v50, 0.0  ;;  %v3140_v53 = vsel %vm93_vm2, %v3095_v30, 0.0  ;;  %v298_v47 = vsel %vm292_vm0, %v213_v55, %v215_v3  ;;  %v299_v59 = vsel %vm292_vm0, %v215_v3, %v217_v5  ;;  %v490_v3 = vld [vmem:[#allocation3 + $0x210] sm:$0xff] }
  0x94   :  { %v3184_v34 = vadd.f32 %v3140_v53, %v3139_v56  ;;  %v3097_v37 = vmax.f32 %v3052_v2, 0.0  ;;  %v4833_v40 = vsub.f32 %v4489_v4, %v298_v47  ;;  %599 = vrot.lane.b32.xlu1 %v489_v32, %s4443_s23  ;;  %v9602_v50 = vcvt.s32.f32 %v4689_v57  ;;  %v491_v2 = vld [vmem:[#allocation3 + $0x218] sm:$0xff] }
  0x95   :  { %597 = vrot.lane.b32.xlu0 %v488_v0, %s4443_s23  ;;  %v3141_v30 = vsel %vm94_vm3, %v3096_v62, 0.0  ;;  %v3098_v1 = vmax.f32 %v3053_v46, 0.0  ;;  %v4844_v55 = vsub.f32 %v4499_v7, %v299_v59  ;;  %v9604_v56 = vcvt.s32.f32 %v4698_v43  ;;  %v493_v59 = vld [vmem:[#allocation3 + $0x228] sm:$0xff] }
  0x96   :  { %v4839_v54 = vsub.f32 %v9602_v50, %v80_v49  ;;  %v3185_v4 = vadd.f32 %v3184_v34, %v3141_v30  ;;  %v3142_v32 = vsel %vm95_vm4, %v3097_v37, 0.0  ;;  %v3054_v57 = vadd.f32 %v4746_v51, %v4833_v40  ;;  %v221_v49 = vpop.permute.xlu1 %220  ;;  %v219_v0 = vpop.permute.xlu0 %218  ;;  %v492_v50 = vld [vmem:[#allocation3 + $0x220] sm:$0xff] }
  0x97   :  { %v4853_v62 = vsub.f32 %v9604_v56, %v82_v63  ;;  %v3055_v7 = vadd.f32 %v4746_v51, %v4844_v55  ;;  %v300_v53 = vsel %vm292_vm0, %v217_v5, %v219_v0  ;;  %v4863_v37 = vsub.f32 %v4507_v9, %v219_v0 }
  0x98   :  { %9603 = vst [vmem:[#allocation38_spill] sm:$0xff] %v4839_v54  ;;  %v3186_v46 = vadd.f32 %v3185_v4, %v3142_v32  ;;  %v3099_v47 = vmax.f32 %v3054_v57, 0.0  ;;  %v4860_v34 = vsub.f32 %v4497_v6, %v300_v53  ;;  %603 = vrot.lane.b32.xlu1 %v491_v2, %s4443_s23  ;;  %v3143_v43 = vsel %vm96_vm5, %v3098_v1, 0.0 }
  0x99   :  { %9605 = vst [vmem:[#allocation39_spill] sm:$0xff] %v4853_v62  ;;  %601 = vrot.lane.b32.xlu0 %v490_v3, %s4443_s23  ;;  %v3100_v63 = vmax.f32 %v3055_v7, 0.0  ;;  %vm98_vm7 = vcmp.lt.f32.partialorder %v4839_v54, 31.5  ;;  %v3057_v2 = vadd.f32 %v4746_v51, %v4863_v37  ;;  %vm100_vm9 = vcmp.lt.f32.partialorder %v4853_v62, 31.5 }
  0x9a   :  { %v3187_v30 = vadd.f32 %v3186_v46, %v3143_v43  ;;  %v3144_v6 = vsel %vm97_vm6, %v3099_v47, 0.0  ;;  %v225_v5 = vpop.permute.xlu1 %224  ;;  %v223_v4 = vpop.permute.xlu0 %222  ;;  %v3056_v9 = vadd.f32 %v4746_v51, %v4860_v34  ;;  %v494_v46 = vld [vmem:[#allocation3 + $0x230] sm:$0xff] }
  0x9b   :  { %v301_v1 = vsel %vm292_vm0, %v221_v49, %v223_v4  ;;  %v302_v32 = vsel %vm292_vm0, %v223_v4, %v225_v5  ;;  %v3145_v0 = vsel %vm98_vm7, %v3100_v63, 0.0  ;;  %v3102_v7 = vmax.f32 %v3057_v2, 0.0  ;;  %v495_v49 = vld [vmem:[#allocation3 + $0x238] sm:$0xff] }
  0x9c   :  { %v3188_v3 = vadd.f32 %v3187_v30, %v3144_v6  ;;  %v4881_v57 = vsub.f32 %v4505_v8, %v301_v1  ;;  %607 = vrot.lane.b32.xlu1 %v493_v59, %s4443_s23  ;;  %v3101_v56 = vmax.f32 %v3056_v9, 0.0  ;;  %v4888_v53 = vsub.f32 %v4515_v11, %v302_v32  ;;  %v497_v32 = vld [vmem:[#allocation3 + $0x248] sm:$0xff] }
  0x9d   :  { %605 = vrot.lane.b32.xlu0 %v492_v50, %s4443_s23  ;;  %v3147_v63 = vsel %vm100_vm9, %v3102_v7, 0.0 }
  0x9e   :  { %v3189_v47 = vadd.f32 %v3188_v3, %v3145_v0  ;;  %v3058_v8 = vadd.f32 %v4746_v51, %v4881_v57  ;;  %v229_v43 = vpop.permute.xlu1 %228  ;;  %v227_v30 = vpop.permute.xlu0 %226  ;;  %v3146_v59 = vsel %vm99_vm8, %v3101_v56, 0.0  ;;  %v3059_v50 = vadd.f32 %v4746_v51, %v4888_v53 }
  0x9f   :  { %v303_v4 = vsel %vm292_vm0, %v225_v5, %v227_v30  ;;  %v3191_v9 = vsel %vm1340_vm10, %v3147_v63, 0.0  ;;  %v304_v1 = vsel %vm292_vm0, %v227_v30, %v229_v43 }
  0xa0   :  { %v3190_v11 = vadd.f32 %v3189_v47, %v3146_v59  ;;  %v3103_v6 = vmax.f32 %v3058_v8, 0.0  ;;  %611 = vrot.lane.b32.xlu1 %v495_v49, %s4443_s23  ;;  %v3104_v2 = vmax.f32 %v3059_v50, 0.0  ;;  %v4904_v3 = vsub.f32 %v4513_v10, %v303_v4  ;;  %v496_v47 = vld [vmem:[#allocation3 + $0x240] sm:$0xff] }
  0xa1   :  { %609 = vrot.lane.b32.xlu0 %v494_v46, %s4443_s23  ;;  %v4909_v7 = vsub.f32 %v4523_v13, %v304_v1 }
  0xa2   :  { %v3192_v0 = vadd.f32 %v3191_v9, %v3190_v11  ;;  %v3148_v56 = vsel %vm92_vm1, %v3103_v6, 0.0  ;;  %v233_v5 = vpop.permute.xlu1 %232  ;;  %v231_v49 = vpop.permute.xlu0 %230  ;;  %v3060_v46 = vadd.f32 %v4746_v51, %v4904_v3  ;;  %v3149_v13 = vsel %vm93_vm2, %v3104_v2, 0.0 }
  0xa3   :  { %v305_v8 = vsel %vm292_vm0, %v229_v43, %v231_v49  ;;  %v3061_v10 = vadd.f32 %v4746_v51, %v4909_v7  ;;  %v306_v59 = vsel %vm292_vm0, %v231_v49, %v233_v5  ;;  %v499_v43 = vld [vmem:[#allocation3 + $0x258] sm:$0xff] }
  0xa4   :  { %v3193_v30 = vadd.f32 %v3192_v0, %v3148_v56  ;;  %615 = vrot.lane.b32.xlu1 %v497_v32, %s4443_s23  ;;  %v3105_v63 = vmax.f32 %v3060_v46, 0.0  ;;  %v4921_v50 = vsub.f32 %v4521_v12, %v305_v8  ;;  %v4924_v11 = vsub.f32 %v4531_v15, %v306_v59  ;;  %v498_v0 = vld [vmem:[#allocation3 + $0x250] sm:$0xff] }
  0xa5   :  { %613 = vrot.lane.b32.xlu0 %v496_v47, %s4443_s23  ;;  %v3106_v4 = vmax.f32 %v3061_v10, 0.0 }
  0xa6   :  { %v3194_v6 = vadd.f32 %v3193_v30, %v3149_v13  ;;  %v237_v9 = vpop.permute.xlu1 %236  ;;  %v235_v1 = vpop.permute.xlu0 %234  ;;  %v3150_v32 = vsel %vm94_vm3, %v3105_v63, 0.0  ;;  %v3062_v2 = vadd.f32 %v4746_v51, %v4921_v50  ;;  %v3063_v12 = vadd.f32 %v4746_v51, %v4924_v11  ;;  %v501_v30 = vld [vmem:[#allocation3 + $0x268] sm:$0xff] }
  0xa7   :  { %v4934_v15 = vsub.f32 %v4537_v16, %v237_v9  ;;  %v3151_v49 = vsel %vm95_vm4, %v3106_v4, 0.0  ;;  %v307_v46 = vsel %vm292_vm0, %v233_v5, %v235_v1  ;;  %v308_v8 = vsel %vm292_vm0, %v235_v1, %v237_v9 }
  0xa8   :  { %v3195_v56 = vadd.f32 %v3194_v6, %v3150_v32  ;;  %619 = vrot.lane.b32.xlu1 %v499_v43, %s4443_s23  ;;  %v3107_v47 = vmax.f32 %v3062_v2, 0.0  ;;  %v3108_v59 = vmax.f32 %v3063_v12, 0.0  ;;  %v500_v6 = vld [vmem:[#allocation3 + $0x260] sm:$0xff]  ;;  %v4947_v4 = vsub.f32 %v4529_v14, %v307_v46  ;;  %v502_v46 = vld [vmem:[#allocation3 + $0x270] sm:$0xff] }
  0xa9   :  { %617 = vrot.lane.b32.xlu0 %v498_v0, %s4443_s23  ;;  %v3066_v13 = vadd.f32 %v4746_v51, %v4934_v15  ;;  %v4950_v5 = vsub.f32 %v4539_v17, %v308_v8  ;;  %v503_v17 = vld [vmem:[#allocation3 + $0x278] sm:$0xff] }
  0xaa   :  { %v3196_v10 = vadd.f32 %v3195_v56, %v3151_v49  ;;  %v241_v16 = vpop.permute.xlu1 %240  ;;  %v239_v63 = vpop.permute.xlu0 %238  ;;  %v3152_v43 = vsel %vm96_vm5, %v3107_v47, 0.0  ;;  %v3153_v32 = vsel %vm97_vm6, %v3108_v59, 0.0  ;;  %v3064_v2 = vadd.f32 %v4746_v51, %v4947_v4 }
  0xab   :  { %v309_v9 = vsel %vm292_vm0, %v239_v63, %v241_v16  ;;  %v3065_v14 = vadd.f32 %v4746_v51, %v4950_v5  ;;  %v3111_v12 = vmax.f32 %v3066_v13, 0.0 }
  0xac   :  { %v3197_v1 = vadd.f32 %v3196_v10, %v3152_v43  ;;  %v4954_v0 = vsub.f32 %v4547_v19, %v309_v9  ;;  %623 = vrot.lane.b32.xlu1 %v501_v30, %s4443_s23  ;;  %v3109_v8 = vmax.f32 %v3064_v2, 0.0  ;;  %v505_v43 = vld [vmem:[#allocation3 + $0x288] sm:$0x1] }
  0xad   :  { %621 = vrot.lane.b32.xlu0 %v500_v6, %s4443_s23  ;;  %v3110_v30 = vmax.f32 %v3065_v14, 0.0  ;;  %v3156_v9 = vsel %vm100_vm9, %v3111_v12, 0.0  ;;  %v504_v14 = vld [vmem:[#allocation3 + $0x280] sm:$0xff] }
  0xae   :  { %v3198_v56 = vadd.f32 %v3197_v1, %v3153_v32  ;;  %v3067_v19 = vadd.f32 %v4746_v51, %v4954_v0  ;;  %v245_v49 = vpop.permute.xlu1 %244  ;;  %v243_v47 = vpop.permute.xlu0 %242  ;;  %v3154_v13 = vsel %vm98_vm7, %v3109_v8, 0.0 }
  0xaf   :  { %v310_v10 = vsel %vm292_vm0, %v241_v16, %v243_v47  ;;  %v311_v59 = vsel %vm292_vm0, %v243_v47, %v245_v49 }
  0xb0   :  { %v4969_v63 = vsub.f32 %v4545_v18, %v310_v10  ;;  %627 = vrot.lane.b32.xlu1 %v503_v17, %s4443_s23  ;;  %v4975_v6 = vsub.f32 %v4555_v21, %v311_v59  ;;  %v3199_v16 = vadd.f32 %v3198_v56, %v3154_v13  ;;  %v3112_v1 = vmax.f32 %v3067_v19, 0.0 }
  0xb1   :  { %625 = vrot.lane.b32.xlu0 %v502_v46, %s4443_s23  ;;  %v3155_v17 = vsel %vm99_vm8, %v3110_v30, 0.0  ;;  %v3201_v10 = vsel %vm1340_vm10, %v3156_v9, 0.0  ;;  %v507_v30 = vld [vmem:[#allocation3 + $0x298] sm:$0x1] }
  0xb2   :  { %v3068_v18 = vadd.f32 %v4746_v51, %v4969_v63  ;;  %v249_v32 = vpop.permute.xlu1 %248  ;;  %v247_v2 = vpop.permute.xlu0 %246  ;;  %v3069_v21 = vadd.f32 %v4746_v51, %v4975_v6  ;;  %v3200_v8 = vadd.f32 %v3199_v16, %v3155_v17 }
  0xb3   :  { %v312_v47 = vsel %vm292_vm0, %v245_v49, %v247_v2  ;;  %v313_v46 = vsel %vm292_vm0, %v247_v2, %v249_v32  ;;  %v3157_v49 = vsel %vm92_vm1, %v3112_v1, 0.0  ;;  %v506_v2 = vld [vmem:[#allocation3 + $0x290] sm:$0x1] }
  0xb4   :  { %v3113_v12 = vmax.f32 %v3068_v18, 0.0  ;;  %v4989_v56 = vsub.f32 %v4553_v20, %v312_v47  ;;  %v4992_v19 = vsub.f32 %v4563_v23, %v313_v46  ;;  %631 = vrot.lane.b32.xlu1 %v505_v43, %s4443_s23  ;;  %v3202_v59 = vadd.f32 %v3201_v10, %v3200_v8  ;;  %v509_v46 = vld [vmem:[#allocation3 + $0x2a8] sm:$0x1] }
  0xb5   :  { %629 = vrot.lane.b32.xlu0 %v504_v14, %s4443_s23  ;;  %v3114_v13 = vmax.f32 %v3069_v21, 0.0 }
  0xb6   :  { %9606 = vst [vmem:[#allocation40_spill] sm:$0xff] %v4992_v19  ;;  %v253_v16 = vpop.permute.xlu1 %252  ;;  %v251_v18 = vpop.permute.xlu0 %250  ;;  %v3158_v20 = vsel %vm93_vm2, %v3113_v12, 0.0  ;;  %v3070_v23 = vadd.f32 %v4746_v51, %v4989_v56  ;;  %v3071_v43 = vadd.f32 %v4746_v51, %v4992_v19  ;;  %v3203_v14 = vadd.f32 %v3202_v59, %v3157_v49  ;;  %v508_v59 = vld [vmem:[#allocation3 + $0x2a0] sm:$0x1] }
  0xb7   :  { %v314_v9 = vsel %vm292_vm0, %v249_v32, %v251_v18  ;;  %v315_v17 = vsel %vm292_vm0, %v251_v18, %v253_v16 }
  0xb8   :  { %v5008_v1 = vsub.f32 %v4561_v22, %v314_v9  ;;  %635 = vrot.lane.b32.xlu1 %v507_v30, %s4443_s23  ;;  %v3115_v21 = vmax.f32 %v3070_v23, 0.0  ;;  %v5012_v47 = vsub.f32 %v4571_v25, %v315_v17  ;;  %v3204_v8 = vadd.f32 %v3203_v14, %v3158_v20  ;;  %v511_v23 = vld [vmem:[#allocation3 + $0x2b8] sm:$0x1] }
  0xb9   :  { %633 = vrot.lane.b32.xlu0 %v506_v2, %s4443_s23  ;;  %v3159_v22 = vsel %vm94_vm3, %v3114_v13, 0.0  ;;  %v3116_v49 = vmax.f32 %v3071_v43, 0.0 }
  0xba   :  { %9607 = vst [vmem:[#allocation41_spill] sm:$0xff] %v5008_v1  ;;  %9608 = vst [vmem:[#allocation42_spill] sm:$0xff] %v5012_v47  ;;  %v3072_v12 = vadd.f32 %v4746_v51, %v5008_v1  ;;  %v257_v32 = vpop.permute.xlu1 %256  ;;  %v255_v10 = vpop.permute.xlu0 %254  ;;  %v3160_v30 = vsel %vm95_vm4, %v3115_v21, 0.0  ;;  %v3073_v25 = vadd.f32 %v4746_v51, %v5012_v47  ;;  %v3205_v18 = vadd.f32 %v3204_v8, %v3159_v22  ;;  %v510_v21 = vld [vmem:[#allocation3 + $0x2b0] sm:$0x1] }
  0xbb   :  { %v316_v20 = vsel %vm292_vm0, %v253_v16, %v255_v10  ;;  %v5030_v13 = vsub.f32 %v4579_v27, %v255_v10  ;;  %v3161_v8 = vsel %vm96_vm5, %v3116_v49, 0.0  ;;  %v513_v27 = vld [vmem:[#allocation3 + $0x2c8] sm:$0x1]  ;;  %v5423_v47 = vld [vmem:[#allocation3 + $0x170] sm:$0xff] }
  0xbc   :  { %v3117_v2 = vmax.f32 %v3072_v12, 0.0  ;;  %639 = vrot.lane.b32.xlu1 %v509_v46, %s4443_s23  ;;  %v3206_v9 = vadd.f32 %v3205_v18, %v3160_v30  ;;  %v5027_v14 = vsub.f32 %v4569_v24, %v316_v20  ;;  %v3118_v12 = vmax.f32 %v3073_v25, 0.0  ;;  %v512_v18 = vld [vmem:[#allocation3 + $0x2c0] sm:$0x1]  ;;  %9709 = vst [vmem:[#allocation119_spill] sm:$0xff] %v5423_v47 }
  0xbd   :  { %637 = vrot.lane.b32.xlu0 %v508_v59, %s4443_s23  ;;  %9610 = vst [vmem:[#allocation44_spill] sm:$0xff] %v5030_v13  ;;  %v3075_v24 = vadd.f32 %v4746_v51, %v5030_v13  ;;  %v5415_v13 = vld [vmem:[#allocation3 + $0x38] sm:$0xff] }
  0xbe   :  { %9609 = vst [vmem:[#allocation43_spill] sm:$0xff] %v5027_v14  ;;  %v261_v43 = vpop.permute.xlu1 %260  ;;  %v259_v17 = vpop.permute.xlu0 %258  ;;  %v3162_v16 = vsel %vm97_vm6, %v3117_v2, 0.0  ;;  %v3207_v46 = vadd.f32 %v3206_v9, %v3161_v8  ;;  %v3074_v59 = vadd.f32 %v4746_v51, %v5027_v14  ;;  %v3163_v2 = vsel %vm98_vm7, %v3118_v12, 0.0  ;;  %9706 = vst [vmem:[#allocation116_spill] sm:$0xff] %v5415_v13 }
  0xbf   :  { %v317_v49 = vsel %vm292_vm0, %v257_v32, %v259_v17  ;;  %v3120_v20 = vmax.f32 %v3075_v24, 0.0  ;;  %v318_v9 = vsel %vm292_vm0, %v259_v17, %v261_v43  ;;  %v871_v17 = vld [vmem:[#allocation3 + $0x2d8] sm:$0xff]  ;;  %v5419_v14 = vmul.f32 0.03125, %v4839_v54 }
  0xc0   :  { %643 = vrot.lane.b32.xlu1 %v511_v23, %s4443_s23  ;;  %v3208_v10 = vadd.f32 %v3207_v46, %v3162_v16  ;;  %v3119_v22 = vmax.f32 %v3074_v59, 0.0  ;;  %v5047_v23 = vsub.f32 %v4577_v26, %v317_v49  ;;  %v5052_v16 = vsub.f32 %v4587_v29, %v318_v9  ;;  %v9613_v9 = vld [vmem:[#allocation9_spill] sm:$0xff] }
  0xc1   :  { %641 = vrot.lane.b32.xlu0 %v510_v21, %s4443_s23  ;;  %v3165_v32 = vsel %vm100_vm9, %v3120_v20, 0.0  ;;  %9707 = vst [vmem:[#allocation117_spill] sm:$0xff] %v5419_v14 }
  0xc2   :  { %v265_v30 = vpop.permute.xlu1 %264  ;;  %v263_v25 = vpop.permute.xlu0 %262  ;;  %9611 = vst [vmem:[#allocation45_spill] sm:$0xff] %v5047_v23  ;;  %v3209_v8 = vadd.f32 %v3208_v10, %v3163_v2  ;;  %v3164_v21 = vsel %vm99_vm8, %v3119_v22, 0.0  ;;  %9612 = vst [vmem:[#allocation46_spill] sm:$0xff] %v5052_v16  ;;  %v3076_v12 = vadd.f32 %v4746_v51, %v5047_v23  ;;  %v3077_v46 = vadd.f32 %v4746_v51, %v5052_v16  ;;  %v5062_v10 = vld [vmem:[#allocation3 + $0x2d0] sm:$0xff] }
  0xc3   :  { %v3211_v29 = vsel %vm1340_vm10, %v3165_v32, 0.0  ;;  %v319_v22 = vsel %vm292_vm0, %v261_v43, %v263_v25  ;;  %v320_v49 = vsel %vm292_vm0, %v263_v25, %v265_v30  ;;  %v5080_v43 = vld [vmem:[#allocation3 + $0x2e8] sm:$0xff] }
  0xc4   :  { %647 = vrot.lane.b32.xlu1 %v513_v27, %s4443_s23  ;;  %v3210_v26 = vadd.f32 %v3209_v8, %v3164_v21  ;;  %v3121_v27 = vmax.f32 %v3076_v12, 0.0  ;;  %v3122_v20 = vmax.f32 %v3077_v46, 0.0  ;;  %v9615_v8 = vld [vmem:[#allocation11_spill] sm:$0xff]  ;;  %9617 = vst [vmem:[#allocation47_spill] sm:$0xff] %v5080_v43 }
  0xc5   :  { %645 = vrot.lane.b32.xlu0 %v512_v18, %s4443_s23  ;;  %v5068_v18 = vsub.f32 %v9613_v9, %v319_v22  ;;  %v5071_v21 = vsub.f32 %v9615_v8, %v320_v49  ;;  %v5084_v22 = vld [vmem:[#allocation3 + $0x2e0] sm:$0xff]  ;;  %v9621_v49 = vld [vmem:[#allocation13_spill] sm:$0xff] }
  0xc6   :  { %v269_v59 = vpop.permute.xlu1 %268  ;;  %v267_v24 = vpop.permute.xlu0 %266  ;;  %v3212_v2 = vadd.f32 %v3211_v29, %v3210_v26  ;;  %v3166_v48 = vsel %vm92_vm1, %v3121_v27, 0.0  ;;  %v3167_v25 = vsel %vm93_vm2, %v3122_v20, 0.0  ;;  %9618 = vst [vmem:[#allocation48_spill] sm:$0xff] %v5084_v22  ;;  %v5100_v20 = vld [vmem:[#allocation3 + $0x2f8] sm:$0xff] }
  0xc7   :  { %9614 = vst [vmem:[#allocation9_spill] sm:$0xff] %v5068_v18  ;;  %9616 = vst [vmem:[#allocation11_spill] sm:$0xff] %v5071_v21  ;;  %v321_v32 = vsel %vm292_vm0, %v265_v30, %v267_v24  ;;  %v322_v12 = vsel %vm292_vm0, %v267_v24, %v269_v59  ;;  %v3079_v30 = vadd.f32 %v4746_v51, %v5071_v21  ;;  %v9619_v24 = vld [vmem:[#allocation10_spill] sm:$0xff]  ;;  %v9627_v21 = vld [vmem:[#allocation12_spill] sm:$0xff] }
  0xc8   :  { %962 = vrot.lane.b32.xlu1 %v871_v17, %s4443_s23  ;;  %v3213_v26 = vadd.f32 %v3212_v2, %v3166_v48  ;;  %v3078_v17 = vadd.f32 %v4746_v51, %v5068_v18  ;;  %v5091_v27 = vsub.f32 %v9619_v24, %v321_v32  ;;  %v5094_v9 = vsub.f32 %v9621_v49, %v322_v12  ;;  %v9624_v24 = vld [vmem:[#allocation14_spill] sm:$0xff]  ;;  %v5109_v49 = vld [vmem:[#allocation3 + $0x2f0] sm:$0xff] }
  0xc9   :  { %960 = vrot.lane.b32.xlu0 %v5062_v10, %s4443_s23  ;;  %v3124_v2 = vmax.f32 %v3079_v30, 0.0  ;;  %9623 = vst [vmem:[#allocation49_spill] sm:$0xff] %v5100_v20  ;;  %9626 = vst [vmem:[#allocation50_spill] sm:$0xff] %v5109_v49 }
  0xca   :  { %v273_v46 = vpop.permute.xlu1 %272  ;;  %v271_v29 = vpop.permute.xlu0 %270  ;;  %9620 = vst [vmem:[#allocation10_spill] sm:$0xff] %v5091_v27  ;;  %9622 = vst [vmem:[#allocation13_spill] sm:$0xff] %v5094_v9  ;;  %v3214_v8 = vadd.f32 %v3213_v26, %v3167_v25  ;;  %v3123_v48 = vmax.f32 %v3078_v17, 0.0  ;;  %v3080_v58 = vadd.f32 %v4746_v51, %v5091_v27  ;;  %v3081_v32 = vadd.f32 %v4746_v51, %v5094_v9 }
  0xcb   :  { %v5107_v12 = vsub.f32 %v9624_v24, %v273_v46  ;;  %v323_v30 = vsel %vm292_vm0, %v269_v59, %v271_v29  ;;  %v324_v38 = vsel %vm292_vm0, %v271_v29, %v273_v46  ;;  %v3169_v36 = vsel %vm95_vm4, %v3124_v2, 0.0  ;;  %v5129_v59 = vld [vmem:[#allocation3 + $0x308] sm:$0xff]  ;;  %v5133_v2 = vld [vmem:[#allocation3 + $0x300] sm:$0xff] }
  0xcc   :  { %966 = vrot.lane.b32.xlu1 %v5080_v43, %s4443_s23  ;;  %v3168_v17 = vsel %vm94_vm3, %v3123_v48, 0.0  ;;  %v3125_v27 = vmax.f32 %v3080_v58, 0.0  ;;  %v3126_v24 = vmax.f32 %v3081_v32, 0.0  ;;  %v5122_v18 = vsub.f32 %v9627_v21, %v323_v30  ;;  %v9629_v48 = vld [vmem:[#allocation15_spill] sm:$0xff]  ;;  %9631 = vst [vmem:[#allocation51_spill] sm:$0xff] %v5129_v59  ;;  %9632 = vst [vmem:[#allocation52_spill] sm:$0xff] %v5133_v2 }
  0xcd   :  { %964 = vrot.lane.b32.xlu0 %v5084_v22, %s4443_s23  ;;  %9625 = vst [vmem:[#allocation14_spill] sm:$0xff] %v5107_v12  ;;  %v3215_v43 = vadd.f32 %v3214_v8, %v3168_v17  ;;  %v3084_v9 = vadd.f32 %v4746_v51, %v5107_v12  ;;  %v5125_v22 = vsub.f32 %v9629_v48, %v324_v38  ;;  %v5404_v12 = vmul.f32 0.03125, %v4795_v45 }
  0xce   :  { %v277_v25 = vpop.permute.xlu1 %276  ;;  %v275_v26 = vpop.permute.xlu0 %274  ;;  %9628 = vst [vmem:[#allocation12_spill] sm:$0xff] %v5122_v18  ;;  %v3170_v58 = vsel %vm96_vm5, %v3125_v27, 0.0  ;;  %v3082_v21 = vadd.f32 %v4746_v51, %v5122_v18  ;;  %v879_v27 = vld [vmem:[#allocation3 + $0x318] sm:$0xff] }
  0xcf   :  { %9630 = vst [vmem:[#allocation15_spill] sm:$0xff] %v5125_v22  ;;  %v3216_v46 = vadd.f32 %v3215_v43, %v3169_v36  ;;  %v3083_v38 = vadd.f32 %v4746_v51, %v5125_v22  ;;  %v3171_v36 = vsel %vm97_vm6, %v3126_v24, 0.0  ;;  %v3129_v43 = vmax.f32 %v3084_v9, 0.0  ;;  %v5397_v22 = vld [vmem:[#allocation3 + $0x28] sm:$0xff]  ;;  %9702 = vst [vmem:[#allocation112_spill] sm:$0xff] %v5404_v12 }
  0xd0   :  { %970 = vrot.lane.b32.xlu1 %v5100_v20, %s4443_s23  ;;  %v3127_v30 = vmax.f32 %v3082_v21, 0.0  ;;  %9701 = vst [vmem:[#allocation111_spill] sm:$0xff] %v5397_v22 }
  0xd1   :  { %968 = vrot.lane.b32.xlu0 %v5109_v49, %s4443_s23  ;;  %v3217_v32 = vadd.f32 %v3216_v46, %v3170_v58  ;;  %v5147_v58 = vld [vmem:[#allocation3 + $0x310] sm:$0xff]  ;;  %v3128_v49 = vmax.f32 %v3083_v38, 0.0  ;;  %v3174_v9 = vsel %vm100_vm9, %v3129_v43, 0.0 }
  0xd2   :  { %v281_v29 = vpop.permute.xlu1 %280  ;;  %v279_v8 = vpop.permute.xlu0 %278  ;;  %9633 = vst [vmem:[#allocation53_spill] sm:$0xff] %v5147_v58  ;;  %v3172_v20 = vsel %vm98_vm7, %v3127_v30, 0.0 }
  0xd3   :  { %v3218_v17 = vadd.f32 %v3217_v32, %v3171_v36  ;;  %v881_v32 = vld [vmem:[#allocation3 + $0x328] sm:$0xff]  ;;  %v3173_v21 = vsel %vm99_vm8, %v3128_v49, 0.0  ;;  %v9634_v36 = vld [vmem:[#allocation17_spill] sm:$0xff]  ;;  %v326_v43 = vsel %vm292_vm0, %v277_v25, %v279_v8 }
  0xd4   :  { %974 = vrot.lane.b32.xlu1 %v5129_v59, %s4443_s23  ;;  %v325_v59 = vsel %vm292_vm0, %v275_v26, %v277_v25  ;;  %v5166_v26 = vld [vmem:[#allocation3 + $0x320] sm:$0xff]  ;;  %v9639_v25 = vld [vmem:[#allocation19_spill] sm:$0xff] }
  0xd5   :  { %972 = vrot.lane.b32.xlu0 %v5133_v2, %s4443_s23  ;;  %v3219_v24 = vadd.f32 %v3218_v17, %v3172_v20  ;;  %v5160_v38 = vsub.f32 %v9634_v36, %v325_v59  ;;  %9636 = vst [vmem:[#allocation54_spill] sm:$0xff] %v5166_v26  ;;  %v3221_v20 = vsel %vm1340_vm10, %v3174_v9, 0.0  ;;  %v327_v59 = vsel %vm292_vm0, %v279_v8, %v281_v29  ;;  %v9637_v36 = vld [vmem:[#allocation16_spill] sm:$0xff] }
  0xd6   :  { %v5145_v48 = vpop.permute.xlu1 %284  ;;  %v283_v46 = vpop.permute.xlu0 %282  ;;  %v5175_v62 = vsub.f32 %v9637_v36, %v326_v43 }
  0xd7   :  { %9635 = vst [vmem:[#allocation17_spill] sm:$0xff] %v5160_v38  ;;  %v3085_v17 = vadd.f32 %v4746_v51, %v5160_v38 }
  0xd8   :  { %978 = vrot.lane.b32.xlu1 %v879_v27, %s4443_s23  ;;  %v3220_v27 = vadd.f32 %v3219_v24, %v3173_v21  ;;  %9638 = vst [vmem:[#allocation16_spill] sm:$0xff] %v5175_v62  ;;  %v5180_v21 = vsub.f32 %v9639_v25, %v327_v59  ;;  %v3086_v8 = vadd.f32 %v4746_v51, %v5175_v62  ;;  %v885_v59 = vld [vmem:[#allocation3 + $0x348] sm:$0xff]  ;;  %v884_v62 = vld [vmem:[#allocation3 + $0x340] sm:$0xff] }
  0xd9   :  { %976 = vrot.lane.b32.xlu0 %v5147_v58, %s4443_s23  ;;  %v883_v58 = vld [vmem:[#allocation3 + $0x338] sm:$0xff]  ;;  %v3130_v24 = vmax.f32 %v3085_v17, 0.0 }
  0xda   :  { %v5162_v2 = vpop.permute.xlu1 %288  ;;  %v5164_v30 = vpop.permute.xlu0 %286  ;;  %v3222_v49 = vadd.f32 %v3221_v20, %v3220_v27  ;;  %9640 = vst [vmem:[#allocation19_spill] sm:$0xff] %v5180_v21  ;;  %v3087_v43 = vadd.f32 %v4746_v51, %v5180_v21  ;;  %v3131_v17 = vmax.f32 %v3086_v8, 0.0  ;;  %v328_v21 = vsel %vm292_vm0, %v281_v29, %v283_v46  ;;  %v9648_v29 = vld [vmem:[#allocation20_spill] sm:$0xff] }
  0xdb   :  { %v3175_v27 = vsel %vm92_vm1, %v3130_v24, 0.0 }
  0xdc   :  { %982 = vrot.lane.b32.xlu1 %v881_v32, %s4443_s23  ;;  %v5186_v32 = vld [vmem:[#allocation3 + $0x330] sm:$0xff]  ;;  %v3223_v20 = vsel %vm1373_vm11, %v3175_v27, 0.0  ;;  %v3132_v25 = vmax.f32 %v3087_v43, 0.0  ;;  %v3176_v24 = vsel %vm93_vm2, %v3131_v17, 0.0  ;;  %v9646_v43 = vld [vmem:[#allocation18_spill] sm:$0xff] }
  0xdd   :  { %980 = vrot.lane.b32.xlu0 %v5166_v26, %s4443_s23  ;;  %9643 = vst [vmem:[#allocation57_spill] sm:$0xff] %v5186_v32  ;;  %v3224_v36 = vadd.f32 %v3223_v20, %v3222_v49  ;;  %v3225_v27 = vsel %vm1373_vm11, %v3176_v24, 0.0  ;;  %v5212_v20 = vsub.f32 %v9646_v43, %v328_v21  ;;  %v888_v43 = vld [vmem:[#allocation3 + $0x360] sm:$0xff] }
  0xde   :  { %v5182_v9 = vpop.permute.xlu1 %559  ;;  %v5184_v38 = vpop.permute.xlu0 %290  ;;  %v3177_v8 = vsel %vm94_vm3, %v3132_v25, 0.0  ;;  %v886_v25 = vld [vmem:[#allocation3 + $0x350] sm:$0xff] }
  0xdf   :  { %9641 = vst [vmem:[#allocation55_spill] sm:$0xff] %v5182_v9  ;;  %9642 = vst [vmem:[#allocation56_spill] sm:$0xff] %v5184_v38  ;;  %v3226_v49 = vadd.f32 %v3225_v27, %v3224_v36  ;;  %v3227_v17 = vsel %vm1373_vm11, %v3177_v8, 0.0  ;;  %v889_v36 = vld [vmem:[#allocation3 + $0x368] sm:$0xff]  ;;  %v5400_v38 = vld [vmem:[#allocation3 + $0x20] sm:$0xff] }
  0xe0   :  { %986 = vrot.lane.b32.xlu1 %v883_v58, %s4443_s23  ;;  %v329_v58 = vsel %vm292_vm0, %v283_v46, %v5145_v48  ;;  %9647 = vst [vmem:[#allocation18_spill] sm:$0xff] %v5212_v20 }
  0xe1   :  { %984 = vrot.lane.b32.xlu0 %v5186_v32, %s4443_s23  ;;  %v887_v32 = vld [vmem:[#allocation3 + $0x358] sm:$0xff]  ;;  %v3228_v24 = vadd.f32 %v3227_v17, %v3226_v49 }
  0xe2   :  { %v5198_v26 = vpop.permute.xlu1 %563  ;;  %v5200_v9 = vpop.permute.xlu0 %561 }
  0xe3   :  { %9644 = vst [vmem:[#allocation58_spill] sm:$0xff] %v5198_v26  ;;  %9645 = vst [vmem:[#allocation59_spill] sm:$0xff] %v5200_v9  ;;  %v5217_v26 = vsub.f32 %v9648_v29, %v329_v58 }
  0xe4   :  { %990 = vrot.lane.b32.xlu1 %v885_v59, %s4443_s23  ;;  %v3088_v59 = vadd.f32 %v4746_v51, %v5212_v20 }
  0xe5   :  { %988 = vrot.lane.b32.xlu0 %v884_v62, %s4443_s23  ;;  %9649 = vst [vmem:[#allocation20_spill] sm:$0xff] %v5217_v26  ;;  %v3089_v21 = vadd.f32 %v4746_v51, %v5217_v26  ;;  %v5394_v26 = vld [vmem:[#allocation3 + $0x50] sm:$0xff] }
  0xe6   :  { %v5219_v46 = vpop.permute.xlu1 %567  ;;  %v5221_v9 = vpop.permute.xlu0 %565  ;;  %v3133_v62 = vmax.f32 %v3088_v59, 0.0  ;;  %9700 = vst [vmem:[#allocation110_spill] sm:$0xff] %v5394_v26 }
  0xe7   :  { %9650 = vst [vmem:[#allocation60_spill] sm:$0xff] %v5219_v46  ;;  %9651 = vst [vmem:[#allocation61_spill] sm:$0xff] %v5221_v9  ;;  %v3134_v58 = vmax.f32 %v3089_v21, 0.0  ;;  %v5389_v9 = vmul.f32 0.03125, %v4791_v39  ;;  %v5406_v39 = vld [vmem:[#allocation3 + $0x68] sm:$0xff] }
  0xe8   :  { %994 = vrot.lane.b32.xlu1 %v887_v32, %s4443_s23  ;;  %v3178_v49 = vsel %vm95_vm4, %v3133_v62, 0.0  ;;  %v893_v62 = vld [vmem:[#allocation3 + $0x388] sm:$0xff]  ;;  %9703 = vst [vmem:[#allocation113_spill] sm:$0xff] %v5406_v39 }
  0xe9   :  { %992 = vrot.lane.b32.xlu0 %v886_v25, %s4443_s23  ;;  %v3179_v17 = vsel %vm96_vm5, %v3134_v58, 0.0  ;;  %v3229_v29 = vsel %vm1373_vm11, %v3178_v49, 0.0  ;;  %v891_v25 = vld [vmem:[#allocation3 + $0x378] sm:$0xff]  ;;  %9698 = vst [vmem:[#allocation108_spill] sm:$0xff] %v5389_v9 }
  0xea   :  { %v5229_v8 = vpop.permute.xlu1 %571  ;;  %v5231_v27 = vpop.permute.xlu0 %569  ;;  %v3230_v32 = vadd.f32 %v3229_v29, %v3228_v24  ;;  %v3231_v59 = vsel %vm1373_vm11, %v3179_v17, 0.0  ;;  %v894_v29 = vld [vmem:[#allocation3 + $0x390] sm:$0xff] }
  0xeb   :  { %9652 = vst [vmem:[#allocation62_spill] sm:$0xff] %v5229_v8  ;;  %9653 = vst [vmem:[#allocation63_spill] sm:$0xff] %v5231_v27  ;;  %v890_v27 = vld [vmem:[#allocation3 + $0x370] sm:$0xff] }
  0xec   :  { %998 = vrot.lane.b32.xlu1 %v889_v36, %s4443_s23  ;;  %v5245_v46 = vadd.f32 %v3231_v59, %v3230_v32  ;;  %v892_v36 = vld [vmem:[#allocation3 + $0x380] sm:$0xff] }
  0xed   :  { %996 = vrot.lane.b32.xlu0 %v888_v43, %s4443_s23  ;;  %v895_v43 = vld [vmem:[#allocation3 + $0x398] sm:$0xff]  ;;  %v896_v59 = vld [vmem:[#allocation3 + $0x3a0] sm:$0xff] }
  0xee   :  { %v5241_v21 = vpop.permute.xlu1 %575  ;;  %v5243_v8 = vpop.permute.xlu0 %573  ;;  %9656 = vst [vmem:[#allocation66_spill] sm:$0xff] %v5245_v46 }
  0xef   :  { %9654 = vst [vmem:[#allocation64_spill] sm:$0xff] %v5241_v21  ;;  %9655 = vst [vmem:[#allocation65_spill] sm:$0xff] %v5243_v8  ;;  %v5383_v8 = vld [vmem:[#allocation3 + $0x48] sm:$0xff] }
  0xf0   :  { %1002 = vrot.lane.b32.xlu1 %v891_v25, %s4443_s23  ;;  %9697 = vst [vmem:[#allocation107_spill] sm:$0xff] %v5383_v8  ;;  %v9712_v18 = vrot.slane %v5383_v8, 1 }
  0xf1   :  { %1000 = vrot.lane.b32.xlu0 %v890_v27, %s4443_s23  ;;  %v897_v27 = vld [vmem:[#allocation3 + $0x3a8] sm:$0xff] }
  0xf2   :  { %v5249_v58 = vpop.permute.xlu1 %579  ;;  %v5251_v24 = vpop.permute.xlu0 %577 }
  0xf3   :  { %9657 = vst [vmem:[#allocation67_spill] sm:$0xff] %v5249_v58  ;;  %9658 = vst [vmem:[#allocation68_spill] sm:$0xff] %v5251_v24 }
  0xf4   :  { %1006 = vrot.lane.b32.xlu1 %v893_v62, %s4443_s23  ;;  %v899_v62 = vld [vmem:[#allocation3 + $0x3b8] sm:$0xff] }
  0xf5   :  { %1004 = vrot.lane.b32.xlu0 %v892_v36, %s4443_s23 }
  0xf6   :  { %v5255_v49 = vpop.permute.xlu1 %583  ;;  %v5257_v17 = vpop.permute.xlu0 %581 }
  0xf7   :  { %9659 = vst [vmem:[#allocation69_spill] sm:$0xff] %v5255_v49  ;;  %9660 = vst [vmem:[#allocation70_spill] sm:$0xff] %v5257_v17  ;;  %v898_v49 = vld [vmem:[#allocation3 + $0x3b0] sm:$0xff]  ;;  %v5366_v17 = vld [vmem:[#allocation3 + $0x18] sm:$0xff] }
  0xf8   :  { %1010 = vrot.lane.b32.xlu1 %v895_v43, %s4443_s23  ;;  %v901_v43 = vld [vmem:[#allocation3 + $0x3c8] sm:$0xff] }
  0xf9   :  { %1008 = vrot.lane.b32.xlu0 %v894_v29, %s4443_s23 }
  0xfa   :  { %v5261_v32 = vpop.permute.xlu1 %587  ;;  %v5263_v25 = vpop.permute.xlu0 %585 }
  0xfb   :  { %9661 = vst [vmem:[#allocation71_spill] sm:$0xff] %v5261_v32  ;;  %9662 = vst [vmem:[#allocation72_spill] sm:$0xff] %v5263_v25  ;;  %v900_v25 = vld [vmem:[#allocation3 + $0x3c0] sm:$0xff] }
  0xfc   :  { %1014 = vrot.lane.b32.xlu1 %v897_v27, %s4443_s23  ;;  %v903_v27 = vld [vmem:[#allocation3 + $0x3d8] sm:$0xff] }
  0xfd   :  { %1012 = vrot.lane.b32.xlu0 %v896_v59, %s4443_s23 }
  0xfe   :  { %v5267_v36 = vpop.permute.xlu1 %591 }
  0xff   :  { %9663 = vst [vmem:[#allocation73_spill] sm:$0xff] %v5267_v36  ;;  %v5269_v46 = vpop.permute.xlu0 %589 }
 0x100   :  { %9664 = vst [vmem:[#allocation74_spill] sm:$0xff] %v5269_v46  ;;  %1018 = vrot.lane.b32.xlu1 %v899_v62, %s4443_s23  ;;  %v902_v46 = vld [vmem:[#allocation3 + $0x3d0] sm:$0xff] }
 0x101   :  { %1016 = vrot.lane.b32.xlu0 %v898_v49, %s4443_s23  ;;  %v905_v49 = vld [vmem:[#allocation3 + $0x3e8] sm:$0xff] }
 0x102   :  { %v5273_v29 = vpop.permute.xlu1 %595 }
 0x103   :  { %9665 = vst [vmem:[#allocation75_spill] sm:$0xff] %v5273_v29  ;;  %v5275_v32 = vpop.permute.xlu0 %593 }
 0x104   :  { %9666 = vst [vmem:[#allocation76_spill] sm:$0xff] %v5275_v32  ;;  %1022 = vrot.lane.b32.xlu1 %v901_v43, %s4443_s23  ;;  %v904_v32 = vld [vmem:[#allocation3 + $0x3e0] sm:$0xff] }
 0x105   :  { %1020 = vrot.lane.b32.xlu0 %v900_v25, %s4443_s23  ;;  %v907_v25 = vld [vmem:[#allocation3 + $0x3f8] sm:$0x1] }
 0x106   :  { %v5279_v59 = vpop.permute.xlu1 %599 }
 0x107   :  { %9667 = vst [vmem:[#allocation77_spill] sm:$0xff] %v5279_v59  ;;  %v5281_v36 = vpop.permute.xlu0 %597 }
 0x108   :  { %9668 = vst [vmem:[#allocation78_spill] sm:$0xff] %v5281_v36  ;;  %1026 = vrot.lane.b32.xlu1 %v903_v27, %s4443_s23  ;;  %v906_v36 = vld [vmem:[#allocation3 + $0x3f0] sm:$0x1] }
 0x109   :  { %1024 = vrot.lane.b32.xlu0 %v902_v46, %s4443_s23  ;;  %v909_v46 = vld [vmem:[#allocation3 + $0x408] sm:$0x1] }
 0x10a   :  { %v5285_v62 = vpop.permute.xlu1 %603 }
 0x10b   :  { %9669 = vst [vmem:[#allocation79_spill] sm:$0xff] %v5285_v62  ;;  %v5287_v29 = vpop.permute.xlu0 %601 }
 0x10c   :  { %9670 = vst [vmem:[#allocation80_spill] sm:$0xff] %v5287_v29  ;;  %1030 = vrot.lane.b32.xlu1 %v905_v49, %s4443_s23  ;;  %v908_v29 = vld [vmem:[#allocation3 + $0x400] sm:$0x1] }
 0x10d   :  { %1028 = vrot.lane.b32.xlu0 %v904_v32, %s4443_s23  ;;  %v911_v32 = vld [vmem:[#allocation3 + $0x418] sm:$0x1] }
 0x10e   :  { %v5291_v43 = vpop.permute.xlu1 %607 }
 0x10f   :  { %9671 = vst [vmem:[#allocation81_spill] sm:$0xff] %v5291_v43  ;;  %v5293_v59 = vpop.permute.xlu0 %605  ;;  %v910_v43 = vld [vmem:[#allocation3 + $0x410] sm:$0x1] }
 0x110   :  { %9672 = vst [vmem:[#allocation82_spill] sm:$0xff] %v5293_v59  ;;  %1034 = vrot.lane.b32.xlu1 %v907_v25, %s4443_s23 }
 0x111   :  { %1032 = vrot.lane.b32.xlu0 %v906_v36, %s4443_s23  ;;  %v913_v36 = vld [vmem:[#allocation3 + $0x428] sm:$0x1] }
 0x112   :  { %v5297_v27 = vpop.permute.xlu1 %611 }
 0x113   :  { %9673 = vst [vmem:[#allocation83_spill] sm:$0xff] %v5297_v27  ;;  %v5299_v62 = vpop.permute.xlu0 %609  ;;  %v912_v27 = vld [vmem:[#allocation3 + $0x420] sm:$0x1] }
 0x114   :  { %9674 = vst [vmem:[#allocation84_spill] sm:$0xff] %v5299_v62  ;;  %1038 = vrot.lane.b32.xlu1 %v909_v46, %s4443_s23  ;;  %v914_v46 = vld [vmem:[#allocation3 + $0x430] sm:$0x1] }
 0x115   :  { %1036 = vrot.lane.b32.xlu0 %v908_v29, %s4443_s23 }
 0x116   :  { %v5303_v49 = vpop.permute.xlu1 %615 }
 0x117   :  { %9675 = vst [vmem:[#allocation85_spill] sm:$0xff] %v5303_v49  ;;  %v5305_v59 = vpop.permute.xlu0 %613 }
 0x118   :  { %9676 = vst [vmem:[#allocation86_spill] sm:$0xff] %v5305_v59  ;;  %1042 = vrot.lane.b32.xlu1 %v911_v32, %s4443_s23 }
 0x119   :  { %1040 = vrot.lane.b32.xlu0 %v910_v43, %s4443_s23 }
 0x11a   :  { %v5309_v25 = vpop.permute.xlu1 %619 }
 0x11b   :  { %9677 = vst [vmem:[#allocation87_spill] sm:$0xff] %v5309_v25  ;;  %v5311_v62 = vpop.permute.xlu0 %617 }
 0x11c   :  { %9678 = vst [vmem:[#allocation88_spill] sm:$0xff] %v5311_v62  ;;  %1046 = vrot.lane.b32.xlu1 %v913_v36, %s4443_s23  ;;  %v5328_v62 = vld [vmem:[#allocation3] sm:$0xff] }
 0x11d   :  { %1044 = vrot.lane.b32.xlu0 %v912_v27, %s4443_s23 }
 0x11e   :  { %v5315_v29 = vpop.permute.xlu1 %623 }
 0x11f   :  { %9679 = vst [vmem:[#allocation89_spill] sm:$0xff] %v5315_v29  ;;  %v5317_v49 = vpop.permute.xlu0 %621  ;;  %v5336_v29 = vld [vmem:[#allocation3 + $0x8] sm:$0xff] }
 0x120   :  { %9680 = vst [vmem:[#allocation90_spill] sm:$0xff] %v5317_v49  ;;  %v2360_v21 = vrot.slane %v5336_v29, 1 }
 0x121   :  { %1048 = vrot.lane.b32.xlu0 %v914_v46, %s4443_s23 }
 0x122   :  { %v5320_v32 = vpop.permute.xlu1 %627 }
 0x123   :  { %9681 = vst [vmem:[#allocation91_spill] sm:$0xff] %v5320_v32  ;;  %v5322_v43 = vpop.permute.xlu0 %625  ;;  %v5347_v32 = vld [vmem:[#allocation3 + $0x10] sm:$0xff] }
 0x124   :  { %9682 = vst [vmem:[#allocation92_spill] sm:$0xff] %v5322_v43  ;;  %v5358_v43 = vmul.f32 0.03125, %v4760_v31  ;;  %v5374_v31 = vld [vmem:[#allocation3 + $0x168] sm:$0xff] }
 0x125   :  { %1402 = vrot.lane.b32.xlu0 %v5328_v62, %s4444_s0  ;;  %9696 = vst [vmem:[#allocation106_spill] sm:$0xff] %v5374_v31 }
 0x126   :  { %v5324_v59 = vpop.permute.xlu1 %631  ;;  %9692 = vst [vmem:[#allocation102_spill] sm:$0xff] %v5358_v43 }
 0x127   :  { %9683 = vst [vmem:[#allocation93_spill] sm:$0xff] %v5324_v59  ;;  %v5326_v25 = vpop.permute.xlu0 %629  ;;  %v5343_v59 = vmul.f32 0.03125, %v4750_v41 }
 0x128   :  { %9684 = vst [vmem:[#allocation94_spill] sm:$0xff] %v5326_v25 }
 0x129   :  { %1404 = vrot.lane.b32.xlu0 %v5336_v29, %s4444_s0  ;;  %9688 = vst [vmem:[#allocation98_spill] sm:$0xff] %v5343_v59  ;;  %v3538_v49 = vsub.f32 %v5328_v62, %v5343_v59 }
 0x12a   :  { %v5332_v27 = vpop.permute.xlu1 %635 }
 0x12b   :  { %9685 = vst [vmem:[#allocation95_spill] sm:$0xff] %v5332_v27  ;;  %v5334_v36 = vpop.permute.xlu0 %633  ;;  %v5352_v27 = vmul.f32 0.03125, %v4778_v52  ;;  %v2369_v52 = vrot.slane %v5400_v38, 1  ;;  %v5411_v23 = vmul.f32 %v3538_v49, %v3538_v49 }
 0x12c   :  { %9686 = vst [vmem:[#allocation96_spill] sm:$0xff] %v5334_v36  ;;  %v5355_v36 = vmul.f32 0.03125, %v4782_v33  ;;  %v5370_v33 = vmul.f32 0.03125, %v4786_v28  ;;  %v5391_v28 = vld [vmem:[#allocation3 + $0x58] sm:$0xff] }
 0x12d   :  { %1406 = vrot.lane.b32.xlu0 %v5347_v32, %s4444_s0  ;;  %9690 = vst [vmem:[#allocation100_spill] sm:$0xff] %v5352_v27  ;;  %9699 = vst [vmem:[#allocation109_spill] sm:$0xff] %v5391_v28  ;;  %v9714_v1 = vrot.slane %v5391_v28, 1 }
 0x12e   :  { %v5340_v46 = vpop.permute.xlu1 %639  ;;  %9691 = vst [vmem:[#allocation101_spill] sm:$0xff] %v5355_v36  ;;  %9694 = vst [vmem:[#allocation104_spill] sm:$0xff] %v5370_v33  ;;  %v3541_v58 = vsub.f32 %v5366_v17, %v5355_v36  ;;  %v3543_v20 = vsub.f32 %v5397_v22, %v5370_v33 }
 0x12f   :  { %9687 = vst [vmem:[#allocation97_spill] sm:$0xff] %v5340_v46  ;;  %v5345_v25 = vpop.permute.xlu0 %637  ;;  %v2363_v46 = vrot.slane %v5347_v32, 1  ;;  %9705 = vst [vmem:[#allocation115_spill] sm:$0xff] %v5411_v23  ;;  %v5431_v23 = vld [vmem:[#allocation3 + $0x30] sm:$0xff] }
 0x130   :  { %9689 = vst [vmem:[#allocation99_spill] sm:$0xff] %v5345_v25  ;;  %v2357_v25 = vrot.slane %v5328_v62, 1  ;;  %v5429_v49 = vmul.f32 %v3541_v58, %v3541_v58  ;;  %v2375_v22 = vrot.slane %v5431_v23, 1  ;;  %v9715_v58 = vrot.slane %v5394_v26, 1 }
 0x131   :  { %1668 = vrot.lane.b32.xlu0 %v5374_v31, %s4444_s0 }
 0x132   :  { %v5361_v41 = vpop.permute.xlu1 %643  ;;  %9711 = vst [vmem:[#allocation121_spill] sm:$0xff] %v5429_v49  ;;  %v2362_v49 = vsel %vm2356_vm12, %v2360_v21, %v9715_v58  ;;  %v3544_v21 = vsub.f32 %v5431_v23, %v5419_v14  ;;  %v5464_v58 = vld [vmem:[#allocation3 + $0x78] sm:$0xff] }
 0x133   :  { %9693 = vst [vmem:[#allocation103_spill] sm:$0xff] %v5361_v41  ;;  %v5372_v24 = vpop.permute.xlu0 %641  ;;  %v3540_v41 = vsub.f32 %v5347_v32, %v5352_v27  ;;  %9719 = vst [vmem:[#allocation125_spill] sm:$0xff] %v5464_v58 }
 0x134   :  { %9695 = vst [vmem:[#allocation105_spill] sm:$0xff] %v5372_v24  ;;  %v3539_v24 = vsub.f32 %v5336_v29, %v5358_v43 }
 0x135   :  { %1670 = vrot.lane.b32.xlu0 %v5423_v47, %s4444_s0  ;;  %v5427_v16 = vmul.f32 %v3540_v41, %v3540_v41  ;;  %v2365_v41 = vsel %vm2356_vm12, %v2363_v46, %v9714_v1  ;;  %v3547_v47 = vsub.f32 %v5383_v8, %v5343_v59  ;;  %v5459_v1 = vmul.f32 %v3543_v20, %v3543_v20 }
 0x136   :  { %v5409_v31 = vpop.permute.xlu1 %647  ;;  %v5437_v54 = vmul.f32 %v3539_v24, %v3539_v24  ;;  %v3549_v20 = vsub.f32 %v5391_v28, %v5352_v27  ;;  %v4044_v28 = vld [vmem:[#allocation3 + $0x160] sm:$0x1] }
 0x137   :  { %9704 = vst [vmem:[#allocation114_spill] sm:$0xff] %v5409_v31  ;;  %v5421_v45 = vpop.permute.xlu0 %645  ;;  %9710 = vst [vmem:[#allocation120_spill] sm:$0xff] %v5427_v16  ;;  %v2359_v31 = vsel %vm2356_vm12, %v2357_v25, %v9712_v18  ;;  %v3545_v16 = vsub.f32 %v5415_v13, %v5404_v12  ;;  %v9716_v18 = vrot.slane %v5406_v39, 1  ;;  %v5454_v25 = vld [vmem:[#allocation3 + $0x60] sm:$0xff]  ;;  %v5488_v27 = vmul.f32 %v3547_v47, %v3547_v47 }
 0x138   :  { %9708 = vst [vmem:[#allocation118_spill] sm:$0xff] %v5421_v45  ;;  %9713 = vst [vmem:[#allocation122_spill] sm:$0xff] %v5437_v54  ;;  %v3542_v45 = vsub.f32 %v5400_v38, %v5389_v9  ;;  %v2474_v46 = vsub.f32 %v5328_v62, %v2359_v31  ;;  %v2475_v54 = vsub.f32 %v5336_v29, %v2362_v49  ;;  %v9724_v49 = vrot.slane %v5454_v25, 1 }
 0x139   :  { %v2371_v24 = vsel %vm2356_vm12, %v2369_v52, %v9716_v18  ;;  %9717 = vst [vmem:[#allocation123_spill] sm:$0xff] %v5454_v25  ;;  %9718 = vst [vmem:[#allocation124_spill] sm:$0xff] %v5459_v1  ;;  %v5469_v52 = vld [vmem:[#allocation3 + $0x178] sm:$0xff]  ;;  %v2476_v18 = vsub.f32 %v5347_v32, %v2365_v41  ;;  %v3548_v31 = vsub.f32 %v5394_v26, %v5358_v43  ;;  %v5490_v32 = vld [vmem:[#allocation3 + $0x40] sm:$0xff] }
 0x13a   :  { %v5457_v19 = vpop.permute.xlu1 %962  ;;  %1672 = vrot.lane.b32.xlu0 %v5469_v52, %s4444_s0  ;;  %v5479_v62 = vmul.f32 %v3542_v45, %v3542_v45  ;;  %v2478_v59 = vsub.f32 %v5400_v38, %v2371_v24  ;;  %v3551_v1 = vsub.f32 %v5406_v39, %v5389_v9  ;;  %v3550_v13 = vsub.f32 %v5454_v25, %v5355_v36  ;;  %v9755_v39 = vld [vmem:[#allocation46_spill] sm:$0xff]  ;;  %v9759_v36 = vld [vmem:[#allocation9_spill] sm:$0xff]  ;;  %v9761_v43 = vld [vmem:[#allocation11_spill] sm:$0xff] }
 0x13b   :  { %v5467_v12 = vpop.permute.xlu0 %960  ;;  %v5486_v8 = vmul.f32 %v3545_v16, %v3545_v16  ;;  %9722 = vst [vmem:[#allocation128_spill] sm:$0xff] %v5488_v27  ;;  %9723 = vst [vmem:[#allocation129_spill] sm:$0xff] %v5490_v32  ;;  %v9725_v45 = vrot.slane %v5366_v17, 1  ;;  %v5502_v9 = vmul.f32 %v2474_v46, %v2474_v46  ;;  %v9729_v16 = vrot.slane %v5464_v58, 1  ;;  %v9763_v26 = vld [vmem:[#allocation10_spill] sm:$0xff] }
 0x13c   :  { %9720 = vst [vmem:[#allocation126_spill] sm:$0xff] %v5479_v62  ;;  %v5500_v62 = vmul.f32 %v3544_v21, %v3544_v21  ;;  %v3553_v27 = vsub.f32 %v5464_v58, %v5419_v14  ;;  %v5517_v21 = vmul.f32 %v2475_v54, %v2475_v54  ;;  %v5519_v46 = vmul.f32 %v3548_v31, %v3548_v31  ;;  %v5550_v31 = vld [vmem:[#allocation3 + $0x88] sm:$0xff]  ;;  %v9752_v14 = vld [vmem:[#allocation44_spill] sm:$0xff]  ;;  %v9753_v58 = vld [vmem:[#allocation45_spill] sm:$0xff] }
 0x13d   :  { %9721 = vst [vmem:[#allocation127_spill] sm:$0xff] %v5486_v8  ;;  %v2368_v41 = vsel %vm2356_vm12, %v9725_v45, %v9724_v49  ;;  %9728 = vst [vmem:[#allocation132_spill] sm:$0xff] %v5502_v9  ;;  %v2377_v47 = vsel %vm2356_vm12, %v2375_v22, %v9729_v16  ;;  %v5513_v8 = vmul.f32 %v3549_v20, %v3549_v20  ;;  %v5533_v20 = vld [vmem:[#allocation3 + $0x70] sm:$0xff] }
 0x13e   :  { %v5498_v24 = vpop.permute.xlu1 %966  ;;  %9727 = vst [vmem:[#allocation131_spill] sm:$0xff] %v5500_v62  ;;  %1408 = vrot.lane.b32.xlu0 %v5366_v17, %s4444_s0  ;;  %v5515_v49 = vmul.f32 %v2476_v18, %v2476_v18  ;;  %9733 = vst [vmem:[#allocation136_spill] sm:$0xff] %v5517_v21  ;;  %v5521_v45 = vmul.f32 %v2478_v59, %v2478_v59  ;;  %v5523_v9 = vmul.f32 %v3551_v1, %v3551_v1  ;;  %v5559_v18 = vld [vmem:[#allocation3 + $0x180] sm:$0xff]  ;;  %v9751_v21 = vld [vmem:[#allocation43_spill] sm:$0xff] }
 0x13f   :  { %9726 = vst [vmem:[#allocation130_spill] sm:$0xff] %v5498_v24  ;;  %v5509_v29 = vpop.permute.xlu0 %964  ;;  %9731 = vst [vmem:[#allocation134_spill] sm:$0xff] %v5513_v8  ;;  %v5526_v22 = vsub.f32 %v5366_v17, %v2368_v41  ;;  %v5528_v16 = vmul.f32 %v3550_v13, %v3550_v13  ;;  %v5531_v62 = vsub.f32 %v5431_v23, %v2377_v47  ;;  %v5806_v24 = vld [vmem:[#allocation3 + $0x1a0] sm:$0xff] }
 0x140   :  { %9730 = vst [vmem:[#allocation133_spill] sm:$0xff] %v5509_v29  ;;  %9732 = vst [vmem:[#allocation135_spill] sm:$0xff] %v5515_v49  ;;  %v330_v54 = vsel %vm292_vm0, %v5145_v48, %v5164_v30  ;;  %v331_v59 = vsel %vm292_vm0, %v5164_v30, %v5162_v2  ;;  %v5544_v17 = vmul.f32 %v3553_v27, %v3553_v27 }
 0x141   :  { %9734 = vst [vmem:[#allocation137_spill] sm:$0xff] %v5519_v46  ;;  %9735 = vst [vmem:[#allocation138_spill] sm:$0xff] %v5521_v45  ;;  %v5548_v13 = vsub.f32 %v5533_v20, %v5370_v33  ;;  %v5555_v47 = vmul.f32 %v4766_v42, %v4766_v42  ;;  %v5565_v30 = vmul.f32 %v4769_v61, %v4769_v61 }
 0x142   :  { %9736 = vst [vmem:[#allocation139_spill] sm:$0xff] %v5523_v9  ;;  %9737 = vst [vmem:[#allocation140_spill] sm:$0xff] %v5526_v22  ;;  %v5542_v1 = vpop.permute.xlu1 %970  ;;  %1674 = vrot.lane.b32.xlu0 %v5559_v18, %s4444_s0  ;;  %v5569_v27 = vmul.f32 %v4772_v35, %v4772_v35  ;;  %v5573_v41 = vmul.f32 %v4809_v60, %v4809_v60  ;;  %v5577_v42 = vmul.f32 %v4812_v44, %v4812_v44  ;;  %v4041_v9 = vld [vmem:[#allocation3 + $0x148] sm:$0x1]  ;;  %v4042_v35 = vld [vmem:[#allocation3 + $0x150] sm:$0x1] }
 0x143   :  { %9738 = vst [vmem:[#allocation141_spill] sm:$0xff] %v5528_v16  ;;  %9739 = vst [vmem:[#allocation142_spill] sm:$0xff] %v5531_v62  ;;  %v5557_v48 = vpop.permute.xlu0 %968  ;;  %v5585_v61 = vmul.f32 %v4844_v55, %v4844_v55  ;;  %v419_v45 = vsub.f32 %v4041_v9, %v330_v54  ;;  %v420_v8 = vsub.f32 %v4042_v35, %v331_v59  ;;  %v9748_v59 = vld [vmem:[#allocation40_spill] sm:$0xff]  ;;  %v9749_v35 = vld [vmem:[#allocation41_spill] sm:$0xff] }
 0x144   :  { %9740 = vst [vmem:[#allocation143_spill] sm:$0xff] %v5533_v20  ;;  %9741 = vst [vmem:[#allocation144_spill] sm:$0xff] %v5542_v1  ;;  %v5589_v60 = vmul.f32 %v4860_v34, %v4860_v34  ;;  %v5593_v44 = vmul.f32 %v4863_v37, %v4863_v37  ;;  %v5601_v55 = vmul.f32 %v4888_v53, %v4888_v53  ;;  %v9750_v16 = vld [vmem:[#allocation42_spill] sm:$0xff]  ;;  %v9770_v20 = vld [vmem:[#allocation56_spill] sm:$0xff] }
 0x145   :  { %9742 = vst [vmem:[#allocation145_spill] sm:$0xff] %v5544_v17  ;;  %9743 = vst [vmem:[#allocation146_spill] sm:$0xff] %v5548_v13  ;;  %v5581_v17 = vmul.f32 %v4833_v40, %v4833_v40  ;;  %v5597_v40 = vmul.f32 %v4881_v57, %v4881_v57  ;;  %v5607_v9 = vmul.f32 %v4904_v3, %v4904_v3  ;;  %v9765_v13 = vld [vmem:[#allocation13_spill] sm:$0xff]  ;;  %v9768_v62 = vld [vmem:[#allocation14_spill] sm:$0xff] }
 0x146   :  { %9744 = vst [vmem:[#allocation147_spill] sm:$0xff] %v5550_v31  ;;  %9745 = vst [vmem:[#allocation148_spill] sm:$0xff] %v5557_v48  ;;  %v5603_v49 = vpop.permute.xlu1 %974  ;;  %v5611_v34 = vmul.f32 %v4909_v7, %v4909_v7  ;;  %v5615_v37 = vmul.f32 %v4921_v50, %v4921_v50  ;;  %v5619_v57 = vmul.f32 %v4924_v11, %v4924_v11  ;;  %1978 = vrot.lane.b32.xlu0 %v5062_v10, %s4444_s0  ;;  %v4048_v1 = vld [vmem:[#allocation3 + $0x198] sm:$0xff] }
 0x147   :  { %9746 = vst [vmem:[#allocation149_spill] sm:$0xff] %v5603_v49  ;;  %v5621_v53 = vpop.permute.xlu0 %972  ;;  %v5627_v3 = vmul.f32 %v4934_v15, %v4934_v15  ;;  %v5631_v7 = vmul.f32 %v4947_v4, %v4947_v4  ;;  %v5635_v50 = vmul.f32 %v4950_v5, %v4950_v5  ;;  %v5639_v11 = vmul.f32 %v4954_v0, %v4954_v0  ;;  %v4046_v49 = vld [vmem:[#allocation3 + $0x190] sm:$0xff] }
 0x148   :  { %9747 = vst [vmem:[#allocation150_spill] sm:$0xff] %v5621_v53  ;;  %v5643_v54 = vmul.f32 %v4969_v63, %v4969_v63  ;;  %v5647_v15 = vmul.f32 %v4975_v6, %v4975_v6  ;;  %v3090_v10 = vadd.f32 %v4746_v51, %v419_v45  ;;  %v3091_v4 = vadd.f32 %v4746_v51, %v420_v8  ;;  %v9810_v53 = vld [vmem:[#allocation69_spill] sm:$0xff] }
 0x149   :  { %v5653_v5 = vmul.f32 %v4989_v56, %v4989_v56  ;;  %v5657_v0 = vmul.f32 %v9748_v59, %v9748_v59  ;;  %v5661_v63 = vmul.f32 %v9749_v35, %v9749_v35  ;;  %v5665_v6 = vmul.f32 %v9750_v16, %v9750_v16  ;;  %v9758_v16 = vld [vmem:[#allocation48_spill] sm:$0xff] }
 0x14a   :  { %v5669_v46 = vmul.f32 %v9751_v21, %v9751_v21  ;;  %v5673_v56 = vmul.f32 %v9752_v14, %v9752_v14  ;;  %v5677_v59 = vmul.f32 %v9753_v58, %v9753_v58  ;;  %v5681_v35 = vmul.f32 %v9755_v39, %v9755_v39  ;;  %1982 = vrot.lane.b32.xlu0 %v9758_v16, %s4444_s0  ;;  %v5703_v31 = vpop.permute.xlu1 %978 }
 0x14b   :  { %v5683_v33 = vpop.permute.xlu0 %976  ;;  %v5689_v21 = vmul.f32 %v9759_v36, %v9759_v36  ;;  %v5693_v14 = vmul.f32 %v9761_v43, %v9761_v43  ;;  %v5697_v58 = vmul.f32 %v9763_v26, %v9763_v26  ;;  %v5701_v39 = vmul.f32 %v9765_v13, %v9765_v13  ;;  %9767 = vst [vmem:[#allocation48_spill] sm:$0xff] %v5703_v31  ;;  %v9805_v31 = vld [vmem:[#allocation68_spill] sm:$0xff] }
 0x14c   :  { %9754 = vst [vmem:[#allocation40_spill] sm:$0xff] %v5677_v59  ;;  %9756 = vst [vmem:[#allocation41_spill] sm:$0xff] %v5681_v35  ;;  %v5707_v16 = vmul.f32 %v9768_v62, %v9768_v62  ;;  %v3135_v36 = vmax.f32 %v3090_v10, 0.0  ;;  %v3136_v22 = vmax.f32 %v3091_v4, 0.0  ;;  %v332_v43 = vsel %vm292_vm0, %v5162_v2, %v9770_v20  ;;  %v9777_v62 = vld [vmem:[#allocation16_spill] sm:$0xff]  ;;  %v9779_v4 = vld [vmem:[#allocation19_spill] sm:$0xff] }
 0x14d   :  { %9757 = vst [vmem:[#allocation42_spill] sm:$0xff] %v5683_v33  ;;  %9760 = vst [vmem:[#allocation43_spill] sm:$0xff] %v5689_v21  ;;  %v5726_v10 = vmul.f32 %v9777_v62, %v9777_v62  ;;  %v9781_v2 = vld [vmem:[#allocation18_spill] sm:$0xff]  ;;  %v9786_v21 = vld [vmem:[#allocation55_spill] sm:$0xff]  ;;  %v5747_v62 = vmul.f32 %v419_v45, %v419_v45 }
 0x14e   :  { %9762 = vst [vmem:[#allocation44_spill] sm:$0xff] %v5693_v14  ;;  %9764 = vst [vmem:[#allocation45_spill] sm:$0xff] %v5697_v58  ;;  %v9771_v14 = vld [vmem:[#allocation12_spill] sm:$0xff]  ;;  %v9773_v58 = vld [vmem:[#allocation15_spill] sm:$0xff]  ;;  %1410 = vrot.lane.b32.xlu0 %v5400_v38, %s4444_s0  ;;  %v5761_v38 = vsub.f32 %v4044_v28, %v9770_v20  ;;  %v5776_v28 = vpop.permute.xlu1 %982 }
 0x14f   :  { %9766 = vst [vmem:[#allocation46_spill] sm:$0xff] %v5701_v39  ;;  %9769 = vst [vmem:[#allocation9_spill] sm:$0xff] %v5707_v16  ;;  %v5714_v26 = vmul.f32 %v9771_v14, %v9771_v14  ;;  %v5718_v13 = vmul.f32 %v9773_v58, %v9773_v58  ;;  %v9775_v39 = vld [vmem:[#allocation17_spill] sm:$0xff]  ;;  %v5730_v16 = vmul.f32 %v9779_v4, %v9779_v4  ;;  %v9801_v20 = vld [vmem:[#allocation119_spill] sm:$0xff] }
 0x150   :  { %v5722_v25 = vmul.f32 %v9775_v39, %v9775_v39  ;;  %9778 = vst [vmem:[#allocation14_spill] sm:$0xff] %v5726_v10  ;;  %v5734_v14 = vmul.f32 %v9781_v2, %v9781_v2  ;;  %9788 = vst [vmem:[#allocation16_spill] sm:$0xff] %v5747_v62  ;;  %v5749_v4 = vmul.f32 %v420_v8, %v420_v8  ;;  %v3180_v10 = vsel %vm97_vm6, %v3135_v36, 0.0  ;;  %v9795_v45 = vld [vmem:[#allocation61_spill] sm:$0xff]  ;;  %v9798_v62 = vld [vmem:[#allocation63_spill] sm:$0xff] }
 0x151   :  { %9772 = vst [vmem:[#allocation11_spill] sm:$0xff] %v5714_v26  ;;  %9774 = vst [vmem:[#allocation10_spill] sm:$0xff] %v5718_v13  ;;  %v9783_v26 = vld [vmem:[#allocation20_spill] sm:$0xff]  ;;  %v9785_v13 = vld [vmem:[#allocation59_spill] sm:$0xff] }
 0x152   :  { %9776 = vst [vmem:[#allocation13_spill] sm:$0xff] %v5722_v25  ;;  %9780 = vst [vmem:[#allocation56_spill] sm:$0xff] %v5730_v16  ;;  %v5738_v58 = vmul.f32 %v9783_v26, %v9783_v26  ;;  %v649_v39 = vsel %vm292_vm0, %v9786_v21, %v9785_v13  ;;  %v5743_v25 = vpop.permute.xlu0 %980  ;;  %v4043_v16 = vld [vmem:[#allocation3 + $0x158] sm:$0x1]  ;;  %v5758_v21 = vsel %vm98_vm7, %v3136_v22, 0.0  ;;  %v9799_v22 = vld [vmem:[#allocation62_spill] sm:$0xff] }
 0x153   :  { %9782 = vst [vmem:[#allocation12_spill] sm:$0xff] %v5734_v14  ;;  %9787 = vst [vmem:[#allocation17_spill] sm:$0xff] %v5743_v25  ;;  %v421_v2 = vsub.f32 %v4043_v16, %v332_v43  ;;  %v9790_v14 = vld [vmem:[#allocation58_spill] sm:$0xff]  ;;  %v4045_v33 = vld [vmem:[#allocation3 + $0x188] sm:$0xff] }
 0x154   :  { %9784 = vst [vmem:[#allocation15_spill] sm:$0xff] %v5738_v58  ;;  %9789 = vst [vmem:[#allocation19_spill] sm:$0xff] %v5749_v4  ;;  %v650_v26 = vsel %vm292_vm0, %v9785_v13, %v9790_v14  ;;  %v651_v8 = vsel %vm292_vm0, %v9790_v14, %v9795_v45  ;;  %v9796_v16 = vld [vmem:[#allocation106_spill] sm:$0xff]  ;;  %v9797_v4 = vld [vmem:[#allocation60_spill] sm:$0xff]  ;;  %1676 = vrot.lane.b32.xlu0 %v4045_v33, %s4444_s0 }
 0x155   :  { %9793 = vst [vmem:[#allocation18_spill] sm:$0xff] %v5758_v21  ;;  %9794 = vst [vmem:[#allocation20_spill] sm:$0xff] %v5761_v38  ;;  %v734_v43 = vsub.f32 %v9796_v16, %v649_v39  ;;  %v652_v13 = vsel %vm292_vm0, %v9795_v45, %v9797_v4  ;;  %v653_v36 = vsel %vm292_vm0, %v9797_v4, %v9798_v62  ;;  %v9802_v58 = vld [vmem:[#allocation65_spill] sm:$0xff]  ;;  %v9803_v39 = vld [vmem:[#allocation64_spill] sm:$0xff] }
 0x156   :  { %v654_v21 = vsel %vm292_vm0, %v9798_v62, %v9799_v22  ;;  %9800 = vst [vmem:[#allocation59_spill] sm:$0xff] %v5776_v28  ;;  %v735_v35 = vsub.f32 %v9801_v20, %v650_v26  ;;  %v655_v14 = vsel %vm292_vm0, %v9799_v22, %v9802_v58  ;;  %v656_v45 = vsel %vm292_vm0, %v9802_v58, %v9803_v39  ;;  %v9804_v16 = vld [vmem:[#allocation67_spill] sm:$0xff]  ;;  %v5788_v25 = vpop.permute.xlu0 %984  ;;  %v9809_v20 = vld [vmem:[#allocation70_spill] sm:$0xff] }
 0x157   :  { %v657_v4 = vsel %vm292_vm0, %v9805_v31, %v9804_v16  ;;  %9806 = vst [vmem:[#allocation55_spill] sm:$0xff] %v5788_v25  ;;  %v5792_v62 = vsel %vm1373_vm11, %v3180_v10, 0.0  ;;  %v5795_v26 = vadd.f32 %v4746_v51, %v421_v2  ;;  %v736_v22 = vsub.f32 %v5469_v52, %v651_v8  ;;  %v4047_v10 = vld [vmem:[#allocation3 + $0x1a8] sm:$0xff]  ;;  %v5809_v8 = vld [vmem:[#allocation3 + $0x1b0] sm:$0xff] }
 0x158   :  { %9807 = vst [vmem:[#allocation58_spill] sm:$0xff] %v5792_v62  ;;  %v658_v58 = vsel %vm292_vm0, %v9804_v16, %v9809_v20  ;;  %v737_v28 = vsub.f32 %v5559_v18, %v652_v13  ;;  %v738_v31 = vsub.f32 %v4045_v33, %v653_v36  ;;  %v739_v25 = vsub.f32 %v4046_v49, %v654_v21  ;;  %v4051_v36 = vld [vmem:[#allocation3 + $0x1b8] sm:$0xff] }
 0x159   :  { %9808 = vst [vmem:[#allocation61_spill] sm:$0xff] %v5795_v26  ;;  %v659_v59 = vsel %vm292_vm0, %v9809_v20, %v9810_v53  ;;  %v742_v62 = vsub.f32 %v4047_v10, %v9803_v39  ;;  %v740_v48 = vsub.f32 %v4048_v1, %v655_v14  ;;  %v741_v52 = vsub.f32 %v5806_v24, %v656_v45  ;;  %v9814_v1 = vld [vmem:[#allocation47_spill] sm:$0xff]  ;;  %v4052_v10 = vld [vmem:[#allocation3 + $0x1c0] sm:$0xff] }
 0x15a   :  { %9811 = vst [vmem:[#allocation106_spill] sm:$0xff] %v5809_v8  ;;  %v743_v18 = vsub.f32 %v5809_v8, %v657_v4  ;;  %v5814_v33 = vadd.f32 %v4746_v51, %v5761_v38  ;;  %v779_v21 = vmul.f32 %v734_v43, %v734_v43  ;;  %v780_v13 = vmul.f32 %v735_v35, %v735_v35  ;;  %v5816_v20 = vpop.permute.xlu0 %988  ;;  %v5823_v8 = vpop.permute.xlu1 %986  ;;  %v9816_v35 = vld [vmem:[#allocation72_spill] sm:$0xff] }
 0x15b   :  { %v744_v16 = vsub.f32 %v4051_v36, %v658_v58  ;;  %9813 = vst [vmem:[#allocation63_spill] sm:$0xff] %v5816_v20  ;;  %1984 = vrot.lane.b32.xlu0 %v9814_v1, %s4444_s0  ;;  %v5820_v14 = vmul.f32 %v421_v2, %v421_v2  ;;  %v781_v45 = vmul.f32 %v736_v22, %v736_v22 }
 0x15c   :  { %9812 = vst [vmem:[#allocation60_spill] sm:$0xff] %v5814_v33  ;;  %v745_v4 = vsub.f32 %v4052_v10, %v659_v59  ;;  %v782_v51 = vmul.f32 %v737_v28, %v737_v28  ;;  %v783_v38 = vmul.f32 %v738_v31, %v738_v31  ;;  %v784_v43 = vmul.f32 %v739_v25, %v739_v25  ;;  %v4053_v31 = vld [vmem:[#allocation3 + $0x1c8] sm:$0xff] }
 0x15d   :  { %9815 = vst [vmem:[#allocation62_spill] sm:$0xff] %v5820_v14  ;;  %v660_v58 = vsel %vm292_vm0, %v9810_v53, %v9816_v35  ;;  %v787_v36 = vmul.f32 %v742_v62, %v742_v62  ;;  %v785_v20 = vmul.f32 %v740_v48, %v740_v48  ;;  %v786_v29 = vmul.f32 %v741_v52, %v741_v52  ;;  %v9817_v48 = vld [vmem:[#allocation71_spill] sm:$0xff] }
 0x15e   :  { %v788_v1 = vmul.f32 %v743_v18, %v743_v18  ;;  %v5830_v39 = vadd.f32 %v779_v21, %v5565_v30  ;;  %v5833_v59 = vadd.f32 %v780_v13, %v5569_v27  ;;  %v789_v22 = vmul.f32 %v744_v16, %v744_v16  ;;  %v5835_v28 = vpop.permute.xlu0 %992  ;;  %v9833_v14 = vld [vmem:[#allocation83_spill] sm:$0xff] }
 0x15f   :  { %1678 = vrot.lane.b32.xlu0 %v4046_v49, %s4444_s0  ;;  %v5839_v25 = vadd.f32 %v781_v45, %v5555_v47  ;;  %v790_v53 = vmul.f32 %v745_v4, %v745_v4  ;;  %v661_v62 = vsel %vm292_vm0, %v9816_v35, %v9817_v48  ;;  %v746_v52 = vsub.f32 %v4053_v31, %v660_v58  ;;  %v9818_v49 = vld [vmem:[#allocation74_spill] sm:$0xff]  ;;  %v4055_v45 = vld [vmem:[#allocation3 + $0x1d8] sm:$0xff] }
 0x160   :  { %v5845_v30 = vadd.f32 %v782_v51, %v5573_v41  ;;  %v5848_v27 = vadd.f32 %v783_v38, %v5577_v42  ;;  %v5851_v18 = vadd.f32 %v784_v43, %v5581_v17  ;;  %v662_v47 = vsel %vm292_vm0, %v9817_v48, %v9818_v49  ;;  %v5868_v41 = vpop.permute.xlu1 %990  ;;  %v5873_v42 = vld [vmem:[#allocation3 + $0x1d0] sm:$0xff]  ;;  %v9823_v4 = vld [vmem:[#allocation78_spill] sm:$0xff]  ;;  %v9824_v43 = vld [vmem:[#allocation75_spill] sm:$0xff] }
 0x161   :  { %v5857_v21 = vadd.f32 %v787_v36, %v5593_v44  ;;  %v5860_v13 = vadd.f32 %v785_v20, %v5585_v61  ;;  %v5863_v16 = vadd.f32 %v786_v29, %v5589_v60  ;;  %v5866_v51 = vadd.f32 %v788_v1, %v5597_v40  ;;  %9819 = vst [vmem:[#allocation119_spill] sm:$0xff] %v5873_v42  ;;  %v9820_v44 = vld [vmem:[#allocation73_spill] sm:$0xff]  ;;  %v9821_v20 = vld [vmem:[#allocation76_spill] sm:$0xff]  ;;  %v9827_v48 = vld [vmem:[#allocation79_spill] sm:$0xff] }
 0x162   :  { %v5871_v17 = vadd.f32 %v789_v22, %v5601_v55  ;;  %v747_v38 = vsub.f32 %v5873_v42, %v661_v62  ;;  %v663_v61 = vsel %vm292_vm0, %v9818_v49, %v9820_v44  ;;  %v664_v29 = vsel %vm292_vm0, %v9820_v44, %v9821_v20  ;;  %v5882_v60 = vpop.permute.xlu0 %996  ;;  %v9825_v58 = vld [vmem:[#allocation77_spill] sm:$0xff]  ;;  %v9826_v1 = vld [vmem:[#allocation80_spill] sm:$0xff]  ;;  %v5904_v62 = vld [vmem:[#allocation3 + $0x1e0] sm:$0xff] }
 0x163   :  { %9822 = vst [vmem:[#allocation65_spill] sm:$0xff] %v5882_v60  ;;  %1414 = vrot.lane.b32.xlu0 %v5431_v23, %s4444_s0  ;;  %v5887_v40 = vadd.f32 %v790_v53, %v5607_v9  ;;  %v791_v55 = vmul.f32 %v746_v52, %v746_v52  ;;  %v748_v10 = vsub.f32 %v4055_v45, %v662_v47  ;;  %v9828_v9 = vld [vmem:[#allocation82_spill] sm:$0xff]  ;;  %9829 = vst [vmem:[#allocation64_spill] sm:$0xff] %v5904_v62  ;;  %v4057_v52 = vld [vmem:[#allocation3 + $0x1e8] sm:$0xff] }
 0x164   :  { %v665_v35 = vsel %vm292_vm0, %v9824_v43, %v9823_v4  ;;  %v666_v36 = vsel %vm292_vm0, %v9823_v4, %v9825_v58  ;;  %v667_v22 = vsel %vm292_vm0, %v9825_v58, %v9826_v1  ;;  %v668_v23 = vsel %vm292_vm0, %v9826_v1, %v9827_v48  ;;  %v9830_v47 = vld [vmem:[#allocation81_spill] sm:$0xff]  ;;  %v9831_v45 = vld [vmem:[#allocation84_spill] sm:$0xff] }
 0x165   :  { %v669_v53 = vsel %vm292_vm0, %v9827_v48, %v9828_v9  ;;  %v749_v31 = vsub.f32 %v5904_v62, %v663_v61  ;;  %v750_v49 = vsub.f32 %v4057_v52, %v664_v29  ;;  %v670_v44 = vsel %vm292_vm0, %v9828_v9, %v9830_v47  ;;  %v5913_v58 = vld [vmem:[#allocation3 + $0x1f0] sm:$0xff]  ;;  %v4059_v48 = vld [vmem:[#allocation3 + $0x1f8] sm:$0xff]  ;;  %v5924_v52 = vld [vmem:[#allocation3 + $0x200] sm:$0xff] }
 0x166   :  { %v671_v4 = vsel %vm292_vm0, %v9830_v47, %v9831_v45  ;;  %v792_v43 = vmul.f32 %v747_v38, %v747_v38  ;;  %9832 = vst [vmem:[#allocation67_spill] sm:$0xff] %v5913_v58  ;;  %v751_v1 = vsub.f32 %v5913_v58, %v9821_v20  ;;  %v752_v2 = vsub.f32 %v4059_v48, %v665_v35  ;;  %v5920_v29 = vpop.permute.xlu0 %1000  ;;  %v9835_v9 = vld [vmem:[#allocation49_spill] sm:$0xff]  ;;  %v5927_v47 = vld [vmem:[#allocation3 + $0x208] sm:$0xff]  ;;  %v5930_v20 = vld [vmem:[#allocation3 + $0x210] sm:$0xff] }
 0x167   :  { %v672_v61 = vsel %vm292_vm0, %v9831_v45, %v9833_v14  ;;  %9834 = vst [vmem:[#allocation68_spill] sm:$0xff] %v5920_v29  ;;  %1988 = vrot.lane.b32.xlu0 %v9835_v9, %s4444_s0  ;;  %9836 = vst [vmem:[#allocation70_spill] sm:$0xff] %v5924_v52  ;;  %v753_v38 = vsub.f32 %v5924_v52, %v666_v36  ;;  %v754_v33 = vsub.f32 %v5927_v47, %v667_v22  ;;  %v4063_v48 = vld [vmem:[#allocation3 + $0x218] sm:$0xff]  ;;  %v5933_v45 = vpop.permute.xlu1 %994  ;;  %v5935_v62 = vld [vmem:[#allocation3 + $0x220] sm:$0xff] }
 0x168   :  { %9837 = vst [vmem:[#allocation69_spill] sm:$0xff] %v5927_v47  ;;  %9838 = vst [vmem:[#allocation47_spill] sm:$0xff] %v5930_v20  ;;  %v755_v35 = vsub.f32 %v5930_v20, %v668_v23  ;;  %v756_v26 = vsub.f32 %v4063_v48, %v669_v53  ;;  %v793_v58 = vmul.f32 %v748_v10, %v748_v10  ;;  %v4065_v42 = vld [vmem:[#allocation3 + $0x238] sm:$0xff]  ;;  %v4066_v52 = vld [vmem:[#allocation3 + $0x228] sm:$0xff] }
 0x169   :  { %9839 = vst [vmem:[#allocation72_spill] sm:$0xff] %v5935_v62  ;;  %v757_v9 = vsub.f32 %v5935_v62, %v670_v44  ;;  %v760_v36 = vsub.f32 %v4065_v42, %v9833_v14  ;;  %v758_v29 = vsub.f32 %v4066_v52, %v671_v4  ;;  %v5940_v22 = vadd.f32 %v791_v55, %v5611_v34  ;;  %v5942_v23 = vld [vmem:[#allocation3 + $0x230] sm:$0xff]  ;;  %v9841_v44 = vld [vmem:[#allocation85_spill] sm:$0xff]  ;;  %v9842_v62 = vld [vmem:[#allocation86_spill] sm:$0xff] }
 0x16a   :  { %v794_v47 = vmul.f32 %v749_v31, %v749_v31  ;;  %v795_v60 = vmul.f32 %v750_v49, %v750_v49  ;;  %9840 = vst [vmem:[#allocation71_spill] sm:$0xff] %v5942_v23  ;;  %v759_v53 = vsub.f32 %v5942_v23, %v672_v61  ;;  %v5946_v10 = vadd.f32 %v792_v43, %v5615_v37  ;;  %v5951_v42 = vpop.permute.xlu0 %1004  ;;  %v4068_v52 = vld [vmem:[#allocation3 + $0x240] sm:$0xff] }
 0x16b   :  { %v796_v48 = vmul.f32 %v751_v1, %v751_v1  ;;  %v797_v20 = vmul.f32 %v752_v2, %v752_v2  ;;  %v673_v14 = vsel %vm292_vm0, %v9842_v62, %v9841_v44  ;;  %1682 = vrot.lane.b32.xlu0 %v5806_v24, %s4444_s0  ;;  %v798_v34 = vmul.f32 %v753_v38, %v753_v38  ;;  %v5964_v24 = vpop.permute.xlu1 %998 }
 0x16c   :  { %v799_v55 = vmul.f32 %v754_v33, %v754_v33  ;;  %v800_v31 = vmul.f32 %v755_v35, %v755_v35  ;;  %v801_v49 = vmul.f32 %v756_v26, %v756_v26  ;;  %v5956_v4 = vadd.f32 %v793_v58, %v5619_v57  ;;  %v9843_v26 = vld [vmem:[#allocation88_spill] sm:$0xff] }
 0x16d   :  { %v802_v37 = vmul.f32 %v757_v9, %v757_v9  ;;  %v805_v43 = vmul.f32 %v760_v36, %v760_v36  ;;  %v803_v1 = vmul.f32 %v758_v29, %v758_v29  ;;  %v5959_v2 = vadd.f32 %v794_v47, %v5631_v7  ;;  %v9844_v7 = vld [vmem:[#allocation87_spill] sm:$0xff] }
 0x16e   :  { %v5962_v62 = vadd.f32 %v795_v60, %v5635_v50  ;;  %v804_v61 = vmul.f32 %v759_v53, %v759_v53  ;;  %v761_v23 = vsub.f32 %v4068_v52, %v673_v14  ;;  %v5967_v33 = vadd.f32 %v796_v48, %v5627_v3  ;;  %v5978_v60 = vpop.permute.xlu0 %1008  ;;  %v4069_v36 = vld [vmem:[#allocation3 + $0x248] sm:$0xff]  ;;  %v4070_v53 = vld [vmem:[#allocation3 + $0x250] sm:$0xff] }
 0x16f   :  { %v5970_v57 = vadd.f32 %v797_v20, %v5639_v11  ;;  %v674_v58 = vsel %vm292_vm0, %v9841_v44, %v9843_v26  ;;  %v675_v50 = vsel %vm292_vm0, %v9843_v26, %v9844_v7  ;;  %1418 = vrot.lane.b32.xlu0 %v5490_v32, %s4444_s0  ;;  %v5983_v29 = vadd.f32 %v798_v34, %v5643_v54  ;;  %v9849_v54 = vld [vmem:[#allocation90_spill] sm:$0xff]  ;;  %v9852_v44 = vld [vmem:[#allocation133_spill] sm:$0xff]  ;;  %v6037_v52 = vpop.permute.xlu1 %1002 }
 0x170   :  { %v5986_v3 = vadd.f32 %v799_v55, %v5647_v15  ;;  %v5989_v11 = vadd.f32 %v800_v31, %v5653_v5  ;;  %v5992_v38 = vadd.f32 %v801_v49, %v5657_v0  ;;  %v5995_v47 = vadd.f32 %v802_v37, %v5661_v63  ;;  %v9851_v63 = vld [vmem:[#allocation89_spill] sm:$0xff]  ;;  %v9853_v34 = vld [vmem:[#allocation130_spill] sm:$0xff]  ;;  %v9854_v55 = vld [vmem:[#allocation51_spill] sm:$0xff] }
 0x171   :  { %v5998_v20 = vadd.f32 %v805_v43, %v5673_v56  ;;  %v6001_v35 = vadd.f32 %v803_v1, %v5665_v6  ;;  %v676_v15 = vsel %vm292_vm0, %v9844_v7, %v9849_v54  ;;  %v6007_v9 = vadd.f32 %v804_v61, %v5669_v46  ;;  %v4071_v31 = vld [vmem:[#allocation3 + $0x258] sm:$0xff]  ;;  %v9855_v37 = vld [vmem:[#allocation92_spill] sm:$0xff]  ;;  %v9856_v43 = vld [vmem:[#allocation91_spill] sm:$0xff] }
 0x172   :  { %9845 = vst [vmem:[#allocation74_spill] sm:$0xff] %v5992_v38  ;;  %9846 = vst [vmem:[#allocation73_spill] sm:$0xff] %v5995_v47  ;;  %v806_v5 = vmul.f32 %v761_v23, %v761_v23  ;;  %v762_v0 = vsub.f32 %v4069_v36, %v674_v58  ;;  %v763_v48 = vsub.f32 %v4070_v53, %v675_v50  ;;  %v6021_v23 = vpop.permute.xlu0 %1012  ;;  %v4072_v1 = vld [vmem:[#allocation3 + $0x2d0] sm:$0xff]  ;;  %v4073_v26 = vld [vmem:[#allocation3 + $0x2d8] sm:$0xff] }
 0x173   :  { %9847 = vst [vmem:[#allocation76_spill] sm:$0xff] %v5998_v20  ;;  %9848 = vst [vmem:[#allocation78_spill] sm:$0xff] %v6001_v35  ;;  %v677_v56 = vsel %vm292_vm0, %v9849_v54, %v9851_v63  ;;  %v1050_v6 = vsel %vm292_vm0, %v5467_v12, %v5457_v19  ;;  %v1051_v14 = vsel %vm292_vm0, %v5457_v19, %v9852_v44  ;;  %1992 = vrot.lane.b32.xlu0 %v9854_v55, %s4444_s0  ;;  %v4074_v7 = vld [vmem:[#allocation3 + $0x2e0] sm:$0xff]  ;;  %v9857_v54 = vld [vmem:[#allocation148_spill] sm:$0xff] }
 0x174   :  { %9850 = vst [vmem:[#allocation75_spill] sm:$0xff] %v6007_v9  ;;  %v1052_v46 = vsel %vm292_vm0, %v9852_v44, %v9853_v34  ;;  %v6025_v49 = vsub.f32 %v4071_v31, %v676_v15  ;;  %v6030_v12 = vsel %vm292_vm0, %v9851_v63, %v9855_v37  ;;  %v6035_v19 = vsel %vm292_vm0, %v9855_v37, %v9856_v43  ;;  %v9858_v36 = vld [vmem:[#allocation144_spill] sm:$0xff]  ;;  %v4075_v31 = vld [vmem:[#allocation3 + $0x2e8] sm:$0xff] }
 0x175   :  { %v1135_v61 = vsub.f32 %v4072_v1, %v1050_v6  ;;  %v1136_v58 = vsub.f32 %v4073_v26, %v1051_v14  ;;  %v1137_v50 = vsub.f32 %v4074_v7, %v1052_v46  ;;  %v1053_v15 = vsel %vm292_vm0, %v9853_v34, %v9857_v54  ;;  %v9859_v63 = vld [vmem:[#allocation40_spill] sm:$0xff]  ;;  %v9861_v26 = vld [vmem:[#allocation50_spill] sm:$0xff]  ;;  %v9882_v47 = vld [vmem:[#allocation55_spill] sm:$0xff] }
 0x176   :  { %v1054_v53 = vsel %vm292_vm0, %v9857_v54, %v9858_v36  ;;  %v6046_v44 = vadd.f32 %v806_v5, %v9859_v63  ;;  %v6048_v55 = vmul.f32 %v762_v0, %v762_v0  ;;  %v1138_v37 = vsub.f32 %v4075_v31, %v1053_v15  ;;  %v9862_v7 = vld [vmem:[#allocation150_spill] sm:$0xff]  ;;  %v6054_v32 = vpop.permute.xlu0 %1016  ;;  %v9863_v54 = vld [vmem:[#allocation107_spill] sm:$0xff]  ;;  %v9864_v63 = vld [vmem:[#allocation149_spill] sm:$0xff] }
 0x177   :  { %v1180_v6 = vmul.f32 %v1135_v61, %v1135_v61  ;;  %v1181_v1 = vmul.f32 %v1136_v58, %v1136_v58  ;;  %v1182_v14 = vmul.f32 %v1137_v50, %v1137_v50  ;;  %v1139_v46 = vsub.f32 %v9861_v26, %v1054_v53  ;;  %1420 = vrot.lane.b32.xlu0 %v9863_v54, %s4444_s0  ;;  %v4076_v58 = vld [vmem:[#allocation3 + $0x2f8] sm:$0xff]  ;;  %v9875_v35 = vld [vmem:[#allocation48_spill] sm:$0xff] }
 0x178   :  { %9860 = vst [vmem:[#allocation77_spill] sm:$0xff] %v6046_v44  ;;  %v1055_v34 = vsel %vm292_vm0, %v9858_v36, %v9862_v7  ;;  %v1183_v0 = vmul.f32 %v1138_v37, %v1138_v37  ;;  %v1056_v61 = vsel %vm292_vm0, %v9862_v7, %v9864_v63  ;;  %v9865_v36 = vld [vmem:[#allocation52_spill] sm:$0xff]  ;;  %v6065_v44 = vmul.f32 %v763_v48, %v763_v48  ;;  %v6071_v37 = vpop.permute.xlu1 %1006 }
 0x179   :  { %v1225_v5 = vadd.f32 %v1180_v6, %v5830_v39  ;;  %v1140_v50 = vsub.f32 %v4076_v58, %v1055_v34  ;;  %v1226_v15 = vadd.f32 %v1181_v1, %v5833_v59  ;;  %v1227_v53 = vadd.f32 %v1182_v14, %v5839_v25  ;;  %v9866_v39 = vld [vmem:[#allocation42_spill] sm:$0xff]  ;;  %v4078_v58 = vld [vmem:[#allocation3 + $0x308] sm:$0xff] }
 0x17a   :  { %v1184_v31 = vmul.f32 %v1139_v46, %v1139_v46  ;;  %v1141_v26 = vsub.f32 %v9865_v36, %v1056_v61  ;;  %v1228_v54 = vadd.f32 %v1183_v0, %v5845_v30  ;;  %v1057_v6 = vsel %vm292_vm0, %v9864_v63, %v9866_v39  ;;  %v6078_v48 = vpop.permute.xlu0 %1020  ;;  %v9870_v30 = vld [vmem:[#allocation106_spill] sm:$0xff]  ;;  %v9953_v36 = vld [vmem:[#allocation111_spill] sm:$0xff] }
 0x17b   :  { %v1185_v20 = vmul.f32 %v1140_v50, %v1140_v50  ;;  %v1288_v34 = vsel %vm92_vm1, %v1225_v5, 0.0  ;;  %v1289_v25 = vsel %vm93_vm2, %v1226_v15, 0.0  ;;  %9869 = vst [vmem:[#allocation80_spill] sm:$0xff] %v6078_v48  ;;  %1686 = vrot.lane.b32.xlu0 %v9870_v30, %s4444_s0  ;;  %v4077_v46 = vld [vmem:[#allocation3 + $0x260] sm:$0xff]  ;;  %v1142_v50 = vsub.f32 %v4078_v58, %v1057_v6 }
 0x17c   :  { %v1229_v1 = vadd.f32 %v1184_v31, %v5848_v27  ;;  %v1186_v14 = vmul.f32 %v1141_v26, %v1141_v26  ;;  %v765_v0 = vsub.f32 %v4077_v46, %v677_v56  ;;  %v1333_v61 = vadd.f32 %v1289_v25, %v1288_v34  ;;  %v9873_v27 = vld [vmem:[#allocation53_spill] sm:$0xff]  ;;  %v9878_v58 = vld [vmem:[#allocation54_spill] sm:$0xff] }
 0x17d   :  { %v1230_v63 = vadd.f32 %v1185_v20, %v5851_v18  ;;  %v1290_v5 = vsel %vm94_vm3, %v1227_v53, 0.0  ;;  %v1291_v15 = vsel %vm95_vm4, %v1228_v54, 0.0  ;;  %v1143_v31 = vsub.f32 %v9873_v27, %v9866_v39  ;;  %v9874_v26 = vld [vmem:[#allocation17_spill] sm:$0xff]  ;;  %v9877_v20 = vld [vmem:[#allocation59_spill] sm:$0xff] }
 0x17e   :  { %v1058_v30 = vsel %vm292_vm0, %v9875_v35, %v9874_v26  ;;  %v1334_v48 = vadd.f32 %v1333_v61, %v1290_v5  ;;  %v1292_v34 = vsel %vm96_vm5, %v1229_v1, 0.0  ;;  %v1187_v18 = vmul.f32 %v1142_v50, %v1142_v50  ;;  %v4079_v54 = vld [vmem:[#allocation3 + $0x318] sm:$0xff]  ;;  %v6099_v27 = vpop.permute.xlu0 %1024  ;;  %v9968_v5 = vld [vmem:[#allocation116_spill] sm:$0xff] }
 0x17f   :  { %v1059_v6 = vsel %vm292_vm0, %v9874_v26, %v9877_v20  ;;  %v1231_v53 = vadd.f32 %v1186_v14, %v5860_v13  ;;  %v1188_v25 = vmul.f32 %v1143_v31, %v1143_v31  ;;  %v1144_v46 = vsub.f32 %v4079_v54, %v1058_v30  ;;  %9879 = vst [vmem:[#allocation79_spill] sm:$0xff] %v6099_v27  ;;  %v9880_v35 = vld [vmem:[#allocation109_spill] sm:$0xff]  ;;  %v6109_v14 = vpop.permute.xlu1 %1010 }
 0x180   :  { %v1145_v39 = vsub.f32 %v9878_v58, %v1059_v6  ;;  %1424 = vrot.lane.b32.xlu0 %v9880_v35, %s4444_s0  ;;  %v1335_v61 = vadd.f32 %v1334_v48, %v1291_v15  ;;  %v1293_v1 = vsel %vm97_vm6, %v1230_v63, 0.0  ;;  %v1232_v50 = vadd.f32 %v1187_v18, %v5863_v16  ;;  %v4080_v6 = vld [vmem:[#allocation3 + $0x328] sm:$0xff]  ;;  %v4082_v35 = vld [vmem:[#allocation3 + $0x270] sm:$0xff] }
 0x181   :  { %v1060_v13 = vsel %vm292_vm0, %v9877_v20, %v9882_v47  ;;  %v1233_v31 = vadd.f32 %v1188_v25, %v5857_v21  ;;  %v1189_v26 = vmul.f32 %v1144_v46, %v1144_v46  ;;  %v1061_v30 = vsel %vm292_vm0, %v9882_v47, %v5823_v8  ;;  %v4081_v15 = vld [vmem:[#allocation3 + $0x268] sm:$0xff]  ;;  %v9884_v25 = vld [vmem:[#allocation94_spill] sm:$0xff]  ;;  %v9975_v46 = vld [vmem:[#allocation72_spill] sm:$0xff] }
 0x182   :  { %v1146_v48 = vsub.f32 %v4080_v6, %v1060_v13  ;;  %v809_v63 = vmul.f32 %v6025_v49, %v6025_v49  ;;  %v766_v16 = vsub.f32 %v4081_v15, %v6030_v12  ;;  %v1336_v18 = vadd.f32 %v1335_v61, %v1292_v34  ;;  %v9883_v58 = vld [vmem:[#allocation63_spill] sm:$0xff]  ;;  %v6127_v49 = vpop.permute.xlu0 %1028  ;;  %v9888_v15 = vld [vmem:[#allocation57_spill] sm:$0xff] }
 0x183   :  { %v1062_v20 = vsel %vm292_vm0, %v5823_v8, %v9883_v58  ;;  %v767_v21 = vsub.f32 %v4082_v35, %v6035_v19  ;;  %v680_v47 = vsel %vm292_vm0, %v9856_v43, %v9884_v25  ;;  %v1294_v13 = vsel %vm98_vm7, %v1231_v53, 0.0  ;;  %9886 = vst [vmem:[#allocation82_spill] sm:$0xff] %v6127_v49  ;;  %v9887_v34 = vld [vmem:[#allocation39_spill] sm:$0xff]  ;;  %v9976_v35 = vld [vmem:[#allocation110_spill] sm:$0xff] }
 0x184   :  { %v1190_v27 = vmul.f32 %v1145_v39, %v1145_v39  ;;  %1996 = vrot.lane.b32.xlu0 %v4079_v54, %s4444_s0  ;;  %v1337_v12 = vadd.f32 %v1336_v18, %v1293_v1  ;;  %v1296_v61 = vsel %vm100_vm9, %v1233_v31, 0.0  ;;  %v1234_v8 = vadd.f32 %v1189_v26, %v5866_v51  ;;  %v6139_v39 = vld [vmem:[#allocation3 + $0x338] sm:$0xff]  ;;  %v9891_v31 = vld [vmem:[#allocation43_spill] sm:$0xff] }
 0x185   :  { %v1147_v19 = vsub.f32 %v9888_v15, %v1061_v30  ;;  %v1295_v38 = vsel %vm99_vm8, %v1232_v50, 0.0  ;;  %v1191_v43 = vmul.f32 %v1146_v48, %v1146_v48  ;;  %v1063_v53 = vsel %vm292_vm0, %v9883_v58, %v5868_v41  ;;  %v9890_v1 = vld [vmem:[#allocation41_spill] sm:$0xff]  ;;  %v6150_v50 = vpop.permute.xlu1 %1014 }
 0x186   :  { %v1148_v54 = vsub.f32 %v6139_v39, %v1062_v20  ;;  %v6144_v18 = vadd.f32 %v6048_v55, %v9890_v1  ;;  %v6148_v51 = vadd.f32 %v6065_v44, %v9891_v31  ;;  %v810_v26 = vmul.f32 %v765_v0, %v765_v0  ;;  %v4084_v48 = vld [vmem:[#allocation3 + $0x278] sm:$0xff]  ;;  %v6157_v55 = vpop.permute.xlu0 %1032  ;;  %v9893_v1 = vld [vmem:[#allocation123_spill] sm:$0xff] }
 0x187   :  { %v1338_v30 = vadd.f32 %v1337_v12, %v1294_v13  ;;  %v768_v15 = vsub.f32 %v4084_v48, %v680_v47  ;;  %v1341_v58 = vsel %vm1340_vm10, %v1296_v61, 0.0  ;;  %v1235_v49 = vadd.f32 %v1190_v27, %v5871_v17  ;;  %v4085_v12 = vld [vmem:[#allocation3 + $0x340] sm:$0xff]  ;;  %v9894_v48 = vld [vmem:[#allocation44_spill] sm:$0xff] }
 0x188   :  { %9892 = vst [vmem:[#allocation81_spill] sm:$0xff] %v6148_v51  ;;  %v1064_v20 = vsel %vm292_vm0, %v5868_v41, %v5835_v28  ;;  %1426 = vrot.lane.b32.xlu0 %v9893_v1, %s4444_s0  ;;  %v1297_v0 = vsel %vm92_vm1, %v1234_v8, 0.0  ;;  %v1192_v13 = vmul.f32 %v1147_v19, %v1147_v19  ;;  %v1149_v47 = vsub.f32 %v4085_v12, %v1063_v53  ;;  %v6167_v41 = vld [vmem:[#allocation3 + $0x348] sm:$0xff]  ;;  %v9895_v19 = vld [vmem:[#allocation45_spill] sm:$0xff]  ;;  %v4087_v53 = vld [vmem:[#allocation3 + $0x280] sm:$0xff] }
 0x189   :  { %v1339_v44 = vadd.f32 %v1338_v30, %v1295_v38  ;;  %v1236_v61 = vadd.f32 %v1191_v43, %v5887_v40  ;;  %v1193_v31 = vmul.f32 %v1148_v54, %v1148_v54  ;;  %v1065_v17 = vsel %vm292_vm0, %v5835_v28, %v5933_v45  ;;  %v6179_v28 = vld [vmem:[#allocation3 + $0x358] sm:$0xff] }
 0x18a   :  { %v1150_v27 = vsub.f32 %v6167_v41, %v1064_v20  ;;  %v6171_v1 = vadd.f32 %v809_v63, %v9894_v48  ;;  %v811_v38 = vmul.f32 %v766_v16, %v766_v16  ;;  %v812_v30 = vmul.f32 %v767_v21, %v767_v21  ;;  %v6183_v20 = vpop.permute.xlu0 %1036  ;;  %v4089_v21 = vld [vmem:[#allocation3 + $0x350] sm:$0xff] }
 0x18b   :  { %v1342_v8 = vadd.f32 %v1341_v58, %v1339_v44  ;;  %v6174_v51 = vadd.f32 %v810_v26, %v9895_v19  ;;  %v769_v40 = vsub.f32 %v4087_v53, %v9884_v25  ;;  %v1298_v43 = vsel %vm93_vm2, %v1235_v49, 0.0  ;;  %v9896_v58 = vld [vmem:[#allocation65_spill] sm:$0xff]  ;;  %v6189_v44 = vpop.permute.xlu1 %1018 }
 0x18c   :  { %v1152_v54 = vsub.f32 %v6179_v28, %v5933_v45  ;;  %2000 = vrot.lane.b32.xlu0 %v4080_v6, %s4444_s0  ;;  %v1194_v16 = vmul.f32 %v1149_v47, %v1149_v47  ;;  %v1151_v26 = vsub.f32 %v4089_v21, %v1065_v17  ;;  %v1066_v25 = vsel %vm292_vm0, %v9896_v58, %v5964_v24  ;;  %v9897_v6 = vld [vmem:[#allocation96_spill] sm:$0xff]  ;;  %v9900_v21 = vld [vmem:[#allocation46_spill] sm:$0xff] }
 0x18d   :  { %v1343_v63 = vadd.f32 %v1342_v8, %v1297_v0  ;;  %v1237_v49 = vadd.f32 %v1192_v13, %v5940_v22  ;;  %v1299_v12 = vsel %vm94_vm3, %v1236_v61, 0.0  ;;  %v1238_v45 = vadd.f32 %v1193_v31, %v5946_v10  ;;  %v9898_v0 = vld [vmem:[#allocation93_spill] sm:$0xff]  ;;  %v9899_v8 = vld [vmem:[#allocation68_spill] sm:$0xff]  ;;  %v9901_v22 = vld [vmem:[#allocation95_spill] sm:$0xff] }
 0x18e   :  { %v1195_v48 = vmul.f32 %v1150_v27, %v1150_v27  ;;  %v813_v19 = vmul.f32 %v768_v15, %v768_v15  ;;  %v681_v47 = vsel %vm292_vm0, %v9898_v0, %v9897_v6  ;;  %v1067_v53 = vsel %vm292_vm0, %v5964_v24, %v9899_v8  ;;  %v4090_v10 = vld [vmem:[#allocation3 + $0x360] sm:$0xff]  ;;  %v6207_v15 = vpop.permute.xlu0 %1040  ;;  %v9902_v27 = vld [vmem:[#allocation119_spill] sm:$0xff] }
 0x18f   :  { %v1344_v17 = vadd.f32 %v1343_v63, %v1298_v43  ;;  %v6202_v58 = vadd.f32 %v811_v38, %v9900_v21  ;;  %v682_v13 = vsel %vm292_vm0, %v9897_v6, %v9901_v22  ;;  %v1197_v61 = vmul.f32 %v1152_v54, %v1152_v54  ;;  %v6220_v6 = vld [vmem:[#allocation3 + $0x368] sm:$0xff] }
 0x190   :  { %v1153_v31 = vsub.f32 %v4090_v10, %v1066_v25  ;;  %1694 = vrot.lane.b32.xlu0 %v9902_v27, %s4444_s0  ;;  %v1239_v63 = vadd.f32 %v1194_v16, %v5956_v4  ;;  %v1196_v0 = vmul.f32 %v1151_v26, %v1151_v26  ;;  %v1068_v24 = vsel %vm292_vm0, %v9899_v8, %v6037_v52  ;;  %v6229_v8 = vpop.permute.xlu1 %1022 }
 0x191   :  { %v1345_v43 = vadd.f32 %v1344_v17, %v1299_v12  ;;  %v1300_v38 = vsel %vm95_vm4, %v1237_v49, 0.0  ;;  %v1301_v54 = vsel %vm96_vm5, %v1238_v45, 0.0  ;;  %v1240_v25 = vadd.f32 %v1195_v48, %v5959_v2  ;;  %v9903_v12 = vld [vmem:[#allocation11_spill] sm:$0xff]  ;;  %v4093_v48 = vld [vmem:[#allocation3 + $0x370] sm:$0xff] }
 0x192   :  { %v1154_v21 = vsub.f32 %v6220_v6, %v1067_v53  ;;  %v6224_v17 = vadd.f32 %v812_v30, %v9903_v12  ;;  %v814_v4 = vmul.f32 %v769_v40, %v769_v40  ;;  %v1069_v26 = vsel %vm292_vm0, %v6037_v52, %v5951_v42  ;;  %v4092_v49 = vld [vmem:[#allocation3 + $0x288] sm:$0x1]  ;;  %v9905_v30 = vld [vmem:[#allocation10_spill] sm:$0xff] }
 0x193   :  { %v1346_v16 = vadd.f32 %v1345_v43, %v1300_v38  ;;  %v770_v10 = vsub.f32 %v4092_v49, %v681_v47  ;;  %v1242_v45 = vadd.f32 %v1197_v61, %v5967_v33  ;;  %v1198_v2 = vmul.f32 %v1153_v31, %v1153_v31  ;;  %v9904_v53 = vld [vmem:[#allocation143_spill] sm:$0xff]  ;;  %v6245_v61 = vld [vmem:[#allocation3 + $0x378] sm:$0xff] }
 0x194   :  { %v1155_v27 = vsub.f32 %v4093_v48, %v1068_v24  ;;  %1430 = vrot.lane.b32.xlu0 %v9904_v53, %s4444_s0  ;;  %v6235_v12 = vadd.f32 %v813_v19, %v9905_v30  ;;  %v1302_v40 = vsel %vm97_vm6, %v1239_v63, 0.0  ;;  %v1241_v52 = vadd.f32 %v1196_v0, %v5962_v62  ;;  %9906 = vst [vmem:[#allocation84_spill] sm:$0xff] %v6245_v61  ;;  %v6248_v19 = vpop.permute.xlu0 %1044  ;;  %v4095_v24 = vld [vmem:[#allocation3 + $0x290] sm:$0x1]  ;;  %v9907_v63 = vld [vmem:[#allocation99_spill] sm:$0xff]  ;;  %v4096_v48 = vld [vmem:[#allocation3 + $0x380] sm:$0xff] }
 0x195   :  { %v1347_v43 = vadd.f32 %v1346_v16, %v1301_v54  ;;  %v1303_v47 = vsel %vm98_vm7, %v1240_v25, 0.0  ;;  %v1199_v38 = vmul.f32 %v1154_v21, %v1154_v21  ;;  %v1070_v33 = vsel %vm292_vm0, %v5951_v42, %v6071_v37  ;;  %v9908_v25 = vld [vmem:[#allocation97_spill] sm:$0xff] }
 0x196   :  { %v1156_v31 = vsub.f32 %v6245_v61, %v1069_v26  ;;  %v771_v49 = vsub.f32 %v4095_v24, %v682_v13  ;;  %v683_v62 = vsel %vm292_vm0, %v9901_v22, %v9907_v63  ;;  %v1071_v54 = vsel %vm292_vm0, %v6071_v37, %v5978_v60  ;;  %v9922_v61 = vld [vmem:[#allocation78_spill] sm:$0xff] }
 0x197   :  { %v1348_v0 = vadd.f32 %v1347_v43, %v1302_v40  ;;  %v684_v42 = vsel %vm292_vm0, %v9907_v63, %v9908_v25  ;;  %v1305_v21 = vsel %vm100_vm9, %v1242_v45, 0.0  ;;  %v1243_v16 = vadd.f32 %v1198_v2, %v5970_v57  ;;  %v6269_v40 = vpop.permute.xlu1 %1026  ;;  %v6272_v57 = vld [vmem:[#allocation3 + $0x388] sm:$0xff]  ;;  %v4099_v63 = vld [vmem:[#allocation3 + $0x2a0] sm:$0x1] }
 0x198   :  { %v1200_v26 = vmul.f32 %v1155_v27, %v1155_v27  ;;  %2004 = vrot.lane.b32.xlu0 %v6139_v39, %s4444_s0  ;;  %v1304_v22 = vsel %vm99_vm8, %v1241_v52, 0.0  ;;  %v1157_v30 = vsub.f32 %v4096_v48, %v1070_v33  ;;  %v1072_v37 = vsel %vm292_vm0, %v5978_v60, %v6109_v14  ;;  %9909 = vst [vmem:[#allocation83_spill] sm:$0xff] %v6272_v57  ;;  %v9910_v27 = vld [vmem:[#allocation9_spill] sm:$0xff] }
 0x199   :  { %v1349_v13 = vadd.f32 %v1348_v0, %v1303_v47  ;;  %v1244_v45 = vadd.f32 %v1199_v38, %v5983_v29  ;;  %v1201_v43 = vmul.f32 %v1156_v31, %v1156_v31  ;;  %v1158_v2 = vsub.f32 %v6272_v57, %v1071_v54  ;;  %v4098_v33 = vld [vmem:[#allocation3 + $0x298] sm:$0x1]  ;;  %v4100_v31 = vld [vmem:[#allocation3 + $0x390] sm:$0xff]  ;;  %v6283_v54 = vpop.permute.xlu0 %1048 }
 0x19a   :  { %v1073_v39 = vsel %vm292_vm0, %v6109_v14, %v6021_v23  ;;  %v6279_v52 = vadd.f32 %v814_v4, %v9910_v27  ;;  %v815_v47 = vmul.f32 %v770_v10, %v770_v10  ;;  %v772_v24 = vsub.f32 %v4098_v33, %v683_v62  ;;  %v9911_v57 = vld [vmem:[#allocation64_spill] sm:$0xff]  ;;  %v6289_v10 = vld [vmem:[#allocation3 + $0x398] sm:$0xff] }
 0x19b   :  { %v1350_v60 = vadd.f32 %v1349_v13, %v1304_v22  ;;  %v773_v0 = vsub.f32 %v4099_v63, %v684_v42  ;;  %v1351_v29 = vsel %vm1340_vm10, %v1305_v21, 0.0  ;;  %v1245_v38 = vadd.f32 %v1200_v26, %v5986_v3  ;;  %9912 = vst [vmem:[#allocation49_spill] sm:$0xff] %v6289_v10  ;;  %v4102_v42 = vld [vmem:[#allocation3 + $0x3a0] sm:$0xff]  ;;  %v6302_v33 = vpop.permute.xlu1 %1030 }
 0x19c   :  { %v1159_v48 = vsub.f32 %v4100_v31, %v1072_v37  ;;  %1698 = vrot.lane.b32.xlu0 %v9911_v57, %s4444_s0  ;;  %v1306_v4 = vsel %vm92_vm1, %v1243_v16, 0.0  ;;  %v1160_v62 = vsub.f32 %v6289_v10, %v1073_v39  ;;  %v1161_v21 = vsub.f32 %v4102_v42, %v6021_v23  ;;  %v9913_v57 = vld [vmem:[#allocation105_spill] sm:$0xff]  ;;  %v9914_v23 = vld [vmem:[#allocation103_spill] sm:$0xff] }
 0x19d   :  { %v1352_v14 = vadd.f32 %v1351_v29, %v1350_v60  ;;  %v1307_v3 = vsel %vm93_vm2, %v1244_v45, 0.0  ;;  %v1202_v26 = vmul.f32 %v1157_v30, %v1157_v30  ;;  %v1246_v22 = vadd.f32 %v1201_v43, %v5989_v11  ;;  %v4103_v30 = vld [vmem:[#allocation3 + $0x2c8] sm:$0x1]  ;;  %v9915_v60 = vld [vmem:[#allocation114_spill] sm:$0xff] }
 0x19e   :  { %v1203_v13 = vmul.f32 %v1158_v2, %v1158_v2  ;;  %v816_v37 = vmul.f32 %v771_v49, %v771_v49  ;;  %v685_v27 = vsel %vm292_vm0, %v9908_v25, %v9913_v57  ;;  %v1074_v39 = vsel %vm292_vm0, %v6150_v50, %v6054_v32  ;;  %v6312_v25 = vpop.permute.xlu0 %1402  ;;  %v6314_v2 = vld [vmem:[#allocation3 + $0x80] sm:$0xff] }
 0x19f   :  { %v1353_v16 = vadd.f32 %v1352_v14, %v1306_v4  ;;  %v686_v45 = vsel %vm292_vm0, %v9913_v57, %v9914_v23  ;;  %v6308_v11 = vsub.f32 %v4103_v30, %v9915_v60  ;;  %v1308_v49 = vsel %vm94_vm3, %v1245_v38, 0.0  ;;  %9917 = vst [vmem:[#allocation86_spill] sm:$0xff] %v6312_v25  ;;  %v9918_v14 = vld [vmem:[#allocation74_spill] sm:$0xff]  ;;  %v6325_v57 = vld [vmem:[#allocation3 + $0x3a8] sm:$0xff]  ;;  %v9920_v25 = vld [vmem:[#allocation13_spill] sm:$0xff] }
 0x1a0   :  { %v1204_v43 = vmul.f32 %v1159_v48, %v1159_v48  ;;  %1434 = vrot.lane.b32.xlu0 %v6314_v2, %s4444_s0  ;;  %v1205_v63 = vmul.f32 %v1160_v62, %v1160_v62  ;;  %v1206_v29 = vmul.f32 %v1161_v21, %v1161_v21  ;;  %v1075_v31 = vsel %vm292_vm0, %v6054_v32, %v6189_v44  ;;  %v9919_v48 = vld [vmem:[#allocation73_spill] sm:$0xff] }
 0x1a1   :  { %9916 = vst [vmem:[#allocation85_spill] sm:$0xff] %v6308_v11  ;;  %v1354_v50 = vadd.f32 %v1353_v16, %v1307_v3  ;;  %v1247_v4 = vadd.f32 %v1202_v26, %v9918_v14  ;;  %v1309_v38 = vsel %vm95_vm4, %v1246_v22, 0.0  ;;  %v1248_v42 = vadd.f32 %v1203_v13, %v9919_v48  ;;  %v9921_v3 = vld [vmem:[#allocation80_spill] sm:$0xff]  ;;  %v4106_v26 = vld [vmem:[#allocation3 + $0x2a8] sm:$0x1] }
 0x1a2   :  { %v1162_v30 = vsub.f32 %v6325_v57, %v1074_v39  ;;  %v6329_v10 = vadd.f32 %v815_v47, %v9920_v25  ;;  %v817_v62 = vmul.f32 %v772_v24, %v772_v24  ;;  %v1076_v32 = vsel %vm292_vm0, %v6189_v44, %v9921_v3  ;;  %v4107_v11 = vld [vmem:[#allocation3 + $0x3b0] sm:$0xff]  ;;  %v9923_v48 = vld [vmem:[#allocation75_spill] sm:$0xff]  ;;  %v1035_v44 = vpop.permute.xlu1 %1034 }
 0x1a3   :  { %v1355_v21 = vadd.f32 %v1354_v50, %v1308_v49  ;;  %v818_v16 = vmul.f32 %v773_v0, %v773_v0  ;;  %v774_v14 = vsub.f32 %v4106_v26, %v685_v27  ;;  %v1249_v22 = vadd.f32 %v1204_v43, %v9922_v61  ;;  %v9924_v25 = vld [vmem:[#allocation76_spill] sm:$0xff]  ;;  %v6349_v43 = vpop.permute.xlu0 %1404  ;;  %v9926_v50 = vld [vmem:[#allocation14_spill] sm:$0xff] }
 0x1a4   :  { %v1163_v13 = vsub.f32 %v4107_v11, %v1075_v31  ;;  %2008 = vrot.lane.b32.xlu0 %v6167_v41, %s4444_s0  ;;  %v1250_v47 = vadd.f32 %v1205_v63, %v9923_v48  ;;  %v1251_v24 = vadd.f32 %v1206_v29, %v9924_v25  ;;  %v1077_v49 = vsel %vm292_vm0, %v9921_v3, %v6229_v8  ;;  %v6346_v11 = vld [vmem:[#allocation3 + $0x3b8] sm:$0xff]  ;;  %v4109_v29 = vld [vmem:[#allocation3 + $0x2b0] sm:$0x1]  ;;  %v4110_v48 = vld [vmem:[#allocation3 + $0x3c0] sm:$0xff] }
 0x1a5   :  { %v1356_v39 = vadd.f32 %v1355_v21, %v1309_v38  ;;  %v1310_v0 = vsel %vm96_vm5, %v1247_v4, 0.0  ;;  %v1311_v61 = vsel %vm97_vm6, %v1248_v42, 0.0  ;;  %v1207_v27 = vmul.f32 %v1162_v30, %v1162_v30  ;;  %9925 = vst [vmem:[#allocation88_spill] sm:$0xff] %v6349_v43  ;;  %v9927_v21 = vld [vmem:[#allocation79_spill] sm:$0xff]  ;;  %v9928_v3 = vld [vmem:[#allocation56_spill] sm:$0xff]  ;;  %v9929_v42 = vld [vmem:[#allocation118_spill] sm:$0xff] }
 0x1a6   :  { %v1164_v41 = vsub.f32 %v6346_v11, %v1076_v32  ;;  %v6352_v63 = vadd.f32 %v816_v37, %v9926_v50  ;;  %v775_v31 = vsub.f32 %v4109_v29, %v686_v45  ;;  %v1078_v4 = vsel %vm292_vm0, %v6229_v8, %v9927_v21  ;;  %v9930_v37 = vld [vmem:[#allocation67_spill] sm:$0xff] }
 0x1a7   :  { %v1357_v38 = vadd.f32 %v1356_v39, %v1310_v0  ;;  %v6358_v26 = vadd.f32 %v817_v62, %v9928_v3  ;;  %v687_v30 = vsel %vm292_vm0, %v9914_v23, %v9929_v42  ;;  %v1208_v32 = vmul.f32 %v1163_v13, %v1163_v13  ;;  %v9931_v0 = vld [vmem:[#allocation77_spill] sm:$0xff]  ;;  %v6375_v13 = vld [vmem:[#allocation3 + $0x3c8] sm:$0xff]  ;;  %v9932_v3 = vld [vmem:[#allocation12_spill] sm:$0xff] }
 0x1a8   :  { %v1165_v25 = vsub.f32 %v4110_v48, %v1077_v49  ;;  %1702 = vrot.lane.b32.xlu0 %v9930_v37, %s4444_s0  ;;  %v1312_v45 = vsel %vm98_vm7, %v1249_v22, 0.0  ;;  %v1313_v8 = vsel %vm99_vm8, %v1250_v47, 0.0  ;;  %v1314_v62 = vsel %vm100_vm9, %v1251_v24, 0.0  ;;  %v9933_v47 = vld [vmem:[#allocation82_spill] sm:$0xff]  ;;  %v1039_v48 = vpop.permute.xlu1 %1038 }
 0x1a9   :  { %v1358_v39 = vadd.f32 %v1357_v38, %v1311_v61  ;;  %v1252_v50 = vadd.f32 %v1207_v27, %v9931_v0  ;;  %v1209_v29 = vmul.f32 %v1164_v41, %v1164_v41  ;;  %v1079_v23 = vsel %vm292_vm0, %v9927_v21, %v6269_v40  ;;  %v6400_v0 = vld [vmem:[#allocation3 + $0x3d8] sm:$0xff] }
 0x1aa   :  { %v1166_v49 = vsub.f32 %v6375_v13, %v1078_v4  ;;  %v6379_v22 = vadd.f32 %v818_v16, %v9932_v3  ;;  %v819_v61 = vmul.f32 %v774_v14, %v774_v14  ;;  %v1080_v24 = vsel %vm292_vm0, %v6269_v40, %v9933_v47  ;;  %v6389_v4 = vpop.permute.xlu0 %1406  ;;  %v4112_v14 = vld [vmem:[#allocation3 + $0x3d0] sm:$0xff] }
 0x1ab   :  { %v1359_v38 = vadd.f32 %v1358_v39, %v1312_v45  ;;  %v1361_v27 = vsel %vm1340_vm10, %v1314_v62, 0.0  ;;  %v1253_v41 = vadd.f32 %v1208_v32, %v6144_v18  ;;  %v1210_v37 = vmul.f32 %v1165_v25, %v1165_v25  ;;  %9934 = vst [vmem:[#allocation87_spill] sm:$0xff] %v6389_v4  ;;  %v9935_v32 = vld [vmem:[#allocation81_spill] sm:$0xff] }
 0x1ac   :  { %v1081_v21 = vsel %vm292_vm0, %v9933_v47, %v6302_v33  ;;  %2012 = vrot.lane.b32.xlu0 %v6179_v28, %s4444_s0  ;;  %v1167_v45 = vsub.f32 %v4112_v14, %v1079_v23  ;;  %v1082_v40 = vsel %vm292_vm0, %v6157_v55, %v1035_v44  ;;  %v1083_v39 = vsel %vm292_vm0, %v1035_v44, %v6183_v20  ;;  %v6406_v23 = vld [vmem:[#allocation3 + $0x3e8] sm:$0xff]  ;;  %v4115_v44 = vld [vmem:[#allocation3 + $0x3e0] sm:$0xff]  ;;  %v4116_v47 = vld [vmem:[#allocation3 + $0x2b8] sm:$0x1] }
 0x1ad   :  { %v1360_v16 = vadd.f32 %v1359_v38, %v1313_v8  ;;  %v1315_v18 = vsel %vm92_vm1, %v1252_v50, 0.0  ;;  %v1254_v25 = vadd.f32 %v1209_v29, %v9935_v32  ;;  %v1211_v62 = vmul.f32 %v1166_v49, %v1166_v49  ;;  %9936 = vst [vmem:[#allocation90_spill] sm:$0xff] %v6406_v23  ;;  %v4117_v49 = vld [vmem:[#allocation3 + $0x3f0] sm:$0x1]  ;;  %v4118_v32 = vld [vmem:[#allocation3 + $0x3f8] sm:$0x1] }
 0x1ae   :  { %v1168_v3 = vsub.f32 %v6400_v0, %v1080_v24  ;;  %v688_v28 = vsel %vm292_vm0, %v9929_v42, %v9915_v60  ;;  %v1170_v55 = vsub.f32 %v6406_v23, %v6302_v33  ;;  %v1169_v38 = vsub.f32 %v4115_v44, %v1081_v21  ;;  %v6410_v24 = vld [vmem:[#allocation3 + $0x98] sm:$0xff]  ;;  %v1043_v21 = vpop.permute.xlu1 %1042 }
 0x1af   :  { %v1362_v8 = vadd.f32 %v1361_v27, %v1360_v16  ;;  %v820_v50 = vmul.f32 %v775_v31, %v775_v31  ;;  %v776_v29 = vsub.f32 %v4116_v47, %v687_v30  ;;  %v1171_v14 = vsub.f32 %v4117_v49, %v1082_v40  ;;  %v4121_v47 = vld [vmem:[#allocation3 + $0x400] sm:$0x1] }
 0x1b0   :  { %v1172_v4 = vsub.f32 %v4118_v32, %v1083_v39  ;;  %1440 = vrot.lane.b32.xlu0 %v6410_v24, %s4444_s0  ;;  %v1255_v42 = vadd.f32 %v1210_v37, %v6171_v1  ;;  %v1212_v27 = vmul.f32 %v1167_v45, %v1167_v45  ;;  %v1084_v33 = vsel %vm292_vm0, %v6183_v20, %v1039_v48  ;;  %v6422_v39 = vpop.permute.xlu0 %1668  ;;  %v4120_v37 = vld [vmem:[#allocation3 + $0x2c0] sm:$0x1] }
 0x1b1   :  { %v1363_v60 = vadd.f32 %v1362_v8, %v1315_v18  ;;  %v1316_v31 = vsel %vm93_vm2, %v1253_v41, 0.0  ;;  %v1317_v30 = vsel %vm94_vm3, %v1254_v25, 0.0  ;;  %v1256_v16 = vadd.f32 %v1211_v62, %v6174_v51  ;;  %9937 = vst [vmem:[#allocation89_spill] sm:$0xff] %v6422_v39  ;;  %v9938_v32 = vld [vmem:[#allocation70_spill] sm:$0xff]  ;;  %v9939_v25 = vld [vmem:[#allocation15_spill] sm:$0xff] }
 0x1b2   :  { %v1213_v40 = vmul.f32 %v1168_v3, %v1168_v3  ;;  %v1215_v18 = vmul.f32 %v1170_v55, %v1170_v55  ;;  %v1214_v8 = vmul.f32 %v1169_v38, %v1169_v38  ;;  %v1085_v1 = vsel %vm292_vm0, %v1039_v48, %v6207_v15  ;;  %v4122_v38 = vld [vmem:[#allocation3 + $0x408] sm:$0x1] }
 0x1b3   :  { %v1364_v44 = vadd.f32 %v1363_v60, %v1316_v31  ;;  %v777_v20 = vsub.f32 %v4120_v37, %v688_v28  ;;  %v1216_v45 = vmul.f32 %v1171_v14, %v1171_v14  ;;  %v1173_v49 = vsub.f32 %v4121_v47, %v1084_v33  ;;  %v9940_v60 = vld [vmem:[#allocation16_spill] sm:$0xff] }
 0x1b4   :  { %v1217_v41 = vmul.f32 %v1172_v4, %v1172_v4  ;;  %1706 = vrot.lane.b32.xlu0 %v9938_v32, %s4444_s0  ;;  %v6429_v51 = vadd.f32 %v819_v61, %v9939_v25  ;;  %v1318_v62 = vsel %vm95_vm4, %v1255_v42, 0.0  ;;  %v1257_v55 = vadd.f32 %v1212_v27, %v6202_v58 }
 0x1b5   :  { %v1365_v3 = vadd.f32 %v1364_v44, %v1317_v30  ;;  %v1319_v48 = vsel %vm96_vm5, %v1256_v16, 0.0  ;;  %v1258_v28 = vadd.f32 %v1213_v40, %v6224_v17  ;;  %v1086_v4 = vsel %vm292_vm0, %v6207_v15, %v1043_v21  ;;  %v1047_v30 = vpop.permute.xlu1 %1046  ;;  %v6446_v40 = vpop.permute.xlu0 %1670  ;;  %v9942_v15 = vld [vmem:[#allocation69_spill] sm:$0xff] }
 0x1b6   :  { %v1174_v14 = vsub.f32 %v4122_v38, %v1085_v1  ;;  %v865_v33 = vadd.f32 %v820_v50, %v9940_v60  ;;  %v1260_v31 = vadd.f32 %v1215_v18, %v6279_v52  ;;  %v1259_v42 = vadd.f32 %v1214_v8, %v6235_v12  ;;  %9941 = vst [vmem:[#allocation133_spill] sm:$0xff] %v6446_v40  ;;  %v4123_v52 = vld [vmem:[#allocation3 + $0x410] sm:$0x1] }
 0x1b7   :  { %v1366_v61 = vadd.f32 %v1365_v3, %v1318_v62  ;;  %v1261_v58 = vadd.f32 %v1216_v45, %v6329_v10  ;;  %v1218_v27 = vmul.f32 %v1173_v49, %v1173_v49  ;;  %v1262_v16 = vadd.f32 %v1217_v41, %v6352_v63  ;;  %v4125_v62 = vld [vmem:[#allocation3 + $0x420] sm:$0x1] }
 0x1b8   :  { %v1087_v17 = vsel %vm292_vm0, %v1043_v21, %v6248_v19  ;;  %1708 = vrot.lane.b32.xlu0 %v9942_v15, %s4444_s0  ;;  %v821_v50 = vmul.f32 %v776_v29, %v776_v29  ;;  %v822_v44 = vmul.f32 %v777_v20, %v777_v20  ;;  %v1175_v18 = vsub.f32 %v4123_v52, %v1086_v4  ;;  %v4124_v20 = vld [vmem:[#allocation3 + $0x418] sm:$0x1] }
 0x1b9   :  { %v1367_v1 = vadd.f32 %v1366_v61, %v1319_v48  ;;  %v1320_v12 = vsel %vm97_vm6, %v1257_v55, 0.0  ;;  %v1321_v10 = vsel %vm98_vm7, %v1258_v28, 0.0  ;;  %v1219_v63 = vmul.f32 %v1174_v14, %v1174_v14  ;;  %v6470_v7 = vpop.permute.xlu0 %1672  ;;  %v9944_v48 = vld [vmem:[#allocation61_spill] sm:$0xff]  ;;  %v9946_v28 = vld [vmem:[#allocation60_spill] sm:$0xff]  ;;  %v9949_v14 = vld [vmem:[#allocation58_spill] sm:$0xff] }
 0x1ba   :  { %v1088_v21 = vsel %vm292_vm0, %v6248_v19, %v1047_v30  ;;  %v1323_v37 = vsel %vm100_vm9, %v1260_v31, 0.0  ;;  %v1322_v29 = vsel %vm99_vm8, %v1259_v42, 0.0  ;;  %v1176_v45 = vsub.f32 %v4124_v20, %v1087_v17  ;;  %9943 = vst [vmem:[#allocation130_spill] sm:$0xff] %v6470_v7 }
 0x1bb   :  { %v1368_v8 = vadd.f32 %v1367_v1, %v1320_v12  ;;  %v1324_v47 = vsel %vm92_vm1, %v1261_v58, 0.0  ;;  %v1263_v49 = vadd.f32 %v1218_v27, %v6358_v26  ;;  %v1325_v41 = vsel %vm93_vm2, %v1262_v16, 0.0  ;;  %v9950_v27 = vld [vmem:[#allocation47_spill] sm:$0xff]  ;;  %v9951_v16 = vld [vmem:[#allocation18_spill] sm:$0xff] }
 0x1bc   :  { %v1089_v19 = vsel %vm292_vm0, %v1047_v30, %v6283_v54  ;;  %2016 = vrot.lane.b32.xlu0 %v6220_v6, %s4444_s0  ;;  %v1220_v25 = vmul.f32 %v1175_v18, %v1175_v18  ;;  %v1177_v3 = vsub.f32 %v4125_v62, %v1088_v21  ;;  %v1264_v55 = vadd.f32 %v1219_v63, %v6379_v22  ;;  %v9948_v6 = vld [vmem:[#allocation66_spill] sm:$0xff]  ;;  %v4126_v22 = vld [vmem:[#allocation3 + $0x428] sm:$0x1] }
 0x1bd   :  { %v1369_v32 = vadd.f32 %v1368_v8, %v1321_v10  ;;  %v9945_v26 = vmax.f32 %v9944_v48, 0.0  ;;  %v9947_v4 = vmax.f32 %v9946_v28, 0.0  ;;  %v3234_v60 = vadd.f32 %v9949_v14, %v9948_v6 }
 0x1be   :  { %v1371_v61 = vsel %vm1340_vm10, %v1323_v37, 0.0  ;;  %v1221_v42 = vmul.f32 %v1176_v45, %v1176_v45  ;;  %v1178_v30 = vsub.f32 %v4126_v22, %v1089_v19  ;;  %v1374_v58 = vsel %vm1373_vm11, %v1324_v47, 0.0  ;;  %v4127_v37 = vld [vmem:[#allocation3 + $0x430] sm:$0x1] }
 0x1bf   :  { %v3182_v59 = vsel %vm99_vm8, %v9945_v26, 0.0  ;;  %v3183_v38 = vsel %vm100_vm9, %v9947_v4, 0.0  ;;  %v1370_v31 = vadd.f32 %v1369_v32, %v1322_v29  ;;  %v3235_v17 = vsel %vm1373_vm11, %v9951_v16, 0.0  ;;  %v9960_v26 = vld [vmem:[#allocation62_spill] sm:$0xff]  ;;  %v9962_v22 = vld [vmem:[#allocation140_spill] sm:$0xff]  ;;  %v9966_v16 = vld [vmem:[#allocation129_spill] sm:$0xff] }
 0x1c0   :  { %1710 = vrot.lane.b32.xlu0 %v9950_v27, %s4444_s0  ;;  %v3237_v15 = vsel %vm1373_vm11, %v3182_v59, 0.0  ;;  %v3239_v1 = vsel %vm1390_vm13, %v3183_v38, 0.0  ;;  %v1326_v18 = vsel %vm94_vm3, %v1263_v49, 0.0  ;;  %v1376_v12 = vsel %vm1373_vm11, %v1325_v41, 0.0  ;;  %v9964_v27 = vld [vmem:[#allocation147_spill] sm:$0xff] }
 0x1c1   :  { %v1372_v52 = vadd.f32 %v1371_v61, %v1370_v31  ;;  %v3236_v10 = vadd.f32 %v3235_v17, %v3234_v60  ;;  %v1265_v63 = vadd.f32 %v1220_v25, %v6429_v51  ;;  %v1327_v21 = vsel %vm95_vm4, %v1264_v55, 0.0  ;;  %v9955_v51 = vld [vmem:[#allocation20_spill] sm:$0xff]  ;;  %v9956_v25 = vld [vmem:[#allocation19_spill] sm:$0xff]  ;;  %v6506_v55 = vpop.permute.xlu0 %1408 }
 0x1c2   :  { %v1222_v8 = vmul.f32 %v1177_v3, %v1177_v3  ;;  %v1179_v29 = vsub.f32 %v4127_v37, %v6283_v54  ;;  %v1266_v45 = vadd.f32 %v1221_v42, %v865_v33  ;;  %v1223_v47 = vmul.f32 %v1178_v30, %v1178_v30  ;;  %9957 = vst [vmem:[#allocation51_spill] sm:$0xff] %v6506_v55  ;;  %v6508_v54 = vld [vmem:[#allocation3 + $0xb0] sm:$0xff]  ;;  %v9959_v33 = vld [vmem:[#allocation85_spill] sm:$0xff]  ;;  %v9963_v30 = vld [vmem:[#allocation142_spill] sm:$0xff] }
 0x1c3   :  { %v1375_v20 = vadd.f32 %v1374_v58, %v1372_v52  ;;  %v3238_v19 = vadd.f32 %v3237_v15, %v3236_v10  ;;  %v9952_v32 = vrot.slane %v9904_v53, 1  ;;  %v9954_v49 = vrot.slane %v9953_v36, 1  ;;  %9958 = vst [vmem:[#allocation92_spill] sm:$0xff] %v6508_v54 }
 0x1c4   :  { %v9409_v62 = vrot.slane %v6314_v2, 1  ;;  %v467_v9 = vmul.f32 %v9955_v51, %v9955_v51  ;;  %v866_v3 = vadd.f32 %v821_v50, %v9956_v25  ;;  %1446 = vrot.lane.b32.xlu0 %v6508_v54, %s4444_s0  ;;  %v823_v48 = vmul.f32 %v9959_v33, %v9959_v33  ;;  %v4131_v25 = vld [vmem:[#allocation3 + $0x40] sm:$0xff]  ;;  %v6565_v33 = vld [vmem:[#allocation3 + $0x38] sm:$0xff] }
 0x1c5   :  { %v2374_v41 = vsel %vm2356_vm12, %v9954_v49, %v9952_v32  ;;  %v867_v59 = vadd.f32 %v822_v44, %v9960_v26  ;;  %v1377_v28 = vadd.f32 %v1376_v12, %v1375_v20  ;;  %v6515_v4 = vadd.f32 %v3239_v1, %v3238_v19  ;;  %v6555_v19 = vpop.permute.xlu0 %1674  ;;  %v9974_v26 = vld [vmem:[#allocation112_spill] sm:$0xff] }
 0x1c6   :  { %v1378_v38 = vsel %vm1373_vm11, %v1326_v18, 0.0  ;;  %v1328_v50 = vsel %vm96_vm5, %v1265_v63, 0.0  ;;  %v1380_v6 = vsel %vm1373_vm11, %v1327_v21, 0.0  ;;  %v1267_v14 = vadd.f32 %v1222_v8, %v866_v3  ;;  %v9970_v18 = vld [vmem:[#allocation84_spill] sm:$0xff]  ;;  %v6547_v8 = vld [vmem:[#allocation3 + $0x28] sm:$0xff]  ;;  %9972 = vst [vmem:[#allocation144_spill] sm:$0xff] %v6555_v19 }
 0x1c7   :  { %9961 = vst [vmem:[#allocation91_spill] sm:$0xff] %v6515_v4  ;;  %v1379_v60 = vadd.f32 %v1378_v38, %v1377_v28  ;;  %v1329_v61 = vsel %vm97_vm6, %v1266_v45, 0.0  ;;  %v1224_v31 = vmul.f32 %v1179_v29, %v1179_v29  ;;  %v1268_v42 = vadd.f32 %v1223_v47, %v867_v59  ;;  %v6550_v29 = vld [vmem:[#allocation3 + $0x90] sm:$0xff] }
 0x1c8   :  { %v6525_v44 = vmul.f32 %v9962_v22, %v9962_v22  ;;  %v6529_v58 = vmul.f32 %v9963_v30, %v9963_v30  ;;  %v9965_v56 = vrot.slane %v9964_v27, 1  ;;  %v9967_v17 = vrot.slane %v9966_v16, 1  ;;  %2020 = vrot.lane.b32.xlu0 %v9970_v18, %s4444_s0  ;;  %v6585_v22 = vld [vmem:[#allocation3 + $0xa8] sm:$0xff] }
 0x1c9   :  { %v9969_v1 = vrot.slane %v9968_v5, 1  ;;  %v6544_v12 = vmul.f32 0.03125, %v9887_v34  ;;  %v9406_v10 = vrot.slane %v6410_v24, 1  ;;  %v868_v63 = vadd.f32 %v823_v48, %v467_v9  ;;  %v9973_v9 = vld [vmem:[#allocation146_spill] sm:$0xff]  ;;  %v6593_v5 = vld [vmem:[#allocation3 + $0xb8] sm:$0xff] }
 0x1ca   :  { %v2383_v15 = vsel %vm2356_vm12, %v9967_v17, %v9965_v56  ;;  %v1381_v21 = vadd.f32 %v1380_v6, %v1379_v60  ;;  %v2479_v37 = vsub.f32 %v6547_v8, %v2374_v41  ;;  %v9408_v20 = vrot.slane %v6550_v29, 1  ;;  %v9978_v6 = vld [vmem:[#allocation102_spill] sm:$0xff]  ;;  %9981 = vst [vmem:[#allocation40_spill] sm:$0xff] %v6593_v5 }
 0x1cb   :  { %v2380_v52 = vsel %vm2356_vm12, %v9969_v1, %v9409_v62  ;;  %9971 = vst [vmem:[#allocation148_spill] sm:$0xff] %v6544_v12  ;;  %v1382_v45 = vsel %vm1373_vm11, %v1328_v50, 0.0  ;;  %v1384_v47 = vsel %vm1373_vm11, %v1329_v61, 0.0  ;;  %v1330_v36 = vsel %vm98_vm7, %v1267_v14, 0.0  ;;  %v9979_v61 = vld [vmem:[#allocation107_spill] sm:$0xff]  ;;  %v6590_v17 = vld [vmem:[#allocation3 + $0xa0] sm:$0xff] }
 0x1cc   :  { %v1383_v32 = vadd.f32 %v1382_v45, %v1381_v21  ;;  %v1269_v49 = vadd.f32 %v1224_v31, %v868_v63  ;;  %v1331_v51 = vsel %vm99_vm8, %v1268_v42, 0.0  ;;  %v6563_v41 = vmul.f32 %v9973_v9, %v9973_v9  ;;  %1714 = vrot.lane.b32.xlu0 %v9975_v46, %s4444_s0  ;;  %v6602_v45 = vld [vmem:[#allocation3 + $0x88] sm:$0xff]  ;;  %v9998_v62 = vld [vmem:[#allocation104_spill] sm:$0xff] }
 0x1cd   :  { %v2482_v3 = vsub.f32 %v4131_v25, %v2383_v15  ;;  %v2481_v48 = vsub.f32 %v6565_v33, %v2380_v52  ;;  %v3554_v59 = vsub.f32 %v6314_v2, %v9974_v26  ;;  %v3546_v28 = vsub.f32 %v4131_v25, %v6544_v12  ;;  %9983 = vst [vmem:[#allocation150_spill] sm:$0xff] %v6602_v45  ;;  %v4139_v9 = vld [vmem:[#allocation3 + $0x48] sm:$0xff] }
 0x1ce   :  { %v9977_v38 = vrot.slane %v9976_v35, 1  ;;  %v3557_v14 = vsub.f32 %v6410_v24, %v9978_v6  ;;  %v1385_v60 = vadd.f32 %v1384_v47, %v1383_v32  ;;  %v9980_v31 = vrot.slane %v9979_v61, 1 }
 0x1cf   :  { %v9404_v30 = vrot.slane %v6585_v22, 1  ;;  %v1386_v56 = vsel %vm1373_vm11, %v1330_v36, 0.0  ;;  %v1388_v16 = vsel %vm1373_vm11, %v1331_v51, 0.0  ;;  %v9407_v15 = vrot.slane %v6590_v17, 1  ;;  %v6608_v36 = vpop.permute.xlu0 %1978  ;;  %v6610_v51 = vld [vmem:[#allocation3 + $0xc0] sm:$0xff] }
 0x1d0   :  { %v2387_v50 = vsel %vm2356_vm12, %v9977_v38, %v9406_v10  ;;  %v2385_v42 = vsel %vm2356_vm12, %v9980_v31, %v9408_v20  ;;  %v9405_v1 = vrot.slane %v6593_v5, 1  ;;  %v1332_v52 = vsel %vm100_vm9, %v1269_v49, 0.0  ;;  %9984 = vst [vmem:[#allocation149_spill] sm:$0xff] %v6608_v36  ;;  %9985 = vst [vmem:[#allocation52_spill] sm:$0xff] %v6610_v51  ;;  %1450 = vrot.lane.b32.xlu0 %v6610_v51, %s4444_s0 }
 0x1d1   :  { %v1387_v18 = vadd.f32 %v1386_v56, %v1385_v60  ;;  %v6598_v63 = vmul.f32 %v2479_v37, %v2479_v37  ;;  %v6600_v21 = vmul.f32 %v2482_v3, %v2482_v3  ;;  %v3555_v47 = vsub.f32 %v6602_v45, %v6544_v12  ;;  %v6616_v37 = vld [vmem:[#allocation3 + $0x50] sm:$0xff] }
 0x1d2   :  { %v6606_v32 = vmul.f32 %v2481_v48, %v2481_v48  ;;  %v6614_v34 = vmul.f32 %v3554_v59, %v3554_v59  ;;  %v2484_v49 = vsub.f32 %v6616_v37, %v2387_v50  ;;  %v2483_v25 = vsub.f32 %v4139_v9, %v2385_v42  ;;  %v9987_v48 = vld [vmem:[#allocation123_spill] sm:$0xff]  ;;  %v9989_v50 = vld [vmem:[#allocation109_spill] sm:$0xff]  ;;  %v9992_v9 = vld [vmem:[#allocation98_spill] sm:$0xff] }
 0x1d3   :  { %9982 = vst [vmem:[#allocation50_spill] sm:$0xff] %v6600_v21  ;;  %v1389_v3 = vadd.f32 %v1388_v16, %v1387_v18  ;;  %v6619_v46 = vmul.f32 %v3557_v14, %v3557_v14  ;;  %v9988_v35 = vrot.slane %v9987_v48, 1  ;;  %v1391_v59 = vsel %vm1390_vm13, %v1332_v52, 0.0  ;;  %v6664_v55 = vpop.permute.xlu0 %1982 }
 0x1d4   :  { %v6628_v61 = vmul.f32 %v3546_v28, %v3546_v28  ;;  %v9990_v31 = vrot.slane %v9989_v50, 1  ;;  %v9991_v14 = vrot.slane %v9904_v53, 1  ;;  %v6640_v18 = vmul.f32 %v3555_v47, %v3555_v47  ;;  %v9993_v28 = vld [vmem:[#allocation101_spill] sm:$0xff]  ;;  %v6654_v47 = vld [vmem:[#allocation3 + $0xc8] sm:$0xff]  ;;  %10002 = vst [vmem:[#allocation106_spill] sm:$0xff] %v6664_v55 }
 0x1d5   :  { %9986 = vst [vmem:[#allocation42_spill] sm:$0xff] %v6619_v46  ;;  %v2391_v38 = vsel %vm2356_vm12, %v9988_v35, %v9404_v30  ;;  %v1392_v16 = vadd.f32 %v1391_v59, %v1389_v3  ;;  %v3556_v52 = vsub.f32 %v6550_v29, %v9992_v9  ;;  %v3559_v48 = vsub.f32 %v6585_v22, %v9993_v28  ;;  %v9994_v35 = vld [vmem:[#allocation100_spill] sm:$0xff]  ;;  %v6669_v59 = vld [vmem:[#allocation3 + $0xd8] sm:$0xff]  ;;  %v10113_v46 = vld [vmem:[#allocation131_spill] sm:$0xff] }
 0x1d6   :  { %v2389_v42 = vsel %vm2356_vm12, %v9990_v31, %v9407_v15  ;;  %v2395_v56 = vsel %vm2356_vm12, %v9991_v14, %v9405_v1  ;;  %v3558_v50 = vsub.f32 %v6590_v17, %v9994_v35  ;;  %v9995_v31 = vld [vmem:[#allocation83_spill] sm:$0xff]  ;;  %v6650_v30 = vmul.f32 %v2484_v49, %v2484_v49  ;;  %v4140_v14 = vld [vmem:[#allocation3 + $0x60] sm:$0xff]  ;;  %9997 = vst [vmem:[#allocation32_spill] sm:$0xff] %v6654_v47  ;;  %v4142_v1 = vld [vmem:[#allocation3 + $0x58] sm:$0xff] }
 0x1d7   :  { %2024 = vrot.lane.b32.xlu0 %v9995_v31, %s4444_s0  ;;  %v6652_v53 = vmul.f32 %v2483_v25, %v2483_v25  ;;  %v2486_v3 = vsub.f32 %v4140_v14, %v2391_v38  ;;  %1393 = vadd.xlane.f32.xlu1 %v1392_v16  ;;  %v2485_v10 = vsub.f32 %v4142_v1, %v2389_v42  ;;  %v4143_v15 = vld [vmem:[#allocation3 + $0x70] sm:$0xff]  ;;  %v9999_v31 = vrot.slane %v6508_v54, 1  ;;  %v10000_v49 = vld [vmem:[#allocation113_spill] sm:$0xff] }
 0x1d8   :  { %9996 = vst [vmem:[#allocation30_spill] sm:$0xff] %v6650_v30  ;;  %v2488_v20 = vsub.f32 %v4143_v15, %v2395_v56  ;;  %v3561_v60 = vsub.f32 %v6593_v5, %v9998_v62  ;;  %v10001_v4 = vrot.slane %v10000_v49, 1  ;;  %v10003_v38 = vld [vmem:[#allocation108_spill] sm:$0xff]  ;;  %v6675_v56 = vmul.f32 %v3556_v52, %v3556_v52  ;;  %v10007_v5 = vld [vmem:[#allocation71_spill] sm:$0xff]  ;;  %v6987_v30 = vld [vmem:[#allocation3 + $0x1a0] sm:$0xff] }
 0x1d9   :  { %v3560_v14 = vsub.f32 %v6508_v54, %v10003_v38  ;;  %v6672_v1 = vld [vmem:[#allocation3 + $0xd0] sm:$0xff]  ;;  %v6677_v49 = vmul.f32 %v3559_v48, %v3559_v48  ;;  %v6685_v16 = vmul.f32 %v2486_v3, %v2486_v3  ;;  %v6687_v54 = vld [vmem:[#allocation3 + $0x68] sm:$0xff]  ;;  %v10010_v42 = vrot.slane %v6654_v47, 1  ;;  %v4148_v3 = vld [vmem:[#allocation3 + $0xe0] sm:$0xff] }
 0x1da   :  { %v2393_v25 = vsel %vm2356_vm12, %v10001_v4, %v9999_v31  ;;  %10004 = vst [vmem:[#allocation33_spill] sm:$0xff] %v6672_v1  ;;  %v6679_v4 = vmul.f32 %v3558_v50, %v3558_v50  ;;  %v3563_v31 = vsub.f32 %v6654_v47, %v9974_v26  ;;  %10009 = vst [vmem:[#allocation48_spill] sm:$0xff] %v6687_v54  ;;  %v10011_v52 = vrot.slane %v6314_v2, 1  ;;  %v6695_v50 = vld [vmem:[#allocation3 + $0xe8] sm:$0xff]  ;;  %v10017_v47 = vld [vmem:[#allocation125_spill] sm:$0xff] }
 0x1db   :  { %10005 = vst [vmem:[#allocation34_spill] sm:$0xff] %v6677_v49  ;;  %1718 = vrot.lane.b32.xlu0 %v10007_v5, %s4444_s0  ;;  %10008 = vst [vmem:[#allocation17_spill] sm:$0xff] %v6685_v16  ;;  %v2487_v15 = vsub.f32 %v6687_v54, %v2393_v25  ;;  %v6698_v36 = vmul.f32 %v2485_v10, %v2485_v10  ;;  %v6700_v19 = vmul.f32 %v2488_v20, %v2488_v20  ;;  %vm2295_vm0 = vcmask 261120  }
 0x1dc   :  { %10006 = vst [vmem:[#allocation53_spill] sm:$0xff] %v6679_v4  ;;  %v2399_v48 = vsel %vm2356_vm12, %v10011_v52, %v10010_v42  ;;  %v6702_v5 = vmul.f32 %v3561_v60, %v3561_v60  ;;  %v2404_v43 = vrot.slane %v4148_v3, 1  ;;  %v6704_v7 = vmul.f32 %v3560_v14, %v3560_v14 }
 0x1dd   :  { %10012 = vst [vmem:[#allocation36_spill] sm:$0xff] %v6698_v36  ;;  %10013 = vst [vmem:[#allocation59_spill] sm:$0xff] %v6700_v19  ;;  %v10016_v25 = vrot.slane %v6610_v51, 1  ;;  %v10018_v39 = vrot.slane %v10017_v47, 1  ;;  %v10019_v52 = vrot.slane %v6669_v59, 1  ;;  %v10020_v55 = vrot.slane %v6550_v29, 1 }
 0x1de   :  { %10014 = vst [vmem:[#allocation54_spill] sm:$0xff] %v6702_v5  ;;  %10015 = vst [vmem:[#allocation35_spill] sm:$0xff] %v6704_v7  ;;  %v10021_v20 = vrot.slane %v6672_v1, 1  ;;  %v10022_v60 = vrot.slane %v9964_v27, 1  ;;  %v2490_v14 = vsub.f32 %v6314_v2, %v2399_v48  ;;  %v6722_v19 = vmul.f32 %v3563_v31, %v3563_v31  ;;  %v10024_v5 = vld [vmem:[#allocation117_spill] sm:$0xff] }
 0x1df   :  { %v2397_v42 = vsel %vm2356_vm12, %v10018_v39, %v10016_v25  ;;  %v2403_v10 = vsel %vm2356_vm12, %v10020_v55, %v10019_v52  ;;  %v3562_v47 = vsub.f32 %v6610_v51, %v10024_v5  ;;  %v3565_v39 = vsub.f32 %v6669_v59, %v9992_v9  ;;  %v6728_v25 = vpop.permute.xlu0 %1410  ;;  %1454 = vrot.lane.b32.xlu0 %v6672_v1, %s4444_s0  ;;  %v6741_v52 = vld [vmem:[#allocation3 + $0xf0] sm:$0xff] }
 0x1e0   :  { %v2401_v40 = vsel %vm2356_vm12, %v10022_v60, %v10021_v20  ;;  %10023 = vst [vmem:[#allocation55_spill] sm:$0xff] %v6722_v19  ;;  %10025 = vst [vmem:[#allocation63_spill] sm:$0xff] %v6728_v25  ;;  %v6732_v55 = vmul.f32 %v2487_v15, %v2487_v15  ;;  %v3564_v27 = vsub.f32 %v6672_v1, %v6544_v12  ;;  %v10027_v2 = vrot.slane %v6695_v50, 1  ;;  %v6744_v60 = vld [vmem:[#allocation3 + $0x78] sm:$0xff] }
 0x1e1   :  { %v10028_v31 = vrot.slane %v6590_v17, 1  ;;  %10029 = vst [vmem:[#allocation38_spill] sm:$0xff] %v6741_v52  ;;  %10030 = vst [vmem:[#allocation39_spill] sm:$0xff] %v6744_v60  ;;  %v2489_v51 = vsub.f32 %v6744_v60, %v2397_v42  ;;  %v2492_v15 = vsub.f32 %v6550_v29, %v2403_v10  ;;  %v2491_v25 = vsub.f32 %v6602_v45, %v2401_v40  ;;  %v10036_v10 = vld [vmem:[#allocation49_spill] sm:$0xff] }
 0x1e2   :  { %10026 = vst [vmem:[#allocation94_spill] sm:$0xff] %v6732_v55  ;;  %v10031_v1 = vrot.slane %v6410_v24, 1  ;;  %v3567_v16 = vsub.f32 %v6695_v50, %v9994_v35  ;;  %v6756_v55 = vld [vmem:[#allocation3 + $0x128] sm:$0x1]  ;;  %v6759_v60 = vmul.f32 %v2490_v14, %v2490_v14  ;;  %v6761_v29 = vmul.f32 %v3562_v47, %v3562_v47 }
 0x1e3   :  { %v2407_v48 = vsel %vm2356_vm12, %v10028_v31, %v10027_v2  ;;  %v3566_v2 = vsub.f32 %v4148_v3, %v9978_v6  ;;  %v4151_v31 = vld [vmem:[#allocation3 + $0xf8] sm:$0xff]  ;;  %10032 = vst [vmem:[#allocation57_spill] sm:$0xff] %v6756_v55  ;;  %v2422_v42 = vrot.slane %v6756_v55, 1  ;;  %v6763_v40 = vmul.f32 %v3565_v39, %v3565_v39  ;;  %2028 = vrot.lane.b32.xlu0 %v10036_v10, %s4444_s0  ;;  %v6784_v10 = vpop.permute.xlu0 %1676 }
 0x1e4   :  { %v2405_v19 = vsel %vm2356_vm12, %v10031_v1, %v2404_v43  ;;  %v3569_v20 = vsub.f32 %v4151_v31, %v10003_v38  ;;  %10033 = vst [vmem:[#allocation37_spill] sm:$0xff] %v6759_v60  ;;  %10034 = vst [vmem:[#allocation41_spill] sm:$0xff] %v6761_v29  ;;  %v2494_v1 = vsub.f32 %v6590_v17, %v2407_v48  ;;  %v10038_v31 = vrot.slane %v6741_v52, 1  ;;  %v4153_v48 = vld [vmem:[#allocation3 + $0x120] sm:$0x1] }
 0x1e5   :  { %10035 = vst [vmem:[#allocation43_spill] sm:$0xff] %v6763_v40  ;;  %v6768_v45 = vmul.f32 %v3564_v27, %v3564_v27  ;;  %v2493_v54 = vsub.f32 %v6410_v24, %v2405_v19  ;;  %v10039_v49 = vrot.slane %v6585_v22, 1  ;;  %v3568_v47 = vsub.f32 %v6741_v52, %v9993_v28  ;;  %10043 = vst [vmem:[#allocation93_spill] sm:$0xff] %v6784_v10 }
 0x1e6   :  { %v6778_v39 = vmul.f32 %v2489_v51, %v2489_v51  ;;  %v6780_v40 = vmul.f32 %v2492_v15, %v2492_v15  ;;  %v6782_v17 = vmul.f32 %v2491_v25, %v2491_v25  ;;  %v2420_v27 = vrot.slane %v4153_v48, 1  ;;  %v4154_v15 = vld [vmem:[#allocation3 + $0x108] sm:$0xff] }
 0x1e7   :  { %10037 = vst [vmem:[#allocation44_spill] sm:$0xff] %v6768_v45  ;;  %v2409_v14 = vsel %vm2356_vm12, %v10039_v49, %v10038_v31  ;;  %v6786_v24 = vmul.f32 %v3567_v16, %v3567_v16  ;;  %v6788_v19 = vmul.f32 %v3566_v2, %v3566_v2  ;;  %v6790_v60 = vmul.f32 %v3569_v20, %v3569_v20  ;;  %v6963_v45 = vld [vmem:[#allocation3 + $0x1a8] sm:$0xff] }
 0x1e8   :  { %10040 = vst [vmem:[#allocation45_spill] sm:$0xff] %v6778_v39  ;;  %10041 = vst [vmem:[#allocation65_spill] sm:$0xff] %v6780_v40  ;;  %v2423_v49 = vsel %vm2356_vm12, %v2404_v43, %v2422_v42  ;;  %v6793_v31 = vmul.f32 %v2494_v1, %v2494_v1  ;;  %v2495_v51 = vsub.f32 %v6585_v22, %v2409_v14  ;;  %v6797_v40 = vld [vmem:[#allocation3 + $0x100] sm:$0xff]  ;;  %1456 = vrot.lane.b32.xlu0 %v6669_v59, %s4444_s0  ;;  %v4156_v43 = vld [vmem:[#allocation3 + $0x118] sm:$0xff]  ;;  %vm2344_vm1 = vcmask 253952  }
 0x1e9   :  { %10042 = vst [vmem:[#allocation96_spill] sm:$0xff] %v6782_v17  ;;  %10044 = vst [vmem:[#allocation68_spill] sm:$0xff] %v6786_v24  ;;  %v3571_v25 = vsub.f32 %v4154_v15, %v10024_v5  ;;  %v3570_v10 = vsub.f32 %v6797_v40, %v9998_v62  ;;  %v6803_v16 = vmul.f32 %v2493_v54, %v2493_v54  ;;  %v6808_v42 = vld [vmem:[#allocation3 + $0x110] sm:$0xff]  ;;  %v10050_v15 = vrot.slane %v6669_v59, 1 }
 0x1ea   :  { %10045 = vst [vmem:[#allocation46_spill] sm:$0xff] %v6788_v19  ;;  %10046 = vst [vmem:[#allocation95_spill] sm:$0xff] %v6790_v60  ;;  %v6805_v20 = vmul.f32 %v3568_v47, %v3568_v47  ;;  %v3573_v2 = vsub.f32 %v4156_v43, %v6544_v12  ;;  %v3572_v22 = vsub.f32 %v6808_v42, %v9974_v26  ;;  %v6818_v47 = vld [vmem:[#allocation3 + $0x2d8] sm:$0xff]  ;;  %v6958_v19 = vld [vmem:[#allocation3 + $0x190] sm:$0xff]  ;;  %vm3967_vm2 = vcmask 524288  }
 0x1eb   :  { %10047 = vst [vmem:[#allocation119_spill] sm:$0xff] %v6793_v31  ;;  %10048 = vst [vmem:[#allocation11_spill] sm:$0xff] %v6803_v16  ;;  %v2502_v1 = vsub.f32 %v4148_v3, %v2423_v49  ;;  %v3575_v14 = vsub.f32 %v6756_v55, %v9978_v6  ;;  %v2421_v5 = vsel %vm2356_vm12, %v10050_v15, %v2420_v27  ;;  %1980 = vrot.lane.b32.xlu1 %v6818_v47, %s4444_s0  ;;  %v6822_v43 = vld [vmem:[#allocation3 + $0x138] sm:$0x1]  ;;  %v4160_v3 = vld [vmem:[#allocation3 + $0x130] sm:$0x1] }
 0x1ec   :  { %10049 = vst [vmem:[#allocation143_spill] sm:$0xff] %v6805_v20  ;;  %v3574_v54 = vsub.f32 %v4153_v48, %v9992_v9  ;;  %10051 = vst [vmem:[#allocation10_spill] sm:$0xff] %v6822_v43  ;;  %v3577_v12 = vsub.f32 %v6822_v43, %v9993_v28  ;;  %v2424_v49 = vrot.slane %v4160_v3, 1  ;;  %v3576_v6 = vsub.f32 %v4160_v3, %v9994_v35  ;;  %v10052_v26 = vld [vmem:[#allocation21_spill] sm:$0xff]  ;;  %v10057_v15 = vld [vmem:[#allocation23_spill] sm:$0xff]  ;;  %v6841_v20 = vpop.permute.xlu0 %1984 }
 0x1ed   :  { %v10053_v62 = vfloor.f32 %v10052_v26  ;;  %v6831_v27 = vmul.f32 %v2495_v51, %v2495_v51  ;;  %v6833_v9 = vmul.f32 %v3571_v25, %v3571_v25  ;;  %v6835_v48 = vmul.f32 %v3570_v10, %v3570_v10  ;;  %10059 = vst [vmem:[#allocation64_spill] sm:$0xff] %v6841_v20  ;;  %v6843_v28 = vld [vmem:[#allocation3 + $0x240] sm:$0xff]  ;;  %v6976_v55 = vld [vmem:[#allocation3 + $0x1c8] sm:$0xff] }
 0x1ee   :  { %v10058_v31 = vfloor.f32 %v10057_v15  ;;  %10060 = vst [vmem:[#allocation105_spill] sm:$0xff] %v6843_v28  ;;  %1722 = vrot.lane.b32.xlu0 %v6843_v28, %s4444_s0  ;;  %v6847_v26 = vmul.f32 %v3573_v2, %v3573_v2  ;;  %v2501_v35 = vsub.f32 %v6669_v59, %v2421_v5  ;;  %v10063_v51 = vld [vmem:[#allocation22_spill] sm:$0xff]  ;;  %v6856_v3 = vmul.f32 %v2502_v1, %v2502_v1  ;;  %v6874_v1 = vld [vmem:[#allocation3 + $0x168] sm:$0xff] }
 0x1ef   :  { %v6829_v60 = vmul.f32 0.03125, %v10053_v62  ;;  %10054 = vst [vmem:[#allocation99_spill] sm:$0xff] %v6831_v27  ;;  %10055 = vst [vmem:[#allocation97_spill] sm:$0xff] %v6833_v9  ;;  %v6849_v62 = vmul.f32 %v3572_v22, %v3572_v22  ;;  %v10064_v10 = vfloor.f32 %v10063_v51  ;;  %v6860_v15 = vmul.f32 %v3574_v54, %v3574_v54  ;;  %1412 = vrot.lane.b32.xlu1 %v6547_v8, %s4444_s0  ;;  %v6878_v54 = vld [vmem:[#allocation3 + $0x148] sm:$0x1]  ;;  %v4166_v51 = vld [vmem:[#allocation3 + $0x170] sm:$0xff] }
 0x1f0   :  { %10056 = vst [vmem:[#allocation9_spill] sm:$0xff] %v6835_v48  ;;  %v6839_v24 = vmul.f32 0.03125, %v10058_v31  ;;  %10061 = vst [vmem:[#allocation103_spill] sm:$0xff] %v6847_v26  ;;  %v6858_v31 = vmul.f32 %v3575_v14, %v3575_v14  ;;  %v6865_v2 = vmul.f32 %v3577_v12, %v3577_v12  ;;  %v10070_v22 = vrot.slane %v6695_v50, 1  ;;  %v10090_v9 = vld [vmem:[#allocation31_spill] sm:$0xff]  ;;  %v6931_v48 = vld [vmem:[#allocation3 + $0x1b8] sm:$0xff] }
 0x1f1   :  { %10062 = vst [vmem:[#allocation114_spill] sm:$0xff] %v6849_v62  ;;  %v6854_v25 = vmul.f32 0.03125, %v10064_v10  ;;  %10066 = vst [vmem:[#allocation73_spill] sm:$0xff] %v6856_v3  ;;  %v6872_v5 = vmul.f32 %v3576_v6, %v3576_v6  ;;  %v3592_v14 = vsub.f32 %v6874_v1, %v6829_v60  ;;  %v6881_v10 = vld [vmem:[#allocation3 + $0x140] sm:$0x1]  ;;  %v6894_v20 = vmul.f32 %v2501_v35, %v2501_v35 }
 0x1f2   :  { %10067 = vst [vmem:[#allocation13_spill] sm:$0xff] %v6858_v31  ;;  %10068 = vst [vmem:[#allocation80_spill] sm:$0xff] %v6860_v15  ;;  %v6870_v59 = vsel %vm2356_vm12, %v10070_v22, %v2424_v49  ;;  %v3578_v8 = vsub.f32 %v6881_v10, %v10003_v38  ;;  %v6886_v49 = vld [vmem:[#allocation3 + $0x178] sm:$0xff]  ;;  %v6890_v22 = vpop.permute.xlu0 %1678  ;;  %1460 = vrot.lane.b32.xlu0 %v6695_v50, %s4444_s0  ;;  %v10077_v3 = vld [vmem:[#allocation26_spill] sm:$0xff]  ;;  %v2546_v35 = vrot.slane %v6874_v1, 1  ;;  %v10091_v50 = vfloor.f32 %v10090_v9 }
 0x1f3   :  { %10065 = vst [vmem:[#allocation74_spill] sm:$0xff] %v6854_v25  ;;  %10069 = vst [vmem:[#allocation78_spill] sm:$0xff] %v6865_v2  ;;  %v3594_v6 = vsub.f32 %v6886_v49, %v6839_v24  ;;  %v3593_v2 = vsub.f32 %v4166_v51, %v6854_v25  ;;  %v10078_v12 = vfloor.f32 %v10077_v3  ;;  %v10079_v38 = vld [vmem:[#allocation24_spill] sm:$0xff]  ;;  %v6905_v31 = vld [vmem:[#allocation3 + $0x158] sm:$0x1]  ;;  %v2561_v17 = vrot.slane %v6958_v19, 1 }
 0x1f4   :  { %10071 = vst [vmem:[#allocation75_spill] sm:$0xff] %v6870_v59  ;;  %10072 = vst [vmem:[#allocation76_spill] sm:$0xff] %v6872_v5  ;;  %v6908_v5 = vld [vmem:[#allocation3 + $0x150] sm:$0x1]  ;;  %v6927_v62 = vmul.f32 0.03125, %v10091_v50  ;;  %v4172_v50 = vld [vmem:[#allocation3 + $0x180] sm:$0xff]  ;;  %v3602_v7 = vsub.f32 %v6931_v48, %v6854_v25 }
 0x1f5   :  { %10073 = vst [vmem:[#allocation14_spill] sm:$0xff] %v6878_v54  ;;  %10074 = vst [vmem:[#allocation79_spill] sm:$0xff] %v6881_v10  ;;  %v6899_v59 = vmul.f32 0.03125, %v10078_v12  ;;  %v10080_v54 = vfloor.f32 %v10079_v38  ;;  %v6916_v3 = vld [vmem:[#allocation3 + $0x2f0] sm:$0xff]  ;;  %v10087_v38 = vld [vmem:[#allocation25_spill] sm:$0xff]  ;;  %v10102_v29 = vrot.slane %v6931_v48, 1 }
 0x1f6   :  { %10075 = vst [vmem:[#allocation56_spill] sm:$0xff] %v6890_v22  ;;  %10076 = vst [vmem:[#allocation118_spill] sm:$0xff] %v6894_v20  ;;  %v10083_v20 = vld [vmem:[#allocation28_spill] sm:$0xff]  ;;  %1986 = vrot.lane.b32.xlu1 %v6916_v3, %s4444_s0  ;;  %v10088_v22 = vfloor.f32 %v10087_v38  ;;  %v6934_v27 = vpop.permute.xlu0 %1414  ;;  %2032 = vrot.lane.b32.xlu0 %v6325_v57, %s4444_s0  ;;  %v2555_v38 = vrot.slane %v4172_v50, 1  ;;  %v6944_v12 = vld [vmem:[#allocation3 + $0x198] sm:$0xff]  ;;  %v10107_v36 = vrot.slane %v6976_v55, 1 }
 0x1f7   :  { %v6903_v43 = vmul.f32 0.03125, %v10080_v54  ;;  %10081 = vst [vmem:[#allocation67_spill] sm:$0xff] %v6905_v31  ;;  %10082 = vst [vmem:[#allocation77_spill] sm:$0xff] %v6908_v5  ;;  %v10084_v26 = vfloor.f32 %v10083_v20  ;;  %v3732_v54 = vmul.f32 %v3592_v14, %v3592_v14  ;;  %v6929_v5 = vmul.f32 %v3578_v8, %v3578_v8  ;;  %v10095_v57 = vld [vmem:[#allocation27_spill] sm:$0xff] }
 0x1f8   :  { %10086 = vst [vmem:[#allocation82_spill] sm:$0xff] %v6916_v3  ;;  %v6923_v31 = vmul.f32 0.03125, %v10088_v22  ;;  %10092 = vst [vmem:[#allocation70_spill] sm:$0xff] %v6927_v62  ;;  %v3734_v20 = vmul.f32 %v3594_v6, %v3594_v6  ;;  %v3733_v14 = vmul.f32 %v3593_v2, %v3593_v2  ;;  %v6938_v22 = vld [vmem:[#allocation3 + $0x188] sm:$0xff]  ;;  %v10096_v2 = vfloor.f32 %v10095_v57  ;;  %v10104_v3 = vld [vmem:[#allocation122_spill] sm:$0xff] }
 0x1f9   :  { %v6914_v15 = vmul.f32 0.03125, %v10084_v26  ;;  %10093 = vst [vmem:[#allocation15_spill] sm:$0xff] %v6929_v5  ;;  %v2549_v26 = vrot.slane %v4166_v51, 1  ;;  %10094 = vst [vmem:[#allocation16_spill] sm:$0xff] %v6934_v27  ;;  %v3596_v8 = vsub.f32 %v6938_v22, %v6899_v59  ;;  %v3595_v6 = vsub.f32 %v4172_v50, %v6903_v43  ;;  %v10098_v9 = vld [vmem:[#allocation115_spill] sm:$0xff] }
 0x1fa   :  { %10089 = vst [vmem:[#allocation81_spill] sm:$0xff] %v6923_v31  ;;  %v6951_v27 = vmul.f32 0.03125, %v10096_v2  ;;  %1680 = vrot.lane.b32.xlu1 %v6944_v12, %s4444_s0  ;;  %v6956_v16 = vadd.f32 %v3732_v54, %v10098_v9  ;;  %v3597_v10 = vsub.f32 %v6958_v19, %v6923_v31  ;;  %v3600_v57 = vsub.f32 %v6963_v45, %v6927_v62  ;;  %v10100_v2 = vld [vmem:[#allocation120_spill] sm:$0xff]  ;;  %v6979_v23 = vpop.permute.xlu0 %1988 }
 0x1fb   :  { %10085 = vst [vmem:[#allocation12_spill] sm:$0xff] %v6914_v15  ;;  %v3598_v5 = vsub.f32 %v6944_v12, %v6914_v15  ;;  %v6968_v28 = vadd.f32 %v3734_v20, %v10100_v2  ;;  %v2551_v54 = vsel %vm2356_vm12, %v2549_v26, %v10102_v29  ;;  %v6973_v9 = vld [vmem:[#allocation3 + $0x1b0] sm:$0xff]  ;;  %10103 = vst [vmem:[#allocation66_spill] sm:$0xff] %v6979_v23  ;;  %1462 = vrot.lane.b32.xlu0 %v6741_v52, %s4444_s0  ;;  %v6993_v23 = vld [vmem:[#allocation3 + $0x1c0] sm:$0xff] }
 0x1fc   :  { %10097 = vst [vmem:[#allocation69_spill] sm:$0xff] %v6951_v27  ;;  %10099 = vst [vmem:[#allocation61_spill] sm:$0xff] %v6956_v16  ;;  %v6984_v20 = vadd.f32 %v3733_v14, %v10104_v3  ;;  %v3736_v2 = vmul.f32 %v3596_v8, %v3596_v8  ;;  %v3599_v39 = vsub.f32 %v6987_v30, %v6951_v27  ;;  %v10115_v21 = vrot.slane %v6993_v23, 1 }
 0x1fd   :  { %10101 = vst [vmem:[#allocation60_spill] sm:$0xff] %v6968_v28  ;;  %v3735_v28 = vmul.f32 %v3595_v6, %v3595_v6  ;;  %v3738_v26 = vmul.f32 %v3598_v5, %v3598_v5  ;;  %v3737_v3 = vmul.f32 %v3597_v10, %v3597_v10  ;;  %v3740_v14 = vmul.f32 %v3600_v57, %v3600_v57 }
 0x1fe   :  { %10105 = vst [vmem:[#allocation58_spill] sm:$0xff] %v6984_v20  ;;  %1416 = vrot.lane.b32.xlu1 %v6565_v33, %s4444_s0  ;;  %v2664_v8 = vsub.f32 %v4166_v51, %v2551_v54  ;;  %v3601_v5 = vsub.f32 %v6973_v9, %v6829_v60  ;;  %v10106_v6 = vrot.slane %v6973_v9, 1  ;;  %v2557_v16 = vsel %vm2356_vm12, %v2555_v38, %v10107_v36  ;;  %v7008_v20 = vld [vmem:[#allocation3 + $0x1d8] sm:$0xff]  ;;  %v7011_v10 = vpop.permute.xlu0 %1682  ;;  %v10109_v51 = vld [vmem:[#allocation126_spill] sm:$0xff]  ;;  %v7022_v38 = vld [vmem:[#allocation3 + $0x1d0] sm:$0xff] }
 0x1ff   :  { %v3604_v52 = vsub.f32 %v6976_v55, %v6903_v43  ;;  %10108 = vst [vmem:[#allocation47_spill] sm:$0xff] %v7011_v10  ;;  %2036 = vrot.lane.b32.xlu0 %v6346_v11, %s4444_s0  ;;  %v7016_v57 = vadd.f32 %v3736_v2, %v10109_v51  ;;  %v2567_v36 = vrot.slane %v6987_v30, 1  ;;  %v7026_v4 = vadd.f32 %v3738_v26, %v10113_v46  ;;  %v7033_v51 = vld [vmem:[#allocation3 + $0x300] sm:$0xff] }
 0x200   :  { %v2548_v29 = vsel %vm2356_vm12, %v2546_v35, %v10106_v6  ;;  %v10111_v35 = vld [vmem:[#allocation121_spill] sm:$0xff]  ;;  %v3739_v33 = vmul.f32 %v3599_v39, %v3599_v39  ;;  %v3742_v10 = vmul.f32 %v3602_v7, %v3602_v7  ;;  %v10116_v11 = vrot.slane %v6886_v49, 1 }
 0x201   :  { %10110 = vst [vmem:[#allocation18_spill] sm:$0xff] %v7016_v57  ;;  %v7019_v54 = vadd.f32 %v3735_v28, %v10111_v35  ;;  %10114 = vst [vmem:[#allocation20_spill] sm:$0xff] %v7026_v4  ;;  %v10117_v28 = vld [vmem:[#allocation124_spill] sm:$0xff]  ;;  %v2663_v6 = vsub.f32 %v6874_v1, %v2548_v29  ;;  %v3741_v46 = vmul.f32 %v3601_v5, %v3601_v5  ;;  %v10118_v57 = vrot.slane %v7008_v20, 1  ;;  %v10123_v29 = vld [vmem:[#allocation127_spill] sm:$0xff] }
 0x202   :  { %v2554_v2 = vsel %vm2356_vm12, %v10116_v11, %v10115_v21  ;;  %1990 = vrot.lane.b32.xlu1 %v7033_v51, %s4444_s0  ;;  %v7038_v35 = vadd.f32 %v3737_v3, %v10117_v28  ;;  %v2666_v26 = vsub.f32 %v4172_v50, %v2557_v16  ;;  %v7042_v7 = vadd.f32 %v3740_v14, %v6628_v61  ;;  %v7047_v11 = vpop.permute.xlu0 %1418  ;;  %v10124_v14 = vld [vmem:[#allocation137_spill] sm:$0xff]  ;;  %v7069_v5 = vld [vmem:[#allocation3 + $0x1e8] sm:$0xff] }
 0x203   :  { %10112 = vst [vmem:[#allocation111_spill] sm:$0xff] %v7019_v54  ;;  %v2700_v39 = vmul.f32 %v2664_v8, %v2664_v8  ;;  %v3744_v4 = vmul.f32 %v3604_v52, %v3604_v52  ;;  %v2563_v21 = vsel %vm2356_vm12, %v2561_v17, %v10118_v57  ;;  %10119 = vst [vmem:[#allocation19_spill] sm:$0xff] %v7047_v11  ;;  %v7049_v54 = vld [vmem:[#allocation3 + $0x260] sm:$0xff]  ;;  %v10121_v52 = vrot.slane %v7022_v38, 1  ;;  %v10126_v11 = vld [vmem:[#allocation128_spill] sm:$0xff] }
 0x204   :  { %10120 = vst [vmem:[#allocation85_spill] sm:$0xff] %v7049_v54  ;;  %1730 = vrot.lane.b32.xlu0 %v7049_v54, %s4444_s0  ;;  %v2665_v1 = vsub.f32 %v6886_v49, %v2554_v2  ;;  %v3603_v16 = vsub.f32 %v6993_v23, %v6839_v24  ;;  %v3606_v61 = vsub.f32 %v7008_v20, %v6923_v31  ;;  %v10122_v50 = vrot.slane %v6938_v22, 1  ;;  %v7072_v57 = vld [vmem:[#allocation3 + $0x1e0] sm:$0xff] }
 0x205   :  { %v7064_v3 = vadd.f32 %v3739_v33, %v10123_v29  ;;  %v7067_v8 = vadd.f32 %v3742_v10, %v10124_v14  ;;  %v2699_v28 = vmul.f32 %v2663_v6, %v2663_v6  ;;  %v2702_v33 = vmul.f32 %v2666_v26, %v2666_v26  ;;  %v10127_v10 = vld [vmem:[#allocation136_spill] sm:$0xff]  ;;  %v10132_v6 = vld [vmem:[#allocation141_spill] sm:$0xff] }
 0x206   :  { %v2560_v17 = vsel %vm2356_vm12, %v10122_v50, %v10121_v52  ;;  %1684 = vrot.lane.b32.xlu1 %v6963_v45, %s4444_s0  ;;  %v7078_v52 = vadd.f32 %v3741_v46, %v10126_v11  ;;  %v2668_v50 = vsub.f32 %v6958_v19, %v2563_v21  ;;  %v7082_v29 = vadd.f32 %v2700_v39, %v10127_v10  ;;  %v7090_v54 = vpop.permute.xlu0 %1992 }
 0x207   :  { %10125 = vst [vmem:[#allocation62_spill] sm:$0xff] %v7067_v8  ;;  %v2667_v14 = vsub.f32 %v6938_v22, %v2560_v17  ;;  %v3605_v49 = vsub.f32 %v7022_v38, %v6899_v59  ;;  %v10129_v8 = vlaneseq  ;;  %10131 = vst [vmem:[#allocation147_spill] sm:$0xff] %v7090_v54  ;;  %v7095_v46 = vadd.f32 %v3744_v4, %v10132_v6 }
 0x208   :  { %10128 = vst [vmem:[#allocation140_spill] sm:$0xff] %v7082_v29  ;;  %1466 = vrot.lane.b32.xlu0 %v6797_v40, %s4444_s0  ;;  %v2701_v19 = vmul.f32 %v2665_v1, %v2665_v1  ;;  %v3743_v26 = vmul.f32 %v3603_v16, %v3603_v16  ;;  %v3746_v39 = vmul.f32 %v3606_v61, %v3606_v61  ;;  %v10134_v21 = vrot.slane %v7069_v5, 1  ;;  %v7107_v40 = vld [vmem:[#allocation3 + $0x1f8] sm:$0xff]  ;;  %v7110_v1 = vld [vmem:[#allocation3 + $0x310] sm:$0xff] }
 0x209   :  { %v7088_v2 = vshrl.u32 %v10129_v8, 7  ;;  %10133 = vst [vmem:[#allocation129_spill] sm:$0xff] %v7095_v46  ;;  %v3608_v11 = vsub.f32 %v7069_v5, %v6951_v27  ;;  %v10135_v17 = vrot.slane %v7072_v57, 1  ;;  %v10136_v8 = vrot.slane %v6944_v12, 1  ;;  %v10137_v16 = vld [vmem:[#allocation132_spill] sm:$0xff] }
 0x20a   :  { %v2569_v22 = vsel %vm2356_vm12, %v2567_v36, %v10134_v21  ;;  %1994 = vrot.lane.b32.xlu1 %v7110_v1, %s4444_s0  ;;  %v7115_v36 = vadd.f32 %v2699_v28, %v10137_v16  ;;  %v7118_v61 = vadd.f32 %v2702_v33, %v6525_v44  ;;  %v2704_v6 = vmul.f32 %v2668_v50, %v2668_v50  ;;  %v7120_v21 = vld [vmem:[#allocation3 + $0x1f0] sm:$0xff]  ;;  %v7126_v29 = vpop.permute.xlu0 %1420  ;;  %v10140_v28 = vld [vmem:[#allocation135_spill] sm:$0xff]  ;;  %v10141_v33 = vld [vmem:[#allocation134_spill] sm:$0xff] }
 0x20b   :  { %10130 = vst [vmem:[#allocation142_spill] sm:$0xff] %v7088_v2  ;;  %v2566_v10 = vsel %vm2356_vm12, %v10136_v8, %v10135_v17  ;;  %v2703_v8 = vmul.f32 %v2667_v14, %v2667_v14  ;;  %v3745_v54 = vmul.f32 %v3605_v49, %v3605_v49  ;;  %v3607_v4 = vsub.f32 %v7072_v57, %v6914_v15 }
 0x20c   :  { %10138 = vst [vmem:[#allocation116_spill] sm:$0xff] %v7118_v61  ;;  %v107_v46 = vcvt.s32.f32 %v7088_v2  ;;  %10139 = vst [vmem:[#allocation84_spill] sm:$0xff] %v7126_v29  ;;  %2040 = vrot.lane.b32.xlu0 %v6375_v13, %s4444_s0  ;;  %v7131_v44 = vadd.f32 %v2701_v19, %v10140_v28  ;;  %v7134_v50 = vadd.f32 %v3743_v26, %v10141_v33  ;;  %v10143_v61 = vrot.slane %v7107_v40, 1 }
 0x20d   :  { %v2670_v16 = vsub.f32 %v6987_v30, %v2569_v22  ;;  %v2669_v49 = vsub.f32 %v6944_v12, %v2566_v10  ;;  %v7139_v14 = vadd.f32 %v3746_v39, %v6563_v41  ;;  %v3748_v17 = vmul.f32 %v3608_v11, %v3608_v11  ;;  %v7158_v39 = vld [vmem:[#allocation3 + $0x208] sm:$0xff]  ;;  %v10148_v10 = vld [vmem:[#allocation138_spill] sm:$0xff] }
 0x20e   :  { %v10144_v29 = vrot.slane %v6973_v9, 1  ;;  %v3610_v19 = vsub.f32 %v7107_v40, %v6829_v60  ;;  %1422 = vrot.lane.b32.xlu1 %v6616_v37, %s4444_s0  ;;  %v7151_v30 = vadd.f32 %v2704_v6, %v6598_v63  ;;  %v10146_v12 = vrot.slane %v7120_v21, 1  ;;  %v10150_v37 = vld [vmem:[#allocation139_spill] sm:$0xff]  ;;  %v7172_v33 = vpop.permute.xlu0 %1686 }
 0x20f   :  { %10142 = vst [vmem:[#allocation146_spill] sm:$0xff] %v7139_v14  ;;  %v10147_v41 = vrot.slane %v6963_v45, 1  ;;  %v7168_v63 = vadd.f32 %v3745_v54, %v10150_v37  ;;  %v3747_v6 = vmul.f32 %v3607_v4, %v3607_v4  ;;  %v7170_v28 = vmul.f32 0.03125, %v107_v46  ;;  %10152 = vst [vmem:[#allocation107_spill] sm:$0xff] %v7172_v33  ;;  %v10159_v37 = vld [vmem:[#allocation145_spill] sm:$0xff] }
 0x210   :  { %v2574_v13 = vsel %vm2356_vm12, %v10144_v29, %v10143_v61  ;;  %10145 = vst [vmem:[#allocation72_spill] sm:$0xff] %v7151_v30  ;;  %v7161_v29 = vld [vmem:[#allocation3 + $0x200] sm:$0xff]  ;;  %v7165_v61 = vadd.f32 %v2703_v8, %v10148_v10  ;;  %v2705_v22 = vmul.f32 %v2669_v49, %v2669_v49  ;;  %v3609_v8 = vsub.f32 %v7120_v21, %v6927_v62  ;;  %v7212_v30 = vld [vmem:[#allocation3 + $0x2d0] sm:$0xff] }
 0x211   :  { %v2572_v26 = vsel %vm2356_vm12, %v10147_v41, %v10146_v12  ;;  %10151 = vst [vmem:[#allocation102_spill] sm:$0xff] %v7168_v63  ;;  %v7174_v12 = vld [vmem:[#allocation3 + $0x270] sm:$0xff]  ;;  %v2706_v41 = vmul.f32 %v2670_v16, %v2670_v16  ;;  %v2672_v11 = vsub.f32 %v6973_v9, %v2574_v13  ;;  %v7182_v54 = vadd.f32 %v3748_v17, %v6614_v34  ;;  %v7228_v63 = vld [vmem:[#allocation3 + $0x228] sm:$0xff] }
 0x212   :  { %10149 = vst [vmem:[#allocation110_spill] sm:$0xff] %v7165_v61  ;;  %1734 = vrot.lane.b32.xlu0 %v7174_v12, %s4444_s0  ;;  %v3750_v4 = vmul.f32 %v3610_v19, %v3610_v19  ;;  %v2671_v46 = vsub.f32 %v6963_v45, %v2572_v26  ;;  %v3612_v10 = vsub.f32 %v7158_v39, %v6839_v24  ;;  %v10154_v16 = vrot.slane %v7158_v39, 1  ;;  %v7201_v19 = vld [vmem:[#allocation3 + $0x218] sm:$0xff] }
 0x213   :  { %10153 = vst [vmem:[#allocation123_spill] sm:$0xff] %v7182_v54  ;;  %1688 = vrot.lane.b32.xlu1 %v6931_v48, %s4444_s0  ;;  %v10155_v49 = vrot.slane %v6993_v23, 1  ;;  %v10156_v13 = vrot.slane %v7161_v29, 1  ;;  %v10157_v34 = vrot.slane %v6931_v48, 1  ;;  %v3611_v45 = vsub.f32 %v7161_v29, %v6854_v25  ;;  %10158 = vst [vmem:[#allocation109_spill] sm:$0xff] %v7201_v19  ;;  %v7207_v54 = vld [vmem:[#allocation3 + $0x210] sm:$0xff] }
 0x214   :  { %v7205_v33 = vadd.f32 %v3747_v6, %v10159_v37  ;;  %v7221_v6 = vadd.f32 %v2706_v41, %v6606_v32  ;;  %v7224_v37 = vadd.f32 %v2705_v22, %v6529_v58  ;;  %v3749_v26 = vmul.f32 %v3609_v8, %v3609_v8  ;;  %10164 = vst [vmem:[#allocation113_spill] sm:$0xff] %v7228_v63 }
 0x215   :  { %v2578_v9 = vsel %vm2356_vm12, %v10155_v49, %v10154_v16  ;;  %v2576_v17 = vsel %vm2356_vm12, %v10157_v34, %v10156_v13  ;;  %v3643_v49 = vsub.f32 %v6818_v47, %v7170_v28  ;;  %v3642_v13 = vsub.f32 %v7212_v30, %v7170_v28  ;;  %v7216_v34 = vpop.permute.xlu0 %1424 }
 0x216   :  { %10160 = vst [vmem:[#allocation98_spill] sm:$0xff] %v7205_v33  ;;  %10161 = vst [vmem:[#allocation101_spill] sm:$0xff] %v7216_v34  ;;  %1470 = vrot.lane.b32.xlu0 %v6808_v42, %s4444_s0  ;;  %v2708_v16 = vmul.f32 %v2672_v11, %v2672_v11  ;;  %v2707_v33 = vmul.f32 %v2671_v46, %v2671_v46  ;;  %v2674_v14 = vsub.f32 %v6993_v23, %v2578_v9 }
 0x217   :  { %10162 = vst [vmem:[#allocation100_spill] sm:$0xff] %v7221_v6  ;;  %10163 = vst [vmem:[#allocation83_spill] sm:$0xff] %v7224_v37  ;;  %v2673_v61 = vsub.f32 %v6931_v48, %v2576_v17  ;;  %v9453_v34 = vrot.slane %v7228_v63, 1  ;;  %1690 = vrot.lane.b32.xlu1 %v6993_v23, %s4444_s0  ;;  %v7234_v32 = vadd.f32 %v3750_v4, %v6675_v56  ;;  %v10166_v22 = vrot.slane %v7201_v19, 1  ;;  %v7246_v23 = vld [vmem:[#allocation3 + $0x2e0] sm:$0xff] }
 0x218   :  { %v3752_v42 = vmul.f32 %v3612_v10, %v3612_v10  ;;  %v3751_v58 = vmul.f32 %v3611_v45, %v3611_v45  ;;  %v10167_v11 = vrot.slane %v7022_v38, 1  ;;  %v10168_v48 = vrot.slane %v7207_v54, 1 }
 0x219   :  { %10165 = vst [vmem:[#allocation108_spill] sm:$0xff] %v7234_v32  ;;  %v10169_v8 = vrot.slane %v6976_v55, 1  ;;  %v3823_v9 = vmul.f32 %v3643_v49, %v3643_v49  ;;  %v3822_v17 = vmul.f32 %v3642_v13, %v3642_v13  ;;  %v3644_v56 = vsub.f32 %v7246_v23, %v7170_v28  ;;  %v7250_v4 = vpop.permute.xlu0 %1996  ;;  %v10181_v32 = vld [vmem:[#allocation61_spill] sm:$0xff] }
 0x21a   :  { %v2582_v41 = vsel %vm2356_vm12, %v10167_v11, %v10166_v22  ;;  %10170 = vst [vmem:[#allocation71_spill] sm:$0xff] %v7250_v4  ;;  %2044 = vrot.lane.b32.xlu0 %v6400_v0, %s4444_s0  ;;  %v7255_v10 = vadd.f32 %v2708_v16, %v6652_v53  ;;  %v7258_v45 = vadd.f32 %v3749_v26, %v6640_v18  ;;  %v10173_v22 = vld [vmem:[#allocation50_spill] sm:$0xff]  ;;  %v10175_v0 = vrot.slane %v7072_v57, 1  ;;  %v10176_v18 = vld [vmem:[#allocation53_spill] sm:$0xff] }
 0x21b   :  { %v2580_v46 = vsel %vm2356_vm12, %v10169_v8, %v10168_v48  ;;  %v3614_v49 = vsub.f32 %v7201_v19, %v6899_v59  ;;  %v3613_v13 = vsub.f32 %v7207_v54, %v6903_v43  ;;  %v7265_v11 = vadd.f32 %v2707_v33, %v10173_v22  ;;  %v7272_v16 = vld [vmem:[#allocation3 + $0x320] sm:$0xff] }
 0x21c   :  { %10171 = vst [vmem:[#allocation125_spill] sm:$0xff] %v7255_v10  ;;  %10172 = vst [vmem:[#allocation49_spill] sm:$0xff] %v7258_v45  ;;  %v2710_v48 = vmul.f32 %v2674_v14, %v2674_v14  ;;  %v2709_v8 = vmul.f32 %v2673_v61, %v2673_v61  ;;  %v2586_v53 = vsel %vm2356_vm12, %v10175_v0, %v9453_v34  ;;  %1998 = vrot.lane.b32.xlu1 %v7272_v16, %s4444_s0  ;;  %v10178_v4 = vld [vmem:[#allocation42_spill] sm:$0xff]  ;;  %v7286_v0 = vld [vmem:[#allocation3 + $0x2e8] sm:$0xff] }
 0x21d   :  { %10174 = vst [vmem:[#allocation21_spill] sm:$0xff] %v7265_v11  ;;  %v7277_v26 = vadd.f32 %v3752_v42, %v10176_v18  ;;  %v7280_v10 = vadd.f32 %v3751_v58, %v10178_v4  ;;  %v2676_v14 = vsub.f32 %v7022_v38, %v2582_v41  ;;  %v2675_v61 = vsub.f32 %v6976_v55, %v2580_v46  ;;  %v10180_v33 = vld [vmem:[#allocation58_spill] sm:$0xff]  ;;  %v7290_v19 = vpop.permute.xlu0 %1426  ;;  %v10183_v46 = vld [vmem:[#allocation36_spill] sm:$0xff] }
 0x21e   :  { %v3868_v22 = vadd.f32 %v3823_v9, %v10180_v33  ;;  %v3867_v6 = vadd.f32 %v3822_v17, %v10181_v32  ;;  %v3645_v34 = vsub.f32 %v7286_v0, %v7170_v28  ;;  %v3824_v11 = vmul.f32 %v3644_v56, %v3644_v56  ;;  %10182 = vst [vmem:[#allocation26_spill] sm:$0xff] %v7290_v19  ;;  %v7292_v42 = vld [vmem:[#allocation3 + $0x280] sm:$0xff]  ;;  %v7308_v33 = vld [vmem:[#allocation3 + $0x238] sm:$0xff]  ;;  %v10190_v19 = vld [vmem:[#allocation60_spill] sm:$0xff] }
 0x21f   :  { %10177 = vst [vmem:[#allocation23_spill] sm:$0xff] %v7277_v26  ;;  %10179 = vst [vmem:[#allocation22_spill] sm:$0xff] %v7280_v10  ;;  %1738 = vrot.lane.b32.xlu0 %v7292_v42, %s4444_s0  ;;  %v3754_v38 = vmul.f32 %v3614_v49, %v3614_v49  ;;  %v3753_v58 = vmul.f32 %v3613_v13, %v3613_v13  ;;  %v2678_v41 = vsub.f32 %v7072_v57, %v2586_v53  ;;  %v10185_v17 = vld [vmem:[#allocation30_spill] sm:$0xff]  ;;  %v7315_v53 = vld [vmem:[#allocation3 + $0x230] sm:$0xff] }
 0x220   :  { %v3616_v32 = vsub.f32 %v7228_v63, %v6914_v15  ;;  %v7300_v9 = vadd.f32 %v2710_v48, %v10183_v46  ;;  %v7303_v4 = vadd.f32 %v2709_v8, %v10185_v17  ;;  %v7305_v56 = vld [vmem:[#allocation3 + $0x220] sm:$0xff]  ;;  %10188 = vst [vmem:[#allocation31_spill] sm:$0xff] %v7308_v33  ;;  %1692 = vrot.lane.b32.xlu1 %v6976_v55, %s4444_s0  ;;  %10189 = vst [vmem:[#allocation27_spill] sm:$0xff] %v7315_v53 }
 0x221   :  { %10187 = vst [vmem:[#allocation25_spill] sm:$0xff] %v7305_v56  ;;  %v2712_v57 = vmul.f32 %v2676_v14, %v2676_v14  ;;  %v2711_v13 = vmul.f32 %v2675_v61, %v2675_v61  ;;  %v3615_v48 = vsub.f32 %v7305_v56, %v6923_v31  ;;  %v3912_v46 = vadd.f32 %v3868_v22, %v3867_v6  ;;  %v7321_v49 = vpop.permute.xlu0 %2000  ;;  %v10193_v55 = vld [vmem:[#allocation90_spill] sm:$0xff]  ;;  %v10194_v14 = vld [vmem:[#allocation35_spill] sm:$0xff] }
 0x222   :  { %10184 = vst [vmem:[#allocation24_spill] sm:$0xff] %v7300_v9  ;;  %10186 = vst [vmem:[#allocation28_spill] sm:$0xff] %v7303_v4  ;;  %v3825_v17 = vmul.f32 %v3645_v34, %v3645_v34  ;;  %v3869_v18 = vadd.f32 %v3824_v11, %v10190_v19  ;;  %v10191_v9 = vld [vmem:[#allocation82_spill] sm:$0xff]  ;;  %v7326_v61 = vadd.f32 %v3754_v38, %v10194_v14  ;;  %v10198_v34 = vrot.slane %v7305_v56, 1  ;;  %v7343_v14 = vld [vmem:[#allocation3 + $0x248] sm:$0xff] }
 0x223   :  { %v3646_v26 = vsub.f32 %v10191_v9, %v7170_v28  ;;  %10192 = vst [vmem:[#allocation115_spill] sm:$0xff] %v7321_v49  ;;  %2048 = vrot.lane.b32.xlu0 %v10193_v55, %s4444_s0  ;;  %v10196_v4 = vld [vmem:[#allocation34_spill] sm:$0xff]  ;;  %v2714_v10 = vmul.f32 %v2678_v41, %v2678_v41  ;;  %v3756_v8 = vmul.f32 %v3616_v32, %v3616_v32  ;;  %v10199_v19 = vrot.slane %v7008_v20, 1  ;;  %v10202_v41 = vld [vmem:[#allocation48_spill] sm:$0xff]  ;;  %v7354_v49 = vld [vmem:[#allocation3 + $0x2f8] sm:$0xff] }
 0x224   :  { %10195 = vst [vmem:[#allocation120_spill] sm:$0xff] %v7326_v61  ;;  %v7329_v63 = vadd.f32 %v3753_v58, %v10196_v4  ;;  %v10200_v11 = vrot.slane %v7308_v33, 1  ;;  %v10201_v22 = vrot.slane %v7120_v21, 1  ;;  %v3618_v38 = vsub.f32 %v7308_v33, %v6927_v62  ;;  %1428 = vrot.lane.b32.xlu1 %v10202_v41, %s4444_s0  ;;  %v10203_v32 = vld [vmem:[#allocation94_spill] sm:$0xff]  ;;  %v10209_v61 = vld [vmem:[#allocation111_spill] sm:$0xff] }
 0x225   :  { %v2584_v6 = vsel %vm2356_vm12, %v10199_v19, %v10198_v34  ;;  %v7349_v4 = vadd.f32 %v2712_v57, %v10203_v32  ;;  %v10205_v34 = vld [vmem:[#allocation17_spill] sm:$0xff]  ;;  %v3755_v56 = vmul.f32 %v3615_v48, %v3615_v48  ;;  %v10208_v33 = vrot.slane %v7069_v5, 1  ;;  %v7364_v32 = vpop.permute.xlu0 %1694 }
 0x226   :  { %10197 = vst [vmem:[#allocation122_spill] sm:$0xff] %v7329_v63  ;;  %v2590_v55 = vsel %vm2356_vm12, %v10201_v22, %v10200_v11  ;;  %v7352_v19 = vadd.f32 %v2711_v13, %v10205_v34  ;;  %v3647_v11 = vsub.f32 %v7354_v49, %v7170_v28  ;;  %v10207_v22 = vrot.slane %v7315_v53, 1  ;;  %10210 = vst [vmem:[#allocation131_spill] sm:$0xff] %v7364_v32  ;;  %v10211_v13 = vld [vmem:[#allocation57_spill] sm:$0xff]  ;;  %v10222_v32 = vld [vmem:[#allocation54_spill] sm:$0xff] }
 0x227   :  { %10204 = vst [vmem:[#allocation126_spill] sm:$0xff] %v7349_v4  ;;  %v3870_v41 = vadd.f32 %v3825_v17, %v10209_v61  ;;  %v3913_v63 = vadd.f32 %v3912_v46, %v3869_v18  ;;  %v3826_v57 = vmul.f32 %v3646_v26, %v3646_v26  ;;  %1476 = vrot.lane.b32.xlu0 %v10211_v13, %s4444_s0  ;;  %v10212_v48 = vld [vmem:[#allocation45_spill] sm:$0xff]  ;;  %v10216_v26 = vrot.slane %v7343_v14, 1 }
 0x228   :  { %10206 = vst [vmem:[#allocation121_spill] sm:$0xff] %v7352_v19  ;;  %v2588_v58 = vsel %vm2356_vm12, %v10208_v33, %v10207_v22  ;;  %v7369_v34 = vadd.f32 %v2714_v10, %v10212_v48  ;;  %v10214_v4 = vld [vmem:[#allocation41_spill] sm:$0xff]  ;;  %v2677_v45 = vsub.f32 %v7008_v20, %v2584_v6  ;;  %v2680_v37 = vsub.f32 %v7120_v21, %v2590_v55  ;;  %v7384_v22 = vld [vmem:[#allocation3 + $0x330] sm:$0xff] }
 0x229   :  { %v7372_v19 = vadd.f32 %v3756_v8, %v10214_v4  ;;  %v3758_v33 = vmul.f32 %v3618_v38, %v3618_v38  ;;  %v3617_v18 = vsub.f32 %v7315_v53, %v6951_v27  ;;  %v10217_v46 = vrot.slane %v7161_v29, 1  ;;  %v10218_v61 = vld [vmem:[#allocation105_spill] sm:$0xff]  ;;  %2002 = vrot.lane.b32.xlu1 %v7384_v22, %s4444_s0  ;;  %v10220_v4 = vld [vmem:[#allocation18_spill] sm:$0xff]  ;;  %v7398_v10 = vpop.permute.xlu0 %1430  ;;  %v7400_v53 = vld [vmem:[#allocation3 + $0x290] sm:$0x1] }
 0x22a   :  { %10213 = vst [vmem:[#allocation124_spill] sm:$0xff] %v7369_v34  ;;  %v2679_v8 = vsub.f32 %v7069_v5, %v2588_v58  ;;  %v3620_v21 = vsub.f32 %v7343_v14, %v6854_v25  ;;  %v7391_v6 = vld [vmem:[#allocation3 + $0x258] sm:$0xff]  ;;  %v3827_v38 = vmul.f32 %v3647_v11, %v3647_v11  ;;  %v3871_v13 = vadd.f32 %v3826_v57, %v10220_v4 }
 0x22b   :  { %10215 = vst [vmem:[#allocation127_spill] sm:$0xff] %v7372_v19  ;;  %v2594_v17 = vsel %vm2356_vm12, %v10217_v46, %v10216_v26  ;;  %10219 = vst [vmem:[#allocation137_spill] sm:$0xff] %v7391_v6  ;;  %v3914_v48 = vadd.f32 %v3913_v63, %v3870_v41  ;;  %v3648_v26 = vsub.f32 %v7033_v51, %v7170_v28  ;;  %v103_v46 = vadd.s32 8, %v7088_v2  ;;  %v10224_v63 = vld [vmem:[#allocation44_spill] sm:$0xff] }
 0x22c   :  { %10221 = vst [vmem:[#allocation128_spill] sm:$0xff] %v7398_v10  ;;  %1742 = vrot.lane.b32.xlu0 %v7400_v53, %s4444_s0  ;;  %v2713_v58 = vmul.f32 %v2677_v45, %v2677_v45  ;;  %v7405_v34 = vadd.f32 %v3755_v56, %v10222_v32  ;;  %v2716_v11 = vmul.f32 %v2680_v37, %v2680_v37  ;;  %v10226_v55 = vrot.slane %v10218_v61, 1 }
 0x22d   :  { %v2682_v57 = vsub.f32 %v7161_v29, %v2594_v17  ;;  %v7409_v41 = vadd.f32 %v3758_v33, %v10224_v63  ;;  %v3757_v4 = vmul.f32 %v3617_v18, %v3617_v18  ;;  %v10227_v10 = vrot.slane %v7107_v40, 1  ;;  %1696 = vrot.lane.b32.xlu1 %v7008_v20, %s4444_s0  ;;  %v7426_v17 = vld [vmem:[#allocation3 + $0x308] sm:$0xff]  ;;  %v7432_v20 = vld [vmem:[#allocation3 + $0x298] sm:$0x1] }
 0x22e   :  { %10223 = vst [vmem:[#allocation136_spill] sm:$0xff] %v7405_v34  ;;  %v3619_v25 = vsub.f32 %v10218_v61, %v6829_v60  ;;  %v2715_v45 = vmul.f32 %v2679_v8, %v2679_v8  ;;  %v3760_v37 = vmul.f32 %v3620_v21, %v3620_v21  ;;  %v10228_v29 = vrot.slane %v7391_v6, 1  ;;  %v10231_v8 = vld [vmem:[#allocation59_spill] sm:$0xff] }
 0x22f   :  { %10225 = vst [vmem:[#allocation141_spill] sm:$0xff] %v7409_v41  ;;  %v2592_v19 = vsel %vm2356_vm12, %v10227_v10, %v10226_v55  ;;  %v10229_v56 = vrot.slane %v7207_v54, 1  ;;  %v3872_v33 = vadd.f32 %v3827_v38, %v7038_v35  ;;  %v3915_v18 = vadd.f32 %v3914_v48, %v3871_v13  ;;  %v7430_v41 = vpop.permute.xlu0 %2004  ;;  %v10233_v13 = vld [vmem:[#allocation96_spill] sm:$0xff]  ;;  %v10235_v34 = vld [vmem:[#allocation39_spill] sm:$0xff] }
 0x230   :  { %v3649_v10 = vsub.f32 %v7426_v17, %v7170_v28  ;;  %v3828_v55 = vmul.f32 %v3648_v26, %v3648_v26  ;;  %v108_v63 = vcvt.s32.f32 %v103_v46  ;;  %10230 = vst [vmem:[#allocation132_spill] sm:$0xff] %v7430_v41  ;;  %1744 = vrot.lane.b32.xlu0 %v7432_v20, %s4444_s0  ;;  %v7437_v21 = vadd.f32 %v2713_v58, %v10231_v8  ;;  %v10236_v58 = vld [vmem:[#allocation37_spill] sm:$0xff] }
 0x231   :  { %v2598_v32 = vsel %vm2356_vm12, %v10229_v56, %v10228_v29  ;;  %v2718_v29 = vmul.f32 %v2682_v57, %v2682_v57  ;;  %v2681_v35 = vsub.f32 %v7107_v40, %v2592_v19  ;;  %v3650_v38 = vsub.f32 %v7110_v1, %v7170_v28  ;;  %v7446_v56 = vld [vmem:[#allocation3 + $0x250] sm:$0xff]  ;;  %1432 = vrot.lane.b32.xlu1 %v10235_v34, %s4444_s0  ;;  %v10237_v19 = vld [vmem:[#allocation55_spill] sm:$0xff]  ;;  %v10238_v28 = vld [vmem:[#allocation46_spill] sm:$0xff] }
 0x232   :  { %10232 = vst [vmem:[#allocation135_spill] sm:$0xff] %v7437_v21  ;;  %v7443_v48 = vadd.f32 %v2716_v11, %v10233_v13  ;;  %v3759_v26 = vmul.f32 %v3619_v25, %v3619_v25  ;;  %v2684_v46 = vsub.f32 %v7207_v54, %v2598_v32  ;;  %v7452_v57 = vadd.f32 %v2715_v45, %v10236_v58  ;;  %v10240_v11 = vld [vmem:[#allocation20_spill] sm:$0xff]  ;;  %v4211_v34 = vld [vmem:[#allocation3 + $0x3f8] sm:$0x1]  ;;  %v10242_v45 = vld [vmem:[#allocation11_spill] sm:$0xff] }
 0x233   :  { %v7455_v8 = vadd.f32 %v3757_v4, %v10237_v19  ;;  %v7458_v21 = vadd.f32 %v3760_v37, %v10238_v28  ;;  %v3622_v25 = vsub.f32 %v7391_v6, %v6903_v43  ;;  %v3829_v54 = vmul.f32 %v3649_v10, %v3649_v10  ;;  %v10244_v28 = vld [vmem:[#allocation43_spill] sm:$0xff] }
 0x234   :  { %10234 = vst [vmem:[#allocation134_spill] sm:$0xff] %v7443_v48  ;;  %v3873_v32 = vadd.f32 %v3828_v55, %v10240_v11  ;;  %v3916_v13 = vadd.f32 %v3915_v18, %v3872_v33  ;;  %v7463_v41 = vmul.f32 0.03125, %v108_v63  ;;  %v7465_v48 = vpop.permute.xlu0 %1698  ;;  %2052 = vrot.lane.b32.xlu0 %v4211_v34, %s4444_s0  ;;  %v7469_v4 = vadd.f32 %v2718_v29, %v10242_v45  ;;  %v7481_v11 = vld [vmem:[#allocation3 + $0x268] sm:$0xff]  ;;  %v7491_v34 = vld [vmem:[#allocation3 + $0x318] sm:$0xff] }
 0x235   :  { %10239 = vst [vmem:[#allocation138_spill] sm:$0xff] %v7458_v21  ;;  %10241 = vst [vmem:[#allocation139_spill] sm:$0xff] %v7465_v48  ;;  %v2717_v58 = vmul.f32 %v2681_v35, %v2681_v35  ;;  %v3621_v37 = vsub.f32 %v7446_v56, %v6839_v24  ;;  %v3830_v19 = vmul.f32 %v3650_v38, %v3650_v38  ;;  %v10246_v33 = vrot.slane %v7446_v56, 1  ;;  %v7485_v35 = vld [vmem:[#allocation3 + $0x340] sm:$0xff] }
 0x236   :  { %10243 = vst [vmem:[#allocation145_spill] sm:$0xff] %v7469_v4  ;;  %v7474_v10 = vadd.f32 %v3759_v26, %v10244_v28  ;;  %v2720_v55 = vmul.f32 %v2684_v46, %v2684_v46  ;;  %v10247_v18 = vrot.slane %v7158_v39, 1  ;;  %10248 = vst [vmem:[#allocation53_spill] sm:$0xff] %v7481_v11  ;;  %v3624_v29 = vsub.f32 %v7481_v11, %v6923_v31  ;;  %v7500_v21 = vld [vmem:[#allocation3 + $0x2a0] sm:$0x1]  ;;  %v10255_v31 = vld [vmem:[#allocation85_spill] sm:$0xff] }
 0x237   :  { %2006 = vrot.lane.b32.xlu1 %v7485_v35, %s4444_s0  ;;  %v3762_v38 = vmul.f32 %v3622_v25, %v3622_v25  ;;  %v2774_v26 = vrot.slane %v6818_v47, 1  ;;  %v2771_v46 = vrot.slane %v7212_v30, 1  ;;  %v3874_v28 = vadd.f32 %v3829_v54, %v7064_v3  ;;  %10250 = vst [vmem:[#allocation58_spill] sm:$0xff] %v7500_v21  ;;  %v10251_v25 = vld [vmem:[#allocation65_spill] sm:$0xff]  ;;  %v10253_v54 = vld [vmem:[#allocation99_spill] sm:$0xff] }
 0x238   :  { %10245 = vst [vmem:[#allocation50_spill] sm:$0xff] %v7474_v10  ;;  %v2596_v63 = vsel %vm2356_vm12, %v10247_v18, %v10246_v33  ;;  %v3917_v33 = vadd.f32 %v3916_v13, %v3873_v32  ;;  %v3651_v18 = vsub.f32 %v7491_v34, %v7463_v41  ;;  %v7498_v4 = vpop.permute.xlu0 %1434  ;;  %1746 = vrot.lane.b32.xlu0 %v7500_v21, %s4444_s0  ;;  %v7516_v11 = vld [vmem:[#allocation3 + $0x288] sm:$0x1] }
 0x239   :  { %10249 = vst [vmem:[#allocation42_spill] sm:$0xff] %v7498_v4  ;;  %v7505_v10 = vadd.f32 %v2717_v58, %v10251_v25  ;;  %v2683_v45 = vsub.f32 %v7158_v39, %v2596_v63  ;;  %v3761_v48 = vmul.f32 %v3621_v37, %v3621_v37  ;;  %v3875_v3 = vadd.f32 %v3830_v19, %v7042_v7  ;;  %v7523_v19 = vld [vmem:[#allocation3 + $0x328] sm:$0xff] }
 0x23a   :  { %v7510_v32 = vadd.f32 %v2720_v55, %v10253_v54  ;;  %v3764_v13 = vmul.f32 %v3624_v29, %v3624_v29  ;;  %v3623_v4 = vsub.f32 %v10255_v31, %v6899_v59  ;;  %v2777_v39 = vrot.slane %v7246_v23, 1  ;;  %v10259_v58 = vld [vmem:[#allocation79_spill] sm:$0xff] }
 0x23b   :  { %10252 = vst [vmem:[#allocation61_spill] sm:$0xff] %v7505_v10  ;;  %1700 = vrot.lane.b32.xlu1 %v7069_v5, %s4444_s0  ;;  %v10256_v37 = vrot.slane %v7491_v34, 1  ;;  %v3918_v63 = vadd.f32 %v3917_v33, %v3874_v28  ;;  %v3831_v31 = vmul.f32 %v3651_v18, %v3651_v18  ;;  %v10257_v29 = vrot.slane %v7272_v16, 1  ;;  %v10262_v10 = vld [vmem:[#allocation68_spill] sm:$0xff]  ;;  %v10264_v33 = vld [vmem:[#allocation9_spill] sm:$0xff] }
 0x23c   :  { %10254 = vst [vmem:[#allocation36_spill] sm:$0xff] %v7510_v32  ;;  %v3652_v25 = vsub.f32 %v7272_v16, %v7463_v41  ;;  %v7531_v54 = vpop.permute.xlu0 %2008  ;;  %1482 = vrot.lane.b32.xlu0 %v10259_v58, %s4444_s0  ;;  %v10260_v32 = vld [vmem:[#allocation143_spill] sm:$0xff]  ;;  %v7539_v55 = vadd.f32 %v3761_v48, %v10262_v10  ;;  %v3919_v28 = vsel %vm3003_vm14, %v3875_v3, 0.0  ;;  %v7543_v18 = vadd.f32 %v3764_v13, %v10264_v33 }
 0x23d   :  { %v2773_v7 = vsel %vm2356_vm12, %v2771_v46, %v10256_v37  ;;  %v2776_v5 = vsel %vm2356_vm12, %v2774_v26, %v10257_v29  ;;  %10258 = vst [vmem:[#allocation30_spill] sm:$0xff] %v7531_v54  ;;  %v7536_v46 = vadd.f32 %v3762_v38, %v10260_v32  ;;  %v2719_v37 = vmul.f32 %v2683_v45, %v2683_v45  ;;  %v7545_v29 = vld [vmem:[#allocation3 + $0x278] sm:$0xff]  ;;  %v10267_v38 = vld [vmem:[#allocation150_spill] sm:$0xff] }
 0x23e   :  { %10263 = vst [vmem:[#allocation82_spill] sm:$0xff] %v7539_v55  ;;  %10265 = vst [vmem:[#allocation90_spill] sm:$0xff] %v7543_v18  ;;  %v3763_v26 = vmul.f32 %v3623_v4, %v3623_v4  ;;  %v3626_v54 = vsub.f32 %v7545_v29, %v6951_v27  ;;  %v2888_v58 = vsub.f32 %v7212_v30, %v2773_v7  ;;  %v2780_v45 = vrot.slane %v7286_v0, 1  ;;  %v10270_v27 = vld [vmem:[#allocation119_spill] sm:$0xff]  ;;  %v10279_v55 = vld [vmem:[#allocation140_spill] sm:$0xff] }
 0x23f   :  { %10261 = vst [vmem:[#allocation60_spill] sm:$0xff] %v7536_v46  ;;  %10266 = vst [vmem:[#allocation35_spill] sm:$0xff] %v7545_v29  ;;  %1436 = vrot.lane.b32.xlu1 %v10267_v38, %s4444_s0  ;;  %v10268_v48 = vrot.slane %v7523_v19, 1  ;;  %v3653_v3 = vsub.f32 %v7523_v19, %v7463_v41  ;;  %v2889_v4 = vsub.f32 %v6818_v47, %v2776_v5  ;;  %v4219_v38 = vld [vmem:[#allocation3 + $0x408] sm:$0x1] }
 0x240   :  { %v3876_v32 = vadd.f32 %v3831_v31, %v7078_v52  ;;  %v3920_v13 = vadd.f32 %v3919_v28, %v3918_v63  ;;  %v3832_v33 = vmul.f32 %v3652_v25, %v3652_v25  ;;  %v7561_v7 = vpop.permute.xlu0 %1702  ;;  %2056 = vrot.lane.b32.xlu0 %v4219_v38, %s4444_s0  ;;  %v7565_v18 = vadd.f32 %v2719_v37, %v10270_v27  ;;  %v10273_v52 = vld [vmem:[#allocation95_spill] sm:$0xff]  ;;  %v7575_v28 = vld [vmem:[#allocation3 + $0x350] sm:$0xff]  ;;  %v7580_v38 = vld [vmem:[#allocation3 + $0x338] sm:$0xff] }
 0x241   :  { %v2779_v10 = vsel %vm2356_vm12, %v2777_v39, %v10268_v48  ;;  %10269 = vst [vmem:[#allocation34_spill] sm:$0xff] %v7561_v7  ;;  %v3625_v39 = vsub.f32 %v7174_v12, %v6914_v15  ;;  %v10272_v48 = vld [vmem:[#allocation29_spill] sm:$0xff]  ;;  %v7572_v63 = vadd.f32 %v3763_v26, %v10273_v52  ;;  %v3766_v31 = vmul.f32 %v3626_v54, %v3626_v54  ;;  %v10275_v52 = vld [vmem:[#allocation62_spill] sm:$0xff] }
 0x242   :  { %10271 = vst [vmem:[#allocation48_spill] sm:$0xff] %v7565_v18  ;;  %v3406_v46 = vadd.f32 %v10272_v48, %v2888_v58  ;;  %v3407_v47 = vadd.f32 %v10272_v48, %v2889_v4  ;;  %v2924_v5 = vmul.f32 %v2888_v58, %v2888_v58  ;;  %v2890_v25 = vsub.f32 %v7246_v23, %v2779_v10 }
 0x243   :  { %10274 = vst [vmem:[#allocation94_spill] sm:$0xff] %v7572_v63  ;;  %2010 = vrot.lane.b32.xlu1 %v7575_v28, %s4444_s0  ;;  %v2783_v27 = vrot.slane %v10191_v9, 1  ;;  %v3833_v37 = vmul.f32 %v3653_v3, %v3653_v3  ;;  %v2925_v12 = vmul.f32 %v2889_v4, %v2889_v4  ;;  %v3877_v54 = vadd.f32 %v3832_v33, %v10275_v52  ;;  %v7590_v63 = vld [vmem:[#allocation3 + $0x2b0] sm:$0x1] }
 0x244   :  { %v3408_v26 = vadd.f32 %v10272_v48, %v2890_v25  ;;  %v3921_v58 = vadd.f32 %v3920_v13, %v3876_v32  ;;  %v10276_v23 = vrot.slane %v7384_v22, 1  ;;  %v7588_v15 = vpop.permute.xlu0 %2012  ;;  %10278 = vst [vmem:[#allocation111_spill] sm:$0xff] %v7590_v63  ;;  %1750 = vrot.lane.b32.xlu0 %v7590_v63, %s4444_s0  ;;  %v3765_v3 = vmul.f32 %v3625_v39, %v3625_v39  ;;  %v4223_v52 = vld [vmem:[#allocation3 + $0x90] sm:$0xff] }
 0x245   :  { %10277 = vst [vmem:[#allocation17_spill] sm:$0xff] %v7588_v15  ;;  %v3442_v4 = vmax.f32 %v3406_v46, 0.0  ;;  %v3443_v18 = vmax.f32 %v3407_v47, 0.0  ;;  %v3654_v30 = vsub.f32 %v7384_v22, %v7463_v41  ;;  %v2786_v33 = vrot.slane %v7354_v49, 1 }
 0x246   :  { %v2782_v10 = vsel %vm2356_vm12, %v2780_v45, %v10276_v23  ;;  %v2789_v32 = vrot.slane %v7033_v51, 1  ;;  %v2960_v13 = vadd.f32 %v2924_v5, %v7115_v36  ;;  %v2926_v45 = vmul.f32 %v2890_v25, %v2890_v25  ;;  %v10281_v25 = vld [vmem:[#allocation77_spill] sm:$0xff] }
 0x247   :  { %1438 = vrot.lane.b32.xlu1 %v4223_v52, %s4444_s0  ;;  %v3878_v23 = vadd.f32 %v3833_v37, %v7134_v50  ;;  %v2961_v15 = vadd.f32 %v2925_v12, %v10279_v55  ;;  %v10280_v46 = vrot.slane %v7580_v38, 1  ;;  %v2891_v47 = vsub.f32 %v7286_v0, %v2782_v10  ;;  %v7614_v12 = vld [vmem:[#allocation3 + $0x348] sm:$0xff] }
 0x248   :  { %v3444_v7 = vmax.f32 %v3408_v26, 0.0  ;;  %v3922_v29 = vadd.f32 %v3921_v58, %v3877_v54  ;;  %v3655_v6 = vsub.f32 %v7580_v38, %v7463_v41  ;;  %v7609_v5 = vpop.permute.xlu0 %1440  ;;  %1486 = vrot.lane.b32.xlu0 %v10281_v25, %s4444_s0  ;;  %v3478_v50 = vadd.f32 %v3443_v18, %v3442_v4 }
 0x249   :  { %v2785_v39 = vsel %vm2356_vm12, %v2783_v27, %v10280_v46  ;;  %v3409_v55 = vadd.f32 %v10272_v48, %v2891_v47  ;;  %v3834_v37 = vmul.f32 %v3654_v30, %v3654_v30  ;;  %v10282_v27 = vld [vmem:[#allocation114_spill] sm:$0xff]  ;;  %v10284_v54 = vrot.slane %v7516_v11, 1  ;;  %v10286_v30 = vld [vmem:[#allocation97_spill] sm:$0xff] }
 0x24a   :  { %v7618_v26 = vadd.f32 %v3766_v31, %v10282_v27  ;;  %v10285_v58 = vrot.slane %v10218_v61, 1  ;;  %v2892_v18 = vsub.f32 %v10191_v9, %v2785_v39  ;;  %v7630_v4 = vadd.f32 %v3765_v3, %v10286_v30  ;;  %v4225_v9 = vld [vmem:[#allocation3 + $0x418] sm:$0x1] }
 0x24b   :  { %1704 = vrot.lane.b32.xlu1 %v7107_v40, %s4444_s0  ;;  %v2962_v46 = vadd.f32 %v2926_v45, %v7131_v44  ;;  %v2996_v31 = vadd.f32 %v2961_v15, %v2960_v13  ;;  %v2927_v27 = vmul.f32 %v2891_v47, %v2891_v47  ;;  %v3835_v36 = vmul.f32 %v3655_v6, %v3655_v6  ;;  %v10289_v39 = vld [vmem:[#allocation129_spill] sm:$0xff]  ;;  %v4226_v45 = vld [vmem:[#allocation3 + $0xa0] sm:$0xff] }
 0x24c   :  { %10283 = vst [vmem:[#allocation57_spill] sm:$0xff] %v7618_v26  ;;  %v2610_v10 = vsel %vm2356_vm12, %v10285_v58, %v10284_v54  ;;  %10287 = vst [vmem:[#allocation45_spill] sm:$0xff] %v7630_v4  ;;  %v3410_v0 = vadd.f32 %v10272_v48, %v2892_v18  ;;  %v3923_v26 = vadd.f32 %v3922_v29, %v3878_v23  ;;  %v10288_v54 = vrot.slane %v7485_v35, 1  ;;  %v7637_v52 = vpop.permute.xlu0 %1706 }
 0x24d   :  { %2060 = vrot.lane.b32.xlu0 %v4225_v9, %s4444_s0  ;;  %v3445_v40 = vmax.f32 %v3409_v55, 0.0  ;;  %v3479_v3 = vadd.f32 %v3478_v50, %v3444_v7  ;;  %v3879_v30 = vadd.f32 %v3834_v37, %v10289_v39  ;;  %v10290_v15 = vrot.slane %v7614_v12, 1  ;;  %v10291_v7 = vld [vmem:[#allocation116_spill] sm:$0xff]  ;;  %v7655_v37 = vld [vmem:[#allocation3 + $0x358] sm:$0xff]  ;;  %v7661_v39 = vld [vmem:[#allocation3 + $0x2c0] sm:$0x1] }
 0x24e   :  { %v2788_v58 = vsel %vm2356_vm12, %v2786_v33, %v10288_v54  ;;  %v2690_v6 = vsub.f32 %v10218_v61, %v2610_v10  ;;  %v2792_v29 = vrot.slane %v7426_v17, 1  ;;  %v2795_v13 = vrot.slane %v7110_v1, 1  ;;  %10292 = vst [vmem:[#allocation41_spill] sm:$0xff] %v7661_v39 }
 0x24f   :  { %v2791_v44 = vsel %vm2356_vm12, %v2789_v32, %v10290_v15  ;;  %v3656_v33 = vsub.f32 %v7485_v35, %v7463_v41  ;;  %1442 = vrot.lane.b32.xlu1 %v4226_v45, %s4444_s0  ;;  %v2928_v23 = vmul.f32 %v2892_v18, %v2892_v18  ;;  %v2963_v47 = vadd.f32 %v2927_v27, %v10291_v7  ;;  %v7670_v45 = vld [vmem:[#allocation3 + $0x360] sm:$0xff] }
 0x250   :  { %v2997_v50 = vadd.f32 %v2996_v31, %v2962_v46  ;;  %v2893_v55 = vsub.f32 %v7354_v49, %v2788_v58  ;;  %v2894_v32 = vsub.f32 %v7033_v51, %v2791_v44  ;;  %v3657_v61 = vsub.f32 %v7614_v12, %v7463_v41  ;;  %v7659_v9 = vpop.permute.xlu0 %1708  ;;  %v10293_v49 = vld [vmem:[#allocation102_spill] sm:$0xff] }
 0x251   :  { %v9480_v10 = vrot.slane %v7655_v37, 1  ;;  %v9481_v54 = vrot.slane %v7575_v28, 1  ;;  %1754 = vrot.lane.b32.xlu0 %v7661_v39, %s4444_s0  ;;  %v3446_v18 = vmax.f32 %v3410_v0, 0.0  ;;  %v3880_v46 = vadd.f32 %v3835_v36, %v10293_v49  ;;  %v10294_v7 = vld [vmem:[#allocation110_spill] sm:$0xff] }
 0x252   :  { %v3480_v51 = vadd.f32 %v3479_v3, %v3445_v40  ;;  %v3924_v31 = vadd.f32 %v3923_v26, %v3879_v30  ;;  %v3628_v27 = vsub.f32 %v7516_v11, %v6829_v60  ;;  %v3411_v58 = vadd.f32 %v10272_v48, %v2893_v55  ;;  %v4230_v49 = vld [vmem:[#allocation3 + $0x160] sm:$0x1] }
 0x253   :  { %v3836_v15 = vmul.f32 %v3656_v33, %v3656_v33  ;;  %v104_v44 = vadd.s32 16, %v7088_v2  ;;  %2014 = vrot.lane.b32.xlu1 %v7670_v45, %s4444_s0  ;;  %v3627_v0 = vsub.f32 %v7292_v42, %v6927_v62  ;;  %v2964_v36 = vadd.f32 %v2928_v23, %v10294_v7 }
 0x254   :  { %v2998_v40 = vadd.f32 %v2997_v50, %v2963_v47  ;;  %v2929_v26 = vmul.f32 %v2893_v55, %v2893_v55  ;;  %v2930_v3 = vmul.f32 %v2894_v32, %v2894_v32  ;;  %v3837_v30 = vmul.f32 %v3657_v61, %v3657_v61  ;;  %v7683_v33 = vpop.permute.xlu0 %2016  ;;  %v10295_v61 = vld [vmem:[#allocation146_spill] sm:$0xff] }
 0x255   :  { %v2797_v60 = vsel %vm2356_vm12, %v2795_v13, %v9480_v10  ;;  %v2794_v11 = vsel %vm2356_vm12, %v2792_v29, %v9481_v54  ;;  %1490 = vrot.lane.b32.xlu0 %v4230_v49, %s4444_s0  ;;  %v3412_v42 = vadd.f32 %v10272_v48, %v2894_v32  ;;  %v3481_v23 = vadd.f32 %v3480_v51, %v3446_v18  ;;  %v4231_v29 = vld [vmem:[#allocation3 + $0xa8] sm:$0xff]  ;;  %v10296_v54 = vld [vmem:[#allocation72_spill] sm:$0xff] }
 0x256   :  { %v3925_v47 = vadd.f32 %v3924_v31, %v3880_v46  ;;  %v3659_v50 = vsub.f32 %v7655_v37, %v7463_v41  ;;  %v3447_v55 = vmax.f32 %v3411_v58, 0.0  ;;  %v3881_v7 = vadd.f32 %v3836_v15, %v10295_v61  ;;  %v10298_v58 = vld [vmem:[#allocation98_spill] sm:$0xff] }
 0x257   :  { %v3658_v13 = vsub.f32 %v7575_v28, %v7463_v41  ;;  %v109_v10 = vcvt.s32.f32 %v104_v44  ;;  %1444 = vrot.lane.b32.xlu1 %v4231_v29, %s4444_s0  ;;  %v2965_v62 = vadd.f32 %v2929_v26, %v10296_v54  ;;  %v2999_v49 = vadd.f32 %v2998_v40, %v2964_v36  ;;  %v4232_v41 = vld [vmem:[#allocation3 + $0x428] sm:$0x1] }
 0x258   :  { %v2896_v32 = vsub.f32 %v7110_v1, %v2797_v60  ;;  %v2895_v18 = vsub.f32 %v7426_v17, %v2794_v11  ;;  %v7696_v46 = vmul.f32 %v2690_v6, %v2690_v6  ;;  %v3768_v51 = vmul.f32 %v3628_v27, %v3628_v27  ;;  %v7699_v61 = vpop.permute.xlu0 %1710  ;;  %v10299_v44 = vld [vmem:[#allocation83_spill] sm:$0xff]  ;;  %v7706_v27 = vld [vmem:[#allocation3 + $0x370] sm:$0xff] }
 0x259   :  { %v3767_v31 = vmul.f32 %v3627_v0, %v3627_v0  ;;  %v3882_v15 = vadd.f32 %v3837_v30, %v10298_v58  ;;  %2064 = vrot.lane.b32.xlu0 %v4232_v41, %s4444_s0  ;;  %v2966_v29 = vadd.f32 %v2930_v3, %v10299_v44  ;;  %v3448_v25 = vmax.f32 %v3412_v42, 0.0  ;;  %v10300_v3 = vld [vmem:[#allocation80_spill] sm:$0xff]  ;;  %v10302_v42 = vld [vmem:[#allocation103_spill] sm:$0xff]  ;;  %v10308_v44 = vld [vmem:[#allocation109_spill] sm:$0xff] }
 0x25a   :  { %10297 = vst [vmem:[#allocation105_spill] sm:$0xff] %v7696_v46  ;;  %v3839_v54 = vmul.f32 %v3659_v50, %v3659_v50  ;;  %v9483_v36 = vrot.slane %v7670_v45, 1  ;;  %v3482_v1 = vadd.f32 %v3481_v23, %v3447_v55  ;;  %v3926_v40 = vadd.f32 %v3925_v47, %v3881_v7 }
 0x25b   :  { %v3838_v17 = vmul.f32 %v3658_v13, %v3658_v13  ;;  %v7704_v6 = vmul.f32 0.03125, %v109_v10  ;;  %2018 = vrot.lane.b32.xlu1 %v7706_v27, %s4444_s0  ;;  %v3000_v0 = vadd.f32 %v2999_v49, %v2965_v62  ;;  %v2932_v26 = vmul.f32 %v2896_v32, %v2896_v32  ;;  %v10305_v62 = vld [vmem:[#allocation49_spill] sm:$0xff]  ;;  %v7724_v13 = vld [vmem:[#allocation3 + $0x368] sm:$0xff] }
 0x25c   :  { %v2931_v30 = vmul.f32 %v2895_v18, %v2895_v18  ;;  %v3413_v60 = vadd.f32 %v10272_v48, %v2895_v18  ;;  %v7712_v11 = vadd.f32 %v3768_v51, %v10300_v3  ;;  %v7715_v50 = vadd.f32 %v3767_v31, %v10302_v42  ;;  %v7720_v47 = vpop.permute.xlu0 %1446  ;;  %v10310_v42 = vld [vmem:[#allocation100_spill] sm:$0xff] }
 0x25d   :  { %v3630_v10 = vsub.f32 %v7432_v20, %v6839_v24  ;;  %v3414_v23 = vadd.f32 %v10272_v48, %v2896_v32  ;;  %10304 = vst [vmem:[#allocation44_spill] sm:$0xff] %v7720_v47  ;;  %v2611_v55 = vrot.slane %v7400_v53, 1  ;;  %v3884_v7 = vadd.f32 %v3839_v54, %v10305_v62  ;;  %v10307_v24 = vld [vmem:[#allocation123_spill] sm:$0xff]  ;;  %v10309_v54 = vld [vmem:[#allocation21_spill] sm:$0xff] }
 0x25e   :  { %10301 = vst [vmem:[#allocation18_spill] sm:$0xff] %v7712_v11  ;;  %10303 = vst [vmem:[#allocation54_spill] sm:$0xff] %v7715_v50  ;;  %v10306_v18 = vrot.slane %v7491_v34, 1  ;;  %v3483_v31 = vadd.f32 %v3482_v1, %v3448_v25  ;;  %v3883_v58 = vadd.f32 %v3838_v17, %v10307_v24  ;;  %v3927_v32 = vadd.f32 %v3926_v40, %v3882_v15 }
 0x25f   :  { %v3660_v41 = vsub.f32 %v7670_v45, %v7704_v6  ;;  %1712 = vrot.lane.b32.xlu1 %v10308_v44, %s4444_s0  ;;  %v2968_v3 = vadd.f32 %v2932_v26, %v10309_v54  ;;  %v2967_v62 = vadd.f32 %v2931_v30, %v10310_v42  ;;  %v3449_v49 = vmax.f32 %v3413_v60, 0.0  ;;  %v10316_v30 = vld [vmem:[#allocation74_spill] sm:$0xff]  ;;  %v4235_v54 = vld [vmem:[#allocation3 + $0xb8] sm:$0xff] }
 0x260   :  { %v2799_v51 = vsel %vm2356_vm12, %v10306_v18, %v9483_v36  ;;  %v3001_v50 = vadd.f32 %v3000_v0, %v2966_v29  ;;  %v10311_v11 = vrot.slane %v7432_v20, 1  ;;  %v10312_v18 = vrot.slane %v7446_v56, 1  ;;  %v7747_v17 = vpop.permute.xlu0 %2020  ;;  %v10345_v44 = vld [vmem:[#allocation122_spill] sm:$0xff] }
 0x261   :  { %v3770_v15 = vmul.f32 %v3630_v10, %v3630_v10  ;;  %v3450_v1 = vmax.f32 %v3414_v23, 0.0  ;;  %v2897_v40 = vsub.f32 %v7491_v34, %v2799_v51  ;;  %10314 = vst [vmem:[#allocation96_spill] sm:$0xff] %v7747_v17  ;;  %v10315_v24 = vrot.slane %v7343_v14, 1  ;;  %v4259_v17 = vld [vmem:[#allocation3 + $0x2e0] sm:$0xff] }
 0x262   :  { %v7744_v25 = vsel %vm2356_vm12, %v10312_v18, %v10311_v11  ;;  %v3629_v29 = vsub.f32 %v7400_v53, %v10316_v30  ;;  %v10317_v20 = vrot.slane %v7724_v13, 1  ;;  %v10318_v0 = vrot.slane %v7272_v16, 1 }
 0x263   :  { %10313 = vst [vmem:[#allocation59_spill] sm:$0xff] %v7744_v25  ;;  %v2612_v26 = vsel %vm2356_vm12, %v10315_v24, %v2611_v55  ;;  %v9484_v11 = vrot.slane %v7706_v27, 1  ;;  %v3929_v10 = vsel %vm3003_vm14, %v3884_v7, 0.0  ;;  %v3928_v34 = vadd.f32 %v3927_v32, %v3883_v58  ;;  %1448 = vrot.lane.b32.xlu1 %v4235_v54, %s4444_s0  ;;  %v7768_v7 = vld [vmem:[#allocation3 + $0x378] sm:$0xff]  ;;  %v7785_v54 = vld [vmem:[#allocation3 + $0x380] sm:$0xff] }
 0x264   :  { %v2801_v60 = vsel %vm2356_vm12, %v10318_v0, %v10317_v20  ;;  %v3661_v23 = vsub.f32 %v7724_v13, %v7704_v6  ;;  %v3840_v51 = vmul.f32 %v3660_v41, %v3660_v41  ;;  %v3004_v53 = vsel %vm3003_vm14, %v2968_v3, 0.0  ;;  %10319 = vst [vmem:[#allocation39_spill] sm:$0xff] %v7768_v7  ;;  %v7771_v32 = vpop.permute.xlu0 %1714  ;;  %v10321_v41 = vld [vmem:[#allocation76_spill] sm:$0xff]  ;;  %10325 = vst [vmem:[#allocation46_spill] sm:$0xff] %v7785_v54  ;;  %v10326_v58 = vld [vmem:[#allocation125_spill] sm:$0xff] }
 0x265   :  { %v3484_v55 = vadd.f32 %v3483_v31, %v3449_v49  ;;  %v3002_v42 = vadd.f32 %v3001_v50, %v2967_v62  ;;  %v3415_v18 = vadd.f32 %v10272_v48, %v2897_v40  ;;  %v3485_v24 = vsel %vm3003_vm14, %v3450_v1, 0.0  ;;  %10320 = vst [vmem:[#allocation37_spill] sm:$0xff] %v7771_v32  ;;  %v10324_v62 = vld [vmem:[#allocation108_spill] sm:$0xff] }
 0x266   :  { %v2898_v30 = vsub.f32 %v7272_v16, %v2801_v60  ;;  %v2933_v20 = vmul.f32 %v2897_v40, %v2897_v40  ;;  %v7774_v0 = vadd.f32 %v3770_v15, %v10321_v41  ;;  %v2691_v3 = vsub.f32 %v7343_v14, %v2612_v26 }
 0x267   :  { %v3769_v49 = vmul.f32 %v3629_v29, %v3629_v29  ;;  %v10323_v50 = vrot.slane %v7523_v19, 1  ;;  %v3841_v16 = vmul.f32 %v3661_v23, %v3661_v23  ;;  %v3885_v1 = vadd.f32 %v3840_v51, %v10324_v62  ;;  %2022 = vrot.lane.b32.xlu1 %v7785_v54, %s4444_s0 }
 0x268   :  { %10322 = vst [vmem:[#allocation55_spill] sm:$0xff] %v7774_v0  ;;  %v3930_v40 = vadd.f32 %v3929_v10, %v3928_v34  ;;  %v3662_v60 = vsub.f32 %v7706_v27, %v7704_v6  ;;  %v3416_v15 = vadd.f32 %v10272_v48, %v2898_v30  ;;  %v3451_v26 = vmax.f32 %v3415_v18, 0.0  ;;  %v7797_v62 = vpop.permute.xlu0 %1450  ;;  %v7801_v0 = vld [vmem:[#allocation3 + $0x2a8] sm:$0x1]  ;;  %v10331_v18 = vld [vmem:[#allocation22_spill] sm:$0xff] }
 0x269   :  { %v2803_v31 = vsel %vm2356_vm12, %v10323_v50, %v9484_v11  ;;  %v3486_v29 = vadd.f32 %v3485_v24, %v3484_v55  ;;  %v3005_v41 = vadd.f32 %v3004_v53, %v3002_v42  ;;  %v2934_v36 = vmul.f32 %v2898_v30, %v2898_v30  ;;  %10329 = vst [vmem:[#allocation20_spill] sm:$0xff] %v7797_v62  ;;  %v10336_v42 = vld [vmem:[#allocation28_spill] sm:$0xff]  ;;  %v4256_v62 = vld [vmem:[#allocation3 + $0x18] sm:$0xff] }
 0x26a   :  { %v2969_v50 = vadd.f32 %v2933_v20, %v10326_v58  ;;  %v10327_v23 = vrot.slane %v7768_v7, 1  ;;  %v10328_v10 = vrot.slane %v7384_v22, 1  ;;  %v2899_v51 = vsub.f32 %v7523_v19, %v2803_v31  ;;  %v7808_v58 = vld [vmem:[#allocation3 + $0x388] sm:$0xff] }
 0x26b   :  { %v7799_v11 = vmul.f32 %v2691_v3, %v2691_v3  ;;  %v3663_v53 = vsub.f32 %v7768_v7, %v7704_v6  ;;  %v3886_v24 = vadd.f32 %v3841_v16, %v10331_v18  ;;  %v3931_v30 = vadd.f32 %v3930_v40, %v3885_v1  ;;  %10332 = vst [vmem:[#allocation43_spill] sm:$0xff] %v7808_v58  ;;  %v10333_v3 = vld [vmem:[#allocation113_spill] sm:$0xff] }
 0x26c   :  { %v2805_v34 = vsel %vm2356_vm12, %v10328_v10, %v10327_v23  ;;  %v3842_v20 = vmul.f32 %v3662_v60, %v3662_v60  ;;  %1716 = vrot.lane.b32.xlu1 %v10333_v3, %s4444_s0  ;;  %v3452_v31 = vmax.f32 %v3416_v15, 0.0  ;;  %v3487_v23 = vadd.f32 %v3486_v29, %v3451_v26  ;;  %v7819_v60 = vpop.permute.xlu0 %2024 }
 0x26d   :  { %10330 = vst [vmem:[#allocation11_spill] sm:$0xff] %v7799_v11  ;;  %v2900_v10 = vsub.f32 %v7384_v22, %v2805_v34  ;;  %v3417_v55 = vadd.f32 %v10272_v48, %v2899_v51  ;;  %v10334_v11 = vld [vmem:[#allocation13_spill] sm:$0xff]  ;;  %v2970_v16 = vadd.f32 %v2934_v36, %v10336_v42  ;;  %v3006_v1 = vadd.f32 %v3005_v41, %v2969_v50 }
 0x26e   :  { %v7816_v46 = vadd.f32 %v3769_v49, %v10334_v11  ;;  %v2935_v40 = vmul.f32 %v2899_v51, %v2899_v51  ;;  %10337 = vst [vmem:[#allocation99_spill] sm:$0xff] %v7819_v60  ;;  %v3632_v18 = vsub.f32 %v7801_v0, %v6899_v59  ;;  %v3843_v15 = vmul.f32 %v3663_v53, %v3663_v53  ;;  %v10340_v11 = vld [vmem:[#allocation23_spill] sm:$0xff]  ;;  %v1394_v51 = vpop.xlane.xlu1 %1393 }
 0x26f   :  { %v3418_v19 = vadd.f32 %v10272_v48, %v2900_v10  ;;  %v10338_v26 = vrot.slane %v7785_v54, 1  ;;  %v10339_v22 = vrot.slane %v7580_v38, 1  ;;  %v3887_v49 = vadd.f32 %v3842_v20, %v10340_v11  ;;  %v4240_v53 = vld [vmem:[#allocation3 + $0xc8] sm:$0xff] }
 0x270   :  { %10335 = vst [vmem:[#allocation65_spill] sm:$0xff] %v7816_v46  ;;  %v3932_v34 = vadd.f32 %v3931_v30, %v3886_v24  ;;  %v10341_v36 = vrot.slane %v7808_v58, 1  ;;  %v10342_v41 = vrot.slane %v7485_v35, 1  ;;  %v3664_v59 = vsub.f32 %v7785_v54, %v7704_v6  ;;  %1452 = vrot.lane.b32.xlu1 %v4240_v53, %s4444_s0  ;;  %v10343_v24 = vld [vmem:[#allocation24_spill] sm:$0xff]  ;;  %v7841_v3 = vpop.permute.xlu0 %1718 }
 0x271   :  { %v2807_v29 = vsel %vm2356_vm12, %v10339_v22, %v10338_v26  ;;  %v3453_v46 = vmax.f32 %v3417_v55, 0.0  ;;  %v3488_v26 = vadd.f32 %v3487_v23, %v3452_v31  ;;  %v1395_v22 = vrot.slane %v1394_v51, 4  ;;  %10344 = vst [vmem:[#allocation85_spill] sm:$0xff] %v7841_v3  ;;  %v7847_v23 = vld [vmem:[#allocation3 + $0x398] sm:$0xff] }
 0x272   :  { %v2809_v50 = vsel %vm2356_vm12, %v10342_v41, %v10341_v36  ;;  %v2936_v20 = vmul.f32 %v2900_v10, %v2900_v10  ;;  %v2971_v30 = vadd.f32 %v2935_v40, %v10343_v24  ;;  %v3007_v11 = vadd.f32 %v3006_v1, %v2970_v16  ;;  %10346 = vst [vmem:[#allocation143_spill] sm:$0xff] %v7847_v23  ;;  %v7850_v16 = vpop.permute.xlu1 %1980 }
 0x273   :  { %v2901_v25 = vsub.f32 %v7580_v38, %v2807_v29  ;;  %v3454_v36 = vmax.f32 %v3418_v19, 0.0  ;;  %v2902_v41 = vsub.f32 %v7485_v35, %v2809_v50  ;;  %v3665_v54 = vsub.f32 %v7808_v58, %v7704_v6  ;;  %v7852_v38 = vld [vmem:[#allocation3 + $0x390] sm:$0xff] }
 0x274   :  { %v1396_v53 = vadd.f32 %v1395_v22, %v1394_v51  ;;  %v3888_v42 = vadd.f32 %v3843_v15, %v10345_v44  ;;  %v3933_v55 = vadd.f32 %v3932_v34, %v3887_v49  ;;  %v3844_v31 = vmul.f32 %v3664_v59, %v3664_v59  ;;  %10347 = vst [vmem:[#allocation68_spill] sm:$0xff] %v7852_v38  ;;  %v10348_v15 = vld [vmem:[#allocation121_spill] sm:$0xff]  ;;  %v7861_v50 = vpop.permute.xlu0 %1454 }
 0x275   :  { %2026 = vrot.lane.b32.xlu1 %v7852_v38, %s4444_s0  ;;  %v3489_v35 = vadd.f32 %v3488_v26, %v3453_v46  ;;  %v3419_v19 = vadd.f32 %v10272_v48, %v2901_v25  ;;  %v3631_v44 = vsub.f32 %v7500_v21, %v6903_v43  ;;  %v2972_v29 = vadd.f32 %v2936_v20, %v10348_v15  ;;  %v10350_v46 = vld [vmem:[#allocation120_spill] sm:$0xff] }
 0x276   :  { %v1397_v40 = vrot.slane %v1396_v53, 2  ;;  %v3008_v49 = vadd.f32 %v3007_v11, %v2971_v30  ;;  %v2937_v34 = vmul.f32 %v2901_v25, %v2901_v25  ;;  %10349 = vst [vmem:[#allocation9_spill] sm:$0xff] %v7861_v50  ;;  %v2938_v59 = vmul.f32 %v2902_v41, %v2902_v41  ;;  %v7872_v25 = vpop.permute.xlu1 %1412  ;;  %v10353_v30 = vld [vmem:[#allocation31_spill] sm:$0xff] }
 0x277   :  { %v3420_v51 = vadd.f32 %v10272_v48, %v2902_v41  ;;  %v3845_v22 = vmul.f32 %v3665_v54, %v3665_v54  ;;  %v3889_v26 = vadd.f32 %v3844_v31, %v10350_v46  ;;  %v3934_v10 = vadd.f32 %v3933_v55, %v3888_v42 }
 0x278   :  { %v1398_v24 = vadd.f32 %v1397_v40, %v1396_v53  ;;  %v10351_v1 = vrot.slane %v7847_v23, 1  ;;  %v10352_v58 = vrot.slane %v7575_v28, 1  ;;  %v3666_v20 = vsub.f32 %v7852_v38, %v7704_v6  ;;  %v7886_v46 = vpop.permute.xlu0 %2028 }
 0x279   :  { %1720 = vrot.lane.b32.xlu1 %v10353_v30, %s4444_s0  ;;  %v3455_v11 = vmax.f32 %v3419_v19, 0.0  ;;  %v3490_v54 = vadd.f32 %v3489_v35, %v3454_v36  ;;  %v10354_v41 = vrot.slane %v7852_v38, 1  ;;  %v10355_v42 = vrot.slane %v7614_v12, 1  ;;  %10358 = vst [vmem:[#allocation119_spill] sm:$0xff] %v7886_v46  ;;  %v10360_v19 = vld [vmem:[#allocation136_spill] sm:$0xff]  ;;  %v10371_v30 = vld [vmem:[#allocation87_spill] sm:$0xff] }
 0x27a   :  { %v2813_v43 = vsel %vm2356_vm12, %v10352_v58, %v10351_v1  ;;  %v1399_v55 = vrot.slane %v1398_v24, 1  ;;  %v7881_v31 = vmul.f32 %v3632_v18, %v3632_v18  ;;  %v10357_v58 = vld [vmem:[#allocation126_spill] sm:$0xff]  ;;  %v3009_v40 = vadd.f32 %v3008_v49, %v2972_v29  ;;  %v7899_v49 = vld [vmem:[#allocation3 + $0x2b8] sm:$0x1] }
 0x27b   :  { %v2811_v53 = vsel %vm2356_vm12, %v10355_v42, %v10354_v41  ;;  %v2973_v1 = vadd.f32 %v2937_v34, %v10357_v58  ;;  %v3667_v15 = vsub.f32 %v7847_v23, %v7704_v6  ;;  %v7888_v21 = vmul.f32 %v3631_v44, %v3631_v44  ;;  %v7895_v29 = vld [vmem:[#allocation3 + $0x3a0] sm:$0xff]  ;;  %10362 = vst [vmem:[#allocation62_spill] sm:$0xff] %v7899_v49 }
 0x27c   :  { %10356 = vst [vmem:[#allocation150_spill] sm:$0xff] %v7881_v31  ;;  %v2904_v36 = vsub.f32 %v7575_v28, %v2813_v43  ;;  %v1400_v35 = vadd.f32 %v1399_v55, %v1398_v24  ;;  %v3890_v38 = vadd.f32 %v3845_v22, %v10360_v19  ;;  %v3935_v41 = vadd.f32 %v3934_v10, %v3889_v26  ;;  %v7893_v31 = vpop.permute.xlu1 %1986  ;;  %v10363_v28 = vld [vmem:[#allocation135_spill] sm:$0xff]  ;;  %v10365_v26 = vld [vmem:[#allocation89_spill] sm:$0xff]  ;;  %v7909_v58 = vpop.permute.xlu0 %1456  ;;  %v10370_v19 = vld [vmem:[#allocation86_spill] sm:$0xff] }
 0x27d   :  { %10359 = vst [vmem:[#allocation29_spill] sm:$0xff] %v7888_v21  ;;  %v2903_v18 = vsub.f32 %v7614_v12, %v2811_v53  ;;  %v3846_v42 = vmul.f32 %v3666_v20, %v3666_v20  ;;  %10361 = vst [vmem:[#allocation95_spill] sm:$0xff] %v7895_v29  ;;  %2030 = vrot.lane.b32.xlu1 %v7895_v29, %s4444_s0  ;;  %v2974_v34 = vadd.f32 %v2938_v59, %v10363_v28  ;;  %v10364_v12 = vld [vmem:[#allocation133_spill] sm:$0xff]  ;;  %v10366_v53 = vld [vmem:[#allocation130_spill] sm:$0xff] }
 0x27e   :  { %v3456_v24 = vmax.f32 %v3420_v51, 0.0  ;;  %v3491_v43 = vadd.f32 %v3490_v54, %v3455_v11  ;;  %4000 = vpush %v1400_v35  ;;  %v3010_v10 = vadd.f32 %v3009_v40, %v2973_v1  ;;  %v3847_v22 = vmul.f32 %v3667_v15, %v3667_v15  ;;  %10367 = vst [vmem:[#allocation140_spill] sm:$0xff] %v7909_v58  ;;  %v10368_v1 = vld [vmem:[#allocation127_spill] sm:$0xff]  ;;  %v4245_v28 = vld [vmem:[#allocation3 + $0xe0] sm:$0xff] }
 0x27f   :  { %v1758_v20 = vsel %vm1492_vm15, %v10365_v26, %v10364_v12  ;;  %v1759_v55 = vsel %vm1492_vm15, %v10364_v12, %v10366_v53  ;;  %v2940_v59 = vmul.f32 %v2904_v36, %v2904_v36  ;;  %v7914_v51 = vadd.f32 %v10272_v48, %v2904_v36  ;;  %v10369_v26 = vld [vmem:[#allocation88_spill] sm:$0xff]  ;;  %v4246_v21 = vld [vmem:[#allocation3 + $0x168] sm:$0xff]  ;;  %v4252_v46 = vld [vmem:[#allocation3 + $0x180] sm:$0xff] }
 0x280   :  { %v2939_v11 = vmul.f32 %v2903_v18, %v2903_v18  ;;  %v3421_v54 = vadd.f32 %v10272_v48, %v2903_v18  ;;  %v3891_v40 = vadd.f32 %v3846_v42, %v10368_v1  ;;  %v3936_v15 = vadd.f32 %v3935_v41, %v3890_v38  ;;  %v7918_v35 = vpop.permute.xlu1 %1680  ;;  %v4247_v36 = vld [vmem:[#allocation3 + $0x170] sm:$0xff] }
 0x281   :  { %1458 = vrot.lane.b32.xlu1 %v4245_v28, %s4444_s0  ;;  %v3492_v12 = vadd.f32 %v3491_v43, %v3456_v24  ;;  %v1493_v44 = vsel %vm1492_vm15, %v10370_v19, %v10369_v26  ;;  %v1843_v23 = vsub.f32 %v4246_v21, %v1758_v20  ;;  %v1844_v39 = vsub.f32 %v4247_v36, %v1759_v55  ;;  %v10372_v41 = vld [vmem:[#allocation144_spill] sm:$0xff]  ;;  %v7931_v24 = vpop.permute.xlu0 %1722  ;;  %v4248_v19 = vld [vmem:[#allocation3] sm:$0xff]  ;;  %v10375_v21 = vld [vmem:[#allocation93_spill] sm:$0xff] }
 0x282   :  { %v3892_v63 = vadd.f32 %v3847_v22, %v7455_v8  ;;  %v3011_v18 = vadd.f32 %v3010_v10, %v2974_v34  ;;  %v1494_v38 = vsel %vm1492_vm15, %v10369_v26, %v10371_v30  ;;  %v1760_v42 = vsel %vm1492_vm15, %v10366_v53, %v10372_v41  ;;  %10373 = vst [vmem:[#allocation114_spill] sm:$0xff] %v7931_v24  ;;  %v10374_v34 = vld [vmem:[#allocation124_spill] sm:$0xff]  ;;  %v4249_v53 = vld [vmem:[#allocation3 + $0x8] sm:$0xff]  ;;  %v4250_v26 = vld [vmem:[#allocation3 + $0x178] sm:$0xff] }
 0x283   :  { %v7934_v43 = vadd.f32 %v2940_v59, %v7452_v57  ;;  %v3250_v20 = vadd.f32 %v10272_v48, %v1843_v23  ;;  %v3251_v8 = vadd.f32 %v10272_v48, %v1844_v39  ;;  %v2975_v10 = vadd.f32 %v2939_v11, %v10374_v34  ;;  %v10377_v34 = vld [vmem:[#allocation106_spill] sm:$0xff] }
 0x284   :  { %v3457_v22 = vmax.f32 %v3421_v54, 0.0  ;;  %v3937_v55 = vadd.f32 %v3936_v15, %v3891_v40  ;;  %v1578_v1 = vsub.f32 %v4248_v19, %v1493_v44  ;;  %v7940_v28 = vpop.permute.xlu1 %1416  ;;  %v7945_v57 = vadd.s32 24, %v7088_v2  ;;  %v7950_v54 = vld [vmem:[#allocation3 + $0x3a8] sm:$0xff]  ;;  %v10376_v15 = vld [vmem:[#allocation149_spill] sm:$0xff] }
 0x285   :  { %1724 = vrot.lane.b32.xlu1 %v7343_v14, %s4444_s0  ;;  %v1579_v59 = vsub.f32 %v4249_v53, %v1494_v38  ;;  %v1845_v36 = vsub.f32 %v4250_v26, %v1760_v42  ;;  %v1761_v11 = vsel %vm1492_vm15, %v10372_v41, %v10375_v21  ;;  %v2068_v14 = vsel %vm1492_vm15, %v10376_v15, %v7850_v16  ;;  %v7960_v19 = vpop.permute.xlu0 %1460  ;;  %v10379_v26 = vld [vmem:[#allocation51_spill] sm:$0xff] }
 0x286   :  { %v2069_v38 = vsel %vm1492_vm15, %v7850_v16, %v10377_v34  ;;  %10378 = vst [vmem:[#allocation97_spill] sm:$0xff] %v7960_v19  ;;  %v3295_v42 = vmax.f32 %v3250_v20, 0.0  ;;  %v3296_v53 = vmax.f32 %v3251_v8, 0.0  ;;  %v1495_v41 = vsel %vm1492_vm15, %v10371_v30, %v10379_v26  ;;  %v10380_v19 = vld [vmem:[#allocation63_spill] sm:$0xff]  ;;  %v4253_v8 = vld [vmem:[#allocation3 + $0x2d0] sm:$0xff]  ;;  %v4254_v30 = vld [vmem:[#allocation3 + $0x2d8] sm:$0xff] }
 0x287   :  { %v3252_v44 = vadd.f32 %v10272_v48, %v1845_v36  ;;  %v3493_v24 = vadd.f32 %v3492_v12, %v3457_v22  ;;  %v3012_v40 = vadd.f32 %v3011_v18, %v2975_v10  ;;  %v1623_v58 = vmul.f32 %v1578_v1, %v1578_v1  ;;  %v4255_v18 = vld [vmem:[#allocation3 + $0x10] sm:$0xff] }
 0x288   :  { %v1846_v50 = vsub.f32 %v4252_v46, %v1761_v11  ;;  %v7966_v15 = vpop.permute.xlu1 %1990  ;;  %v1624_v16 = vmul.f32 %v1579_v59, %v1579_v59  ;;  %v1496_v20 = vsel %vm1492_vm15, %v10379_v26, %v10380_v19  ;;  %v2153_v3 = vsub.f32 %v4253_v8, %v2068_v14  ;;  %v10381_v22 = vld [vmem:[#allocation56_spill] sm:$0xff] }
 0x289   :  { %1726 = vrot.lane.b32.xlu1 %v7446_v56, %s4444_s0  ;;  %v2154_v4 = vsub.f32 %v4254_v30, %v2069_v38  ;;  %v1888_v60 = vmul.f32 %v1843_v23, %v1843_v23  ;;  %v1889_v12 = vmul.f32 %v1844_v39, %v1844_v39  ;;  %v1580_v10 = vsub.f32 %v4255_v18, %v1495_v41  ;;  %v7976_v1 = vpop.permute.xlu0 %2032  ;;  %v10383_v23 = vld [vmem:[#allocation64_spill] sm:$0xff] }
 0x28a   :  { %v1762_v46 = vsel %vm1492_vm15, %v10375_v21, %v10381_v22  ;;  %10382 = vst [vmem:[#allocation129_spill] sm:$0xff] %v7976_v1  ;;  %v7978_v56 = vadd.f32 %v3937_v55, %v3892_v63  ;;  %v110_v59 = vcvt.s32.f32 %v7945_v57  ;;  %v3340_v11 = vadd.f32 %v3296_v53, %v3295_v42  ;;  %v7990_v63 = vld [vmem:[#allocation3 + $0x3b0] sm:$0xff] }
 0x28b   :  { %v3297_v26 = vmax.f32 %v3252_v44, 0.0  ;;  %v1581_v14 = vsub.f32 %v4256_v62, %v1496_v20  ;;  %v3253_v38 = vadd.f32 %v10272_v48, %v1846_v50  ;;  %v2070_v39 = vsel %vm1492_vm15, %v10377_v34, %v10383_v23  ;;  %v4258_v44 = vld [vmem:[#allocation3 + $0x188] sm:$0xff] }
 0x28c   :  { %v2071_v21 = vsel %vm1492_vm15, %v10383_v23, %v7893_v31  ;;  %v7988_v41 = vpop.permute.xlu1 %1684  ;;  %v10384_v55 = vrot.slane %v7950_v54, 1  ;;  %v10385_v62 = vrot.slane %v7670_v45, 1  ;;  %v1847_v42 = vsub.f32 %v4258_v44, %v1762_v46 }
 0x28d   :  { %2034 = vrot.lane.b32.xlu1 %v7990_v63, %s4444_s0  ;;  %v2198_v34 = vmul.f32 %v2153_v3, %v2153_v3  ;;  %v2199_v53 = vmul.f32 %v2154_v4, %v2154_v4  ;;  %v10386_v20 = vrot.slane %v7895_v29, 1  ;;  %v10387_v8 = vrot.slane %v7655_v37, 1  ;;  %v8004_v2 = vpop.permute.xlu0 %1462  ;;  %v4260_v3 = vld [vmem:[#allocation3 + $0x2e8] sm:$0xff] }
 0x28e   :  { %v2817_v57 = vsel %vm2356_vm12, %v10385_v62, %v10384_v55  ;;  %v1933_v18 = vadd.f32 %v1888_v60, %v1623_v58  ;;  %v1934_v23 = vadd.f32 %v1889_v12, %v1624_v16  ;;  %v1625_v1 = vmul.f32 %v1580_v10, %v1580_v10  ;;  %v10388_v60 = vld [vmem:[#allocation137_spill] sm:$0xff] }
 0x28f   :  { %v2815_v30 = vsel %vm2356_vm12, %v10387_v8, %v10386_v20  ;;  %v1890_v32 = vmul.f32 %v1845_v36, %v1845_v36  ;;  %v2155_v47 = vsub.f32 %v4259_v17, %v2070_v39  ;;  %v1497_v46 = vsel %vm1492_vm15, %v10380_v19, %v7872_v25  ;;  %v10391_v20 = vld [vmem:[#allocation47_spill] sm:$0xff] }
 0x290   :  { %v2156_v4 = vsub.f32 %v4260_v3, %v2071_v21  ;;  %v3341_v55 = vadd.f32 %v3340_v11, %v3297_v26  ;;  %v1626_v62 = vmul.f32 %v1581_v14, %v1581_v14  ;;  %v1891_v44 = vmul.f32 %v1846_v50, %v1846_v50  ;;  %v8009_v7 = vpop.permute.xlu1 %1994  ;;  %v4261_v11 = vld [vmem:[#allocation3 + $0x20] sm:$0xff] }
 0x291   :  { %v3298_v49 = vmax.f32 %v3253_v38, 0.0  ;;  %1728 = vrot.lane.b32.xlu1 %v10388_v60, %s4444_s0  ;;  %v3254_v58 = vadd.f32 %v10272_v48, %v1847_v42  ;;  %v2243_v36 = vadd.f32 %v2198_v34, %v1933_v18  ;;  %v2244_v16 = vadd.f32 %v2199_v53, %v1934_v23  ;;  %v8027_v14 = vpop.permute.xlu0 %2036  ;;  %v10390_v21 = vld [vmem:[#allocation66_spill] sm:$0xff]  ;;  %v4263_v53 = vld [vmem:[#allocation3 + $0xf8] sm:$0xff] }
 0x292   :  { %v1763_v17 = vsel %vm1492_vm15, %v10381_v22, %v7918_v35  ;;  %v10389_v19 = vmax.f32 %v7914_v51, 0.0  ;;  %v8022_v50 = vadd.f32 %v3012_v40, %v7934_v43  ;;  %v8025_v10 = vsub.f32 %v7670_v45, %v2817_v57  ;;  %v4262_v40 = vld [vmem:[#allocation3 + $0x190] sm:$0xff] }
 0x293   :  { %v1582_v26 = vsub.f32 %v4261_v11, %v1497_v46  ;;  %v1935_v38 = vadd.f32 %v1890_v32, %v1625_v1  ;;  %v2200_v39 = vmul.f32 %v2155_v47, %v2155_v47  ;;  %v2072_v22 = vsel %vm1492_vm15, %v7893_v31, %v10390_v21  ;;  %v4268_v11 = vld [vmem:[#allocation3 + $0x28] sm:$0xff] }
 0x294   :  { %v8019_v12 = vadd.f32 %v3493_v24, %v10389_v19  ;;  %v2201_v34 = vmul.f32 %v2156_v4, %v2156_v4  ;;  %v8032_v51 = vmul.f32 0.03125, %v110_v59  ;;  %v8035_v24 = vsub.f32 %v7655_v37, %v2815_v30  ;;  %v8037_v57 = vpop.permute.xlu1 %1422  ;;  %v10392_v59 = vld [vmem:[#allocation16_spill] sm:$0xff]  ;;  %v8061_v19 = vld [vmem:[#allocation3 + $0x3c0] sm:$0xff] }
 0x295   :  { %v1936_v43 = vadd.f32 %v1891_v44, %v1626_v62  ;;  %v1848_v45 = vsub.f32 %v4262_v40, %v1763_v17  ;;  %1464 = vrot.lane.b32.xlu1 %v4263_v53, %s4444_s0  ;;  %v3342_v32 = vadd.f32 %v3341_v55, %v3298_v49  ;;  %v3299_v47 = vmax.f32 %v3254_v58, 0.0  ;;  %v4264_v30 = vld [vmem:[#allocation3 + $0x2f0] sm:$0xff]  ;;  %v8049_v46 = vpop.permute.xlu0 %1730  ;;  %v4265_v55 = vld [vmem:[#allocation3 + $0x198] sm:$0xff]  ;;  %v4266_v44 = vld [vmem:[#allocation3 + $0x40] sm:$0xff]  ;;  %10394 = vst [vmem:[#allocation116_spill] sm:$0xff] %v8061_v19 }
 0x296   :  { %v2288_v1 = vadd.f32 %v2244_v16, %v2243_v36  ;;  %v1764_v31 = vsel %vm1492_vm15, %v7918_v35, %v10391_v20  ;;  %v1498_v37 = vsel %vm1492_vm15, %v7872_v25, %v10392_v59  ;;  %v1627_v8 = vmul.f32 %v1582_v26, %v1582_v26  ;;  %v10393_v58 = vld [vmem:[#allocation19_spill] sm:$0xff]  ;;  %v4270_v53 = vld [vmem:[#allocation3 + $0x30] sm:$0xff] }
 0x297   :  { %v2157_v18 = vsub.f32 %v4264_v30, %v2072_v22  ;;  %v2073_v23 = vsel %vm1492_vm15, %v10390_v21, %v7966_v15  ;;  %v2245_v49 = vadd.f32 %v2200_v39, %v1935_v38  ;;  %v1892_v3 = vmul.f32 %v1847_v42, %v1847_v42  ;;  %v10395_v38 = vld [vmem:[#allocation147_spill] sm:$0xff]  ;;  %v4269_v21 = vld [vmem:[#allocation3 + $0x2f8] sm:$0xff] }
 0x298   :  { %v2246_v4 = vadd.f32 %v2201_v34, %v1936_v43  ;;  %v1499_v35 = vsel %vm1492_vm15, %v10392_v59, %v7940_v28  ;;  %v1849_v62 = vsub.f32 %v4265_v55, %v1764_v31  ;;  %v3255_v25 = vadd.f32 %v10272_v48, %v1848_v45  ;;  %v8059_v17 = vpop.permute.xlu1 %1688 }
 0x299   :  { %v1586_v36 = vsub.f32 %v4266_v44, %v10393_v58  ;;  %v1765_v16 = vsel %vm1492_vm15, %v10391_v20, %v7988_v41  ;;  %2038 = vrot.lane.b32.xlu1 %v8061_v19, %s4444_s0  ;;  %v2289_v42 = vadd.f32 %v2288_v1, %v2245_v49  ;;  %v1583_v26 = vsub.f32 %v4268_v11, %v1498_v37  ;;  %v8068_v31 = vpop.permute.xlu0 %1466  ;;  %v4271_v37 = vld [vmem:[#allocation3 + $0x1a0] sm:$0xff]  ;;  %v4274_v11 = vld [vmem:[#allocation3 + $0x1a8] sm:$0xff] }
 0x29a   :  { %v2074_v39 = vsel %vm1492_vm15, %v7966_v15, %v10395_v38  ;;  %v2158_v22 = vsub.f32 %v4269_v21, %v2073_v23  ;;  %v3343_v34 = vadd.f32 %v3342_v32, %v3299_v47  ;;  %v1937_v43 = vadd.f32 %v1892_v3, %v1627_v8  ;;  %10396 = vst [vmem:[#allocation102_spill] sm:$0xff] %v8068_v31  ;;  %v4272_v44 = vld [vmem:[#allocation3 + $0x300] sm:$0xff]  ;;  %v10397_v8 = vld [vmem:[#allocation53_spill] sm:$0xff]  ;;  %v8084_v31 = vld [vmem:[#allocation3 + $0x108] sm:$0xff] }
 0x29b   :  { %v2202_v40 = vmul.f32 %v2157_v18, %v2157_v18  ;;  %v1584_v20 = vsub.f32 %v4270_v53, %v1499_v35  ;;  %v2290_v59 = vadd.f32 %v2289_v42, %v2246_v4  ;;  %v1893_v30 = vmul.f32 %v1848_v45, %v1848_v45  ;;  %v10398_v4 = vld [vmem:[#allocation26_spill] sm:$0xff] }
 0x29c   :  { %v1500_v1 = vsel %vm1492_vm15, %v7940_v28, %v10393_v58  ;;  %v1850_v49 = vsub.f32 %v4271_v37, %v1765_v16  ;;  %v3256_v55 = vadd.f32 %v10272_v48, %v1849_v62  ;;  %v3300_v15 = vmax.f32 %v3255_v25, 0.0  ;;  %v1691_v47 = vpop.permute.xlu1 %1690  ;;  %v10399_v28 = vld [vmem:[#allocation101_spill] sm:$0xff]  ;;  %v4275_v37 = vld [vmem:[#allocation3 + $0x308] sm:$0xff] }
 0x29d   :  { %v2159_v23 = vsub.f32 %v4272_v44, %v2074_v39  ;;  %v2075_v32 = vsel %vm1492_vm15, %v10395_v38, %v8009_v7  ;;  %1732 = vrot.lane.b32.xlu1 %v10397_v8, %s4444_s0  ;;  %v1628_v45 = vmul.f32 %v1583_v26, %v1583_v26  ;;  %v1631_v18 = vmul.f32 %v1586_v36, %v1586_v36  ;;  %v4273_v16 = vld [vmem:[#allocation3 + $0x38] sm:$0xff] }
 0x29e   :  { %v2203_v3 = vmul.f32 %v2158_v22, %v2158_v22  ;;  %v1503_v35 = vsel %vm1492_vm15, %v10399_v28, %v10398_v4  ;;  %v2247_v58 = vadd.f32 %v2202_v40, %v1937_v43  ;;  %v1585_v25 = vsub.f32 %v4273_v16, %v1500_v1  ;;  %v8088_v43 = vpop.permute.xlu0 %2040 }
 0x29f   :  { %v1629_v42 = vmul.f32 %v1584_v20, %v1584_v20  ;;  %v1851_v39 = vsub.f32 %v4274_v11, %v7988_v41  ;;  %v1894_v21 = vmul.f32 %v1849_v62, %v1849_v62  ;;  %v1938_v38 = vadd.f32 %v1893_v30, %v1628_v45  ;;  %10400 = vst [vmem:[#allocation110_spill] sm:$0xff] %v8088_v43  ;;  %v4277_v62 = vld [vmem:[#allocation3 + $0x310] sm:$0xff]  ;;  %v10401_v30 = vld [vmem:[#allocation107_spill] sm:$0xff] }
 0x2a0   :  { %v3257_v53 = vadd.f32 %v10272_v48, %v1850_v49  ;;  %v2160_v44 = vsub.f32 %v4275_v37, %v2075_v32  ;;  %v2291_v26 = vadd.f32 %v2290_v59, %v2247_v58  ;;  %v3301_v36 = vmax.f32 %v3256_v55, 0.0  ;;  %v1999_v60 = vpop.permute.xlu1 %1998  ;;  %v10402_v45 = vld [vmem:[#allocation84_spill] sm:$0xff] }
 0x2a1   :  { %v3344_v22 = vadd.f32 %v3343_v34, %v3300_v15  ;;  %v2204_v8 = vmul.f32 %v2159_v23, %v2159_v23  ;;  %1468 = vrot.lane.b32.xlu1 %v8084_v31, %s4444_s0  ;;  %v2248_v40 = vadd.f32 %v2203_v3, %v1938_v38  ;;  %v1895_v41 = vmul.f32 %v1850_v49, %v1850_v49  ;;  %v10403_v3 = vld [vmem:[#allocation71_spill] sm:$0xff]  ;;  %v4279_v38 = vld [vmem:[#allocation3 + $0x58] sm:$0xff] }
 0x2a2   :  { %v2161_v20 = vsub.f32 %v4277_v62, %v8009_v7  ;;  %v1766_v59 = vsel %vm1492_vm15, %v10401_v30, %v8059_v17  ;;  %v1630_v1 = vmul.f32 %v1585_v25, %v1585_v25  ;;  %v1939_v34 = vadd.f32 %v1894_v21, %v1629_v42  ;;  %v4278_v7 = vld [vmem:[#allocation3 + $0x1b0] sm:$0xff]  ;;  %v4281_v30 = vld [vmem:[#allocation3 + $0x48] sm:$0xff] }
 0x2a3   :  { %v1896_v55 = vmul.f32 %v1851_v39, %v1851_v39  ;;  %v3258_v15 = vadd.f32 %v10272_v48, %v1851_v39  ;;  %v3302_v23 = vmax.f32 %v3257_v53, 0.0  ;;  %v2205_v32 = vmul.f32 %v2160_v44, %v2160_v44  ;;  %v8100_v42 = vld [vmem:[#allocation3 + $0x3d0] sm:$0xff] }
 0x2a4   :  { %v1501_v58 = vsel %vm1492_vm15, %v10402_v45, %v8037_v57  ;;  %v2076_v49 = vsel %vm1492_vm15, %v10403_v3, %v1999_v60  ;;  %v3345_v16 = vadd.f32 %v3344_v22, %v3301_v36  ;;  %v1852_v11 = vsub.f32 %v4278_v7, %v1766_v59  ;;  %v1693_v25 = vpop.permute.xlu1 %1692  ;;  %v4282_v22 = vld [vmem:[#allocation3 + $0x318] sm:$0xff]  ;;  %v8106_v3 = vpop.permute.xlu0 %1734 }
 0x2a5   :  { %v1589_v37 = vsub.f32 %v4279_v38, %v1503_v35  ;;  %2042 = vrot.lane.b32.xlu1 %v8100_v42, %s4444_s0  ;;  %v2249_v39 = vadd.f32 %v2204_v8, %v1939_v34  ;;  %v2292_v21 = vadd.f32 %v2291_v26, %v2248_v40  ;;  %v1940_v53 = vadd.f32 %v1895_v41, %v1630_v1 }
 0x2a6   :  { %v2206_v44 = vmul.f32 %v2161_v20, %v2161_v20  ;;  %v3303_v62 = vmax.f32 %v3258_v15, 0.0  ;;  %v1587_v45 = vsub.f32 %v4281_v30, %v1501_v58  ;;  %v1767_v36 = vsel %vm1492_vm15, %v8059_v17, %v1691_v47  ;;  %10404 = vst [vmem:[#allocation146_spill] sm:$0xff] %v8106_v3  ;;  %v10405_v17 = vld [vmem:[#allocation35_spill] sm:$0xff]  ;;  %v4283_v15 = vld [vmem:[#allocation3 + $0x1b8] sm:$0xff]  ;;  %v8339_v3 = vld [vmem:[#allocation3 + $0x420] sm:$0x1] }
 0x2a7   :  { %v2162_v59 = vsub.f32 %v4282_v22, %v2076_v49  ;;  %v1941_v35 = vadd.f32 %v1896_v55, %v1631_v18  ;;  %v3346_v7 = vadd.f32 %v3345_v16, %v3302_v23  ;;  %v2250_v38 = vadd.f32 %v2205_v32, %v1940_v53  ;;  %v10406_v55 = vld [vmem:[#allocation115_spill] sm:$0xff]  ;;  %10444 = vst [vmem:[#allocation125_spill] sm:$0xff] %v8339_v3 }
 0x2a8   :  { %v1768_v43 = vsel %vm1492_vm15, %v1691_v47, %v1693_v25  ;;  %v1502_v26 = vsel %vm1492_vm15, %v8037_v57, %v10399_v28  ;;  %v1897_v8 = vmul.f32 %v1852_v11, %v1852_v11  ;;  %v3259_v40 = vadd.f32 %v10272_v48, %v1852_v11  ;;  %v1429_v20 = vpop.permute.xlu1 %1428  ;;  %v4284_v57 = vld [vmem:[#allocation3 + $0x1c0] sm:$0xff]  ;;  %v4285_v11 = vld [vmem:[#allocation3 + $0x50] sm:$0xff]  ;;  %v10407_v53 = vld [vmem:[#allocation131_spill] sm:$0xff] }
 0x2a9   :  { %v1634_v41 = vmul.f32 %v1589_v37, %v1589_v37  ;;  %1736 = vrot.lane.b32.xlu1 %v10405_v17, %s4444_s0  ;;  %v2293_v1 = vadd.f32 %v2292_v21, %v2249_v39  ;;  %v2251_v34 = vadd.f32 %v2206_v44, %v1941_v35  ;;  %v1853_v18 = vsub.f32 %v4283_v15, %v1767_v36  ;;  %v4286_v44 = vld [vmem:[#allocation3 + $0x320] sm:$0xff] }
 0x2aa   :  { %v2077_v23 = vsel %vm1492_vm15, %v1999_v60, %v10406_v55  ;;  %v3347_v47 = vsel %vm2295_vm0, %v3303_v62, 0.0  ;;  %v1632_v32 = vmul.f32 %v1587_v45, %v1587_v45  ;;  %v2207_v58 = vmul.f32 %v2162_v59, %v2162_v59  ;;  %v8122_v62 = vld [vmem:[#allocation3 + $0x118] sm:$0xff] }
 0x2ab   :  { %v1854_v28 = vsub.f32 %v4284_v57, %v1768_v43  ;;  %v3348_v49 = vadd.f32 %v3347_v47, %v3346_v7  ;;  %v2294_v16 = vadd.f32 %v2293_v1, %v2250_v38  ;;  %v1588_v37 = vsub.f32 %v4285_v11, %v1502_v26  ;;  %v8126_v43 = vpop.permute.xlu0 %1470  ;;  %v4288_v38 = vld [vmem:[#allocation3 + $0x1c8] sm:$0xff]  ;;  %v10409_v57 = vld [vmem:[#allocation132_spill] sm:$0xff] }
 0x2ac   :  { %v1769_v30 = vsel %vm1492_vm15, %v1693_v25, %v10407_v53  ;;  %v1942_v39 = vadd.f32 %v1897_v8, %v1632_v32  ;;  %v3304_v21 = vmax.f32 %v3259_v40, 0.0  ;;  %v2163_v36 = vsub.f32 %v4286_v44, %v2077_v23  ;;  %v2003_v22 = vpop.permute.xlu1 %2002  ;;  %10408 = vst [vmem:[#allocation72_spill] sm:$0xff] %v8126_v43  ;;  %v4289_v8 = vld [vmem:[#allocation3 + $0x328] sm:$0xff]  ;;  %v4290_v23 = vld [vmem:[#allocation3 + $0x60] sm:$0xff]  ;;  %v4310_v43 = vld [vmem:[#allocation3 + $0x138] sm:$0x1] }
 0x2ad   :  { %v1504_v60 = vsel %vm1492_vm15, %v10398_v4, %v1429_v20  ;;  %1472 = vrot.lane.b32.xlu1 %v8122_v62, %s4444_s0  ;;  %v2296_v45 = vsel %vm2295_vm0, %v2251_v34, 0.0  ;;  %v1898_v59 = vmul.f32 %v1853_v18, %v1853_v18  ;;  %v3260_v25 = vadd.f32 %v10272_v48, %v1853_v18 }
 0x2ae   :  { %v2078_v35 = vsel %vm1492_vm15, %v10406_v55, %v2003_v22  ;;  %v2252_v7 = vadd.f32 %v2207_v58, %v1942_v39  ;;  %v1855_v26 = vsub.f32 %v4288_v38, %v1769_v30  ;;  %v1899_v4 = vmul.f32 %v1854_v28, %v1854_v28  ;;  %v8135_v55 = vld [vmem:[#allocation3 + $0x3e0] sm:$0xff] }
 0x2af   :  { %v2164_v40 = vsub.f32 %v4289_v8, %v2078_v35  ;;  %v2297_v17 = vadd.f32 %v2296_v45, %v2294_v16  ;;  %v1633_v1 = vmul.f32 %v1588_v37, %v1588_v37  ;;  %v3261_v15 = vadd.f32 %v10272_v48, %v1854_v28  ;;  %v10410_v28 = vld [vmem:[#allocation139_spill] sm:$0xff]  ;;  %v10412_v35 = vld [vmem:[#allocation128_spill] sm:$0xff]  ;;  %s4001_s25 = spop %4000 }
 0x2b0   :  { %v1590_v47 = vsub.f32 %v4290_v23, %v1504_v60  ;;  %v3349_v32 = vadd.f32 %v3348_v49, %v3304_v21  ;;  %v2208_v34 = vmul.f32 %v2163_v36, %v2163_v36  ;;  %v2079_v18 = vsel %vm1492_vm15, %v2003_v22, %v10409_v57  ;;  %v1697_v44 = vpop.permute.xlu1 %1696  ;;  %v4292_v36 = vld [vmem:[#allocation3 + $0x1d0] sm:$0xff]  ;;  %v8144_v22 = vpop.permute.xlu0 %2044 }
 0x2b1   :  { %v2209_v11 = vmul.f32 %v2164_v40, %v2164_v40  ;;  %2046 = vrot.lane.b32.xlu1 %v8135_v55, %s4444_s0  ;;  %v1943_v58 = vadd.f32 %v1898_v59, %v1633_v1  ;;  %v3305_v30 = vmax.f32 %v3260_v25, 0.0  ;;  %v1770_v16 = vsel %vm1492_vm15, %v10407_v53, %v1697_v44  ;;  %10411 = vst [vmem:[#allocation98_spill] sm:$0xff] %v8144_v22  ;;  %v4293_v25 = vld [vmem:[#allocation3 + $0x330] sm:$0xff]  ;;  %v4295_v1 = vld [vmem:[#allocation3 + $0x120] sm:$0x1] }
 0x2b2   :  { %v1771_v37 = vsel %vm1492_vm15, %v1697_v44, %v10410_v28  ;;  %v2298_v49 = vadd.f32 %v2297_v17, %v2252_v7  ;;  %v1944_v39 = vadd.f32 %v1899_v4, %v1634_v41  ;;  %v3262_v21 = vadd.f32 %v10272_v48, %v1855_v26  ;;  %v4294_v41 = vld [vmem:[#allocation3 + $0x1d8] sm:$0xff] }
 0x2b3   :  { %v1856_v60 = vsub.f32 %v4292_v36, %v1770_v16  ;;  %v3306_v45 = vmax.f32 %v3261_v15, 0.0  ;;  %v1505_v38 = vsel %vm1492_vm15, %v1429_v20, %v10412_v35  ;;  %v1635_v59 = vmul.f32 %v1590_v47, %v1590_v47 }
 0x2b4   :  { %v2165_v8 = vsub.f32 %v4293_v25, %v2079_v18  ;;  %v8150_v53 = vsub.f32 %v7895_v29, %v7704_v6  ;;  %v2253_v40 = vadd.f32 %v2208_v34, %v1943_v58  ;;  %v2254_v7 = vadd.f32 %v2209_v11, %v1944_v39  ;;  %v1433_v17 = vpop.permute.xlu1 %1432  ;;  %v4296_v34 = vld [vmem:[#allocation3 + $0x68] sm:$0xff]  ;;  %v4297_v11 = vld [vmem:[#allocation3 + $0x70] sm:$0xff] }
 0x2b5   :  { %v1857_v4 = vsub.f32 %v4294_v41, %v1771_v37  ;;  %1474 = vrot.lane.b32.xlu1 %v4295_v1, %s4444_s0  ;;  %v3350_v23 = vadd.f32 %v3349_v32, %v3305_v30  ;;  %v1900_v15 = vmul.f32 %v1855_v26, %v1855_v26  ;;  %v3263_v44 = vadd.f32 %v10272_v48, %v1856_v60  ;;  %v4298_v1 = vld [vmem:[#allocation3 + $0x288] sm:$0x1] }
 0x2b6   :  { %v1506_v20 = vsel %vm1492_vm15, %v10412_v35, %v1433_v17  ;;  %v8158_v47 = vmul.f32 %v8025_v10, %v8025_v10  ;;  %v2299_v6 = vadd.f32 %v2298_v49, %v2253_v40  ;;  %v1591_v18 = vsub.f32 %v4296_v34, %v1505_v38  ;;  %v8161_v35 = vpop.permute.xlu0 %1738  ;;  %v10413_v49 = vld [vmem:[#allocation42_spill] sm:$0xff]  ;;  %v4299_v40 = vld [vmem:[#allocation3 + $0x338] sm:$0xff] }
 0x2b7   :  { %v1592_v58 = vsub.f32 %v4297_v11, %v1506_v20  ;;  %v3307_v16 = vmax.f32 %v3262_v21, 0.0  ;;  %v3351_v37 = vadd.f32 %v3350_v23, %v3306_v45  ;;  %v1945_v39 = vadd.f32 %v1900_v15, %v1635_v59  ;;  %v10414_v45 = vld [vmem:[#allocation30_spill] sm:$0xff]  ;;  %v4301_v11 = vld [vmem:[#allocation3 + $0x78] sm:$0xff] }
 0x2b8   :  { %v2210_v36 = vmul.f32 %v2165_v8, %v2165_v8  ;;  %v2300_v32 = vadd.f32 %v2299_v6, %v2254_v7  ;;  %v1901_v26 = vmul.f32 %v1856_v60, %v1856_v60  ;;  %v1902_v30 = vmul.f32 %v1857_v4, %v1857_v4  ;;  %v2007_v41 = vpop.permute.xlu1 %2006  ;;  %v4300_v23 = vld [vmem:[#allocation3 + $0x340] sm:$0xff] }
 0x2b9   :  { %v1637_v25 = vmul.f32 %v1592_v58, %v1592_v58  ;;  %1740 = vrot.lane.b32.xlu1 %v4298_v1, %s4444_s0  ;;  %v3308_v29 = vmax.f32 %v3263_v44, 0.0  ;;  %v1507_v38 = vsel %vm1492_vm15, %v1433_v17, %v10413_v49  ;;  %v2080_v21 = vsel %vm1492_vm15, %v10409_v57, %v2007_v41 }
 0x2ba   :  { %v2081_v59 = vsel %vm1492_vm15, %v2007_v41, %v10414_v45  ;;  %v1636_v8 = vmul.f32 %v1591_v18, %v1591_v18  ;;  %v2166_v7 = vsub.f32 %v4299_v40, %v2080_v21  ;;  %v8171_v20 = vadd.f32 %v10272_v48, %v8025_v10  ;;  %v4302_v18 = vld [vmem:[#allocation3 + $0x130] sm:$0x1]  ;;  %v10415_v10 = vld [vmem:[#allocation34_spill] sm:$0xff] }
 0x2bb   :  { %v1947_v60 = vadd.f32 %v1902_v30, %v1637_v25  ;;  %v2167_v15 = vsub.f32 %v4300_v23, %v2081_v59  ;;  %v3352_v44 = vadd.f32 %v3351_v37, %v3307_v16  ;;  %v2255_v6 = vadd.f32 %v2210_v36, %v1945_v39  ;;  %v8179_v59 = vpop.permute.xlu0 %2048  ;;  %v4305_v40 = vld [vmem:[#allocation3 + $0x1f0] sm:$0xff] }
 0x2bc   :  { %v3264_v17 = vadd.f32 %v10272_v48, %v1857_v4  ;;  %v1946_v34 = vadd.f32 %v1901_v26, %v1636_v8  ;;  %v1593_v57 = vsub.f32 %v4301_v11, %v1507_v38  ;;  %v2211_v58 = vmul.f32 %v2166_v7, %v2166_v7  ;;  %v1701_v41 = vpop.permute.xlu1 %1700  ;;  %v4303_v4 = vld [vmem:[#allocation3 + $0x1e0] sm:$0xff]  ;;  %v4304_v26 = vld [vmem:[#allocation3 + $0x1e8] sm:$0xff] }
 0x2bd   :  { %v2212_v1 = vmul.f32 %v2167_v15, %v2167_v15  ;;  %1478 = vrot.lane.b32.xlu1 %v4302_v18, %s4444_s0  ;;  %v2301_v30 = vadd.f32 %v2300_v32, %v2255_v6  ;;  %v3353_v25 = vadd.f32 %v3352_v44, %v3308_v29  ;;  %v1772_v21 = vsel %vm1492_vm15, %v10410_v28, %v1701_v41  ;;  %v8187_v6 = vld [vmem:[#allocation3 + $0x3f0] sm:$0x1] }
 0x2be   :  { %v1773_v16 = vsel %vm1492_vm15, %v1701_v41, %v10415_v10  ;;  %v2256_v37 = vadd.f32 %v2211_v58, %v1946_v34  ;;  %v1858_v36 = vsub.f32 %v4303_v4, %v1772_v21  ;;  %v3669_v8 = vsub.f32 %v7950_v54, %v8032_v51  ;;  %v4307_v58 = vld [vmem:[#allocation3 + $0x88] sm:$0xff]  ;;  %v10416_v4 = vld [vmem:[#allocation17_spill] sm:$0xff] }
 0x2bf   :  { %v2257_v39 = vadd.f32 %v2212_v1, %v1947_v60  ;;  %v1859_v38 = vsub.f32 %v4304_v26, %v1773_v16  ;;  %v2941_v29 = vmul.f32 %v8035_v24, %v8035_v24  ;;  %v3309_v32 = vmax.f32 %v3264_v17, 0.0 }
 0x2c0   :  { %v1860_v28 = vsub.f32 %v4305_v40, %v10415_v10  ;;  %v1638_v7 = vmul.f32 %v1593_v57, %v1593_v57  ;;  %v2302_v23 = vadd.f32 %v2301_v30, %v2256_v37  ;;  %v1903_v15 = vmul.f32 %v1858_v36, %v1858_v36  ;;  %v1437_v44 = vpop.permute.xlu1 %1436  ;;  %v4308_v30 = vld [vmem:[#allocation3 + $0x80] sm:$0xff]  ;;  %v4309_v37 = vld [vmem:[#allocation3 + $0x358] sm:$0xff] }
 0x2c1   :  { %v3265_v60 = vadd.f32 %v10272_v48, %v1858_v36  ;;  %2050 = vrot.lane.b32.xlu1 %v8187_v6, %s4444_s0  ;;  %v3354_v34 = vadd.f32 %v3353_v25, %v3309_v32  ;;  %v3266_v11 = vadd.f32 %v10272_v48, %v1859_v38  ;;  %v1508_v17 = vsel %vm1492_vm15, %v10413_v49, %v1437_v44 }
 0x2c2   :  { %v1595_v1 = vsub.f32 %v4307_v58, %v1437_v44  ;;  %v2303_v41 = vadd.f32 %v2302_v23, %v2257_v39  ;;  %v1948_v57 = vadd.f32 %v1903_v15, %v1638_v7  ;;  %v1594_v21 = vsub.f32 %v4308_v30, %v1508_v17  ;;  %v8198_v39 = vpop.permute.xlu0 %1476  ;;  %v4311_v44 = vld [vmem:[#allocation3 + $0x348] sm:$0xff]  ;;  %v10418_v17 = vld [vmem:[#allocation61_spill] sm:$0xff] }
 0x2c3   :  { %v3310_v18 = vmax.f32 %v3265_v60, 0.0  ;;  %v3423_v10 = vadd.f32 %v10272_v48, %v8035_v24  ;;  %v1905_v16 = vmul.f32 %v1860_v28, %v1860_v28  ;;  %v2170_v36 = vsub.f32 %v4309_v37, %v10416_v4  ;;  %10417 = vst [vmem:[#allocation83_spill] sm:$0xff] %v8198_v39 }
 0x2c4   :  { %v1640_v25 = vmul.f32 %v1595_v1, %v1595_v1  ;;  %v1904_v26 = vmul.f32 %v1859_v38, %v1859_v38  ;;  %v3311_v32 = vmax.f32 %v3266_v11, 0.0  ;;  %v1639_v22 = vmul.f32 %v1594_v21, %v1594_v21  ;;  %v2011_v49 = vpop.permute.xlu1 %2010 }
 0x2c5   :  { %v3355_v40 = vadd.f32 %v3354_v34, %v3310_v18  ;;  %1480 = vrot.lane.b32.xlu1 %v4310_v43, %s4444_s0  ;;  %v3848_v7 = vmul.f32 %v8150_v53, %v8150_v53  ;;  %v2082_v24 = vsel %vm1492_vm15, %v10414_v45, %v2011_v49  ;;  %v2083_v23 = vsel %vm1492_vm15, %v2011_v49, %v10416_v4  ;;  %v4312_v34 = vld [vmem:[#allocation3 + $0x350] sm:$0xff]  ;;  %v8219_v4 = vld [vmem:[#allocation3 + $0x400] sm:$0x1] }
 0x2c6   :  { %v1775_v38 = vsel %vm1492_vm15, %v7637_v52, %v7659_v9  ;;  %v1949_v60 = vadd.f32 %v1904_v26, %v1639_v22  ;;  %v2168_v43 = vsub.f32 %v4311_v44, %v2082_v24  ;;  %v2169_v11 = vsub.f32 %v4312_v34, %v2083_v23  ;;  %v10419_v26 = vld [vmem:[#allocation134_spill] sm:$0xff]  ;;  %v8230_v23 = vld [vmem:[#allocation3 + $0x3b8] sm:$0xff] }
 0x2c7   :  { %v8209_v15 = vadd.f32 %v3355_v40, %v3311_v32  ;;  %v8213_v53 = vadd.f32 %v8158_v47, %v10418_v17  ;;  %v3267_v45 = vadd.f32 %v10272_v48, %v1860_v28  ;;  %v2215_v58 = vmul.f32 %v2170_v36, %v2170_v36  ;;  %v10422_v17 = vld [vmem:[#allocation50_spill] sm:$0xff] }
 0x2c8   :  { %v1950_v1 = vadd.f32 %v1905_v16, %v1640_v25  ;;  %v3849_v18 = vmul.f32 %v3669_v8, %v3669_v8  ;;  %v2213_v30 = vmul.f32 %v2168_v43, %v2168_v43  ;;  %v2214_v21 = vmul.f32 %v2169_v11, %v2169_v11  ;;  %v1439_v37 = vpop.permute.xlu1 %1438  ;;  %v4314_v8 = vld [vmem:[#allocation3 + $0x200] sm:$0xff]  ;;  %v10420_v25 = vld [vmem:[#allocation141_spill] sm:$0xff]  ;;  %v4316_v11 = vld [vmem:[#allocation3 + $0x208] sm:$0xff] }
 0x2c9   :  { %v1776_v22 = vsel %vm1492_vm15, %v7659_v9, %v7699_v61  ;;  %2054 = vrot.lane.b32.xlu1 %v8219_v4, %s4444_s0  ;;  %v2977_v32 = vadd.f32 %v2941_v29, %v10419_v26  ;;  %v1509_v28 = vsel %vm1492_vm15, %v1439_v37, %v7609_v5  ;;  %v1862_v16 = vsub.f32 %v4314_v8, %v1775_v38  ;;  %v8228_v9 = vpop.permute.xlu0 %1742 }
 0x2ca   :  { %v3459_v36 = vmax.f32 %v3423_v10, 0.0  ;;  %v3893_v40 = vadd.f32 %v3848_v7, %v10420_v25  ;;  %v2258_v49 = vadd.f32 %v2213_v30, %v1948_v57  ;;  %v2259_v24 = vadd.f32 %v2214_v21, %v1949_v60  ;;  %10421 = vst [vmem:[#allocation80_spill] sm:$0xff] %v8228_v9  ;;  %v4317_v57 = vld [vmem:[#allocation3 + $0x90] sm:$0xff] }
 0x2cb   :  { %v9510_v44 = vrot.slane %v8230_v23, 1  ;;  %v3312_v43 = vmax.f32 %v3267_v45, 0.0  ;;  %v2260_v34 = vadd.f32 %v2215_v58, %v1950_v1  ;;  %v8233_v29 = vsub.f32 %v4316_v11, %v1776_v22  ;;  %v4318_v22 = vld [vmem:[#allocation3 + $0x1f8] sm:$0xff] }
 0x2cc   :  { %v8236_v37 = vadd.f32 %v3849_v18, %v10422_v17  ;;  %v3671_v10 = vsub.f32 %v8230_v23, %v8032_v51  ;;  %v2304_v7 = vadd.f32 %v2303_v41, %v2258_v49  ;;  %v1596_v38 = vsub.f32 %v4317_v57, %v1509_v28  ;;  %v1705_v60 = vpop.permute.xlu1 %1704  ;;  %v4319_v17 = vld [vmem:[#allocation3 + $0x148] sm:$0x1] }
 0x2cd   :  { %1748 = vrot.lane.b32.xlu1 %v7801_v0, %s4444_s0  ;;  %v3014_v30 = vsel %vm3003_vm14, %v2977_v32, 0.0  ;;  %v9511_v45 = vrot.slane %v7990_v63, 1  ;;  %v3269_v58 = vadd.f32 %v10272_v48, %v1862_v16  ;;  %v1774_v1 = vsel %vm1492_vm15, %v1705_v60, %v7637_v52 }
 0x2ce   :  { %v3495_v18 = vsel %vm3003_vm14, %v3459_v36, 0.0  ;;  %v3939_v21 = vsel %vm3003_vm14, %v3893_v40, 0.0  ;;  %v2305_v41 = vadd.f32 %v2304_v7, %v2259_v24  ;;  %v1861_v26 = vsub.f32 %v4318_v22, %v1774_v1  ;;  %v4320_v22 = vld [vmem:[#allocation3 + $0x98] sm:$0xff] }
 0x2cf   :  { %v10423_v28 = vrot.slane %v7706_v27, 1  ;;  %v3357_v8 = vsel %vm2295_vm0, %v3312_v43, 0.0  ;;  %v2306_v25 = vsel %vm2295_vm0, %v2260_v34, 0.0  ;;  %v3270_v52 = vadd.f32 %v10272_v48, %v8233_v29  ;;  %v8262_v27 = vpop.permute.xlu0 %1744 }
 0x2d0   :  { %v1641_v49 = vmul.f32 %v1596_v38, %v1596_v38  ;;  %v1906_v36 = vmul.f32 %v1861_v26, %v1861_v26  ;;  %v3268_v40 = vadd.f32 %v10272_v48, %v1861_v26  ;;  %v1443_v24 = vpop.permute.xlu1 %1442  ;;  %v8259_v11 = vadd.f32 %v2306_v25, %v2305_v41 }
 0x2d1   :  { %v2821_v32 = vsel %vm2356_vm12, %v10423_v28, %v9510_v44  ;;  %1484 = vrot.lane.b32.xlu1 %v4319_v17, %s4444_s0  ;;  %v10424_v43 = vrot.slane %v7724_v13, 1  ;;  %v3670_v7 = vsub.f32 %v7990_v63, %v8032_v51  ;;  %v3314_v57 = vmax.f32 %v3269_v58, 0.0  ;;  %v4321_v13 = vld [vmem:[#allocation3 + $0x370] sm:$0xff] }
 0x2d2   :  { %v1510_v38 = vsel %vm1492_vm15, %v7609_v5, %v1443_v24  ;;  %v1951_v60 = vadd.f32 %v1906_v36, %v1641_v49  ;;  %v3313_v1 = vmax.f32 %v3268_v40, 0.0  ;;  %v3358_v41 = vadd.f32 %v3357_v8, %v8209_v15  ;;  %v8277_v5 = vld [vmem:[#allocation3 + $0x410] sm:$0x1]  ;;  %v4324_v49 = vld [vmem:[#allocation3 + $0x360] sm:$0xff] }
 0x2d3   :  { %v2819_v34 = vsel %vm2356_vm12, %v10424_v43, %v9511_v45  ;;  %v1597_v26 = vsub.f32 %v4320_v22, %v1510_v38  ;;  %v3496_v28 = vadd.f32 %v3495_v18, %v8019_v12  ;;  %v3015_v25 = vadd.f32 %v3014_v30, %v8022_v50  ;;  %10425 = vst [vmem:[#allocation103_spill] sm:$0xff] %v8277_v5  ;;  %v4323_v12 = vld [vmem:[#allocation3 + $0x368] sm:$0xff]  ;;  %v8286_v36 = vpop.permute.xlu0 %2052 }
 0x2d4   :  { %v2908_v17 = vsub.f32 %v4321_v13, %v2821_v32  ;;  %v9513_v43 = vrot.slane %v8061_v19, 1  ;;  %v1907_v44 = vmul.f32 %v1862_v16, %v1862_v16  ;;  %v3359_v45 = vadd.f32 %v3358_v41, %v3313_v1  ;;  %v2015_v39 = vpop.permute.xlu1 %2014  ;;  %10426 = vst [vmem:[#allocation49_spill] sm:$0xff] %v8286_v36  ;;  %v10431_v41 = vld [vmem:[#allocation62_spill] sm:$0xff] }
 0x2d5   :  { %v1642_v58 = vmul.f32 %v1597_v26, %v1597_v26  ;;  %v3315_v47 = vmax.f32 %v3270_v52, 0.0  ;;  %2058 = vrot.lane.b32.xlu1 %v8277_v5, %s4444_s0  ;;  %v3940_v15 = vadd.f32 %v3939_v21, %v7978_v56  ;;  %v3851_v8 = vmul.f32 %v3671_v10, %v3671_v10  ;;  %v8291_v10 = vld [vmem:[#allocation3 + $0x3c8] sm:$0xff] }
 0x2d6   :  { %v2907_v18 = vsub.f32 %v4323_v12, %v2819_v34  ;;  %v2084_v50 = vsel %vm1492_vm15, %v2015_v39, %v7683_v33  ;;  %v3850_v30 = vmul.f32 %v3670_v7, %v3670_v7  ;;  %v3360_v16 = vadd.f32 %v3359_v45, %v3314_v57  ;;  %10428 = vst [vmem:[#allocation123_spill] sm:$0xff] %v8291_v10 }
 0x2d7   :  { %v8284_v32 = vadd.f32 %v1907_v44, %v1642_v58  ;;  %v2171_v52 = vsub.f32 %v4324_v49, %v2084_v50  ;;  %v2944_v40 = vmul.f32 %v2908_v17, %v2908_v17  ;;  %v10427_v38 = vmax.f32 %v8171_v20, 0.0  ;;  %v10429_v44 = vld [vmem:[#allocation39_spill] sm:$0xff]  ;;  %v10434_v50 = vld [vmem:[#allocation138_spill] sm:$0xff] }
 0x2d8   :  { %v3016_v56 = vadd.f32 %v3015_v25, %v8213_v53  ;;  %v3673_v21 = vsub.f32 %v8291_v10, %v8032_v51  ;;  %v3425_v39 = vadd.f32 %v10272_v48, %v2907_v18  ;;  %v10430_v45 = vrot.slane %v10429_v44, 1  ;;  %v1445_v20 = vpop.permute.xlu1 %1444  ;;  %v10432_v53 = vld [vmem:[#allocation82_spill] sm:$0xff] }
 0x2d9   :  { %v3497_v1 = vadd.f32 %v3496_v28, %v10427_v38  ;;  %v8301_v7 = vadd.f32 %v3360_v16, %v3315_v47  ;;  %v2216_v57 = vmul.f32 %v2171_v52, %v2171_v52  ;;  %1752 = vrot.lane.b32.xlu1 %v10431_v41, %s4444_s0  ;;  %v3896_v22 = vadd.f32 %v3851_v8, %v10432_v53  ;;  %v4326_v47 = vld [vmem:[#allocation3 + $0xa0] sm:$0xff]  ;;  %v10435_v52 = vld [vmem:[#allocation48_spill] sm:$0xff] }
 0x2da   :  { %v2823_v34 = vsel %vm2356_vm12, %v10430_v45, %v9513_v43  ;;  %v2943_v26 = vmul.f32 %v2907_v18, %v2907_v18  ;;  %v3941_v28 = vadd.f32 %v3940_v15, %v8236_v37  ;;  %v1511_v25 = vsel %vm1492_vm15, %v1443_v24, %v1445_v20  ;;  %v8315_v43 = vld [vmem:[#allocation3 + $0x378] sm:$0xff]  ;;  %v10439_v53 = vld [vmem:[#allocation44_spill] sm:$0xff] }
 0x2db   :  { %v8309_v58 = vadd.f32 %v10272_v48, %v2908_v17  ;;  %v3895_v49 = vadd.f32 %v3850_v30, %v10434_v50  ;;  %v2261_v38 = vadd.f32 %v2216_v57, %v1951_v60  ;;  %v1598_v16 = vsub.f32 %v4326_v47, %v1511_v25  ;;  %v4328_v30 = vld [vmem:[#allocation3 + $0x158] sm:$0x1]  ;;  %v10440_v25 = vld [vmem:[#allocation96_spill] sm:$0xff] }
 0x2dc   :  { %v8313_v44 = vadd.f32 %v2944_v40, %v10435_v52  ;;  %v3853_v45 = vmul.f32 %v3673_v21, %v3673_v21  ;;  %v2909_v8 = vsub.f32 %v8315_v43, %v2823_v34  ;;  %v3672_v37 = vsub.f32 %v8061_v19, %v8032_v51  ;;  %v2019_v18 = vpop.permute.xlu1 %2018  ;;  %v8324_v40 = vpop.permute.xlu0 %1746  ;;  %v10438_v21 = vld [vmem:[#allocation145_spill] sm:$0xff]  ;;  %v10441_v52 = vld [vmem:[#allocation94_spill] sm:$0xff] }
 0x2dd   :  { %10433 = vst [vmem:[#allocation21_spill] sm:$0xff] %v8309_v58  ;;  %v3461_v24 = vmax.f32 %v3425_v39, 0.0  ;;  %v1908_v17 = vmul.f32 %v8233_v29, %v8233_v29  ;;  %v2308_v15 = vadd.f32 %v8259_v11, %v2261_v38  ;;  %v1643_v60 = vmul.f32 %v1598_v16, %v1598_v16  ;;  %1488 = vrot.lane.b32.xlu1 %v4328_v30, %s4444_s0 }
 0x2de   :  { %10436 = vst [vmem:[#allocation100_spill] sm:$0xff] %v8313_v44  ;;  %10437 = vst [vmem:[#allocation74_spill] sm:$0xff] %v8324_v40  ;;  %v2979_v57 = vadd.f32 %v2943_v26, %v10438_v21  ;;  %v1512_v34 = vsel %vm1492_vm15, %v1445_v20, %v10439_v53  ;;  %v2085_v39 = vsel %vm1492_vm15, %v7683_v33, %v2019_v18  ;;  %v4329_v20 = vld [vmem:[#allocation3 + $0xa8] sm:$0xff] }
 0x2df   :  { %v2086_v29 = vsel %vm1492_vm15, %v2019_v18, %v10440_v25  ;;  %v1953_v50 = vadd.f32 %v1908_v17, %v1643_v60  ;;  %v2172_v38 = vsub.f32 %v4323_v12, %v2085_v39  ;;  %v3942_v16 = vadd.f32 %v3941_v28, %v3895_v49  ;;  %v10448_v49 = vld [vmem:[#allocation37_spill] sm:$0xff]  ;;  %v4331_v17 = vld [vmem:[#allocation3 + $0x210] sm:$0xff] }
 0x2e0   :  { %v2173_v47 = vsub.f32 %v4321_v13, %v2086_v29  ;;  %v8335_v30 = vadd.f32 %v3853_v45, %v10441_v52  ;;  %v2945_v44 = vmul.f32 %v2909_v8, %v2909_v8  ;;  %v3852_v26 = vmul.f32 %v3672_v37, %v3672_v37  ;;  %v1713_v10 = vpop.permute.xlu1 %1712  ;;  %v8343_v12 = vpop.permute.xlu0 %1482  ;;  %v8355_v18 = vld [vmem:[#allocation3 + $0x218] sm:$0xff]  ;;  %v8367_v52 = vld [vmem:[#allocation3 + $0x2c8] sm:$0x1] }
 0x2e1   :  { %v8337_v21 = vadd.f32 %v3497_v1, %v3461_v24  ;;  %v1599_v19 = vsub.f32 %v4329_v20, %v1512_v34  ;;  %v2217_v36 = vmul.f32 %v2172_v38, %v2172_v38  ;;  %2062 = vrot.lane.b32.xlu1 %v8339_v3, %s4444_s0  ;;  %10445 = vst [vmem:[#allocation22_spill] sm:$0xff] %v8343_v12  ;;  %v8362_v38 = vld [vmem:[#allocation3 + $0x3d8] sm:$0xff] }
 0x2e2   :  { %10442 = vst [vmem:[#allocation76_spill] sm:$0xff] %v8335_v30  ;;  %v2218_v33 = vmul.f32 %v2173_v47, %v2173_v47  ;;  %v8345_v13 = vadd.f32 %v3016_v56, %v2979_v57  ;;  %v8348_v28 = vadd.f32 %v10272_v48, %v2909_v8  ;;  %v1777_v1 = vsel %vm1492_vm15, %v7699_v61, %v1713_v10  ;;  %v10449_v56 = vld [vmem:[#allocation36_spill] sm:$0xff] }
 0x2e3   :  { %10443 = vst [vmem:[#allocation108_spill] sm:$0xff] %v8337_v21  ;;  %v1778_v45 = vsel %vm1492_vm15, %v1713_v10, %v10448_v49  ;;  %v2262_v37 = vadd.f32 %v2217_v36, %v8284_v32  ;;  %v1864_v60 = vsub.f32 %v4331_v17, %v1777_v1  ;;  %v8359_v57 = vadd.f32 %v2945_v44, %v10449_v56  ;;  %v10451_v8 = vld [vmem:[#allocation60_spill] sm:$0xff] }
 0x2e4   :  { %10446 = vst [vmem:[#allocation13_spill] sm:$0xff] %v8345_v13  ;;  %10447 = vst [vmem:[#allocation28_spill] sm:$0xff] %v8348_v28  ;;  %v2263_v24 = vadd.f32 %v2218_v33, %v1953_v50  ;;  %v1865_v34 = vsub.f32 %v8355_v18, %v1778_v45  ;;  %v3897_v39 = vadd.f32 %v3852_v26, %v10451_v8  ;;  %v1449_v47 = vpop.permute.xlu1 %1448  ;;  %v8377_v33 = vld [vmem:[#allocation3 + $0xb0] sm:$0xff]  ;;  %v8380_v45 = vpop.permute.xlu0 %2056  ;;  %v10461_v28 = vld [vmem:[#allocation45_spill] sm:$0xff]  ;;  %v10465_v21 = vrot.slane %v7950_v54, 1 }
 0x2e5   :  { %10450 = vst [vmem:[#allocation23_spill] sm:$0xff] %v8359_v57  ;;  %v3943_v29 = vadd.f32 %v3942_v16, %v3896_v22  ;;  %v3675_v61 = vsub.f32 %v8362_v38, %v8032_v51  ;;  %v1644_v10 = vmul.f32 %v1599_v19, %v1599_v19  ;;  %v2309_v32 = vadd.f32 %v2308_v15, %v2262_v37  ;;  %v4353_v57 = vld [vmem:[#allocation3 + $0x298] sm:$0x1] }
 0x2e6   :  { %v1909_v36 = vmul.f32 %v1864_v60, %v1864_v60  ;;  %v3271_v50 = vadd.f32 %v10272_v48, %v1864_v60  ;;  %1756 = vrot.lane.b32.xlu1 %v8367_v52, %s4444_s0  ;;  %v3674_v22 = vsub.f32 %v8100_v42, %v8032_v51  ;;  %v3272_v16 = vadd.f32 %v10272_v48, %v1865_v34  ;;  %v10454_v60 = vld [vmem:[#allocation142_spill] sm:$0xff]  ;;  %v8385_v42 = vld [vmem:[#allocation3 + $0x3f8] sm:$0x1] }
 0x2e7   :  { %v1513_v19 = vsel %vm1492_vm15, %v10439_v53, %v1449_v47  ;;  %v2310_v15 = vadd.f32 %v2309_v32, %v2263_v24  ;;  %10452 = vst [vmem:[#allocation24_spill] sm:$0xff] %v8380_v45  ;;  %v8382_v37 = vadd.f32 %v3943_v29, %v3897_v39  ;;  %v3855_v17 = vmul.f32 %v3675_v61, %v3675_v61  ;;  %v10457_v29 = vld [vmem:[#allocation20_spill] sm:$0xff] }
 0x2e8   :  { %v1954_v26 = vadd.f32 %v1909_v36, %v1644_v10  ;;  %v3316_v20 = vmax.f32 %v3271_v50, 0.0  ;;  %v1600_v1 = vsub.f32 %v8377_v33, %v1513_v19  ;;  %v106_v56 = vadd.s32 32, %v10454_v60  ;;  %10455 = vst [vmem:[#allocation121_spill] sm:$0xff] %v8385_v42  ;;  %v2023_v32 = vpop.permute.xlu1 %2022  ;;  %v8389_v36 = vld [vmem:[#allocation3 + $0x430] sm:$0x1]  ;;  %v10458_v19 = vld [vmem:[#allocation99_spill] sm:$0xff] }
 0x2e9   :  { %10453 = vst [vmem:[#allocation122_spill] sm:$0xff] %v8382_v37  ;;  %v2836_v8 = vrot.slane %v8385_v42, 1  ;;  %v1910_v44 = vmul.f32 %v1865_v34, %v1865_v34  ;;  %v3317_v53 = vmax.f32 %v3272_v16, 0.0  ;;  %10456 = vst [vmem:[#allocation120_spill] sm:$0xff] %v8389_v36  ;;  %v2834_v39 = vrot.slane %v8187_v6, 1  ;;  %v8404_v37 = vld [vmem:[#allocation3 + $0x3e8] sm:$0xff] }
 0x2ea   :  { %v3362_v24 = vadd.f32 %v8301_v7, %v3316_v20  ;;  %v1645_v10 = vmul.f32 %v1600_v1, %v1600_v1  ;;  %2066 = vrot.lane.b32.xlu1 %v8389_v36, %s4444_s0  ;;  %v1514_v61 = vsel %vm1492_vm15, %v1449_v47, %v10457_v29  ;;  %v2087_v50 = vsel %vm1492_vm15, %v10440_v25, %v2023_v32  ;;  %v8401_v1 = vld [vmem:[#allocation3 + $0x380] sm:$0xff] }
 0x2eb   :  { %v2088_v34 = vsel %vm1492_vm15, %v2023_v32, %v10458_v19  ;;  %v2174_v20 = vsub.f32 %v8315_v43, %v2087_v50  ;;  %10459 = vst [vmem:[#allocation126_spill] sm:$0xff] %v8401_v1  ;;  %v3854_v11 = vmul.f32 %v3674_v22, %v3674_v22  ;;  %10460 = vst [vmem:[#allocation136_spill] sm:$0xff] %v8404_v37  ;;  %v111_v30 = vcvt.s32.f32 %v106_v56  ;;  %v8416_v22 = vpop.permute.xlu0 %1750 }
 0x2ec   :  { %v3363_v16 = vadd.f32 %v3362_v24, %v3317_v53  ;;  %v1955_v7 = vadd.f32 %v1910_v44, %v1645_v10  ;;  %v2175_v60 = vsub.f32 %v8401_v1, %v2088_v34  ;;  %v3677_v47 = vsub.f32 %v8404_v37, %v8032_v51  ;;  %v8413_v44 = vld [vmem:[#allocation3 + $0xb8] sm:$0xff]  ;;  %v1717_v10 = vpop.permute.xlu1 %1716  ;;  %10463 = vst [vmem:[#allocation133_spill] sm:$0xff] %v8416_v22 }
 0x2ed   :  { %v3676_v25 = vsub.f32 %v8135_v55, %v8032_v51  ;;  %v8411_v32 = vadd.f32 %v3855_v17, %v10461_v28  ;;  %v1601_v43 = vsub.f32 %v8413_v44, %v1514_v61  ;;  %v2219_v53 = vmul.f32 %v2174_v20, %v2174_v20  ;;  %v10466_v28 = vld [vmem:[#allocation85_spill] sm:$0xff]  ;;  %v8428_v20 = vld [vmem:[#allocation3 + $0x220] sm:$0xff] }
 0x2ee   :  { %v2220_v24 = vmul.f32 %v2175_v60, %v2175_v60  ;;  %v10464_v50 = vrot.slane %v7990_v63, 1  ;;  %v2835_v51 = vsel %vm2356_vm12, %v10465_v21, %v2834_v39  ;;  %v1779_v55 = vsel %vm1492_vm15, %v10448_v49, %v1717_v10 }
 0x2ef   :  { %10462 = vst [vmem:[#allocation135_spill] sm:$0xff] %v8411_v32  ;;  %v1780_v17 = vsel %vm1492_vm15, %v1717_v10, %v10466_v28  ;;  %v2264_v56 = vadd.f32 %v2219_v53, %v1954_v26  ;;  %v1866_v60 = vsub.f32 %v8428_v20, %v1779_v55  ;;  %v8431_v32 = vld [vmem:[#allocation3 + $0x228] sm:$0xff]  ;;  %v8437_v21 = vmul.f32 %v3677_v47, %v3677_v47 }
 0x2f0   :  { %v2837_v34 = vsel %vm2356_vm12, %v10464_v50, %v2836_v8  ;;  %v2265_v61 = vadd.f32 %v2220_v24, %v1955_v7  ;;  %v1867_v8 = vsub.f32 %v8431_v32, %v1780_v17  ;;  %v10467_v50 = vld [vmem:[#allocation90_spill] sm:$0xff]  ;;  %v8439_v39 = vmul.f32 %v3676_v25, %v3676_v25  ;;  %v1453_v24 = vpop.permute.xlu1 %1452 }
 0x2f1   :  { %v8435_v58 = vadd.f32 %v3854_v11, %v10467_v50  ;;  %10469 = vst [vmem:[#allocation130_spill] sm:$0xff] %v8437_v21  ;;  %v8441_v49 = vmul.f32 0.03125, %v111_v30  ;;  %v1646_v10 = vmul.f32 %v1601_v43, %v1601_v43  ;;  %v2311_v26 = vadd.f32 %v2310_v15, %v2264_v56  ;;  %v8453_v43 = vld [vmem:[#allocation3 + $0xc0] sm:$0xff]  ;;  %v8456_v56 = vpop.permute.xlu0 %1486 }
 0x2f2   :  { %10470 = vst [vmem:[#allocation127_spill] sm:$0xff] %v8439_v39  ;;  %v1911_v7 = vmul.f32 %v1866_v60, %v1866_v60  ;;  %v3273_v53 = vadd.f32 %v10272_v48, %v1866_v60  ;;  %v8445_v55 = vsub.f32 %v7990_v63, %v2837_v34  ;;  %v8448_v17 = vsub.f32 %v7950_v54, %v2835_v51  ;;  %v8462_v34 = vld [vmem:[#allocation3 + $0x408] sm:$0x1] }
 0x2f3   :  { %10468 = vst [vmem:[#allocation89_spill] sm:$0xff] %v8435_v58  ;;  %10471 = vst [vmem:[#allocation88_spill] sm:$0xff] %v8441_v49  ;;  %v3274_v11 = vadd.f32 %v10272_v48, %v1867_v8  ;;  %v1515_v47 = vsel %vm1492_vm15, %v10457_v29, %v1453_v24  ;;  %v2312_v25 = vadd.f32 %v2311_v26, %v2265_v61  ;;  %v10478_v39 = vld [vmem:[#allocation119_spill] sm:$0xff] }
 0x2f4   :  { %10472 = vst [vmem:[#allocation86_spill] sm:$0xff] %v8445_v55  ;;  %10473 = vst [vmem:[#allocation87_spill] sm:$0xff] %v8448_v17  ;;  %v1956_v30 = vadd.f32 %v1911_v7, %v1646_v10  ;;  %v3318_v50 = vmax.f32 %v3273_v53, 0.0  ;;  %v1602_v15 = vsub.f32 %v8453_v43, %v1515_v47  ;;  %v3679_v63 = vsub.f32 %v8385_v42, %v8441_v49  ;;  %v2027_v7 = vpop.permute.xlu1 %2026  ;;  %v8469_v53 = vld [vmem:[#allocation3 + $0xd0] sm:$0xff]  ;;  %v10477_v47 = vld [vmem:[#allocation9_spill] sm:$0xff] }
 0x2f5   :  { %10474 = vst [vmem:[#allocation144_spill] sm:$0xff] %v8456_v56  ;;  %v3678_v54 = vsub.f32 %v8187_v6, %v8441_v49  ;;  %10475 = vst [vmem:[#allocation124_spill] sm:$0xff] %v8462_v34  ;;  %v8467_v29 = vsub.f32 %v8462_v34, %v8441_v49  ;;  %v1912_v61 = vmul.f32 %v1867_v8, %v1867_v8  ;;  %v3319_v60 = vmax.f32 %v3274_v11, 0.0  ;;  %v8479_v11 = vld [vmem:[#allocation3 + $0x388] sm:$0xff] }
 0x2f6   :  { %v3364_v10 = vadd.f32 %v3363_v16, %v3318_v50  ;;  %v1647_v26 = vmul.f32 %v1602_v15, %v1602_v15  ;;  %v1604_v58 = vsub.f32 %v8469_v53, %v10477_v47  ;;  %v1516_v6 = vsel %vm1492_vm15, %v1453_v24, %v10477_v47  ;;  %10479 = vst [vmem:[#allocation149_spill] sm:$0xff] %v8479_v11  ;;  %v8482_v50 = vld [vmem:[#allocation3 + $0x390] sm:$0xff] }
 0x2f7   :  { %10476 = vst [vmem:[#allocation93_spill] sm:$0xff] %v8467_v29  ;;  %v2089_v51 = vsel %vm1492_vm15, %v10458_v19, %v2027_v7  ;;  %v2090_v21 = vsel %vm1492_vm15, %v2027_v7, %v10478_v39  ;;  %10480 = vst [vmem:[#allocation106_spill] sm:$0xff] %v8482_v50  ;;  %v8485_v49 = vmul.f32 %v3679_v63, %v3679_v63  ;;  %v2838_v24 = vrot.slane %v8219_v4, 1  ;;  %v8499_v63 = vpop.permute.xlu0 %2060  ;;  %v8503_v7 = vld [vmem:[#allocation3 + $0x238] sm:$0xff] }
 0x2f8   :  { %v3365_v29 = vadd.f32 %v3364_v10, %v3319_v60  ;;  %v1957_v8 = vadd.f32 %v1912_v61, %v1647_v26  ;;  %v2176_v16 = vsub.f32 %v8479_v11, %v2089_v51  ;;  %v2177_v15 = vsub.f32 %v8482_v50, %v2090_v21  ;;  %v8493_v60 = vld [vmem:[#allocation3 + $0xc8] sm:$0xff]  ;;  %v1721_v26 = vpop.permute.xlu1 %1720  ;;  %10483 = vst [vmem:[#allocation56_spill] sm:$0xff] %v8499_v63  ;;  %v10506_v11 = vld [vmem:[#allocation38_spill] sm:$0xff] }
 0x2f9   :  { %10481 = vst [vmem:[#allocation51_spill] sm:$0xff] %v8485_v49  ;;  %v8487_v56 = vmul.f32 %v3678_v54, %v3678_v54  ;;  %v1791_v19 = vsel %vm1492_vm15, %v8228_v9, %v8262_v27  ;;  %v1603_v61 = vsub.f32 %v8493_v60, %v1516_v6  ;;  %v1792_v21 = vsel %vm1492_vm15, %v8262_v27, %v8324_v40  ;;  %v8510_v49 = vld [vmem:[#allocation3 + $0x230] sm:$0xff]  ;;  %v10517_v9 = vld [vmem:[#allocation79_spill] sm:$0xff] }
 0x2fa   :  { %v2221_v10 = vmul.f32 %v2176_v16, %v2176_v16  ;;  %v2222_v51 = vmul.f32 %v2177_v15, %v2177_v15  ;;  %v1649_v54 = vmul.f32 %v1604_v58, %v1604_v58  ;;  %v1781_v4 = vsel %vm1492_vm15, %v10466_v28, %v1721_v26  ;;  %v10484_v58 = vld [vmem:[#allocation97_spill] sm:$0xff]  ;;  %v4352_v40 = vld [vmem:[#allocation3 + $0x290] sm:$0x1] }
 0x2fb   :  { %10482 = vst [vmem:[#allocation63_spill] sm:$0xff] %v8487_v56  ;;  %v1869_v47 = vsub.f32 %v8503_v7, %v1721_v26  ;;  %v8506_v56 = vld [vmem:[#allocation3 + $0x280] sm:$0xff]  ;;  %v1868_v27 = vsub.f32 %v8510_v49, %v1781_v4  ;;  %v1519_v63 = vsel %vm1492_vm15, %v10484_v58, %v8004_v2  ;;  %v1880_v26 = vsub.f32 %v4352_v40, %v1791_v19 }
 0x2fc   :  { %v1878_v6 = vsub.f32 %v8506_v56, %v8161_v35  ;;  %v2266_v16 = vadd.f32 %v2221_v10, %v1956_v30  ;;  %v2267_v15 = vadd.f32 %v2222_v51, %v1957_v8  ;;  %v1881_v45 = vsub.f32 %v4353_v57, %v1792_v21  ;;  %v2031_v8 = vpop.permute.xlu1 %2030  ;;  %v8520_v4 = vld [vmem:[#allocation3 + $0x3a0] sm:$0xff]  ;;  %v8524_v57 = vld [vmem:[#allocation3 + $0x398] sm:$0xff] }
 0x2fd   :  { %v1914_v28 = vmul.f32 %v1869_v47, %v1869_v47  ;;  %v3276_v22 = vadd.f32 %v10272_v48, %v1869_v47  ;;  %v1648_v13 = vmul.f32 %v1603_v61, %v1603_v61  ;;  %v1913_v17 = vmul.f32 %v1868_v27, %v1868_v27  ;;  %10485 = vst [vmem:[#allocation64_spill] sm:$0xff] %v8520_v4  ;;  %v8527_v61 = vpop.permute.xlu0 %1754 }
 0x2fe   :  { %v2313_v55 = vadd.f32 %v2312_v25, %v2266_v16  ;;  %v3275_v30 = vadd.f32 %v10272_v48, %v1868_v27  ;;  %v2091_v51 = vsel %vm1492_vm15, %v10478_v39, %v2031_v8  ;;  %v2179_v42 = vsub.f32 %v8520_v4, %v2031_v8  ;;  %10486 = vst [vmem:[#allocation66_spill] sm:$0xff] %v8524_v57  ;;  %v8529_v16 = vld [vmem:[#allocation3 + $0xe8] sm:$0xff] }
 0x2ff   :  { %v3321_v10 = vmax.f32 %v3276_v22, 0.0  ;;  %v3285_v47 = vadd.f32 %v10272_v48, %v1878_v6  ;;  %v1958_v40 = vadd.f32 %v1913_v17, %v1648_v13  ;;  %v2178_v25 = vsub.f32 %v8524_v57, %v2091_v51  ;;  %10487 = vst [vmem:[#allocation47_spill] sm:$0xff] %v8527_v61  ;;  %v8539_v51 = vld [vmem:[#allocation3 + $0x418] sm:$0x1] }
 0x300   :  { %v2314_v12 = vadd.f32 %v2313_v55, %v2267_v15  ;;  %v3320_v19 = vmax.f32 %v3275_v30, 0.0  ;;  %v1959_v21 = vadd.f32 %v1914_v28, %v1649_v54  ;;  %v2224_v22 = vmul.f32 %v2179_v42, %v2179_v42  ;;  %v1459_v15 = vpop.permute.xlu1 %1458  ;;  %10490 = vst [vmem:[#allocation19_spill] sm:$0xff] %v8539_v51  ;;  %v10509_v51 = vld [vmem:[#allocation40_spill] sm:$0xff] }
 0x301   :  { %v1607_v39 = vsub.f32 %v8529_v16, %v1519_v63  ;;  %v3287_v27 = vadd.f32 %v10272_v48, %v1880_v26  ;;  %v10488_v8 = vrot.slane %v8230_v23, 1  ;;  %v2223_v17 = vmul.f32 %v2178_v25, %v2178_v25  ;;  %v10491_v63 = vld [vmem:[#allocation140_spill] sm:$0xff] }
 0x302   :  { %v3366_v13 = vadd.f32 %v3365_v29, %v3320_v19  ;;  %v3288_v30 = vadd.f32 %v10272_v48, %v1881_v45  ;;  %v3367_v54 = vsel %vm2295_vm0, %v3321_v10, 0.0  ;;  %v2269_v28 = vadd.f32 %v2224_v22, %v1959_v21 }
 0x303   :  { %v8536_v55 = vsel %vm2356_vm12, %v10488_v8, %v2838_v24  ;;  %v1517_v61 = vsel %vm1492_vm15, %v10491_v63, %v1459_v15  ;;  %v2268_v57 = vadd.f32 %v2223_v17, %v1958_v40  ;;  %v3330_v50 = vmax.f32 %v3285_v47, 0.0  ;;  %v10494_v17 = vld [vmem:[#allocation114_spill] sm:$0xff] }
 0x304   :  { %10489 = vst [vmem:[#allocation16_spill] sm:$0xff] %v8536_v55  ;;  %v3368_v4 = vadd.f32 %v3367_v54, %v3366_v13  ;;  %v2188_v29 = vsub.f32 %v8404_v37, %v8179_v59  ;;  %v8549_v25 = vmul.f32 %v1607_v39, %v1607_v39  ;;  %v3332_v8 = vmax.f32 %v3287_v27, 0.0  ;;  %v4358_v55 = vld [vmem:[#allocation3 + $0xd8] sm:$0xff]  ;;  %v1725_v21 = vpop.permute.xlu1 %1724  ;;  %v8553_v13 = vpop.permute.xlu0 %1490  ;;  %v8560_v39 = vld [vmem:[#allocation3 + $0x160] sm:$0x1] }
 0x305   :  { %v2315_v42 = vadd.f32 %v2314_v12, %v2268_v57  ;;  %v1605_v10 = vsub.f32 %v4358_v55, %v1517_v61  ;;  %v8551_v22 = vmul.f32 %v1878_v6, %v1878_v6  ;;  %v3333_v63 = vmax.f32 %v3288_v30, 0.0  ;;  %10493 = vst [vmem:[#allocation53_spill] sm:$0xff] %v8553_v13  ;;  %v4360_v6 = vld [vmem:[#allocation3 + $0x240] sm:$0xff] }
 0x306   :  { %v2316_v47 = vsel %vm2295_vm0, %v2269_v28, 0.0  ;;  %v1518_v40 = vsel %vm1492_vm15, %v1459_v15, %v10484_v58  ;;  %v1782_v54 = vsel %vm1492_vm15, %v10494_v17, %v1725_v21  ;;  %v1622_v12 = vsub.f32 %v8560_v39, %v8553_v13  ;;  %v8578_v28 = vld [vmem:[#allocation3 + $0xf8] sm:$0xff] }
 0x307   :  { %10492 = vst [vmem:[#allocation147_spill] sm:$0xff] %v8551_v22  ;;  %v8564_v57 = vadd.f32 %v2316_v47, %v2315_v42  ;;  %v1870_v61 = vsub.f32 %v4360_v6, %v1782_v54  ;;  %v8567_v27 = vsel %vm2295_vm0, %v3330_v50, 0.0  ;;  %v8569_v55 = vmul.f32 %v2188_v29, %v2188_v29  ;;  %v4362_v42 = vld [vmem:[#allocation3 + $0xe0] sm:$0xff]  ;;  %v10523_v22 = vld [vmem:[#allocation67_spill] sm:$0xff] }
 0x308   :  { %10495 = vst [vmem:[#allocation26_spill] sm:$0xff] %v8567_v27  ;;  %v8571_v30 = vmul.f32 %v1880_v26, %v1880_v26  ;;  %v8574_v58 = vsel %vm1373_vm11, %v3332_v8, 0.0  ;;  %v8576_v15 = vmul.f32 %v1881_v45, %v1881_v45  ;;  %v2410_v17 = vrot.slane %v8578_v28, 1  ;;  %v1727_v6 = vpop.permute.xlu1 %1726  ;;  %v8588_v45 = vld [vmem:[#allocation3 + $0x100] sm:$0xff] }
 0x309   :  { %10496 = vst [vmem:[#allocation101_spill] sm:$0xff] %v8569_v55  ;;  %10498 = vst [vmem:[#allocation84_spill] sm:$0xff] %v8574_v58  ;;  %v1606_v47 = vsub.f32 %v4362_v42, %v1518_v40  ;;  %v1650_v19 = vmul.f32 %v1605_v10, %v1605_v10  ;;  %v1915_v54 = vmul.f32 %v1870_v61, %v1870_v61  ;;  %v8584_v26 = vsel %vm1373_vm11, %v3333_v63, 0.0  ;;  %v4364_v58 = vld [vmem:[#allocation3 + $0x248] sm:$0xff]  ;;  %v10502_v42 = vld [vmem:[#allocation92_spill] sm:$0xff] }
 0x30a   :  { %10497 = vst [vmem:[#allocation107_spill] sm:$0xff] %v8571_v30  ;;  %10499 = vst [vmem:[#allocation71_spill] sm:$0xff] %v8576_v15  ;;  %v3277_v50 = vadd.f32 %v10272_v48, %v1870_v61  ;;  %v1783_v29 = vsel %vm1492_vm15, %v1725_v21, %v1727_v6  ;;  %v8586_v8 = vmul.f32 %v1622_v12, %v1622_v12  ;;  %v2412_v24 = vrot.slane %v8588_v45, 1  ;;  %v8595_v21 = vld [vmem:[#allocation3 + $0x110] sm:$0xff]  ;;  %v10515_v55 = vld [vmem:[#allocation33_spill] sm:$0xff] }
 0x30b   :  { %10500 = vst [vmem:[#allocation35_spill] sm:$0xff] %v8584_v26  ;;  %v1960_v13 = vadd.f32 %v1915_v54, %v1650_v19  ;;  %v1871_v40 = vsub.f32 %v4364_v58, %v1783_v29  ;;  %v2414_v10 = vrot.slane %v8084_v31, 1  ;;  %v10503_v61 = vrot.slane %v10502_v42, 1  ;;  %v10508_v42 = vld [vmem:[#allocation129_spill] sm:$0xff] }
 0x30c   :  { %10501 = vst [vmem:[#allocation115_spill] sm:$0xff] %v8586_v8  ;;  %v3322_v15 = vmax.f32 %v3277_v50, 0.0  ;;  %v2416_v63 = vrot.slane %v8595_v21, 1  ;;  %v2418_v12 = vrot.slane %v8122_v62, 1  ;;  %v10504_v8 = vld [vmem:[#allocation10_spill] sm:$0xff]  ;;  %v10507_v1 = vrot.slane %v10506_v11, 1  ;;  %v2035_v29 = vpop.permute.xlu1 %2034 }
 0x30d   :  { %v2411_v30 = vsel %vm2356_vm12, %v10503_v61, %v2410_v17  ;;  %v10505_v26 = vrot.slane %v10504_v8, 1  ;;  %v1651_v54 = vmul.f32 %v1606_v47, %v1606_v47  ;;  %v1916_v50 = vmul.f32 %v1871_v40, %v1871_v40  ;;  %v4366_v47 = vld [vmem:[#allocation3 + $0x3a8] sm:$0xff] }
 0x30e   :  { %v3369_v58 = vadd.f32 %v3368_v4, %v3322_v15  ;;  %v3278_v31 = vadd.f32 %v10272_v48, %v1871_v40  ;;  %v2092_v61 = vsel %vm1492_vm15, %v10508_v42, %v2035_v29  ;;  %v2093_v3 = vsel %vm1492_vm15, %v2035_v29, %v8027_v14  ;;  %v4367_v15 = vld [vmem:[#allocation3 + $0x3b0] sm:$0xff] }
 0x30f   :  { %v2427_v19 = vsel %vm2356_vm12, %v10507_v1, %v10505_v26  ;;  %v10510_v5 = vrot.slane %v10509_v51, 1  ;;  %v2436_v11 = vrot.slane %v8560_v39, 1  ;;  %v1961_v34 = vadd.f32 %v1916_v50, %v1651_v54  ;;  %v10511_v40 = vld [vmem:[#allocation52_spill] sm:$0xff] }
 0x310   :  { %v3323_v1 = vmax.f32 %v3278_v31, 0.0  ;;  %v2180_v4 = vsub.f32 %v4366_v47, %v2092_v61  ;;  %v2181_v26 = vsub.f32 %v4367_v15, %v2093_v3  ;;  %v10512_v36 = vrot.slane %v10511_v40, 1  ;;  %v10513_v42 = vld [vmem:[#allocation32_spill] sm:$0xff]  ;;  %v1729_v3 = vpop.permute.xlu1 %1728  ;;  %v10519_v47 = vld [vmem:[#allocation14_spill] sm:$0xff] }
 0x311   :  { %v2413_v8 = vsel %vm2356_vm12, %v10510_v5, %v2412_v24  ;;  %v10514_v27 = vrot.slane %v10513_v42, 1  ;;  %v10516_v51 = vrot.slane %v10515_v55, 1  ;;  %v10518_v39 = vrot.slane %v10517_v9, 1  ;;  %v10521_v42 = vld [vmem:[#allocation77_spill] sm:$0xff] }
 0x312   :  { %v2415_v37 = vsel %vm2356_vm12, %v10512_v36, %v2414_v10  ;;  %v3370_v50 = vadd.f32 %v3369_v58, %v3323_v1  ;;  %v2225_v31 = vmul.f32 %v2180_v4, %v2180_v4  ;;  %v2226_v61 = vmul.f32 %v2181_v26, %v2181_v26  ;;  %v8636_v1 = vld [vmem:[#allocation3 + $0x250] sm:$0xff] }
 0x313   :  { %v2417_v29 = vsel %vm2356_vm12, %v10514_v27, %v2416_v63  ;;  %v2419_v5 = vsel %vm2356_vm12, %v10516_v51, %v2418_v12  ;;  %v2429_v54 = vsel %vm2356_vm12, %v2410_v17, %v10518_v39  ;;  %v10520_v15 = vrot.slane %v10519_v47, 1 }
 0x314   :  { %v1784_v40 = vsel %vm1492_vm15, %v1727_v6, %v1729_v3  ;;  %v10522_v27 = vrot.slane %v10521_v42, 1  ;;  %v10524_v51 = vrot.slane %v10523_v22, 1  ;;  %v2496_v17 = vsub.f32 %v8377_v33, %v2411_v30  ;;  %v10525_v22 = vld [vmem:[#allocation75_spill] sm:$0xff]  ;;  %v1465_v30 = vpop.permute.xlu1 %1464 }
 0x315   :  { %v2431_v36 = vsel %vm2356_vm12, %v2412_v24, %v10520_v15  ;;  %v2270_v58 = vadd.f32 %v2225_v31, %v1960_v13  ;;  %v1872_v4 = vsub.f32 %v8636_v1, %v1784_v40  ;;  %v2437_v26 = vsel %vm2356_vm12, %v2418_v12, %v2436_v11  ;;  %v4369_v31 = vld [vmem:[#allocation3 + $0xf0] sm:$0xff] }
 0x316   :  { %v2433_v55 = vsel %vm2356_vm12, %v2414_v10, %v10522_v27  ;;  %v2435_v9 = vsel %vm2356_vm12, %v2416_v63, %v10524_v51  ;;  %v2497_v24 = vsub.f32 %v8413_v44, %v2413_v8  ;;  %v2498_v6 = vsub.f32 %v8453_v43, %v2415_v37  ;;  %v8650_v37 = vld [vmem:[#allocation3 + $0x108] sm:$0xff] }
 0x317   :  { %v2499_v39 = vsub.f32 %v8493_v60, %v2417_v29  ;;  %v2500_v10 = vsub.f32 %v8469_v53, %v2419_v5  ;;  %v2503_v63 = vsub.f32 %v8529_v16, %v10525_v22  ;;  %v2271_v47 = vadd.f32 %v2226_v61, %v1961_v34 }
 0x318   :  { %v2318_v33 = vadd.f32 %v8564_v57, %v2270_v58  ;;  %v3279_v13 = vadd.f32 %v10272_v48, %v1872_v4  ;;  %v2504_v15 = vsub.f32 %v4369_v31, %v2427_v19  ;;  %v2505_v12 = vsub.f32 %v8578_v28, %v2429_v54  ;;  %v2039_v61 = vpop.permute.xlu1 %2038 }
 0x319   :  { %v2506_v44 = vsub.f32 %v8588_v45, %v2431_v36  ;;  %v2507_v43 = vsub.f32 %v8650_v37, %v2433_v55  ;;  %v2508_v53 = vsub.f32 %v8595_v21, %v2435_v9  ;;  %v2509_v34 = vsub.f32 %v8122_v62, %v2437_v26  ;;  %v4371_v55 = vld [vmem:[#allocation3 + $0x258] sm:$0xff]  ;;  %v4373_v26 = vld [vmem:[#allocation3 + $0x268] sm:$0xff] }
 0x31a   :  { %v2319_v60 = vadd.f32 %v2318_v33, %v2271_v47  ;;  %v3324_v16 = vmax.f32 %v3279_v13, 0.0  ;;  %v8655_v57 = vmul.f32 %v2496_v17, %v2496_v17  ;;  %v1785_v8 = vsel %vm1492_vm15, %v1729_v3, %v8049_v46  ;;  %v4372_v17 = vld [vmem:[#allocation3 + $0x260] sm:$0xff] }
 0x31b   :  { %v8659_v19 = vmul.f32 %v2497_v24, %v2497_v24  ;;  %v8661_v11 = vmul.f32 %v2498_v6, %v2498_v6  ;;  %v8663_v29 = vmul.f32 %v2499_v39, %v2499_v39  ;;  %v1917_v5 = vmul.f32 %v1872_v4, %v1872_v4  ;;  %v8685_v39 = vld [vmem:[#allocation3 + $0x278] sm:$0xff] }
 0x31c   :  { %v3371_v54 = vadd.f32 %v3370_v50, %v3324_v16  ;;  %v8665_v36 = vmul.f32 %v2500_v10, %v2500_v10  ;;  %v8667_v40 = vmul.f32 %v2503_v63, %v2503_v63  ;;  %v2094_v62 = vsel %vm1492_vm15, %v8027_v14, %v2039_v61  ;;  %v8682_v14 = vld [vmem:[#allocation3 + $0x270] sm:$0xff]  ;;  %v10532_v63 = vld [vmem:[#allocation102_spill] sm:$0xff]  ;;  %v1733_v47 = vpop.permute.xlu1 %1732 }
 0x31d   :  { %v8671_v42 = vmul.f32 %v2504_v15, %v2504_v15  ;;  %v8673_v27 = vmul.f32 %v2505_v12, %v2505_v12  ;;  %v8675_v3 = vmul.f32 %v2506_v44, %v2506_v44  ;;  %v1873_v51 = vsub.f32 %v4371_v55, %v1785_v8  ;;  %v10534_v15 = vld [vmem:[#allocation110_spill] sm:$0xff] }
 0x31e   :  { %10526 = vst [vmem:[#allocation131_spill] sm:$0xff] %v8665_v36  ;;  %10527 = vst [vmem:[#allocation132_spill] sm:$0xff] %v8667_v40  ;;  %v1520_v9 = vsel %vm1492_vm15, %v8004_v2, %v1465_v30  ;;  %v2182_v50 = vsub.f32 %v8230_v23, %v2094_v62  ;;  %v2599_v58 = vrot.slane %v4372_v17, 1  ;;  %v8680_v4 = vmul.f32 %v2507_v43, %v2507_v43 }
 0x31f   :  { %10528 = vst [vmem:[#allocation139_spill] sm:$0xff] %v8671_v42  ;;  %10529 = vst [vmem:[#allocation128_spill] sm:$0xff] %v8673_v27  ;;  %v2601_v24 = vrot.slane %v4373_v26, 1  ;;  %v2603_v6 = vrot.slane %v8682_v14, 1  ;;  %v2605_v10 = vrot.slane %v8685_v39, 1  ;;  %v1962_v22 = vadd.f32 %v1917_v5, %v8549_v25  ;;  %v10536_v5 = vld [vmem:[#allocation109_spill] sm:$0xff] }
 0x320   :  { %10530 = vst [vmem:[#allocation42_spill] sm:$0xff] %v8675_v3  ;;  %10531 = vst [vmem:[#allocation30_spill] sm:$0xff] %v8680_v4  ;;  %v1521_v2 = vsel %vm1492_vm15, %v1465_v30, %v10532_v63  ;;  %v2227_v23 = vmul.f32 %v2182_v50, %v2182_v50  ;;  %v8691_v33 = vmul.f32 %v2508_v53, %v2508_v53  ;;  %v2607_v43 = vrot.slane %v8506_v56, 1  ;;  %v10540_v50 = vld [vmem:[#allocation113_spill] sm:$0xff]  ;;  %v10542_v4 = vld [vmem:[#allocation27_spill] sm:$0xff] }
 0x321   :  { %v1608_v13 = vsub.f32 %v4369_v31, %v1520_v9  ;;  %v2095_v12 = vsel %vm1492_vm15, %v2039_v61, %v10534_v15  ;;  %v1786_v44 = vsel %vm1492_vm15, %v8049_v46, %v1733_v47  ;;  %v3280_v16 = vadd.f32 %v10272_v48, %v1873_v51  ;;  %v10538_v31 = vld [vmem:[#allocation25_spill] sm:$0xff]  ;;  %v10547_v27 = vld [vmem:[#allocation58_spill] sm:$0xff] }
 0x322   :  { %10533 = vst [vmem:[#allocation34_spill] sm:$0xff] %v8691_v33  ;;  %v2272_v8 = vadd.f32 %v2227_v23, %v1962_v22  ;;  %v8699_v25 = vmul.f32 %v2509_v34, %v2509_v34  ;;  %v10537_v30 = vrot.slane %v10536_v5, 1  ;;  %v1609_v53 = vsub.f32 %v8578_v28, %v1521_v2  ;;  %v8714_v34 = vld [vmem:[#allocation3 + $0x3c0] sm:$0xff]  ;;  %v10549_v42 = vld [vmem:[#allocation137_spill] sm:$0xff] }
 0x323   :  { %v10539_v9 = vrot.slane %v10538_v31, 1  ;;  %v10541_v33 = vrot.slane %v10540_v50, 1  ;;  %v10543_v3 = vrot.slane %v10542_v4, 1  ;;  %10544 = vst [vmem:[#allocation61_spill] sm:$0xff] %v8714_v34  ;;  %v2183_v23 = vsub.f32 %v8714_v34, %v2095_v12  ;;  %v10545_v31 = vld [vmem:[#allocation31_spill] sm:$0xff] }
 0x324   :  { %10535 = vst [vmem:[#allocation17_spill] sm:$0xff] %v8699_v25  ;;  %v2600_v62 = vsel %vm2356_vm12, %v10537_v30, %v2599_v58  ;;  %v2320_v5 = vadd.f32 %v2319_v60, %v2272_v8  ;;  %v1874_v30 = vsub.f32 %v4372_v17, %v1786_v44  ;;  %v1469_v25 = vpop.permute.xlu1 %1468  ;;  %v2625_v28 = vrot.slane %v8367_v52, 1  ;;  %v10552_v8 = vld [vmem:[#allocation111_spill] sm:$0xff] }
 0x325   :  { %v2602_v61 = vsel %vm2356_vm12, %v10539_v9, %v2601_v24  ;;  %v2604_v46 = vsel %vm2356_vm12, %v10541_v33, %v2603_v6  ;;  %v2606_v22 = vsel %vm2356_vm12, %v10543_v3, %v2605_v10  ;;  %v1653_v2 = vmul.f32 %v1608_v13, %v1608_v13 }
 0x326   :  { %v10546_v9 = vrot.slane %v10545_v31, 1  ;;  %v10548_v33 = vrot.slane %v10547_v27, 1  ;;  %v10550_v4 = vrot.slane %v10549_v42, 1  ;;  %v10551_v40 = vrot.slane %v7801_v0, 1  ;;  %v10556_v42 = vld [vmem:[#allocation41_spill] sm:$0xff] }
 0x327   :  { %v1918_v60 = vmul.f32 %v1873_v51, %v1873_v51  ;;  %v3325_v44 = vmax.f32 %v3280_v16, 0.0  ;;  %v10553_v34 = vrot.slane %v10552_v8, 1  ;;  %v10554_v13 = vrot.slane %v10431_v41, 1 }
 0x328   :  { %v2608_v50 = vsel %vm2356_vm12, %v10546_v9, %v2607_v43  ;;  %v2616_v3 = vsel %vm2356_vm12, %v10550_v4, %v10548_v33  ;;  %v2618_v12 = vsel %vm2356_vm12, %v2599_v58, %v10551_v40  ;;  %v10555_v9 = vld [vmem:[#allocation146_spill] sm:$0xff]  ;;  %v10557_v36 = vrot.slane %v10556_v42, 1 }
 0x329   :  { %v2620_v52 = vsel %vm2356_vm12, %v2601_v24, %v10553_v34  ;;  %v2622_v31 = vsel %vm2356_vm12, %v2603_v6, %v10554_v13  ;;  %v1787_v27 = vsel %vm1492_vm15, %v1733_v47, %v10555_v9  ;;  %v2685_v0 = vsub.f32 %v8355_v18, %v2600_v62  ;;  %v2043_v24 = vpop.permute.xlu1 %2042 }
 0x32a   :  { %v2624_v33 = vsel %vm2356_vm12, %v2605_v10, %v10557_v36  ;;  %v2686_v40 = vsub.f32 %v8428_v20, %v2602_v61  ;;  %v1654_v51 = vmul.f32 %v1609_v53, %v1609_v53  ;;  %v2228_v58 = vmul.f32 %v2183_v23, %v2183_v23  ;;  %v10558_v10 = vld [vmem:[#allocation59_spill] sm:$0xff] }
 0x32b   :  { %v3281_v16 = vadd.f32 %v10272_v48, %v1874_v30  ;;  %v2626_v41 = vsel %vm2356_vm12, %v2607_v43, %v2625_v28  ;;  %v3372_v34 = vadd.f32 %v3371_v54, %v3325_v44  ;;  %v1963_v6 = vadd.f32 %v1918_v60, %v1653_v2 }
 0x32c   :  { %v2687_v4 = vsub.f32 %v8431_v32, %v2604_v46  ;;  %v2688_v47 = vsub.f32 %v8510_v49, %v2606_v22  ;;  %v1875_v8 = vsub.f32 %v4373_v26, %v1787_v27  ;;  %v1522_v36 = vsel %vm1492_vm15, %v10532_v63, %v1469_v25  ;;  %v10559_v22 = vld [vmem:[#allocation72_spill] sm:$0xff] }
 0x32d   :  { %v2096_v18 = vsel %vm1492_vm15, %v10534_v15, %v2043_v24  ;;  %v2689_v20 = vsub.f32 %v8503_v7, %v2608_v50  ;;  %v2692_v62 = vsub.f32 %v8636_v1, %v10558_v10  ;;  %v2693_v53 = vsub.f32 %v4371_v55, %v2616_v3  ;;  %v1737_v46 = vpop.permute.xlu1 %1736  ;;  %v10560_v15 = vld [vmem:[#allocation123_spill] sm:$0xff]  ;;  %v10561_v50 = vld [vmem:[#allocation98_spill] sm:$0xff] }
 0x32e   :  { %v2694_v43 = vsub.f32 %v4372_v17, %v2618_v12  ;;  %v2695_v54 = vsub.f32 %v4373_v26, %v2620_v52  ;;  %v2273_v61 = vadd.f32 %v2228_v58, %v1963_v6  ;;  %v1919_v23 = vmul.f32 %v1874_v30, %v1874_v30 }
 0x32f   :  { %v3326_v32 = vmax.f32 %v3281_v16, 0.0  ;;  %v2696_v49 = vsub.f32 %v8682_v14, %v2622_v31  ;;  %v1523_v63 = vsel %vm1492_vm15, %v1469_v25, %v10559_v22  ;;  %v1610_v28 = vsub.f32 %v8588_v45, %v1522_v36 }
 0x330   :  { %v2184_v2 = vsub.f32 %v10560_v15, %v2096_v18  ;;  %v1788_v7 = vsel %vm1492_vm15, %v10555_v9, %v1737_v46  ;;  %v3282_v1 = vadd.f32 %v10272_v48, %v1875_v8  ;;  %v2697_v17 = vsub.f32 %v8685_v39, %v2624_v33 }
 0x331   :  { %v1876_v55 = vsub.f32 %v8682_v14, %v1788_v7  ;;  %v2698_v26 = vsub.f32 %v8506_v56, %v2626_v41  ;;  %v1920_v30 = vmul.f32 %v1875_v8, %v1875_v8  ;;  %v2097_v3 = vsel %vm1492_vm15, %v2043_v24, %v10561_v50  ;;  %v1473_v52 = vpop.permute.xlu1 %1472  ;;  %v8769_v56 = vld [vmem:[#allocation3 + $0x3d0] sm:$0xff] }
 0x332   :  { %v2721_v25 = vmul.f32 %v2685_v0, %v2685_v0  ;;  %v2722_v12 = vmul.f32 %v2686_v40, %v2686_v40  ;;  %v2321_v45 = vadd.f32 %v2320_v5, %v2273_v61  ;;  %v3373_v60 = vadd.f32 %v3372_v34, %v3326_v32  ;;  %v4378_v5 = vld [vmem:[#allocation3 + $0x118] sm:$0xff] }
 0x333   :  { %v1611_v44 = vsub.f32 %v8650_v37, %v1523_v63  ;;  %v2723_v13 = vmul.f32 %v2687_v4, %v2687_v4  ;;  %v1964_v31 = vadd.f32 %v1919_v23, %v1654_v51  ;;  %v1655_v9 = vmul.f32 %v1610_v28, %v1610_v28 }
 0x334   :  { %v2229_v27 = vmul.f32 %v2184_v2, %v2184_v2  ;;  %v1789_v14 = vsel %vm1492_vm15, %v1737_v46, %v8161_v35  ;;  %v3327_v42 = vmax.f32 %v3282_v1, 0.0  ;;  %v2185_v33 = vsub.f32 %v8769_v56, %v2097_v3  ;;  %v10565_v3 = vld [vmem:[#allocation105_spill] sm:$0xff] }
 0x335   :  { %v3283_v0 = vadd.f32 %v10272_v48, %v1876_v55  ;;  %v2724_v40 = vmul.f32 %v2688_v47, %v2688_v47  ;;  %v1613_v58 = vsub.f32 %v4378_v5, %v1473_v52  ;;  %v2725_v16 = vmul.f32 %v2689_v20, %v2689_v20  ;;  %v2047_v6 = vpop.permute.xlu1 %2046 }
 0x336   :  { %v2728_v37 = vmul.f32 %v2692_v62, %v2692_v62  ;;  %v2729_v24 = vmul.f32 %v2693_v53, %v2693_v53  ;;  %v3374_v41 = vadd.f32 %v3373_v60, %v3327_v42  ;;  %v1656_v51 = vmul.f32 %v1611_v44, %v1611_v44  ;;  %v8807_v60 = vld [vmem:[#allocation3 + $0x3e0] sm:$0xff]  ;;  %v10570_v42 = vld [vmem:[#allocation139_spill] sm:$0xff] }
 0x337   :  { %v1877_v34 = vsub.f32 %v8685_v39, %v1789_v14  ;;  %v2730_v4 = vmul.f32 %v2694_v43, %v2694_v43  ;;  %v1965_v35 = vadd.f32 %v1920_v30, %v1655_v9  ;;  %v2274_v8 = vadd.f32 %v2229_v27, %v1964_v31  ;;  %v10563_v30 = vld [vmem:[#allocation131_spill] sm:$0xff]  ;;  %v10569_v27 = vld [vmem:[#allocation80_spill] sm:$0xff] }
 0x338   :  { %v2098_v36 = vsel %vm1492_vm15, %v10561_v50, %v2047_v6  ;;  %v2731_v18 = vmul.f32 %v2695_v54, %v2695_v54  ;;  %v2230_v10 = vmul.f32 %v2185_v33, %v2185_v33  ;;  %v3328_v61 = vmax.f32 %v3283_v0, 0.0  ;;  %v10564_v50 = vld [vmem:[#allocation118_spill] sm:$0xff] }
 0x339   :  { %v2186_v47 = vsub.f32 %v8362_v38, %v2098_v36  ;;  %v2732_v23 = vmul.f32 %v2696_v49, %v2696_v49  ;;  %v1524_v20 = vsel %vm1492_vm15, %v10559_v22, %v1473_v52  ;;  %v1658_v62 = vmul.f32 %v1613_v58, %v1613_v58  ;;  %v1475_v46 = vpop.permute.xlu1 %1474  ;;  %v10568_v52 = vld [vmem:[#allocation132_spill] sm:$0xff]  ;;  %v4380_v58 = vld [vmem:[#allocation3 + $0x288] sm:$0x1] }
 0x33a   :  { %v2733_v53 = vmul.f32 %v2697_v17, %v2697_v17  ;;  %v2734_v32 = vmul.f32 %v2698_v26, %v2698_v26  ;;  %v1921_v39 = vmul.f32 %v1876_v55, %v1876_v55  ;;  %v3284_v43 = vadd.f32 %v10272_v48, %v1877_v34  ;;  %v10573_v36 = vld [vmem:[#allocation83_spill] sm:$0xff] }
 0x33b   :  { %v8781_v63 = vadd.f32 %v2721_v25, %v8655_v57  ;;  %v8784_v54 = vadd.f32 %v2722_v12, %v8659_v19  ;;  %v2322_v28 = vadd.f32 %v2321_v45, %v2274_v8  ;;  %v2099_v49 = vsel %vm1492_vm15, %v2047_v6, %v8179_v59  ;;  %v10562_v57 = vld [vmem:[#allocation147_spill] sm:$0xff]  ;;  %v10566_v59 = vld [vmem:[#allocation73_spill] sm:$0xff]  ;;  %v10572_v6 = vld [vmem:[#allocation128_spill] sm:$0xff] }
 0x33c   :  { %v8789_v2 = vadd.f32 %v2723_v13, %v8661_v11  ;;  %v8792_v22 = vadd.f32 %v2724_v40, %v8663_v29  ;;  %v2275_v7 = vadd.f32 %v2230_v10, %v1965_v35  ;;  %v3375_v1 = vadd.f32 %v3374_v41, %v3328_v61  ;;  %v10567_v11 = vld [vmem:[#allocation11_spill] sm:$0xff]  ;;  %v10571_v41 = vld [vmem:[#allocation101_spill] sm:$0xff] }
 0x33d   :  { %v1612_v55 = vsub.f32 %v8595_v21, %v1524_v20  ;;  %v2231_v17 = vmul.f32 %v2186_v47, %v2186_v47  ;;  %v1968_v26 = vadd.f32 %v10562_v57, %v1658_v62  ;;  %v8797_v19 = vadd.f32 %v2725_v16, %v10563_v30  ;;  %v1741_v44 = vpop.permute.xlu1 %1740  ;;  %v10574_v62 = vld [vmem:[#allocation42_spill] sm:$0xff] }
 0x33e   :  { %v8801_v25 = vadd.f32 %v10565_v3, %v10564_v50  ;;  %v8805_v12 = vadd.f32 %v10567_v11, %v10566_v59  ;;  %v1966_v29 = vadd.f32 %v1921_v39, %v1656_v51  ;;  %v3329_v45 = vmax.f32 %v3284_v43, 0.0  ;;  %v4381_v30 = vld [vmem:[#allocation3 + $0x120] sm:$0x1] }
 0x33f   :  { %v2187_v21 = vsub.f32 %v8807_v60, %v2099_v49  ;;  %v8811_v13 = vadd.f32 %v2728_v37, %v10568_v52  ;;  %v2323_v31 = vadd.f32 %v2322_v28, %v2275_v7  ;;  %v1922_v9 = vmul.f32 %v1877_v34, %v1877_v34  ;;  %v10576_v28 = vld [vmem:[#allocation34_spill] sm:$0xff]  ;;  %v10584_v52 = vld [vmem:[#allocation68_spill] sm:$0xff] }
 0x340   :  { %v1790_v14 = vsel %vm1492_vm15, %v1741_v44, %v10569_v27  ;;  %v8816_v33 = vadd.f32 %v2729_v24, %v10570_v42  ;;  %v3376_v0 = vadd.f32 %v3375_v1, %v3329_v45  ;;  %v1657_v40 = vmul.f32 %v1612_v55, %v1612_v55  ;;  %v10577_v7 = vld [vmem:[#allocation26_spill] sm:$0xff]  ;;  %v10582_v45 = vld [vmem:[#allocation43_spill] sm:$0xff] }
 0x341   :  { %v2276_v5 = vadd.f32 %v2231_v17, %v1966_v29  ;;  %v1879_v16 = vsub.f32 %v4380_v58, %v1790_v14  ;;  %v2278_v51 = vadd.f32 %v10571_v41, %v1968_v26  ;;  %v8820_v35 = vadd.f32 %v2730_v4, %v10572_v6  ;;  %v1479_v24 = vpop.permute.xlu1 %1478  ;;  %v10575_v4 = vld [vmem:[#allocation30_spill] sm:$0xff]  ;;  %v10578_v17 = vld [vmem:[#allocation17_spill] sm:$0xff]  ;;  %v10588_v58 = vld [vmem:[#allocation120_spill] sm:$0xff] }
 0x342   :  { %v2824_v37 = vrot.slane %v10560_v15, 1  ;;  %v2826_v34 = vrot.slane %v8769_v56, 1  ;;  %v2232_v8 = vmul.f32 %v2187_v21, %v2187_v21  ;;  %v1525_v10 = vsel %vm1492_vm15, %v1475_v46, %v10573_v36  ;;  %v10579_v3 = vld [vmem:[#allocation46_spill] sm:$0xff]  ;;  %v10589_v6 = vld [vmem:[#allocation49_spill] sm:$0xff] }
 0x343   :  { %v2828_v61 = vrot.slane %v8362_v38, 1  ;;  %v2830_v47 = vrot.slane %v8807_v60, 1  ;;  %v3286_v20 = vadd.f32 %v10272_v48, %v1879_v16  ;;  %v8830_v39 = vadd.f32 %v2731_v18, %v10574_v62 }
 0x344   :  { %v8833_v43 = vadd.f32 %v2732_v23, %v10575_v4  ;;  %v8836_v49 = vadd.f32 %v2733_v53, %v10576_v28  ;;  %v3378_v1 = vadd.f32 %v10577_v7, %v3376_v0  ;;  %v1967_v55 = vadd.f32 %v1922_v9, %v1657_v40  ;;  %v10581_v23 = vld [vmem:[#allocation136_spill] sm:$0xff]  ;;  %v10586_v9 = vld [vmem:[#allocation143_spill] sm:$0xff] }
 0x345   :  { %v2324_v46 = vadd.f32 %v2323_v31, %v2276_v5  ;;  %v8840_v57 = vadd.f32 %v2734_v32, %v10578_v17  ;;  %v2326_v26 = vsel %vm2295_vm0, %v2278_v51, 0.0  ;;  %v1614_v50 = vsub.f32 %v4381_v30, %v1525_v10  ;;  %v2051_v53 = vpop.permute.xlu1 %2050  ;;  %v8858_v40 = vld [vmem:[#allocation3 + $0x428] sm:$0x1]  ;;  %v10590_v10 = vld [vmem:[#allocation124_spill] sm:$0xff] }
 0x346   :  { %v10580_v18 = vrot.slane %v10579_v3, 1  ;;  %v2832_v11 = vrot.slane %v10581_v23, 1  ;;  %v2277_v29 = vadd.f32 %v2232_v8, %v1967_v55  ;;  %v10583_v21 = vrot.slane %v10582_v45, 1  ;;  %v10592_v4 = vld [vmem:[#allocation116_spill] sm:$0xff]  ;;  %v10596_v3 = vld [vmem:[#allocation95_spill] sm:$0xff] }
 0x347   :  { %v10585_v31 = vrot.slane %v10584_v52, 1  ;;  %v10587_v27 = vrot.slane %v10586_v9, 1  ;;  %v3331_v42 = vmax.f32 %v3286_v20, 0.0  ;;  %v1526_v0 = vsel %vm1492_vm15, %v10573_v36, %v1479_v24  ;;  %v10594_v20 = vld [vmem:[#allocation103_spill] sm:$0xff]  ;;  %v10600_v9 = vld [vmem:[#allocation125_spill] sm:$0xff] }
 0x348   :  { %v2825_v59 = vsel %vm2356_vm12, %v10580_v18, %v2824_v37  ;;  %v2827_v44 = vsel %vm2356_vm12, %v10583_v21, %v2826_v34  ;;  %v2848_v5 = vrot.slane %v8858_v40, 1  ;;  %v2850_v41 = vrot.slane %v10588_v58, 1  ;;  %v4383_v21 = vld [vmem:[#allocation3 + $0x128] sm:$0x1] }
 0x349   :  { %v2829_v32 = vsel %vm2356_vm12, %v10585_v31, %v2828_v61  ;;  %v2831_v14 = vsel %vm2356_vm12, %v10587_v27, %v2830_v47  ;;  %v2325_v51 = vadd.f32 %v2324_v46, %v2277_v29  ;;  %v2100_v8 = vsel %vm1492_vm15, %v2051_v53, %v10589_v6  ;;  %v10598_v46 = vld [vmem:[#allocation19_spill] sm:$0xff]  ;;  %v1481_v31 = vpop.permute.xlu1 %1480 }
 0x34a   :  { %v10591_v62 = vrot.slane %v10590_v10, 1  ;;  %v10593_v28 = vrot.slane %v10592_v4, 1  ;;  %v10595_v55 = vrot.slane %v10594_v20, 1  ;;  %v1659_v17 = vmul.f32 %v1614_v50, %v1614_v50 }
 0x34b   :  { %v1924_v30 = vmul.f32 %v1879_v16, %v1879_v16  ;;  %v10597_v18 = vrot.slane %v10596_v3, 1  ;;  %v10599_v29 = vrot.slane %v10598_v46, 1  ;;  %v1615_v52 = vsub.f32 %v4383_v21, %v1526_v0  ;;  %v10604_v3 = vld [vmem:[#allocation106_spill] sm:$0xff] }
 0x34c   :  { %v2841_v7 = vsel %vm2356_vm12, %v10593_v28, %v10591_v62  ;;  %v2843_v36 = vsel %vm2356_vm12, %v2824_v37, %v10595_v55  ;;  %v10601_v27 = vrot.slane %v10600_v9, 1  ;;  %v10602_v62 = vld [vmem:[#allocation126_spill] sm:$0xff]  ;;  %v10603_v37 = vld [vmem:[#allocation149_spill] sm:$0xff]  ;;  %v3379_v50 = vsel %vm1373_vm11, %v3331_v42, 0.0  ;;  %v4384_v28 = vld [vmem:[#allocation3 + $0x3f0] sm:$0x1] }
 0x34d   :  { %v2833_v45 = vsel %vm2356_vm12, %v10597_v18, %v2832_v11  ;;  %v2845_v53 = vsel %vm2356_vm12, %v2826_v34, %v10599_v29  ;;  %v8882_v4 = vsub.f32 %v10602_v62, %v2825_v59  ;;  %v8885_v16 = vsub.f32 %v10603_v37, %v2827_v44  ;;  %v10606_v59 = vld [vmem:[#allocation64_spill] sm:$0xff]  ;;  %v4385_v9 = vld [vmem:[#allocation3 + $0x3b8] sm:$0xff] }
 0x34e   :  { %v2847_v58 = vsel %vm2356_vm12, %v2828_v61, %v10601_v27  ;;  %v2189_v20 = vsub.f32 %v4384_v28, %v2100_v8  ;;  %v2849_v55 = vsel %vm2356_vm12, %v2830_v47, %v2848_v5  ;;  %v2851_v34 = vsel %vm2356_vm12, %v2832_v11, %v2850_v41  ;;  %v10605_v61 = vld [vmem:[#allocation66_spill] sm:$0xff]  ;;  %v10607_v42 = vld [vmem:[#allocation16_spill] sm:$0xff]  ;;  %v10609_v8 = vld [vmem:[#allocation61_spill] sm:$0xff]  ;;  %v2055_v5 = vpop.permute.xlu1 %2054 }
 0x34f   :  { %v8890_v0 = vadd.f32 %v2326_v26, %v2325_v51  ;;  %v8893_v18 = vsub.f32 %v10604_v3, %v2829_v32  ;;  %v8896_v29 = vsub.f32 %v10605_v61, %v2831_v14  ;;  %v8899_v21 = vsub.f32 %v10606_v59, %v2833_v45  ;;  %v10617_v45 = vld [vmem:[#allocation121_spill] sm:$0xff]  ;;  %v4386_v37 = vld [vmem:[#allocation3 + $0x130] sm:$0x1] }
 0x350   :  { %v1969_v44 = vadd.f32 %v1924_v30, %v1659_v17  ;;  %v8902_v27 = vsub.f32 %v4385_v9, %v10607_v42  ;;  %v8905_v47 = vsub.f32 %v10609_v8, %v2841_v7  ;;  %v8908_v26 = vsub.f32 %v10560_v15, %v2843_v36  ;;  %v10616_v36 = vld [vmem:[#allocation22_spill] sm:$0xff]  ;;  %v10622_v59 = vld [vmem:[#allocation100_spill] sm:$0xff]  ;;  %v10623_v9 = vld [vmem:[#allocation13_spill] sm:$0xff] }
 0x351   :  { %v3380_v11 = vadd.f32 %v3379_v50, %v3378_v1  ;;  %v1660_v32 = vmul.f32 %v1615_v52, %v1615_v52  ;;  %v8911_v14 = vsub.f32 %v8769_v56, %v2845_v53  ;;  %v8914_v41 = vsub.f32 %v8362_v38, %v2847_v58  ;;  %v10618_v53 = vld [vmem:[#allocation107_spill] sm:$0xff]  ;;  %v10619_v58 = vld [vmem:[#allocation84_spill] sm:$0xff]  ;;  %v4387_v8 = vld [vmem:[#allocation3 + $0x138] sm:$0x1] }
 0x352   :  { %10608 = vst [vmem:[#allocation134_spill] sm:$0xff] %v8902_v27  ;;  %10610 = vst [vmem:[#allocation141_spill] sm:$0xff] %v8905_v47  ;;  %v2234_v51 = vmul.f32 %v2189_v20, %v2189_v20  ;;  %v1527_v17 = vsel %vm1492_vm15, %v1479_v24, %v1481_v31  ;;  %v2101_v30 = vsel %vm1492_vm15, %v10589_v6, %v2055_v5  ;;  %v1749_v28 = vpop.permute.xlu1 %1748  ;;  %v10620_v20 = vld [vmem:[#allocation87_spill] sm:$0xff] }
 0x353   :  { %10611 = vst [vmem:[#allocation50_spill] sm:$0xff] %v8908_v26  ;;  %10612 = vst [vmem:[#allocation39_spill] sm:$0xff] %v8911_v14  ;;  %v8920_v7 = vsub.f32 %v8807_v60, %v2849_v55  ;;  %v8923_v15 = vsub.f32 %v10581_v23, %v2851_v34  ;;  %v2946_v1 = vmul.f32 %v8882_v4, %v8882_v4 }
 0x354   :  { %10613 = vst [vmem:[#allocation62_spill] sm:$0xff] %v8914_v41  ;;  %v2947_v56 = vmul.f32 %v8885_v16, %v8885_v16  ;;  %v2948_v38 = vmul.f32 %v8893_v18, %v8893_v18  ;;  %v1528_v24 = vsel %vm1492_vm15, %v1481_v31, %v10616_v36  ;;  %v2190_v6 = vsub.f32 %v10617_v45, %v2101_v30  ;;  %v10621_v31 = vld [vmem:[#allocation86_spill] sm:$0xff]  ;;  %v10624_v30 = vld [vmem:[#allocation24_spill] sm:$0xff] }
 0x355   :  { %10614 = vst [vmem:[#allocation82_spill] sm:$0xff] %v8920_v7  ;;  %10615 = vst [vmem:[#allocation138_spill] sm:$0xff] %v8923_v15  ;;  %v2949_v60 = vmul.f32 %v8896_v29, %v8896_v29  ;;  %v2950_v23 = vmul.f32 %v8899_v21, %v8899_v21  ;;  %v1970_v52 = vadd.f32 %v10618_v53, %v1660_v32 }
 0x356   :  { %v3382_v62 = vadd.f32 %v10619_v58, %v3380_v11  ;;  %v1616_v50 = vsub.f32 %v4386_v37, %v1527_v17  ;;  %v2951_v55 = vmul.f32 %v10620_v20, %v10620_v20  ;;  %v2279_v34 = vadd.f32 %v2234_v51, %v1969_v44  ;;  %v10625_v58 = vld [vmem:[#allocation23_spill] sm:$0xff] }
 0x357   :  { %v2952_v3 = vmul.f32 %v10621_v31, %v10621_v31  ;;  %v2953_v61 = vmul.f32 %v8902_v27, %v8902_v27  ;;  %v3018_v42 = vadd.f32 %v10623_v9, %v10622_v59  ;;  %v1617_v32 = vsub.f32 %v4387_v8, %v1528_v24  ;;  %v10626_v59 = vld [vmem:[#allocation35_spill] sm:$0xff]  ;;  %v1485_v8 = vpop.permute.xlu1 %1484 }
 0x358   :  { %v2954_v11 = vmul.f32 %v8905_v47, %v8905_v47  ;;  %v2955_v17 = vmul.f32 %v8908_v26, %v8908_v26  ;;  %v2956_v44 = vmul.f32 %v8911_v14, %v8911_v14  ;;  %v2235_v51 = vmul.f32 %v2190_v6, %v2190_v6  ;;  %v10627_v14 = vld [vmem:[#allocation74_spill] sm:$0xff]  ;;  %v10628_v31 = vld [vmem:[#allocation71_spill] sm:$0xff] }
 0x359   :  { %v2102_v45 = vsel %vm1492_vm15, %v2055_v5, %v10624_v30  ;;  %v2982_v53 = vadd.f32 %v2946_v1, %v8781_v63  ;;  %v3019_v37 = vadd.f32 %v3018_v42, %v10625_v58  ;;  %v8959_v9 = vadd.f32 %v10626_v59, %v3382_v62  ;;  %v8971_v62 = vld [vmem:[#allocation3 + $0x400] sm:$0x1] }
 0x35a   :  { %v1661_v24 = vmul.f32 %v1616_v50, %v1616_v50  ;;  %v2957_v47 = vmul.f32 %v8914_v41, %v8914_v41  ;;  %v2958_v26 = vmul.f32 %v8920_v7, %v8920_v7  ;;  %v2328_v6 = vsel %vm1373_vm11, %v2279_v34, 0.0 }
 0x35b   :  { %v1793_v5 = vsel %vm1492_vm15, %v10627_v14, %v1749_v28  ;;  %v2959_v63 = vmul.f32 %v8923_v15, %v8923_v15  ;;  %v2983_v1 = vadd.f32 %v2947_v56, %v8784_v54  ;;  %v2191_v50 = vsub.f32 %v8971_v62, %v2102_v45  ;;  %v4389_v56 = vld [vmem:[#allocation3 + $0x2a0] sm:$0x1]  ;;  %v2059_v20 = vpop.permute.xlu1 %2058 }
 0x35c   :  { %v2984_v42 = vadd.f32 %v2948_v38, %v8789_v2  ;;  %v2985_v58 = vadd.f32 %v2949_v60, %v8792_v22  ;;  %v2986_v59 = vadd.f32 %v2950_v23, %v8797_v19  ;;  %v1662_v7 = vmul.f32 %v1617_v32, %v1617_v32  ;;  %v10629_v2 = vld [vmem:[#allocation133_spill] sm:$0xff] }
 0x35d   :  { %v2280_v34 = vadd.f32 %v2235_v51, %v1970_v52  ;;  %v8978_v41 = vadd.f32 %v2951_v55, %v8801_v25  ;;  %v3020_v14 = vadd.f32 %v3019_v37, %v2982_v53  ;;  %v2329_v27 = vadd.f32 %v2328_v6, %v8890_v0  ;;  %v10631_v37 = vld [vmem:[#allocation144_spill] sm:$0xff] }
 0x35e   :  { %v1971_v54 = vadd.f32 %v10628_v31, %v1661_v24  ;;  %v1882_v15 = vsub.f32 %v4389_v56, %v1793_v5  ;;  %v8983_v45 = vadd.f32 %v2952_v3, %v8805_v12  ;;  %v1794_v22 = vsel %vm1492_vm15, %v1749_v28, %v10629_v2  ;;  %v4390_v31 = vld [vmem:[#allocation3 + $0x2a8] sm:$0x1] }
 0x35f   :  { %v2103_v19 = vsel %vm1492_vm15, %v10624_v30, %v2059_v20  ;;  %v8990_v25 = vadd.f32 %v2953_v61, %v8811_v13  ;;  %v8993_v38 = vadd.f32 %v2954_v11, %v8816_v33  ;;  %v2236_v0 = vmul.f32 %v2191_v50, %v2191_v50  ;;  %v10630_v61 = vld [vmem:[#allocation56_spill] sm:$0xff]  ;;  %v1753_v32 = vpop.permute.xlu1 %1752 }
 0x360   :  { %v1529_v60 = vsel %vm1492_vm15, %v10616_v36, %v1485_v8  ;;  %v8998_v23 = vadd.f32 %v2955_v17, %v8820_v35  ;;  %v3021_v12 = vadd.f32 %v3020_v14, %v2983_v1  ;;  %v2330_v52 = vsel %vm1373_vm11, %v2280_v34, 0.0  ;;  %v4391_v17 = vld [vmem:[#allocation3 + $0x140] sm:$0x1]  ;;  %v9039_v34 = vld [vmem:[#allocation3 + $0x148] sm:$0x1] }
 0x361   :  { %v2192_v28 = vsub.f32 %v10590_v10, %v2103_v19  ;;  %v9003_v55 = vadd.f32 %v2956_v44, %v8830_v39  ;;  %v2995_v13 = vadd.f32 %v2959_v63, %v8840_v57  ;;  %v3289_v33 = vadd.f32 %v10272_v48, %v1882_v15 }
 0x362   :  { %v1883_v3 = vsub.f32 %v4390_v31, %v1794_v22  ;;  %v2104_v36 = vsel %vm1492_vm15, %v2059_v20, %v10630_v61  ;;  %v3022_v35 = vadd.f32 %v3021_v12, %v2984_v42  ;;  %v1927_v11 = vmul.f32 %v1882_v15, %v1882_v15  ;;  %v9020_v15 = vld [vmem:[#allocation3 + $0x410] sm:$0x1]  ;;  %v2065_v22 = vpop.permute.xlu0 %2064 }
 0x363   :  { %v1618_v51 = vsub.f32 %v4391_v17, %v1529_v60  ;;  %v1795_v10 = vsel %vm1492_vm15, %v10629_v2, %v1753_v32  ;;  %v9012_v39 = vadd.f32 %v2957_v47, %v8833_v43  ;;  %v2331_v44 = vadd.f32 %v2330_v52, %v2329_v27  ;;  %v9024_v47 = vld [vmem:[#allocation3 + $0x2b0] sm:$0x1]  ;;  %v10632_v60 = vld [vmem:[#allocation47_spill] sm:$0xff] }
 0x364   :  { %v2281_v57 = vadd.f32 %v2236_v0, %v1971_v54  ;;  %v9015_v30 = vadd.f32 %v2958_v26, %v8836_v49  ;;  %v3024_v53 = vsel %vm3003_vm14, %v2986_v59, 0.0  ;;  %v1530_v20 = vsel %vm1492_vm15, %v1485_v8, %v10631_v37  ;;  %v1489_v49 = vpop.permute.xlu1 %1488 }
 0x365   :  { %v2237_v24 = vmul.f32 %v2192_v28, %v2192_v28  ;;  %v2193_v6 = vsub.f32 %v9020_v15, %v2104_v36  ;;  %v3023_v5 = vadd.f32 %v3022_v35, %v2985_v58  ;;  %v3334_v63 = vmax.f32 %v3289_v33, 0.0 }
 0x366   :  { %v3290_v43 = vadd.f32 %v10272_v48, %v1883_v3  ;;  %v1884_v27 = vsub.f32 %v9024_v47, %v1795_v10  ;;  %v9028_v26 = vsel %vm3003_vm14, %v2995_v13, 0.0  ;;  %v1972_v1 = vadd.f32 %v1927_v11, %v1662_v7  ;;  %v9047_v13 = vld [vmem:[#allocation3 + $0x150] sm:$0x1]  ;;  %v9060_v10 = vld [vmem:[#allocation3 + $0x2b8] sm:$0x1] }
 0x367   :  { %v1663_v50 = vmul.f32 %v1618_v51, %v1618_v51  ;;  %v9032_v8 = vadd.f32 %v10272_v48, %v8882_v4  ;;  %v9036_v42 = vadd.f32 %v10272_v48, %v8885_v16  ;;  %v2332_v58 = vsel %vm1373_vm11, %v2281_v57, 0.0  ;;  %v9063_v57 = vld [vmem:[#allocation3 + $0x420] sm:$0x1] }
 0x368   :  { %v1928_v59 = vmul.f32 %v1883_v3, %v1883_v3  ;;  %v1619_v14 = vsub.f32 %v9039_v34, %v1530_v20  ;;  %v1531_v54 = vsel %vm1492_vm15, %v10631_v37, %v1489_v49  ;;  %v2333_v7 = vadd.f32 %v2332_v58, %v2331_v44  ;;  %v2063_v52 = vpop.permute.xlu1 %2062  ;;  %v9075_v58 = vld [vmem:[#allocation3 + $0x2c0] sm:$0x1] }
 0x369   :  { %v2282_v56 = vadd.f32 %v2237_v24, %v1972_v1  ;;  %v2238_v2 = vmul.f32 %v2193_v6, %v2193_v6  ;;  %v3025_v4 = vadd.f32 %v3024_v53, %v3023_v5  ;;  %v3385_v19 = vsel %vm1373_vm11, %v3334_v63, 0.0  ;;  %v10633_v53 = vld [vmem:[#allocation53_spill] sm:$0xff]  ;;  %v9072_v63 = vld [vmem:[#allocation3 + $0x2c8] sm:$0x1] }
 0x36a   :  { %v3335_v0 = vmax.f32 %v3290_v43, 0.0  ;;  %v1929_v16 = vmul.f32 %v1884_v27, %v1884_v27  ;;  %v1796_v12 = vsel %vm1492_vm15, %v1753_v32, %v10632_v60  ;;  %v1973_v28 = vadd.f32 %v1928_v59, %v1663_v50 }
 0x36b   :  { %v1620_v33 = vsub.f32 %v9047_v13, %v1531_v54  ;;  %v2105_v31 = vsel %vm1492_vm15, %v10630_v61, %v2063_v52  ;;  %v9054_v3 = vadd.f32 %v10272_v48, %v8893_v18  ;;  %v1664_v36 = vmul.f32 %v1619_v14, %v1619_v14 }
 0x36c   :  { %v2194_v35 = vsub.f32 %v10598_v46, %v2105_v31  ;;  %v2106_v11 = vsel %vm1492_vm15, %v2063_v52, %v2065_v22  ;;  %v3026_v32 = vadd.f32 %v3025_v4, %v8978_v41  ;;  %v2334_v17 = vsel %vm1373_vm11, %v2282_v56, 0.0  ;;  %v1757_v20 = vpop.permute.xlu1 %1756 }
 0x36d   :  { %v2283_v51 = vadd.f32 %v2238_v2, %v1973_v28  ;;  %v1885_v44 = vsub.f32 %v9060_v10, %v1796_v12  ;;  %v2195_v61 = vsub.f32 %v9063_v57, %v2106_v11  ;;  %v1974_v18 = vadd.f32 %v1929_v16, %v1664_v36 }
 0x36e   :  { %v1532_v37 = vsel %vm1492_vm15, %v1489_v49, %v10633_v53  ;;  %v2239_v46 = vmul.f32 %v2194_v35, %v2194_v35  ;;  %v3027_v24 = vadd.f32 %v3026_v32, %v8983_v45  ;;  %v3291_v41 = vadd.f32 %v10272_v48, %v1884_v27  ;;  %v9079_v45 = vld [vmem:[#allocation3 + $0x158] sm:$0x1] }
 0x36f   :  { %v1665_v6 = vmul.f32 %v1620_v33, %v1620_v33  ;;  %v1797_v5 = vsel %vm1492_vm15, %v10632_v60, %v1757_v20  ;;  %v1887_v43 = vsub.f32 %v9072_v63, %v1757_v20  ;;  %v2335_v1 = vadd.f32 %v2334_v17, %v2333_v7 }
 0x370   :  { %v2284_v50 = vadd.f32 %v2239_v46, %v1974_v18  ;;  %v1886_v49 = vsub.f32 %v9075_v58, %v1797_v5  ;;  %v3028_v59 = vadd.f32 %v3027_v24, %v8990_v25  ;;  %v1930_v14 = vmul.f32 %v1885_v44, %v1885_v44  ;;  %v2067_v16 = vpop.permute.xlu1 %2066  ;;  %v10634_v18 = vld [vmem:[#allocation115_spill] sm:$0xff] }
 0x371   :  { %v1621_v27 = vsub.f32 %v9079_v45, %v1532_v37  ;;  %v2240_v54 = vmul.f32 %v2195_v61, %v2195_v61  ;;  %v9084_v56 = vadd.f32 %v10272_v48, %v8896_v29  ;;  %v3386_v2 = vadd.f32 %v3385_v19, %v8959_v9  ;;  %v9092_v29 = vld [vmem:[#allocation3 + $0x430] sm:$0x1] }
 0x372   :  { %v3387_v7 = vsel %vm1373_vm11, %v3335_v0, 0.0  ;;  %v2336_v4 = vsel %vm1373_vm11, %v2283_v51, 0.0  ;;  %v3029_v60 = vadd.f32 %v3028_v59, %v8993_v38  ;;  %v1975_v25 = vadd.f32 %v1930_v14, %v1665_v6 }
 0x373   :  { %v2338_v12 = vsel %vm1373_vm11, %v2284_v50, 0.0  ;;  %v1931_v52 = vmul.f32 %v1886_v49, %v1886_v49  ;;  %v1932_v28 = vmul.f32 %v1887_v43, %v1887_v43  ;;  %v2337_v33 = vadd.f32 %v2336_v4, %v2335_v1 }
 0x374   :  { %v3336_v31 = vmax.f32 %v3291_v41, 0.0  ;;  %v2107_v36 = vsel %vm1492_vm15, %v2065_v22, %v2067_v16  ;;  %v2197_v9 = vsub.f32 %v9092_v29, %v2067_v16  ;;  %v1666_v19 = vmul.f32 %v1621_v27, %v1621_v27  ;;  %v10638_v27 = vld [vmem:[#allocation28_spill] sm:$0xff] }
 0x375   :  { %v2285_v0 = vadd.f32 %v2240_v54, %v1975_v25  ;;  %v2196_v35 = vsub.f32 %v8858_v40, %v2107_v36  ;;  %v3030_v38 = vadd.f32 %v3029_v60, %v8998_v23  ;;  %v3292_v11 = vadd.f32 %v10272_v48, %v1885_v44  ;;  %v10635_v23 = vld [vmem:[#allocation21_spill] sm:$0xff]  ;;  %v10637_v44 = vld [vmem:[#allocation108_spill] sm:$0xff]  ;;  %v10640_v36 = vld [vmem:[#allocation87_spill] sm:$0xff] }
 0x376   :  { %v2339_v32 = vadd.f32 %v2338_v12, %v2337_v33  ;;  %v3293_v17 = vadd.f32 %v10272_v48, %v1886_v49  ;;  %v2242_v51 = vmul.f32 %v2197_v9, %v2197_v9  ;;  %v1976_v61 = vadd.f32 %v1931_v52, %v1666_v19 }
 0x377   :  { %v1977_v22 = vadd.f32 %v1932_v28, %v10634_v18  ;;  %v2241_v53 = vmul.f32 %v2196_v35, %v2196_v35  ;;  %v3031_v37 = vadd.f32 %v3030_v38, %v9003_v55  ;;  %v3389_v46 = vsel %vm1373_vm11, %v3336_v31, 0.0  ;;  %v10642_v35 = vld [vmem:[#allocation138_spill] sm:$0xff]  ;;  %v10645_v18 = vld [vmem:[#allocation141_spill] sm:$0xff] }
 0x378   :  { %v3432_v20 = vadd.f32 %v10272_v48, %v8899_v21  ;;  %v3464_v24 = vmax.f32 %v9032_v8, 0.0  ;;  %v10636_v41 = vmax.f32 %v10635_v23, 0.0  ;;  %v2340_v5 = vsel %vm1373_vm11, %v2285_v0, 0.0 }
 0x379   :  { %v2286_v1 = vadd.f32 %v2241_v53, %v1976_v61  ;;  %v2287_v50 = vadd.f32 %v2242_v51, %v1977_v22  ;;  %v3032_v49 = vadd.f32 %v3031_v37, %v9012_v39  ;;  %v3388_v59 = vadd.f32 %v3387_v7, %v3386_v2  ;;  %v10646_v22 = vld [vmem:[#allocation50_spill] sm:$0xff] }
 0x37a   :  { %v3499_v6 = vadd.f32 %v10637_v44, %v10636_v41  ;;  %v2341_v14 = vadd.f32 %v2340_v5, %v2339_v32  ;;  %v3465_v55 = vmax.f32 %v9036_v42, 0.0  ;;  %v10639_v54 = vmax.f32 %v10638_v27, 0.0  ;;  %v10648_v44 = vld [vmem:[#allocation93_spill] sm:$0xff]  ;;  %v10649_v5 = vld [vmem:[#allocation62_spill] sm:$0xff] }
 0x37b   :  { %v3337_v21 = vmax.f32 %v3292_v11, 0.0  ;;  %v3338_v16 = vmax.f32 %v3293_v17, 0.0  ;;  %v2342_v8 = vsel %vm1373_vm11, %v2286_v1, 0.0  ;;  %v3033_v60 = vadd.f32 %v3032_v49, %v9015_v30  ;;  %v10641_v30 = vld [vmem:[#allocation88_spill] sm:$0xff] }
 0x37c   :  { %v3500_v4 = vadd.f32 %v3499_v6, %v10639_v54  ;;  %v3390_v25 = vadd.f32 %v3389_v46, %v3388_v59  ;;  %v2343_v12 = vadd.f32 %v2342_v8, %v2341_v14  ;;  %v3466_v52 = vmax.f32 %v9054_v3, 0.0  ;;  %v10647_v46 = vld [vmem:[#allocation39_spill] sm:$0xff]  ;;  %v10651_v14 = vld [vmem:[#allocation65_spill] sm:$0xff]  ;;  %v10653_v54 = vld [vmem:[#allocation18_spill] sm:$0xff] }
 0x37d   :  { %v3294_v39 = vadd.f32 %v10272_v48, %v1887_v43  ;;  %v2345_v2 = vsel %vm2344_vm1, %v2287_v50, 0.0  ;;  %v3035_v42 = vadd.f32 %v9028_v26, %v3033_v60  ;;  %v3468_v7 = vmax.f32 %v3432_v20, 0.0  ;;  %v10643_v26 = vld [vmem:[#allocation86_spill] sm:$0xff] }
 0x37e   :  { %v3501_v28 = vadd.f32 %v3500_v4, %v3464_v24  ;;  %v2346_v33 = vadd.f32 %v2345_v2, %v2343_v12  ;;  %v3467_v31 = vmax.f32 %v9084_v56, 0.0  ;;  %v3433_v9 = vadd.f32 %v10272_v48, %v10640_v36  ;;  %v10644_v56 = vld [vmem:[#allocation134_spill] sm:$0xff]  ;;  %v10654_v4 = vld [vmem:[#allocation63_spill] sm:$0xff]  ;;  %v10656_v36 = vld [vmem:[#allocation104_spill] sm:$0xff] }
 0x37f   :  { %v3680_v0 = vsub.f32 %v8971_v62, %v10641_v30  ;;  %v3391_v3 = vsel %vm1373_vm11, %v3337_v21, 0.0  ;;  %3036 = vadd.xlane.f32.xlu1 %v3035_v42  ;;  %v3441_v43 = vadd.f32 %v10272_v48, %v10642_v35  ;;  %v3393_v38 = vsel %vm1373_vm11, %v3338_v16, 0.0  ;;  %v10650_v50 = vld [vmem:[#allocation82_spill] sm:$0xff]  ;;  %v10655_v16 = vld [vmem:[#allocation91_spill] sm:$0xff]  ;;  %v10658_v35 = vld [vmem:[#allocation112_spill] sm:$0xff] }
 0x380   :  { %v3502_v19 = vadd.f32 %v3501_v28, %v3465_v55  ;;  %2347 = vadd.xlane.f32.xlu0 %v2346_v33  ;;  %v3434_v11 = vadd.f32 %v10272_v48, %v10643_v26  ;;  %v3435_v32 = vadd.f32 %v10272_v48, %v10644_v56  ;;  %v3392_v51 = vadd.f32 %v3391_v3, %v3390_v25  ;;  %v10652_v55 = vld [vmem:[#allocation51_spill] sm:$0xff]  ;;  %v10660_v26 = vld [vmem:[#allocation122_spill] sm:$0xff] }
 0x381   :  { %v3339_v61 = vmax.f32 %v3294_v39, 0.0  ;;  %v3436_v62 = vadd.f32 %v10272_v48, %v10645_v18  ;;  %v3437_v53 = vadd.f32 %v10272_v48, %v10646_v22  ;;  %v3505_v37 = vsel %vm3003_vm14, %v3468_v7, 0.0  ;;  %v4402_v56 = vld [vmem:[#allocation3 + $0x160] sm:$0x1]  ;;  %v10663_v18 = vld [vmem:[#allocation12_spill] sm:$0xff] }
 0x382   :  { %v3503_v17 = vadd.f32 %v3502_v19, %v3466_v52  ;;  %v3438_v20 = vadd.f32 %v10272_v48, %v10647_v46  ;;  %v3469_v24 = vmax.f32 %v3433_v9, 0.0  ;;  %v3394_v41 = vadd.f32 %v3393_v38, %v3392_v51  ;;  %v10659_v38 = vld [vmem:[#allocation76_spill] sm:$0xff]  ;;  %v10662_v51 = vld [vmem:[#allocation81_spill] sm:$0xff]  ;;  %v10665_v22 = vld [vmem:[#allocation130_spill] sm:$0xff] }
 0x383   :  { %v3861_v6 = vmul.f32 %v10648_v44, %v10648_v44  ;;  %v9143_v1 = vadd.f32 %v10272_v48, %v10649_v5  ;;  %v9147_v49 = vadd.f32 %v10272_v48, %v10650_v50  ;;  %v3477_v59 = vmax.f32 %v3441_v43, 0.0  ;;  %v10670_v44 = vld [vmem:[#allocation70_spill] sm:$0xff] }
 0x384   :  { %v3504_v23 = vadd.f32 %v3503_v17, %v3467_v31  ;;  %v3904_v27 = vadd.f32 %v10652_v55, %v10651_v14  ;;  %v3903_v21 = vadd.f32 %v10654_v4, %v10653_v54  ;;  %3241 = vadd.xlane.f32.xlu0 %v10655_v16  ;;  %v3470_v8 = vmax.f32 %v3434_v11, 0.0  ;;  %v10671_v14 = vld [vmem:[#allocation135_spill] sm:$0xff]  ;;  %v10672_v4 = vld [vmem:[#allocation78_spill] sm:$0xff]  ;;  %v10673_v16 = vld [vmem:[#allocation29_spill] sm:$0xff] }
 0x385   :  { %v3860_v25 = vmul.f32 %v3680_v0, %v3680_v0  ;;  %v3471_v12 = vmax.f32 %v3435_v32, 0.0  ;;  %v3472_v52 = vmax.f32 %v3436_v62, 0.0  ;;  %v3395_v28 = vsel %vm2344_vm1, %v3339_v61, 0.0  ;;  %v10657_v0 = vld [vmem:[#allocation117_spill] sm:$0xff]  ;;  %v10661_v32 = vld [vmem:[#allocation148_spill] sm:$0xff]  ;;  %v10664_v62 = vld [vmem:[#allocation54_spill] sm:$0xff] }
 0x386   :  { %v3506_v60 = vadd.f32 %v3505_v37, %v3504_v23  ;;  %v3473_v39 = vmax.f32 %v3437_v53, 0.0  ;;  %v3474_v2 = vmax.f32 %v3438_v20, 0.0  ;;  %v3396_v42 = vadd.f32 %v3395_v28, %v3394_v41  ;;  %v10668_v20 = vld [vmem:[#allocation127_spill] sm:$0xff]  ;;  %v10669_v23 = vld [vmem:[#allocation89_spill] sm:$0xff] }
 0x387   :  { %v3475_v7 = vmax.f32 %v9143_v1, 0.0  ;;  %v3476_v33 = vmax.f32 %v9147_v49, 0.0  ;;  %v3515_v31 = vsel %vm3003_vm14, %v3477_v59, 0.0  ;;  %v3579_v9 = vsub.f32 %v9039_v34, %v10656_v36  ;;  %v4403_v1 = vld [vmem:[#allocation3 + $0x418] sm:$0x1]  ;;  %v10676_v36 = vld [vmem:[#allocation55_spill] sm:$0xff] }
 0x388   :  { %v3507_v48 = vadd.f32 %v3506_v60, %v3469_v24  ;;  %3397 = vadd.xlane.f32.xlu0 %v3396_v42  ;;  %v3580_v3 = vsub.f32 %v9047_v13, %v10657_v0  ;;  %v3581_v43 = vsub.f32 %v9079_v45, %v10658_v35  ;;  %v3945_v11 = vadd.f32 %v10660_v26, %v10659_v38  ;;  %v10666_v13 = vld [vmem:[#allocation69_spill] sm:$0xff] }
 0x389   :  { %v3582_v17 = vsub.f32 %v4402_v56, %v10661_v32  ;;  %v3633_v61 = vsub.f32 %v9024_v47, %v10662_v51  ;;  %v3634_v34 = vsub.f32 %v9060_v10, %v10663_v18  ;;  %v3902_v53 = vadd.f32 %v10665_v22, %v10664_v62  ;;  %v10667_v45 = vld [vmem:[#allocation57_spill] sm:$0xff] }
 0x38a   :  { %v3508_v19 = vadd.f32 %v3507_v48, %v3470_v8  ;;  %v3635_v46 = vsub.f32 %v9075_v58, %v10666_v13  ;;  %v3901_v24 = vadd.f32 %v10668_v20, %v10667_v45  ;;  %v3946_v41 = vadd.f32 %v3945_v11, %v10669_v23  ;;  %v10675_v48 = vld [vmem:[#allocation150_spill] sm:$0xff] }
 0x38b   :  { %v3636_v5 = vsub.f32 %v9072_v63, %v10670_v44  ;;  %v3682_v47 = vsub.f32 %v9020_v15, %v10641_v30  ;;  %v3683_v10 = vsub.f32 %v4403_v1, %v10641_v30  ;;  %v3684_v50 = vsub.f32 %v9063_v57, %v10641_v30 }
 0x38c   :  { %v3509_v37 = vadd.f32 %v3508_v19, %v3471_v12  ;;  %v3685_v58 = vsub.f32 %v8858_v40, %v10641_v30  ;;  %v3686_v59 = vsub.f32 %v9092_v29, %v10641_v30  ;;  %v3947_v55 = vadd.f32 %v3946_v41, %v10671_v14 }
 0x38d   :  { %v3728_v54 = vmul.f32 %v3579_v9, %v3579_v9  ;;  %v3773_v63 = vmul.f32 %v3633_v61, %v3633_v61  ;;  %v3816_v15 = vadd.f32 %v10673_v16, %v10672_v4  ;;  %v3949_v8 = vsel %vm3003_vm14, %v3902_v53, 0.0 }
 0x38e   :  { %v3510_v49 = vadd.f32 %v3509_v37, %v3472_v52  ;;  %v3729_v12 = vmul.f32 %v3580_v3, %v3580_v3  ;;  %v3774_v28 = vmul.f32 %v3634_v34, %v3634_v34  ;;  %v3948_v57 = vadd.f32 %v3947_v55, %v3901_v24  ;;  %v10674_v52 = vld [vmem:[#allocation15_spill] sm:$0xff] }
 0x38f   :  { %v3817_v42 = vadd.f32 %v10675_v48, %v10674_v52  ;;  %v3862_v40 = vmul.f32 %v3682_v47, %v3682_v47  ;;  %v3905_v19 = vadd.f32 %v3860_v25, %v10676_v36  ;;  %v3951_v29 = vsel %vm1373_vm11, %v3903_v21, 0.0 }
 0x390   :  { %v3511_v60 = vadd.f32 %v3510_v49, %v3473_v39  ;;  %v3730_v9 = vmul.f32 %v3581_v43, %v3581_v43  ;;  %v3775_v0 = vmul.f32 %v3635_v46, %v3635_v46  ;;  %v3950_v35 = vadd.f32 %v3949_v8, %v3948_v57 }
 0x391   :  { %v3818_v38 = vadd.f32 %v3773_v63, %v3728_v54  ;;  %v3863_v26 = vmul.f32 %v3683_v10, %v3683_v10  ;;  %v3906_v11 = vadd.f32 %v3861_v6, %v3816_v15  ;;  %v3953_v39 = vsel %vm1373_vm11, %v3904_v27, 0.0 }
 0x392   :  { %v3512_v30 = vadd.f32 %v3511_v60, %v3474_v2  ;;  %v3731_v56 = vmul.f32 %v3582_v17, %v3582_v17  ;;  %v3776_v32 = vmul.f32 %v3636_v5, %v3636_v5  ;;  %v3952_v51 = vadd.f32 %v3951_v29, %v3950_v35 }
 0x393   :  { %v3819_v61 = vadd.f32 %v3774_v28, %v3729_v12  ;;  %v3864_v18 = vmul.f32 %v3684_v50, %v3684_v50  ;;  %v3907_v34 = vadd.f32 %v3862_v40, %v3817_v42  ;;  %v3955_v25 = vsel %vm1373_vm11, %v3905_v19, 0.0 }
 0x394   :  { %v3513_v3 = vadd.f32 %v3512_v30, %v3475_v7  ;;  %v3954_v21 = vadd.f32 %v3953_v39, %v3952_v51  ;;  %v3820_v2 = vadd.f32 %v3775_v0, %v3730_v9  ;;  %v3865_v43 = vmul.f32 %v3685_v58, %v3685_v58 }
 0x395   :  { %v3908_v22 = vadd.f32 %v3863_v26, %v3818_v38  ;;  %v3957_v53 = vsel %vm1373_vm11, %v3906_v11, 0.0  ;;  %v3821_v13 = vadd.f32 %v3776_v32, %v3731_v56  ;;  %v3866_v27 = vmul.f32 %v3686_v59, %v3686_v59 }
 0x396   :  { %v3514_v62 = vadd.f32 %v3513_v3, %v3476_v33  ;;  %v3956_v6 = vadd.f32 %v3955_v25, %v3954_v21  ;;  %v3909_v7 = vadd.f32 %v3864_v18, %v3819_v61  ;;  %v3959_v17 = vsel %vm1373_vm11, %v3907_v34, 0.0 }
 0x397   :  { %v3910_v45 = vadd.f32 %v3865_v43, %v3820_v2  ;;  %v3961_v20 = vsel %vm1373_vm11, %v3908_v22, 0.0  ;;  %v3911_v33 = vadd.f32 %v3866_v27, %v3821_v13 }
 0x398   :  { %v3516_v37 = vadd.f32 %v3515_v31, %v3514_v62  ;;  %v3958_v46 = vadd.f32 %v3957_v53, %v3956_v6  ;;  %v3963_v23 = vsel %vm1373_vm11, %v3909_v7, 0.0 }
 0x399   :  { %v3965_v44 = vsel %vm1373_vm11, %v3910_v45, 0.0  ;;  %v3968_v5 = vsel %vm3967_vm2, %v3911_v33, 0.0 }
 0x39a   :  { %3517 = vadd.xlane.f32.xlu1 %v3516_v37  ;;  %v3960_v24 = vadd.f32 %v3959_v17, %v3958_v46 }
 0x39c   :  { %v3962_v41 = vadd.f32 %v3961_v20, %v3960_v24 }
 0x39e   :  { %v3964_v31 = vadd.f32 %v3963_v23, %v3962_v41 }
 0x3a0   :  { %v3966_v47 = vadd.f32 %v3965_v44, %v3964_v31 }
 0x3a2   :  { %v3969_v1 = vadd.f32 %v3968_v5, %v3966_v47 }
 0x3a4   :  { %3970 = vadd.xlane.f32.xlu0 %v3969_v1 }
 0x40c   :  { %v3037_v10 = vpop.xlane.xlu1 %3036 }
 0x40d   :  { %v2348_v50 = vpop.xlane.xlu0 %2347  ;;  %v3038_v49 = vrot.slane %v3037_v10, 4 }
 0x40e   :  { %v2349_v58 = vrot.slane %v2348_v50, 4 }
 0x40f   :  { %v3039_v59 = vadd.f32 %v3038_v49, %v3037_v10 }
 0x410   :  { %v2350_v14 = vadd.f32 %v2349_v58, %v2348_v50 }
 0x411   :  { %v3040_v55 = vrot.slane %v3039_v59, 2  ;;  %v3242_v54 = vpop.xlane.xlu0 %3241 }
 0x412   :  { %v2351_v63 = vrot.slane %v2350_v14, 2  ;;  %v3243_v4 = vrot.slane %v3242_v54, 4 }
 0x413   :  { %v3041_v16 = vadd.f32 %v3040_v55, %v3039_v59 }
 0x414   :  { %v3244_v15 = vadd.f32 %v3243_v4, %v3242_v54  ;;  %v2352_v8 = vadd.f32 %v2351_v63, %v2350_v14 }
 0x415   :  { %v3398_v60 = vpop.xlane.xlu0 %3397  ;;  %v3042_v12 = vrot.slane %v3041_v16, 1 }
 0x416   :  { %v3245_v28 = vrot.slane %v3244_v15, 2  ;;  %v3399_v57 = vrot.slane %v3398_v60, 4  ;;  %v2353_v52 = vrot.slane %v2352_v8, 1 }
 0x417   :  { %v3043_v48 = vadd.f32 %v3042_v12, %v3041_v16 }
 0x418   :  { %v3400_v42 = vadd.f32 %v3399_v57, %v3398_v60  ;;  %v2354_v40 = vadd.f32 %v2353_v52, %v2352_v8  ;;  %v3246_v36 = vadd.f32 %v3245_v28, %v3244_v15 }
 0x41a   :  { %v3401_v19 = vrot.slane %v3400_v42, 2  ;;  %4002 = vpush %v2354_v40  ;;  %v3247_v29 = vrot.slane %v3246_v36, 1 }
 0x41b   :  { %4004 = vpush %v3043_v48 }
 0x41c   :  { %v3248_v30 = vadd.f32 %v3247_v29, %v3246_v36  ;;  %v3402_v9 = vadd.f32 %v3401_v19, %v3400_v42 }
 0x41e   :  { %4006 = vpush %v3248_v30  ;;  %v3403_v0 = vrot.slane %v3402_v9, 1 }
 0x420   :  { %v3404_v35 = vadd.f32 %v3403_v0, %v3402_v9 }
 0x422   :  { %4008 = vpush %v3404_v35 }
 0x427   :  { %v3518_v38 = vpop.xlane.xlu1 %3517 }
 0x428   :  { %v3519_v26 = vrot.slane %v3518_v38, 4 }
 0x42a   :  { %v3520_v11 = vadd.f32 %v3519_v26, %v3518_v38 }
 0x42c   :  { %v3521_v39 = vrot.slane %v3520_v11, 2 }
 0x42e   :  { %v3522_v3 = vadd.f32 %v3521_v39, %v3520_v11 }
 0x430   :  { %v3523_v56 = vrot.slane %v3522_v3, 1 }
 0x431   :  { %v3971_v51 = vpop.xlane.xlu0 %3970 }
 0x432   :  { %v3524_v32 = vadd.f32 %v3523_v56, %v3522_v3  ;;  %v3972_v61 = vrot.slane %v3971_v51, 4 }
 0x434   :  { %4010 = vpush %v3524_v32  ;;  %v3973_v18 = vadd.f32 %v3972_v61, %v3971_v51 }
 0x436   :  { %v3974_v34 = vrot.slane %v3973_v18, 2 }
 0x438   :  { %v3975_v25 = vadd.f32 %v3974_v34, %v3973_v18 }
 0x43a   :  { %v3976_v62 = vrot.slane %v3975_v25, 1 }
 0x43c   :  { %v3977_v21 = vadd.f32 %v3976_v62, %v3975_v25 }
 0x43e   :  { %4012 = vpush %v3977_v21 }
 0x44b   :  { %s4003_s26 = spop %4002 }
 0x44c   :  { %s3045_s27 = sadd.f32 %s4003_s26, %s4001_s25  ;;  %s4005_s28 = spop %4004 }
 0x44e   :  { %s3046_s29 = sadd.f32 %s4005_s28, %s3045_s27 }
 0x44f   :  { %s4007_s3 = spop %4006 }
 0x450   :  { %s3047_s30 = smul.f32 9.56535e-06, %s3046_s29 }
 0x452   :  { %3981 = sst [smem:[#allocation6]] %s3047_s30 }
 0x453   :  { %s4009_s4 = spop %4008 }
 0x454   :  { %s3526_s5 = sadd.f32 %s4009_s4, %s4007_s3 }
 0x465   :  { %s4011_s6 = spop %4010 }
 0x466   :  { %s3527_s7 = sadd.f32 %s4011_s6, %s3526_s5 }
 0x468   :  { %s3528_s8 = smul.f32 2.8696051e-05, %s3527_s7 }
 0x46a   :  { %3983 = sst [smem:[#allocation6 + $0x1]] %s3528_s8 }
 0x46f   :  { %s4013_s9 = spop %4012 }
 0x470   :  { %s3979_s10 = smul.f32 2.7826474e-05, %s4013_s9 }
 0x472   :  { %3985 = sst [smem:[#allocation6 + $0x2]] %s3979_s10 }
 0x473   :  { %4435 = shalt.err (!%p4432_p10)
}
 0x474   :  { %s4445_s18 = smov [#allocation6]  }
 0x475   :  { %3993 = dma.smem_to_hbm %s4445_s18, 16, %s9218_s2, [#allocation5]  }
 0x476   :  { %4438 = dma.done.wait [#allocation5], 16  }
 0x477   :  { %4439 = vsyncadd [#allocation5], 4294967280 }
 0x478   :  { %3997 = sfence }
 0x479   :  { %3998 = vsyncpa [#allocation4], 1 }
 0x47a   :  { %3999 = vsyncpa [#allocation5], 1 }

</bundles_post_ra>
